<compile_context>
chip_gen: v6e
topology: v6e:2x2x1
jax: 0.10.0
libtpu: 0.0.40
codegen_flags: <defaults>
</compile_context>

<pallas_src>
import jax
import jax.numpy as jnp
from jax.experimental import pallas as pl
from jax.experimental.pallas import tpu as pltpu


# --------------------------------------------------------------------------- #
# Fused kernel
# --------------------------------------------------------------------------- #
def _make_kernel(dims, nb):
    """dims: 4 tuples (H, W, cin, cout) (input spatial dims per conv layer)."""
    n_layers = len(dims)

    def kernel(x_ref, *rest):
        # rest = w0,b0, w1,b1, w2,b2, w3,b3, w_lin, b_lin, o_ref,
        #        nxt1, nxt2, nxt3, lhs0, lhs1, lhs2, lhs3
        ws = rest[0:2 * n_layers:2]
        bs = rest[1:2 * n_layers:2]
        wlin_ref = rest[2 * n_layers]
        blin_ref = rest[2 * n_layers + 1]
        o_ref = rest[2 * n_layers + 2]
        nxts = rest[2 * n_layers + 3:2 * n_layers + 3 + (n_layers - 1)]
        lhss = rest[2 * n_layers + 3 + (n_layers - 1):]

        src = x_ref                       # phase-split padded input (bf16)
        out2d = None
        for i, (H, W, cin, cout) in enumerate(dims):
            ho, wo = H // 2, W // 2
            M = nb * ho * wo
            lhs_ref = lhss[i]

            # ---- im2col: 16 unstrided taps -> (nb, ho, wo, 16*cin) in VMEM -- #
            for kh in range(4):
                for kw in range(4):
                    p = 2 * (kh % 2) + (kw % 2)          # phase index
                    a, bw = kh // 2, kw // 2             # in-phase offsets
                    t = 4 * kh + kw
                    tap = src[p, :, a:a + ho, bw:bw + wo, :]   # (nb,ho,wo,cin)
                    lhs_ref[:, :, :, t * cin:(t + 1) * cin] = tap

            # ---- one long-K MXU GEMM per layer ------------------------------ #
            lhs = lhs_ref[...].reshape(M, 16 * cin)            # bf16
            out2d = jnp.dot(lhs, ws[i][...],
                            preferred_element_type=jnp.float32)  # (M,cout) f32
            out2d = out2d + bs[i][...]                          # bias (1,cout)

            if i < n_layers - 1:
                # LeakyReLU(0.2), f32 on the VPU
                out2d = jnp.where(out2d >= 0.0, out2d, 0.2 * out2d)

                # ---- restage next layer's phase-split padded input (bf16) --- #
                nxt = nxts[i]
                hh, wh = ho // 2, wo // 2
                act6 = out2d.astype(jnp.bfloat16).reshape(nb, hh, 2, wh, 2, cout)
                for s in (0, 1):          # output-row parity
                    for r in (0, 1):      # output-col parity
                        pph = 2 * (1 - s) + (1 - r)
                        nxt[pph, :, s:s + hh, r:r + wh, :] = act6[:, :, s, :, r, :]
                # zero only the 1-element padding halo (interior fully rewritten)
                for pph in range(4):
                    hp, wp = pph // 2, pph % 2
                    u0 = 0 if hp == 0 else hh
                    q0 = 0 if wp == 0 else wh
                    nxt[pph, :, u0, :, :] = jnp.zeros((nb, wh + 1, cout),
                                                      jnp.bfloat16)
                    nxt[pph, :, :, q0, :] = jnp.zeros((nb, hh + 1, cout),
                                                      jnp.bfloat16)
                src = nxt

        # ---- Linear(out_size, 1) + exact Sigmoid ---------------------------- #
        H3, W3, _, c4 = dims[-1]
        hw3 = (H3 // 2) * (W3 // 2)
        feat = out2d.reshape(nb, hw3, c4)                 # f32, NHWC row order
        z = feat * wlin_ref[...][None]                    # (nb, hw3, c4)
        z = jnp.sum(z, axis=2, keepdims=True)             # (nb, hw3, 1)
        z = jnp.sum(z, axis=1, keepdims=True)             # (nb, 1, 1)
        z = z + blin_ref[...]
        o_ref[...] = 1.0 / (1.0 + jnp.exp(-z))            # exact sigmoid

    return kernel


# --------------------------------------------------------------------------- #
# Host-side glue
# --------------------------------------------------------------------------- #
def init_params(key, img_size, dim):
    """Synthetic parameters with the same shapes as Discriminator_."""
    h, w, c = img_size
    chans = [c, dim, 2 * dim, 4 * dim, 8 * dim]
    keys = jax.random.split(key, 10)
    params = {}
    for i in range(4):
        cin, cout = chans[i], chans[i + 1]
        scale = 1.0 / jnp.sqrt(jnp.float32(cin * 16))
        params[f"w{i}"] = scale * jax.random.normal(
            keys[2 * i], (4, 4, cin, cout), jnp.float32)          # HWIO
        params[f"b{i}"] = scale * jax.random.normal(
            keys[2 * i + 1], (cout,), jnp.float32)
    out_size = int(8 * dim * (h / 16) * (w / 16))
    ls = 1.0 / jnp.sqrt(jnp.float32(out_size))
    params["w_lin"] = ls * jax.random.normal(keys[8], (out_size, 1), jnp.float32)
    params["b_lin"] = ls * jax.random.normal(keys[9], (1,), jnp.float32)
    return params


def pack_params(params, img_size, dim):
    """Host repack: bf16 tap-major (16*cin, cout) conv weights; fold the
    PyTorch NCHW view-flatten permutation into w_lin (kernel feats are NHWC)."""
    h, w, _ = img_size
    packed = {}
    for i in range(4):
        wi = params[f"w{i}"]                                      # (4,4,cin,cout)
        cin, cout = wi.shape[2], wi.shape[3]
        packed[f"w{i}"] = wi.reshape(16 * cin, cout).astype(jnp.bfloat16)
        packed[f"b{i}"] = params[f"b{i}"].reshape(1, cout).astype(jnp.float32)
    c4, h3, w3 = 8 * dim, h // 16, w // 16
    wl = params["w_lin"][:, 0].reshape(c4, h3, w3)                # NCHW row order
    packed["w_lin"] = jnp.transpose(wl, (1, 2, 0)).reshape(h3 * w3, c4).astype(
        jnp.float32)
    packed["b_lin"] = params["b_lin"].reshape(1, 1).astype(jnp.float32)
    return packed


@jax.jit
def discriminator_forward(packed, x_nchw):
    n, c, hh_, ww_ = x_nchw.shape

    dims, h, w, cin = [], hh_, ww_, c
    for i in range(4):
        cout = packed[f"w{i}"].shape[1]
        dims.append((h, w, cin, cout))
        h, w, cin = h // 2, w // 2, cout

    # Keep the grid a multiple of 2 when possible (v7x dual TC); fold the rest
    # of the batch into the GEMM M dimension.
    grid_steps = 2 if (n % 2 == 0 and n >= 2) else 1
    nb = n // grid_steps

    # NCHW -> NHWC, pad by 1, phase-split (space-to-depth) and cast to bf16.
    x_nhwc = jnp.transpose(x_nchw, (0, 2, 3, 1))
    xp = jnp.pad(x_nhwc, ((0, 0), (1, 1), (1, 1), (0, 0)))
    hq0, wq0 = (hh_ + 2) // 2, (ww_ + 2) // 2
    x_rep = (xp.reshape(n, hq0, 2, wq0, 2, c)
               .transpose(2, 4, 0, 1, 3, 5)
               .reshape(4, n, hq0, wq0, c)
               .astype(jnp.bfloat16))

    in_specs = [pl.BlockSpec((4, nb, hq0, wq0, c), lambda b: (0, b, 0, 0, 0))]
    args = [x_rep]
    for i in range(4):
        in_specs.append(pl.BlockSpec(packed[f"w{i}"].shape, lambda b: (0, 0)))
        in_specs.append(pl.BlockSpec(packed[f"b{i}"].shape, lambda b: (0, 0)))
        args += [packed[f"w{i}"], packed[f"b{i}"]]
    in_specs.append(pl.BlockSpec(packed["w_lin"].shape, lambda b: (0, 0)))
    in_specs.append(pl.BlockSpec(packed["b_lin"].shape, lambda b: (0, 0)))
    args += [packed["w_lin"], packed["b_lin"]]

    scratch = []
    for i in range(1, 4):  # phase-split padded inputs of layers 1..3 (bf16)
        H, W, cin_i, _ = dims[i]
        scratch.append(pltpu.VMEM((4, nb, H // 2 + 1, W // 2 + 1, cin_i),
                                  jnp.bfloat16))
    for i in range(4):     # per-layer im2col staging buffers (bf16)
        H, W, cin_i, _ = dims[i]
        scratch.append(pltpu.VMEM((nb, H // 2, W // 2, 16 * cin_i),
                                  jnp.bfloat16))

    flops = sum(2 * n * (H // 2) * (W // 2) * 16 * ci * co
                for (H, W, ci, co) in dims)
    flops += 2 * n * dims[-1][3] * (hh_ // 16) * (ww_ // 16)
    bytes_accessed = int(x_rep.size * 2 + n * 4 +
                         sum(int(v.size) * v.dtype.itemsize
                             for v in packed.values()))

    out = pl.pallas_call(
        _make_kernel(tuple(dims), nb),
        out_shape=jax.ShapeDtypeStruct((n, 1, 1), jnp.float32),
        grid_spec=pltpu.PrefetchScalarGridSpec(
            num_scalar_prefetch=0,
            grid=(grid_steps,),
            in_specs=in_specs,
            out_specs=pl.BlockSpec((nb, 1, 1), lambda b: (b, 0, 0)),
            scratch_shapes=scratch),
        compiler_params=pltpu.CompilerParams(
            dimension_semantics=("parallel",),
            vmem_limit_bytes=32 * 1024 * 1024),
        cost_estimate=pl.CostEstimate(
            flops=flops, transcendentals=n, bytes_accessed=bytes_accessed),
    )(*args)
    return out.reshape(n, 1)


def reference_forward(params, x_nchw):
    """Pure-JAX f32 reference with exactly the module's semantics."""
    x = jnp.transpose(x_nchw, (0, 2, 3, 1))
    for i in range(4):
        x = jax.lax.conv_general_dilated(
            x, params[f"w{i}"], window_strides=(2, 2),
            padding=((1, 1), (1, 1)),
            dimension_numbers=("NHWC", "HWIO", "NHWC"),
            precision=jax.lax.Precision.HIGHEST)
        x = x + params[f"b{i}"][None, None, None, :]
        if i < 3:
            x = jnp.where(x >= 0.0, x, 0.2 * x)
    n = x.shape[0]
    feat = jnp.transpose(x, (0, 3, 1, 2)).reshape(n, -1)          # NCHW flatten
    z = jnp.matmul(feat, params["w_lin"],
                   precision=jax.lax.Precision.HIGHEST) + params["b_lin"]
    return jax.nn.sigmoid(z)


if __name__ == "__main__":
    img_size = (16, 16, 3)     # (H, W, C); H, W powers of 2
    dim = 8
    batch = 2

    key = jax.random.PRNGKey(0)
    k_params, k_x = jax.random.split(key)
    params = init_params(k_params, img_size, dim)
    packed = pack_params(params, img_size, dim)
    x = jax.random.normal(
        k_x, (batch, img_size[2], img_size[0], img_size[1]), jnp.float32)  # NCHW

    out = jax.block_until_ready(discriminator_forward(packed, x))
    ref = jax.block_until_ready(reference_forward(params, x))

    assert out.shape == (batch, 1), out.shape
    assert bool(jnp.all(jnp.isfinite(out)))
    assert bool(jnp.all((out >= 0.0) & (out <= 1.0)))
    max_diff = float(jnp.max(jnp.abs(out - ref)))
    assert max_diff < 0.06, f"mismatch vs reference: {max_diff}"
    print("KERNEL_OK")
</pallas_src>

<mosaic_0001>
module attributes {stable_mosaic.version = 11 : i64} {
  func.func @kernel(%arg0: i32, %arg1: memref<4x1x9x9x3xbf16, #tpu.memory_space<vmem>>, %arg2: memref<48x8xbf16, #tpu.memory_space<vmem>>, %arg3: memref<1x8xf32, #tpu.memory_space<vmem>>, %arg4: memref<128x16xbf16, #tpu.memory_space<vmem>>, %arg5: memref<1x16xf32, #tpu.memory_space<vmem>>, %arg6: memref<256x32xbf16, #tpu.memory_space<vmem>>, %arg7: memref<1x32xf32, #tpu.memory_space<vmem>>, %arg8: memref<512x64xbf16, #tpu.memory_space<vmem>>, %arg9: memref<1x64xf32, #tpu.memory_space<vmem>>, %arg10: memref<1x64xf32, #tpu.memory_space<vmem>>, %arg11: memref<1x1xf32, #tpu.memory_space<vmem>>, %arg12: memref<1x1x1xf32, #tpu.memory_space<vmem>>, %arg13: memref<4x1x5x5x8xbf16, #tpu.memory_space<vmem>>, %arg14: memref<4x1x3x3x16xbf16, #tpu.memory_space<vmem>>, %arg15: memref<4x1x2x2x32xbf16, #tpu.memory_space<vmem>>, %arg16: memref<1x8x8x48xbf16, #tpu.memory_space<vmem>>, %arg17: memref<1x4x4x128xbf16, #tpu.memory_space<vmem>>, %arg18: memref<1x2x2x256xbf16, #tpu.memory_space<vmem>>, %arg19: memref<1x1x1x512xbf16, #tpu.memory_space<vmem>>) attributes {dimension_semantics = [#tpu.dimension_semantics<parallel>], iteration_bounds = array<i64: 2>, scalar_prefetch = 0 : i64, scratch_operands = 7 : i64, tpu.core_type = #tpu.core_type<tc>, window_params = [{transform_indices = @transform_0, window_bounds = array<i64: 4, 1, 9, 9, 3>}, {pipeline_mode = #tpu.pipeline_mode<synchronous>, transform_indices = @transform_1, window_bounds = array<i64: 48, 8>}, {pipeline_mode = #tpu.pipeline_mode<synchronous>, transform_indices = @transform_2, window_bounds = array<i64: 1, 8>}, {pipeline_mode = #tpu.pipeline_mode<synchronous>, transform_indices = @transform_3, window_bounds = array<i64: 128, 16>}, {pipeline_mode = #tpu.pipeline_mode<synchronous>, transform_indices = @transform_4, window_bounds = array<i64: 1, 16>}, {pipeline_mode = #tpu.pipeline_mode<synchronous>, transform_indices = @transform_5, window_bounds = array<i64: 256, 32>}, {pipeline_mode = #tpu.pipeline_mode<synchronous>, transform_indices = @transform_6, window_bounds = array<i64: 1, 32>}, {pipeline_mode = #tpu.pipeline_mode<synchronous>, transform_indices = @transform_7, window_bounds = array<i64: 512, 64>}, {pipeline_mode = #tpu.pipeline_mode<synchronous>, transform_indices = @transform_8, window_bounds = array<i64: 1, 64>}, {pipeline_mode = #tpu.pipeline_mode<synchronous>, transform_indices = @transform_9, window_bounds = array<i64: 1, 64>}, {pipeline_mode = #tpu.pipeline_mode<synchronous>, transform_indices = @transform_10, window_bounds = array<i64: 1, 1>}, {transform_indices = @transform_11, window_bounds = array<i64: 1, 1, 1>}]} {
    %c0 = arith.constant 0 : index
    %c0_0 = arith.constant 0 : index
    %c0_1 = arith.constant 0 : index
    %c0_2 = arith.constant 0 : index
    %c0_3 = arith.constant 0 : index
    %0 = vector.load %arg1[%c0, %c0_0, %c0_1, %c0_2, %c0_3] : memref<4x1x9x9x3xbf16, #tpu.memory_space<vmem>>, vector<1x1x8x8x3xbf16>
    %1 = vector.shape_cast %0 : vector<1x1x8x8x3xbf16> to vector<1x8x8x3xbf16>
    %c0_4 = arith.constant 0 : index
    %c0_5 = arith.constant 0 : index
    %c0_6 = arith.constant 0 : index
    %c0_7 = arith.constant 0 : index
    %2 = vector.load %arg16[%c0_4, %c0_5, %c0_6, %c0_7] : memref<1x8x8x48xbf16, #tpu.memory_space<vmem>>, vector<1x8x8x3xbf16>
    tpu.vector_store %arg16[%c0_4, %c0_5, %c0_6, %c0_7], %1 {strides = array<i32>} : memref<1x8x8x48xbf16, #tpu.memory_space<vmem>>, vector<1x8x8x3xbf16>,
    %c1 = arith.constant 1 : index
    %c0_8 = arith.constant 0 : index
    %c0_9 = arith.constant 0 : index
    %c0_10 = arith.constant 0 : index
    %c0_11 = arith.constant 0 : index
    %3 = vector.load %arg1[%c1, %c0_8, %c0_9, %c0_10, %c0_11] : memref<4x1x9x9x3xbf16, #tpu.memory_space<vmem>>, vector<1x1x8x8x3xbf16>
    %4 = vector.shape_cast %3 : vector<1x1x8x8x3xbf16> to vector<1x8x8x3xbf16>
    %c0_12 = arith.constant 0 : index
    %c0_13 = arith.constant 0 : index
    %c0_14 = arith.constant 0 : index
    %c3 = arith.constant 3 : index
    %5 = vector.load %arg16[%c0_12, %c0_13, %c0_14, %c3] : memref<1x8x8x48xbf16, #tpu.memory_space<vmem>>, vector<1x8x8x3xbf16>
    tpu.vector_store %arg16[%c0_12, %c0_13, %c0_14, %c3], %4 {strides = array<i32>} : memref<1x8x8x48xbf16, #tpu.memory_space<vmem>>, vector<1x8x8x3xbf16>,
    %c0_15 = arith.constant 0 : index
    %c0_16 = arith.constant 0 : index
    %c0_17 = arith.constant 0 : index
    %c1_18 = arith.constant 1 : index
    %c0_19 = arith.constant 0 : index
    %6 = vector.load %arg1[%c0_15, %c0_16, %c0_17, %c1_18, %c0_19] : memref<4x1x9x9x3xbf16, #tpu.memory_space<vmem>>, vector<1x1x8x8x3xbf16>
    %7 = vector.shape_cast %6 : vector<1x1x8x8x3xbf16> to vector<1x8x8x3xbf16>
    %c0_20 = arith.constant 0 : index
    %c0_21 = arith.constant 0 : index
    %c0_22 = arith.constant 0 : index
    %c6 = arith.constant 6 : index
    %8 = vector.load %arg16[%c0_20, %c0_21, %c0_22, %c6] : memref<1x8x8x48xbf16, #tpu.memory_space<vmem>>, vector<1x8x8x3xbf16>
    tpu.vector_store %arg16[%c0_20, %c0_21, %c0_22, %c6], %7 {strides = array<i32>} : memref<1x8x8x48xbf16, #tpu.memory_space<vmem>>, vector<1x8x8x3xbf16>,
    %c1_23 = arith.constant 1 : index
    %c0_24 = arith.constant 0 : index
    %c0_25 = arith.constant 0 : index
    %c1_26 = arith.constant 1 : index
    %c0_27 = arith.constant 0 : index
    %9 = vector.load %arg1[%c1_23, %c0_24, %c0_25, %c1_26, %c0_27] : memref<4x1x9x9x3xbf16, #tpu.memory_space<vmem>>, vector<1x1x8x8x3xbf16>
    %10 = vector.shape_cast %9 : vector<1x1x8x8x3xbf16> to vector<1x8x8x3xbf16>
    %c0_28 = arith.constant 0 : index
    %c0_29 = arith.constant 0 : index
    %c0_30 = arith.constant 0 : index
    %c9 = arith.constant 9 : index
    %11 = vector.load %arg16[%c0_28, %c0_29, %c0_30, %c9] : memref<1x8x8x48xbf16, #tpu.memory_space<vmem>>, vector<1x8x8x3xbf16>
    tpu.vector_store %arg16[%c0_28, %c0_29, %c0_30, %c9], %10 {strides = array<i32>} : memref<1x8x8x48xbf16, #tpu.memory_space<vmem>>, vector<1x8x8x3xbf16>,
    %c2 = arith.constant 2 : index
    %c0_31 = arith.constant 0 : index
    %c0_32 = arith.constant 0 : index
    %c0_33 = arith.constant 0 : index
    %c0_34 = arith.constant 0 : index
    %12 = vector.load %arg1[%c2, %c0_31, %c0_32, %c0_33, %c0_34] : memref<4x1x9x9x3xbf16, #tpu.memory_space<vmem>>, vector<1x1x8x8x3xbf16>
    %13 = vector.shape_cast %12 : vector<1x1x8x8x3xbf16> to vector<1x8x8x3xbf16>
    %c0_35 = arith.constant 0 : index
    %c0_36 = arith.constant 0 : index
    %c0_37 = arith.constant 0 : index
    %c12 = arith.constant 12 : index
    %14 = vector.load %arg16[%c0_35, %c0_36, %c0_37, %c12] : memref<1x8x8x48xbf16, #tpu.memory_space<vmem>>, vector<1x8x8x3xbf16>
    tpu.vector_store %arg16[%c0_35, %c0_36, %c0_37, %c12], %13 {strides = array<i32>} : memref<1x8x8x48xbf16, #tpu.memory_space<vmem>>, vector<1x8x8x3xbf16>,
    %c3_38 = arith.constant 3 : index
    %c0_39 = arith.constant 0 : index
    %c0_40 = arith.constant 0 : index
    %c0_41 = arith.constant 0 : index
    %c0_42 = arith.constant 0 : index
    %15 = vector.load %arg1[%c3_38, %c0_39, %c0_40, %c0_41, %c0_42] : memref<4x1x9x9x3xbf16, #tpu.memory_space<vmem>>, vector<1x1x8x8x3xbf16>
    %16 = vector.shape_cast %15 : vector<1x1x8x8x3xbf16> to vector<1x8x8x3xbf16>
    %c0_43 = arith.constant 0 : index
    %c0_44 = arith.constant 0 : index
    %c0_45 = arith.constant 0 : index
    %c15 = arith.constant 15 : index
    %17 = vector.load %arg16[%c0_43, %c0_44, %c0_45, %c15] : memref<1x8x8x48xbf16, #tpu.memory_space<vmem>>, vector<1x8x8x3xbf16>
    tpu.vector_store %arg16[%c0_43, %c0_44, %c0_45, %c15], %16 {strides = array<i32>} : memref<1x8x8x48xbf16, #tpu.memory_space<vmem>>, vector<1x8x8x3xbf16>,
    %c2_46 = arith.constant 2 : index
    %c0_47 = arith.constant 0 : index
    %c0_48 = arith.constant 0 : index
    %c1_49 = arith.constant 1 : index
    %c0_50 = arith.constant 0 : index
    %18 = vector.load %arg1[%c2_46, %c0_47, %c0_48, %c1_49, %c0_50] : memref<4x1x9x9x3xbf16, #tpu.memory_space<vmem>>, vector<1x1x8x8x3xbf16>
    %19 = vector.shape_cast %18 : vector<1x1x8x8x3xbf16> to vector<1x8x8x3xbf16>
    %c0_51 = arith.constant 0 : index
    %c0_52 = arith.constant 0 : index
    %c0_53 = arith.constant 0 : index
    %c18 = arith.constant 18 : index
    %20 = vector.load %arg16[%c0_51, %c0_52, %c0_53, %c18] : memref<1x8x8x48xbf16, #tpu.memory_space<vmem>>, vector<1x8x8x3xbf16>
    tpu.vector_store %arg16[%c0_51, %c0_52, %c0_53, %c18], %19 {strides = array<i32>} : memref<1x8x8x48xbf16, #tpu.memory_space<vmem>>, vector<1x8x8x3xbf16>,
    %c3_54 = arith.constant 3 : index
    %c0_55 = arith.constant 0 : index
    %c0_56 = arith.constant 0 : index
    %c1_57 = arith.constant 1 : index
    %c0_58 = arith.constant 0 : index
    %21 = vector.load %arg1[%c3_54, %c0_55, %c0_56, %c1_57, %c0_58] : memref<4x1x9x9x3xbf16, #tpu.memory_space<vmem>>, vector<1x1x8x8x3xbf16>
    %22 = vector.shape_cast %21 : vector<1x1x8x8x3xbf16> to vector<1x8x8x3xbf16>
    %c0_59 = arith.constant 0 : index
    %c0_60 = arith.constant 0 : index
    %c0_61 = arith.constant 0 : index
    %c21 = arith.constant 21 : index
    %23 = vector.load %arg16[%c0_59, %c0_60, %c0_61, %c21] : memref<1x8x8x48xbf16, #tpu.memory_space<vmem>>, vector<1x8x8x3xbf16>
    tpu.vector_store %arg16[%c0_59, %c0_60, %c0_61, %c21], %22 {strides = array<i32>} : memref<1x8x8x48xbf16, #tpu.memory_space<vmem>>, vector<1x8x8x3xbf16>,
    %c0_62 = arith.constant 0 : index
    %c0_63 = arith.constant 0 : index
    %c1_64 = arith.constant 1 : index
    %c0_65 = arith.constant 0 : index
    %c0_66 = arith.constant 0 : index
    %24 = vector.load %arg1[%c0_62, %c0_63, %c1_64, %c0_65, %c0_66] : memref<4x1x9x9x3xbf16, #tpu.memory_space<vmem>>, vector<1x1x8x8x3xbf16>
    %25 = vector.shape_cast %24 : vector<1x1x8x8x3xbf16> to vector<1x8x8x3xbf16>
    %c0_67 = arith.constant 0 : index
    %c0_68 = arith.constant 0 : index
    %c0_69 = arith.constant 0 : index
    %c24 = arith.constant 24 : index
    %26 = vector.load %arg16[%c0_67, %c0_68, %c0_69, %c24] : memref<1x8x8x48xbf16, #tpu.memory_space<vmem>>, vector<1x8x8x3xbf16>
    tpu.vector_store %arg16[%c0_67, %c0_68, %c0_69, %c24], %25 {strides = array<i32>} : memref<1x8x8x48xbf16, #tpu.memory_space<vmem>>, vector<1x8x8x3xbf16>,
    %c1_70 = arith.constant 1 : index
    %c0_71 = arith.constant 0 : index
    %c1_72 = arith.constant 1 : index
    %c0_73 = arith.constant 0 : index
    %c0_74 = arith.constant 0 : index
    %27 = vector.load %arg1[%c1_70, %c0_71, %c1_72, %c0_73, %c0_74] : memref<4x1x9x9x3xbf16, #tpu.memory_space<vmem>>, vector<1x1x8x8x3xbf16>
    %28 = vector.shape_cast %27 : vector<1x1x8x8x3xbf16> to vector<1x8x8x3xbf16>
    %c0_75 = arith.constant 0 : index
    %c0_76 = arith.constant 0 : index
    %c0_77 = arith.constant 0 : index
    %c27 = arith.constant 27 : index
    %29 = vector.load %arg16[%c0_75, %c0_76, %c0_77, %c27] : memref<1x8x8x48xbf16, #tpu.memory_space<vmem>>, vector<1x8x8x3xbf16>
    tpu.vector_store %arg16[%c0_75, %c0_76, %c0_77, %c27], %28 {strides = array<i32>} : memref<1x8x8x48xbf16, #tpu.memory_space<vmem>>, vector<1x8x8x3xbf16>,
    %c0_78 = arith.constant 0 : index
    %c0_79 = arith.constant 0 : index
    %c1_80 = arith.constant 1 : index
    %c1_81 = arith.constant 1 : index
    %c0_82 = arith.constant 0 : index
    %30 = vector.load %arg1[%c0_78, %c0_79, %c1_80, %c1_81, %c0_82] : memref<4x1x9x9x3xbf16, #tpu.memory_space<vmem>>, vector<1x1x8x8x3xbf16>
    %31 = vector.shape_cast %30 : vector<1x1x8x8x3xbf16> to vector<1x8x8x3xbf16>
    %c0_83 = arith.constant 0 : index
    %c0_84 = arith.constant 0 : index
    %c0_85 = arith.constant 0 : index
    %c30 = arith.constant 30 : index
    %32 = vector.load %arg16[%c0_83, %c0_84, %c0_85, %c30] : memref<1x8x8x48xbf16, #tpu.memory_space<vmem>>, vector<1x8x8x3xbf16>
    tpu.vector_store %arg16[%c0_83, %c0_84, %c0_85, %c30], %31 {strides = array<i32>} : memref<1x8x8x48xbf16, #tpu.memory_space<vmem>>, vector<1x8x8x3xbf16>,
    %c1_86 = arith.constant 1 : index
    %c0_87 = arith.constant 0 : index
    %c1_88 = arith.constant 1 : index
    %c1_89 = arith.constant 1 : index
    %c0_90 = arith.constant 0 : index
    %33 = vector.load %arg1[%c1_86, %c0_87, %c1_88, %c1_89, %c0_90] : memref<4x1x9x9x3xbf16, #tpu.memory_space<vmem>>, vector<1x1x8x8x3xbf16>
    %34 = vector.shape_cast %33 : vector<1x1x8x8x3xbf16> to vector<1x8x8x3xbf16>
    %c0_91 = arith.constant 0 : index
    %c0_92 = arith.constant 0 : index
    %c0_93 = arith.constant 0 : index
    %c33 = arith.constant 33 : index
    %35 = vector.load %arg16[%c0_91, %c0_92, %c0_93, %c33] : memref<1x8x8x48xbf16, #tpu.memory_space<vmem>>, vector<1x8x8x3xbf16>
    tpu.vector_store %arg16[%c0_91, %c0_92, %c0_93, %c33], %34 {strides = array<i32>} : memref<1x8x8x48xbf16, #tpu.memory_space<vmem>>, vector<1x8x8x3xbf16>,
    %c2_94 = arith.constant 2 : index
    %c0_95 = arith.constant 0 : index
    %c1_96 = arith.constant 1 : index
    %c0_97 = arith.constant 0 : index
    %c0_98 = arith.constant 0 : index
    %36 = vector.load %arg1[%c2_94, %c0_95, %c1_96, %c0_97, %c0_98] : memref<4x1x9x9x3xbf16, #tpu.memory_space<vmem>>, vector<1x1x8x8x3xbf16>
    %37 = vector.shape_cast %36 : vector<1x1x8x8x3xbf16> to vector<1x8x8x3xbf16>
    %c0_99 = arith.constant 0 : index
    %c0_100 = arith.constant 0 : index
    %c0_101 = arith.constant 0 : index
    %c36 = arith.constant 36 : index
    %38 = vector.load %arg16[%c0_99, %c0_100, %c0_101, %c36] : memref<1x8x8x48xbf16, #tpu.memory_space<vmem>>, vector<1x8x8x3xbf16>
    tpu.vector_store %arg16[%c0_99, %c0_100, %c0_101, %c36], %37 {strides = array<i32>} : memref<1x8x8x48xbf16, #tpu.memory_space<vmem>>, vector<1x8x8x3xbf16>,
    %c3_102 = arith.constant 3 : index
    %c0_103 = arith.constant 0 : index
    %c1_104 = arith.constant 1 : index
    %c0_105 = arith.constant 0 : index
    %c0_106 = arith.constant 0 : index
    %39 = vector.load %arg1[%c3_102, %c0_103, %c1_104, %c0_105, %c0_106] : memref<4x1x9x9x3xbf16, #tpu.memory_space<vmem>>, vector<1x1x8x8x3xbf16>
    %40 = vector.shape_cast %39 : vector<1x1x8x8x3xbf16> to vector<1x8x8x3xbf16>
    %c0_107 = arith.constant 0 : index
    %c0_108 = arith.constant 0 : index
    %c0_109 = arith.constant 0 : index
    %c39 = arith.constant 39 : index
    %41 = vector.load %arg16[%c0_107, %c0_108, %c0_109, %c39] : memref<1x8x8x48xbf16, #tpu.memory_space<vmem>>, vector<1x8x8x3xbf16>
    tpu.vector_store %arg16[%c0_107, %c0_108, %c0_109, %c39], %40 {strides = array<i32>} : memref<1x8x8x48xbf16, #tpu.memory_space<vmem>>, vector<1x8x8x3xbf16>,
    %c2_110 = arith.constant 2 : index
    %c0_111 = arith.constant 0 : index
    %c1_112 = arith.constant 1 : index
    %c1_113 = arith.constant 1 : index
    %c0_114 = arith.constant 0 : index
    %42 = vector.load %arg1[%c2_110, %c0_111, %c1_112, %c1_113, %c0_114] : memref<4x1x9x9x3xbf16, #tpu.memory_space<vmem>>, vector<1x1x8x8x3xbf16>
    %43 = vector.shape_cast %42 : vector<1x1x8x8x3xbf16> to vector<1x8x8x3xbf16>
    %c0_115 = arith.constant 0 : index
    %c0_116 = arith.constant 0 : index
    %c0_117 = arith.constant 0 : index
    %c42 = arith.constant 42 : index
    %44 = vector.load %arg16[%c0_115, %c0_116, %c0_117, %c42] : memref<1x8x8x48xbf16, #tpu.memory_space<vmem>>, vector<1x8x8x3xbf16>
    tpu.vector_store %arg16[%c0_115, %c0_116, %c0_117, %c42], %43 {strides = array<i32>} : memref<1x8x8x48xbf16, #tpu.memory_space<vmem>>, vector<1x8x8x3xbf16>,
    %c3_118 = arith.constant 3 : index
    %c0_119 = arith.constant 0 : index
    %c1_120 = arith.constant 1 : index
    %c1_121 = arith.constant 1 : index
    %c0_122 = arith.constant 0 : index
    %45 = vector.load %arg1[%c3_118, %c0_119, %c1_120, %c1_121, %c0_122] : memref<4x1x9x9x3xbf16, #tpu.memory_space<vmem>>, vector<1x1x8x8x3xbf16>
    %46 = vector.shape_cast %45 : vector<1x1x8x8x3xbf16> to vector<1x8x8x3xbf16>
    %c0_123 = arith.constant 0 : index
    %c0_124 = arith.constant 0 : index
    %c0_125 = arith.constant 0 : index
    %c45 = arith.constant 45 : index
    %47 = vector.load %arg16[%c0_123, %c0_124, %c0_125, %c45] : memref<1x8x8x48xbf16, #tpu.memory_space<vmem>>, vector<1x8x8x3xbf16>
    tpu.vector_store %arg16[%c0_123, %c0_124, %c0_125, %c45], %46 {strides = array<i32>} : memref<1x8x8x48xbf16, #tpu.memory_space<vmem>>, vector<1x8x8x3xbf16>,
    %c0_126 = arith.constant 0 : index
    %c0_127 = arith.constant 0 : index
    %c0_128 = arith.constant 0 : index
    %c0_129 = arith.constant 0 : index
    %48 = vector.load %arg16[%c0_126, %c0_127, %c0_128, %c0_129] : memref<1x8x8x48xbf16, #tpu.memory_space<vmem>>, vector<1x8x8x48xbf16>
    %49 = vector.shape_cast %48 : vector<1x8x8x48xbf16> to vector<64x48xbf16>
    %c0_130 = arith.constant 0 : index
    %c0_131 = arith.constant 0 : index
    %50 = vector.load %arg2[%c0_130, %c0_131] : memref<48x8xbf16, #tpu.memory_space<vmem>>, vector<48x8xbf16>
    %cst = arith.constant dense<0.000000e+00> : vector<64x8xf32>
    %51 = tpu.matmul %49, %50, %cst {dimension_numbers = #tpu.dot_dimension_numbers<[1], [0], [0], [1], [0, 0, 1, 1], [], []>} : vector<64x48xbf16>, vector<48x8xbf16>, vector<64x8xf32> -> vector<64x8xf32>
    %c0_132 = arith.constant 0 : index
    %c0_133 = arith.constant 0 : index
    %52 = vector.load %arg3[%c0_132, %c0_133] : memref<1x8xf32, #tpu.memory_space<vmem>>, vector<1x8xf32>
    %53 = vector.broadcast %52 : vector<1x8xf32> to vector<64x8xf32>
    %54 = arith.addf %51, %53 : vector<64x8xf32>
    %cst_134 = arith.constant 0.000000e+00 : f32
    %55 = vector.broadcast %cst_134 : f32 to vector<64x8xf32>
    %56 = arith.cmpf oge, %54, %55 : vector<64x8xf32>
    %cst_135 = arith.constant 2.000000e-01 : f32
    %57 = vector.broadcast %cst_135 : f32 to vector<64x8xf32>
    %58 = arith.mulf %57, %54 : vector<64x8xf32>
    %59 = arith.select %56, %54, %58 : vector<64x8xi1>, vector<64x8xf32>
    %60 = arith.truncf %59 : vector<64x8xf32> to vector<64x8xbf16>
    %61 = vector.shape_cast %60 : vector<64x8xbf16> to vector<1x4x2x4x2x8xbf16>
    %62 = vector.extract_strided_slice %61 {offsets = [0, 0, 0, 0, 0, 0], sizes = [1, 4, 1, 4, 1, 8], strides = [1, 1, 1, 1, 1, 1]} : vector<1x4x2x4x2x8xbf16> to vector<1x4x1x4x1x8xbf16>
    %63 = vector.shape_cast %62 : vector<1x4x1x4x1x8xbf16> to vector<1x4x4x8xbf16>
    %c3_136 = arith.constant 3 : index
    %c0_137 = arith.constant 0 : index
    %c0_138 = arith.constant 0 : index
    %c0_139 = arith.constant 0 : index
    %c0_140 = arith.constant 0 : index
    %64 = vector.load %arg13[%c3_136, %c0_137, %c0_138, %c0_139, %c0_140] : memref<4x1x5x5x8xbf16, #tpu.memory_space<vmem>>, vector<1x1x4x4x8xbf16>
    %65 = vector.shape_cast %64 : vector<1x1x4x4x8xbf16> to vector<1x4x4x8xbf16>
    %66 = vector.shape_cast %63 : vector<1x4x4x8xbf16> to vector<1x1x4x4x8xbf16>
    tpu.vector_store %arg13[%c3_136, %c0_137, %c0_138, %c0_139, %c0_140], %66 {strides = array<i32>} : memref<4x1x5x5x8xbf16, #tpu.memory_space<vmem>>, vector<1x1x4x4x8xbf16>,
    %67 = vector.extract_strided_slice %61 {offsets = [0, 0, 0, 0, 1, 0], sizes = [1, 4, 1, 4, 1, 8], strides = [1, 1, 1, 1, 1, 1]} : vector<1x4x2x4x2x8xbf16> to vector<1x4x1x4x1x8xbf16>
    %68 = vector.shape_cast %67 : vector<1x4x1x4x1x8xbf16> to vector<1x4x4x8xbf16>
    %c2_141 = arith.constant 2 : index
    %c0_142 = arith.constant 0 : index
    %c0_143 = arith.constant 0 : index
    %c1_144 = arith.constant 1 : index
    %c0_145 = arith.constant 0 : index
    %69 = vector.load %arg13[%c2_141, %c0_142, %c0_143, %c1_144, %c0_145] : memref<4x1x5x5x8xbf16, #tpu.memory_space<vmem>>, vector<1x1x4x4x8xbf16>
    %70 = vector.shape_cast %69 : vector<1x1x4x4x8xbf16> to vector<1x4x4x8xbf16>
    %71 = vector.shape_cast %68 : vector<1x4x4x8xbf16> to vector<1x1x4x4x8xbf16>
    tpu.vector_store %arg13[%c2_141, %c0_142, %c0_143, %c1_144, %c0_145], %71 {strides = array<i32>} : memref<4x1x5x5x8xbf16, #tpu.memory_space<vmem>>, vector<1x1x4x4x8xbf16>,
    %72 = vector.extract_strided_slice %61 {offsets = [0, 0, 1, 0, 0, 0], sizes = [1, 4, 1, 4, 1, 8], strides = [1, 1, 1, 1, 1, 1]} : vector<1x4x2x4x2x8xbf16> to vector<1x4x1x4x1x8xbf16>
    %73 = vector.shape_cast %72 : vector<1x4x1x4x1x8xbf16> to vector<1x4x4x8xbf16>
    %c1_146 = arith.constant 1 : index
    %c0_147 = arith.constant 0 : index
    %c1_148 = arith.constant 1 : index
    %c0_149 = arith.constant 0 : index
    %c0_150 = arith.constant 0 : index
    %74 = vector.load %arg13[%c1_146, %c0_147, %c1_148, %c0_149, %c0_150] : memref<4x1x5x5x8xbf16, #tpu.memory_space<vmem>>, vector<1x1x4x4x8xbf16>
    %75 = vector.shape_cast %74 : vector<1x1x4x4x8xbf16> to vector<1x4x4x8xbf16>
    %76 = vector.shape_cast %73 : vector<1x4x4x8xbf16> to vector<1x1x4x4x8xbf16>
    tpu.vector_store %arg13[%c1_146, %c0_147, %c1_148, %c0_149, %c0_150], %76 {strides = array<i32>} : memref<4x1x5x5x8xbf16, #tpu.memory_space<vmem>>, vector<1x1x4x4x8xbf16>,
    %77 = vector.extract_strided_slice %61 {offsets = [0, 0, 1, 0, 1, 0], sizes = [1, 4, 1, 4, 1, 8], strides = [1, 1, 1, 1, 1, 1]} : vector<1x4x2x4x2x8xbf16> to vector<1x4x1x4x1x8xbf16>
    %78 = vector.shape_cast %77 : vector<1x4x1x4x1x8xbf16> to vector<1x4x4x8xbf16>
    %c0_151 = arith.constant 0 : index
    %c0_152 = arith.constant 0 : index
    %c1_153 = arith.constant 1 : index
    %c1_154 = arith.constant 1 : index
    %c0_155 = arith.constant 0 : index
    %79 = vector.load %arg13[%c0_151, %c0_152, %c1_153, %c1_154, %c0_155] : memref<4x1x5x5x8xbf16, #tpu.memory_space<vmem>>, vector<1x1x4x4x8xbf16>
    %80 = vector.shape_cast %79 : vector<1x1x4x4x8xbf16> to vector<1x4x4x8xbf16>
    %81 = vector.shape_cast %78 : vector<1x4x4x8xbf16> to vector<1x1x4x4x8xbf16>
    tpu.vector_store %arg13[%c0_151, %c0_152, %c1_153, %c1_154, %c0_155], %81 {strides = array<i32>} : memref<4x1x5x5x8xbf16, #tpu.memory_space<vmem>>, vector<1x1x4x4x8xbf16>,
    %cst_156 = arith.constant 0.000000e+00 : bf16
    %82 = vector.broadcast %cst_156 : bf16 to vector<1x5x8xbf16>
    %c0_157 = arith.constant 0 : index
    %c0_158 = arith.constant 0 : index
    %c0_159 = arith.constant 0 : index
    %c0_160 = arith.constant 0 : index
    %c0_161 = arith.constant 0 : index
    %83 = vector.load %arg13[%c0_157, %c0_158, %c0_159, %c0_160, %c0_161] : memref<4x1x5x5x8xbf16, #tpu.memory_space<vmem>>, vector<1x1x1x5x8xbf16>
    %84 = vector.shape_cast %83 : vector<1x1x1x5x8xbf16> to vector<1x5x8xbf16>
    %85 = vector.shape_cast %82 : vector<1x5x8xbf16> to vector<1x1x1x5x8xbf16>
    tpu.vector_store %arg13[%c0_157, %c0_158, %c0_159, %c0_160, %c0_161], %85 {strides = array<i32>} : memref<4x1x5x5x8xbf16, #tpu.memory_space<vmem>>, vector<1x1x1x5x8xbf16>,
    %cst_162 = arith.constant 0.000000e+00 : bf16
    %86 = vector.broadcast %cst_162 : bf16 to vector<1x5x8xbf16>
    %c0_163 = arith.constant 0 : index
    %c0_164 = arith.constant 0 : index
    %c0_165 = arith.constant 0 : index
    %c0_166 = arith.constant 0 : index
    %c0_167 = arith.constant 0 : index
    %87 = vector.load %arg13[%c0_163, %c0_164, %c0_165, %c0_166, %c0_167] : memref<4x1x5x5x8xbf16, #tpu.memory_space<vmem>>, vector<1x1x5x1x8xbf16>
    %88 = vector.shape_cast %87 : vector<1x1x5x1x8xbf16> to vector<1x5x8xbf16>
    %89 = vector.shape_cast %86 : vector<1x5x8xbf16> to vector<1x1x5x1x8xbf16>
    tpu.vector_store %arg13[%c0_163, %c0_164, %c0_165, %c0_166, %c0_167], %89 {strides = array<i32>} : memref<4x1x5x5x8xbf16, #tpu.memory_space<vmem>>, vector<1x1x5x1x8xbf16>,
    %cst_168 = arith.constant 0.000000e+00 : bf16
    %90 = vector.broadcast %cst_168 : bf16 to vector<1x5x8xbf16>
    %c1_169 = arith.constant 1 : index
    %c0_170 = arith.constant 0 : index
    %c0_171 = arith.constant 0 : index
    %c0_172 = arith.constant 0 : index
    %c0_173 = arith.constant 0 : index
    %91 = vector.load %arg13[%c1_169, %c0_170, %c0_171, %c0_172, %c0_173] : memref<4x1x5x5x8xbf16, #tpu.memory_space<vmem>>, vector<1x1x1x5x8xbf16>
    %92 = vector.shape_cast %91 : vector<1x1x1x5x8xbf16> to vector<1x5x8xbf16>
    %93 = vector.shape_cast %90 : vector<1x5x8xbf16> to vector<1x1x1x5x8xbf16>
    tpu.vector_store %arg13[%c1_169, %c0_170, %c0_171, %c0_172, %c0_173], %93 {strides = array<i32>} : memref<4x1x5x5x8xbf16, #tpu.memory_space<vmem>>, vector<1x1x1x5x8xbf16>,
    %cst_174 = arith.constant 0.000000e+00 : bf16
    %94 = vector.broadcast %cst_174 : bf16 to vector<1x5x8xbf16>
    %c1_175 = arith.constant 1 : index
    %c0_176 = arith.constant 0 : index
    %c0_177 = arith.constant 0 : index
    %c4 = arith.constant 4 : index
    %c0_178 = arith.constant 0 : index
    %95 = vector.load %arg13[%c1_175, %c0_176, %c0_177, %c4, %c0_178] : memref<4x1x5x5x8xbf16, #tpu.memory_space<vmem>>, vector<1x1x5x1x8xbf16>
    %96 = vector.shape_cast %95 : vector<1x1x5x1x8xbf16> to vector<1x5x8xbf16>
    %97 = vector.shape_cast %94 : vector<1x5x8xbf16> to vector<1x1x5x1x8xbf16>
    tpu.vector_store %arg13[%c1_175, %c0_176, %c0_177, %c4, %c0_178], %97 {strides = array<i32>} : memref<4x1x5x5x8xbf16, #tpu.memory_space<vmem>>, vector<1x1x5x1x8xbf16>,
    %cst_179 = arith.constant 0.000000e+00 : bf16
    %98 = vector.broadcast %cst_179 : bf16 to vector<1x5x8xbf16>
    %c2_180 = arith.constant 2 : index
    %c0_181 = arith.constant 0 : index
    %c4_182 = arith.constant 4 : index
    %c0_183 = arith.constant 0 : index
    %c0_184 = arith.constant 0 : index
    %99 = vector.load %arg13[%c2_180, %c0_181, %c4_182, %c0_183, %c0_184] : memref<4x1x5x5x8xbf16, #tpu.memory_space<vmem>>, vector<1x1x1x5x8xbf16>
    %100 = vector.shape_cast %99 : vector<1x1x1x5x8xbf16> to vector<1x5x8xbf16>
    %101 = vector.shape_cast %98 : vector<1x5x8xbf16> to vector<1x1x1x5x8xbf16>
    tpu.vector_store %arg13[%c2_180, %c0_181, %c4_182, %c0_183, %c0_184], %101 {strides = array<i32>} : memref<4x1x5x5x8xbf16, #tpu.memory_space<vmem>>, vector<1x1x1x5x8xbf16>,
    %cst_185 = arith.constant 0.000000e+00 : bf16
    %102 = vector.broadcast %cst_185 : bf16 to vector<1x5x8xbf16>
    %c2_186 = arith.constant 2 : index
    %c0_187 = arith.constant 0 : index
    %c0_188 = arith.constant 0 : index
    %c0_189 = arith.constant 0 : index
    %c0_190 = arith.constant 0 : index
    %103 = vector.load %arg13[%c2_186, %c0_187, %c0_188, %c0_189, %c0_190] : memref<4x1x5x5x8xbf16, #tpu.memory_space<vmem>>, vector<1x1x5x1x8xbf16>
    %104 = vector.shape_cast %103 : vector<1x1x5x1x8xbf16> to vector<1x5x8xbf16>
    %105 = vector.shape_cast %102 : vector<1x5x8xbf16> to vector<1x1x5x1x8xbf16>
    tpu.vector_store %arg13[%c2_186, %c0_187, %c0_188, %c0_189, %c0_190], %105 {strides = array<i32>} : memref<4x1x5x5x8xbf16, #tpu.memory_space<vmem>>, vector<1x1x5x1x8xbf16>,
    %cst_191 = arith.constant 0.000000e+00 : bf16
    %106 = vector.broadcast %cst_191 : bf16 to vector<1x5x8xbf16>
    %c3_192 = arith.constant 3 : index
    %c0_193 = arith.constant 0 : index
    %c4_194 = arith.constant 4 : index
    %c0_195 = arith.constant 0 : index
    %c0_196 = arith.constant 0 : index
    %107 = vector.load %arg13[%c3_192, %c0_193, %c4_194, %c0_195, %c0_196] : memref<4x1x5x5x8xbf16, #tpu.memory_space<vmem>>, vector<1x1x1x5x8xbf16>
    %108 = vector.shape_cast %107 : vector<1x1x1x5x8xbf16> to vector<1x5x8xbf16>
    %109 = vector.shape_cast %106 : vector<1x5x8xbf16> to vector<1x1x1x5x8xbf16>
    tpu.vector_store %arg13[%c3_192, %c0_193, %c4_194, %c0_195, %c0_196], %109 {strides = array<i32>} : memref<4x1x5x5x8xbf16, #tpu.memory_space<vmem>>, vector<1x1x1x5x8xbf16>,
    %cst_197 = arith.constant 0.000000e+00 : bf16
    %110 = vector.broadcast %cst_197 : bf16 to vector<1x5x8xbf16>
    %c3_198 = arith.constant 3 : index
    %c0_199 = arith.constant 0 : index
    %c0_200 = arith.constant 0 : index
    %c4_201 = arith.constant 4 : index
    %c0_202 = arith.constant 0 : index
    %111 = vector.load %arg13[%c3_198, %c0_199, %c0_200, %c4_201, %c0_202] : memref<4x1x5x5x8xbf16, #tpu.memory_space<vmem>>, vector<1x1x5x1x8xbf16>
    %112 = vector.shape_cast %111 : vector<1x1x5x1x8xbf16> to vector<1x5x8xbf16>
    %113 = vector.shape_cast %110 : vector<1x5x8xbf16> to vector<1x1x5x1x8xbf16>
    tpu.vector_store %arg13[%c3_198, %c0_199, %c0_200, %c4_201, %c0_202], %113 {strides = array<i32>} : memref<4x1x5x5x8xbf16, #tpu.memory_space<vmem>>, vector<1x1x5x1x8xbf16>,
    %c0_203 = arith.constant 0 : index
    %c0_204 = arith.constant 0 : index
    %c0_205 = arith.constant 0 : index
    %c0_206 = arith.constant 0 : index
    %c0_207 = arith.constant 0 : index
    %114 = vector.load %arg13[%c0_203, %c0_204, %c0_205, %c0_206, %c0_207] : memref<4x1x5x5x8xbf16, #tpu.memory_space<vmem>>, vector<1x1x4x4x8xbf16>
    %115 = vector.shape_cast %114 : vector<1x1x4x4x8xbf16> to vector<1x4x4x8xbf16>
    %c0_208 = arith.constant 0 : index
    %c0_209 = arith.constant 0 : index
    %c0_210 = arith.constant 0 : index
    %c0_211 = arith.constant 0 : index
    %116 = vector.load %arg17[%c0_208, %c0_209, %c0_210, %c0_211] : memref<1x4x4x128xbf16, #tpu.memory_space<vmem>>, vector<1x4x4x8xbf16>
    tpu.vector_store %arg17[%c0_208, %c0_209, %c0_210, %c0_211], %115 {strides = array<i32>} : memref<1x4x4x128xbf16, #tpu.memory_space<vmem>>, vector<1x4x4x8xbf16>,
    %c1_212 = arith.constant 1 : index
    %c0_213 = arith.constant 0 : index
    %c0_214 = arith.constant 0 : index
    %c0_215 = arith.constant 0 : index
    %c0_216 = arith.constant 0 : index
    %117 = vector.load %arg13[%c1_212, %c0_213, %c0_214, %c0_215, %c0_216] : memref<4x1x5x5x8xbf16, #tpu.memory_space<vmem>>, vector<1x1x4x4x8xbf16>
    %118 = vector.shape_cast %117 : vector<1x1x4x4x8xbf16> to vector<1x4x4x8xbf16>
    %c0_217 = arith.constant 0 : index
    %c0_218 = arith.constant 0 : index
    %c0_219 = arith.constant 0 : index
    %c8 = arith.constant 8 : index
    %119 = vector.load %arg17[%c0_217, %c0_218, %c0_219, %c8] : memref<1x4x4x128xbf16, #tpu.memory_space<vmem>>, vector<1x4x4x8xbf16>
    tpu.vector_store %arg17[%c0_217, %c0_218, %c0_219, %c8], %118 {strides = array<i32>} : memref<1x4x4x128xbf16, #tpu.memory_space<vmem>>, vector<1x4x4x8xbf16>,
    %c0_220 = arith.constant 0 : index
    %c0_221 = arith.constant 0 : index
    %c0_222 = arith.constant 0 : index
    %c1_223 = arith.constant 1 : index
    %c0_224 = arith.constant 0 : index
    %120 = vector.load %arg13[%c0_220, %c0_221, %c0_222, %c1_223, %c0_224] : memref<4x1x5x5x8xbf16, #tpu.memory_space<vmem>>, vector<1x1x4x4x8xbf16>
    %121 = vector.shape_cast %120 : vector<1x1x4x4x8xbf16> to vector<1x4x4x8xbf16>
    %c0_225 = arith.constant 0 : index
    %c0_226 = arith.constant 0 : index
    %c0_227 = arith.constant 0 : index
    %c16 = arith.constant 16 : index
    %122 = vector.load %arg17[%c0_225, %c0_226, %c0_227, %c16] : memref<1x4x4x128xbf16, #tpu.memory_space<vmem>>, vector<1x4x4x8xbf16>
    tpu.vector_store %arg17[%c0_225, %c0_226, %c0_227, %c16], %121 {strides = array<i32>} : memref<1x4x4x128xbf16, #tpu.memory_space<vmem>>, vector<1x4x4x8xbf16>,
    %c1_228 = arith.constant 1 : index
    %c0_229 = arith.constant 0 : index
    %c0_230 = arith.constant 0 : index
    %c1_231 = arith.constant 1 : index
    %c0_232 = arith.constant 0 : index
    %123 = vector.load %arg13[%c1_228, %c0_229, %c0_230, %c1_231, %c0_232] : memref<4x1x5x5x8xbf16, #tpu.memory_space<vmem>>, vector<1x1x4x4x8xbf16>
    %124 = vector.shape_cast %123 : vector<1x1x4x4x8xbf16> to vector<1x4x4x8xbf16>
    %c0_233 = arith.constant 0 : index
    %c0_234 = arith.constant 0 : index
    %c0_235 = arith.constant 0 : index
    %c24_236 = arith.constant 24 : index
    %125 = vector.load %arg17[%c0_233, %c0_234, %c0_235, %c24_236] : memref<1x4x4x128xbf16, #tpu.memory_space<vmem>>, vector<1x4x4x8xbf16>
    tpu.vector_store %arg17[%c0_233, %c0_234, %c0_235, %c24_236], %124 {strides = array<i32>} : memref<1x4x4x128xbf16, #tpu.memory_space<vmem>>, vector<1x4x4x8xbf16>,
    %c2_237 = arith.constant 2 : index
    %c0_238 = arith.constant 0 : index
    %c0_239 = arith.constant 0 : index
    %c0_240 = arith.constant 0 : index
    %c0_241 = arith.constant 0 : index
    %126 = vector.load %arg13[%c2_237, %c0_238, %c0_239, %c0_240, %c0_241] : memref<4x1x5x5x8xbf16, #tpu.memory_space<vmem>>, vector<1x1x4x4x8xbf16>
    %127 = vector.shape_cast %126 : vector<1x1x4x4x8xbf16> to vector<1x4x4x8xbf16>
    %c0_242 = arith.constant 0 : index
    %c0_243 = arith.constant 0 : index
    %c0_244 = arith.constant 0 : index
    %c32 = arith.constant 32 : index
    %128 = vector.load %arg17[%c0_242, %c0_243, %c0_244, %c32] : memref<1x4x4x128xbf16, #tpu.memory_space<vmem>>, vector<1x4x4x8xbf16>
    tpu.vector_store %arg17[%c0_242, %c0_243, %c0_244, %c32], %127 {strides = array<i32>} : memref<1x4x4x128xbf16, #tpu.memory_space<vmem>>, vector<1x4x4x8xbf16>,
    %c3_245 = arith.constant 3 : index
    %c0_246 = arith.constant 0 : index
    %c0_247 = arith.constant 0 : index
    %c0_248 = arith.constant 0 : index
    %c0_249 = arith.constant 0 : index
    %129 = vector.load %arg13[%c3_245, %c0_246, %c0_247, %c0_248, %c0_249] : memref<4x1x5x5x8xbf16, #tpu.memory_space<vmem>>, vector<1x1x4x4x8xbf16>
    %130 = vector.shape_cast %129 : vector<1x1x4x4x8xbf16> to vector<1x4x4x8xbf16>
    %c0_250 = arith.constant 0 : index
    %c0_251 = arith.constant 0 : index
    %c0_252 = arith.constant 0 : index
    %c40 = arith.constant 40 : index
    %131 = vector.load %arg17[%c0_250, %c0_251, %c0_252, %c40] : memref<1x4x4x128xbf16, #tpu.memory_space<vmem>>, vector<1x4x4x8xbf16>
    tpu.vector_store %arg17[%c0_250, %c0_251, %c0_252, %c40], %130 {strides = array<i32>} : memref<1x4x4x128xbf16, #tpu.memory_space<vmem>>, vector<1x4x4x8xbf16>,
    %c2_253 = arith.constant 2 : index
    %c0_254 = arith.constant 0 : index
    %c0_255 = arith.constant 0 : index
    %c1_256 = arith.constant 1 : index
    %c0_257 = arith.constant 0 : index
    %132 = vector.load %arg13[%c2_253, %c0_254, %c0_255, %c1_256, %c0_257] : memref<4x1x5x5x8xbf16, #tpu.memory_space<vmem>>, vector<1x1x4x4x8xbf16>
    %133 = vector.shape_cast %132 : vector<1x1x4x4x8xbf16> to vector<1x4x4x8xbf16>
    %c0_258 = arith.constant 0 : index
    %c0_259 = arith.constant 0 : index
    %c0_260 = arith.constant 0 : index
    %c48 = arith.constant 48 : index
    %134 = vector.load %arg17[%c0_258, %c0_259, %c0_260, %c48] : memref<1x4x4x128xbf16, #tpu.memory_space<vmem>>, vector<1x4x4x8xbf16>
    tpu.vector_store %arg17[%c0_258, %c0_259, %c0_260, %c48], %133 {strides = array<i32>} : memref<1x4x4x128xbf16, #tpu.memory_space<vmem>>, vector<1x4x4x8xbf16>,
    %c3_261 = arith.constant 3 : index
    %c0_262 = arith.constant 0 : index
    %c0_263 = arith.constant 0 : index
    %c1_264 = arith.constant 1 : index
    %c0_265 = arith.constant 0 : index
    %135 = vector.load %arg13[%c3_261, %c0_262, %c0_263, %c1_264, %c0_265] : memref<4x1x5x5x8xbf16, #tpu.memory_space<vmem>>, vector<1x1x4x4x8xbf16>
    %136 = vector.shape_cast %135 : vector<1x1x4x4x8xbf16> to vector<1x4x4x8xbf16>
    %c0_266 = arith.constant 0 : index
    %c0_267 = arith.constant 0 : index
    %c0_268 = arith.constant 0 : index
    %c56 = arith.constant 56 : index
    %137 = vector.load %arg17[%c0_266, %c0_267, %c0_268, %c56] : memref<1x4x4x128xbf16, #tpu.memory_space<vmem>>, vector<1x4x4x8xbf16>
    tpu.vector_store %arg17[%c0_266, %c0_267, %c0_268, %c56], %136 {strides = array<i32>} : memref<1x4x4x128xbf16, #tpu.memory_space<vmem>>, vector<1x4x4x8xbf16>,
    %c0_269 = arith.constant 0 : index
    %c0_270 = arith.constant 0 : index
    %c1_271 = arith.constant 1 : index
    %c0_272 = arith.constant 0 : index
    %c0_273 = arith.constant 0 : index
    %138 = vector.load %arg13[%c0_269, %c0_270, %c1_271, %c0_272, %c0_273] : memref<4x1x5x5x8xbf16, #tpu.memory_space<vmem>>, vector<1x1x4x4x8xbf16>
    %139 = vector.shape_cast %138 : vector<1x1x4x4x8xbf16> to vector<1x4x4x8xbf16>
    %c0_274 = arith.constant 0 : index
    %c0_275 = arith.constant 0 : index
    %c0_276 = arith.constant 0 : index
    %c64 = arith.constant 64 : index
    %140 = vector.load %arg17[%c0_274, %c0_275, %c0_276, %c64] : memref<1x4x4x128xbf16, #tpu.memory_space<vmem>>, vector<1x4x4x8xbf16>
    tpu.vector_store %arg17[%c0_274, %c0_275, %c0_276, %c64], %139 {strides = array<i32>} : memref<1x4x4x128xbf16, #tpu.memory_space<vmem>>, vector<1x4x4x8xbf16>,
    %c1_277 = arith.constant 1 : index
    %c0_278 = arith.constant 0 : index
    %c1_279 = arith.constant 1 : index
    %c0_280 = arith.constant 0 : index
    %c0_281 = arith.constant 0 : index
    %141 = vector.load %arg13[%c1_277, %c0_278, %c1_279, %c0_280, %c0_281] : memref<4x1x5x5x8xbf16, #tpu.memory_space<vmem>>, vector<1x1x4x4x8xbf16>
    %142 = vector.shape_cast %141 : vector<1x1x4x4x8xbf16> to vector<1x4x4x8xbf16>
    %c0_282 = arith.constant 0 : index
    %c0_283 = arith.constant 0 : index
    %c0_284 = arith.constant 0 : index
    %c72 = arith.constant 72 : index
    %143 = vector.load %arg17[%c0_282, %c0_283, %c0_284, %c72] : memref<1x4x4x128xbf16, #tpu.memory_space<vmem>>, vector<1x4x4x8xbf16>
    tpu.vector_store %arg17[%c0_282, %c0_283, %c0_284, %c72], %142 {strides = array<i32>} : memref<1x4x4x128xbf16, #tpu.memory_space<vmem>>, vector<1x4x4x8xbf16>,
    %c0_285 = arith.constant 0 : index
    %c0_286 = arith.constant 0 : index
    %c1_287 = arith.constant 1 : index
    %c1_288 = arith.constant 1 : index
    %c0_289 = arith.constant 0 : index
    %144 = vector.load %arg13[%c0_285, %c0_286, %c1_287, %c1_288, %c0_289] : memref<4x1x5x5x8xbf16, #tpu.memory_space<vmem>>, vector<1x1x4x4x8xbf16>
    %145 = vector.shape_cast %144 : vector<1x1x4x4x8xbf16> to vector<1x4x4x8xbf16>
    %c0_290 = arith.constant 0 : index
    %c0_291 = arith.constant 0 : index
    %c0_292 = arith.constant 0 : index
    %c80 = arith.constant 80 : index
    %146 = vector.load %arg17[%c0_290, %c0_291, %c0_292, %c80] : memref<1x4x4x128xbf16, #tpu.memory_space<vmem>>, vector<1x4x4x8xbf16>
    tpu.vector_store %arg17[%c0_290, %c0_291, %c0_292, %c80], %145 {strides = array<i32>} : memref<1x4x4x128xbf16, #tpu.memory_space<vmem>>, vector<1x4x4x8xbf16>,
    %c1_293 = arith.constant 1 : index
    %c0_294 = arith.constant 0 : index
    %c1_295 = arith.constant 1 : index
    %c1_296 = arith.constant 1 : index
    %c0_297 = arith.constant 0 : index
    %147 = vector.load %arg13[%c1_293, %c0_294, %c1_295, %c1_296, %c0_297] : memref<4x1x5x5x8xbf16, #tpu.memory_space<vmem>>, vector<1x1x4x4x8xbf16>
    %148 = vector.shape_cast %147 : vector<1x1x4x4x8xbf16> to vector<1x4x4x8xbf16>
    %c0_298 = arith.constant 0 : index
    %c0_299 = arith.constant 0 : index
    %c0_300 = arith.constant 0 : index
    %c88 = arith.constant 88 : index
    %149 = vector.load %arg17[%c0_298, %c0_299, %c0_300, %c88] : memref<1x4x4x128xbf16, #tpu.memory_space<vmem>>, vector<1x4x4x8xbf16>
    tpu.vector_store %arg17[%c0_298, %c0_299, %c0_300, %c88], %148 {strides = array<i32>} : memref<1x4x4x128xbf16, #tpu.memory_space<vmem>>, vector<1x4x4x8xbf16>,
    %c2_301 = arith.constant 2 : index
    %c0_302 = arith.constant 0 : index
    %c1_303 = arith.constant 1 : index
    %c0_304 = arith.constant 0 : index
    %c0_305 = arith.constant 0 : index
    %150 = vector.load %arg13[%c2_301, %c0_302, %c1_303, %c0_304, %c0_305] : memref<4x1x5x5x8xbf16, #tpu.memory_space<vmem>>, vector<1x1x4x4x8xbf16>
    %151 = vector.shape_cast %150 : vector<1x1x4x4x8xbf16> to vector<1x4x4x8xbf16>
    %c0_306 = arith.constant 0 : index
    %c0_307 = arith.constant 0 : index
    %c0_308 = arith.constant 0 : index
    %c96 = arith.constant 96 : index
    %152 = vector.load %arg17[%c0_306, %c0_307, %c0_308, %c96] : memref<1x4x4x128xbf16, #tpu.memory_space<vmem>>, vector<1x4x4x8xbf16>
    tpu.vector_store %arg17[%c0_306, %c0_307, %c0_308, %c96], %151 {strides = array<i32>} : memref<1x4x4x128xbf16, #tpu.memory_space<vmem>>, vector<1x4x4x8xbf16>,
    %c3_309 = arith.constant 3 : index
    %c0_310 = arith.constant 0 : index
    %c1_311 = arith.constant 1 : index
    %c0_312 = arith.constant 0 : index
    %c0_313 = arith.constant 0 : index
    %153 = vector.load %arg13[%c3_309, %c0_310, %c1_311, %c0_312, %c0_313] : memref<4x1x5x5x8xbf16, #tpu.memory_space<vmem>>, vector<1x1x4x4x8xbf16>
    %154 = vector.shape_cast %153 : vector<1x1x4x4x8xbf16> to vector<1x4x4x8xbf16>
    %c0_314 = arith.constant 0 : index
    %c0_315 = arith.constant 0 : index
    %c0_316 = arith.constant 0 : index
    %c104 = arith.constant 104 : index
    %155 = vector.load %arg17[%c0_314, %c0_315, %c0_316, %c104] : memref<1x4x4x128xbf16, #tpu.memory_space<vmem>>, vector<1x4x4x8xbf16>
    tpu.vector_store %arg17[%c0_314, %c0_315, %c0_316, %c104], %154 {strides = array<i32>} : memref<1x4x4x128xbf16, #tpu.memory_space<vmem>>, vector<1x4x4x8xbf16>,
    %c2_317 = arith.constant 2 : index
    %c0_318 = arith.constant 0 : index
    %c1_319 = arith.constant 1 : index
    %c1_320 = arith.constant 1 : index
    %c0_321 = arith.constant 0 : index
    %156 = vector.load %arg13[%c2_317, %c0_318, %c1_319, %c1_320, %c0_321] : memref<4x1x5x5x8xbf16, #tpu.memory_space<vmem>>, vector<1x1x4x4x8xbf16>
    %157 = vector.shape_cast %156 : vector<1x1x4x4x8xbf16> to vector<1x4x4x8xbf16>
    %c0_322 = arith.constant 0 : index
    %c0_323 = arith.constant 0 : index
    %c0_324 = arith.constant 0 : index
    %c112 = arith.constant 112 : index
    %158 = vector.load %arg17[%c0_322, %c0_323, %c0_324, %c112] : memref<1x4x4x128xbf16, #tpu.memory_space<vmem>>, vector<1x4x4x8xbf16>
    tpu.vector_store %arg17[%c0_322, %c0_323, %c0_324, %c112], %157 {strides = array<i32>} : memref<1x4x4x128xbf16, #tpu.memory_space<vmem>>, vector<1x4x4x8xbf16>,
    %c3_325 = arith.constant 3 : index
    %c0_326 = arith.constant 0 : index
    %c1_327 = arith.constant 1 : index
    %c1_328 = arith.constant 1 : index
    %c0_329 = arith.constant 0 : index
    %159 = vector.load %arg13[%c3_325, %c0_326, %c1_327, %c1_328, %c0_329] : memref<4x1x5x5x8xbf16, #tpu.memory_space<vmem>>, vector<1x1x4x4x8xbf16>
    %160 = vector.shape_cast %159 : vector<1x1x4x4x8xbf16> to vector<1x4x4x8xbf16>
    %c0_330 = arith.constant 0 : index
    %c0_331 = arith.constant 0 : index
    %c0_332 = arith.constant 0 : index
    %c120 = arith.constant 120 : index
    %161 = vector.load %arg17[%c0_330, %c0_331, %c0_332, %c120] : memref<1x4x4x128xbf16, #tpu.memory_space<vmem>>, vector<1x4x4x8xbf16>
    tpu.vector_store %arg17[%c0_330, %c0_331, %c0_332, %c120], %160 {strides = array<i32>} : memref<1x4x4x128xbf16, #tpu.memory_space<vmem>>, vector<1x4x4x8xbf16>,
    %c0_333 = arith.constant 0 : index
    %c0_334 = arith.constant 0 : index
    %c0_335 = arith.constant 0 : index
    %c0_336 = arith.constant 0 : index
    %162 = vector.load %arg17[%c0_333, %c0_334, %c0_335, %c0_336] : memref<1x4x4x128xbf16, #tpu.memory_space<vmem>>, vector<1x4x4x128xbf16>
    %163 = vector.shape_cast %162 : vector<1x4x4x128xbf16> to vector<16x128xbf16>
    %c0_337 = arith.constant 0 : index
    %c0_338 = arith.constant 0 : index
    %164 = vector.load %arg4[%c0_337, %c0_338] : memref<128x16xbf16, #tpu.memory_space<vmem>>, vector<128x16xbf16>
    %cst_339 = arith.constant dense<0.000000e+00> : vector<16x16xf32>
    %165 = tpu.matmul %163, %164, %cst_339 {dimension_numbers = #tpu.dot_dimension_numbers<[1], [0], [0], [1], [0, 0, 1, 1], [], []>} : vector<16x128xbf16>, vector<128x16xbf16>, vector<16x16xf32> -> vector<16x16xf32>
    %c0_340 = arith.constant 0 : index
    %c0_341 = arith.constant 0 : index
    %166 = vector.load %arg5[%c0_340, %c0_341] : memref<1x16xf32, #tpu.memory_space<vmem>>, vector<1x16xf32>
    %167 = vector.broadcast %166 : vector<1x16xf32> to vector<16x16xf32>
    %168 = arith.addf %165, %167 : vector<16x16xf32>
    %cst_342 = arith.constant 0.000000e+00 : f32
    %169 = vector.broadcast %cst_342 : f32 to vector<16x16xf32>
    %170 = arith.cmpf oge, %168, %169 : vector<16x16xf32>
    %cst_343 = arith.constant 2.000000e-01 : f32
    %171 = vector.broadcast %cst_343 : f32 to vector<16x16xf32>
    %172 = arith.mulf %171, %168 : vector<16x16xf32>
    %173 = arith.select %170, %168, %172 : vector<16x16xi1>, vector<16x16xf32>
    %174 = arith.truncf %173 : vector<16x16xf32> to vector<16x16xbf16>
    %175 = vector.shape_cast %174 : vector<16x16xbf16> to vector<1x2x2x2x2x16xbf16>
    %176 = vector.extract_strided_slice %175 {offsets = [0, 0, 0, 0, 0, 0], sizes = [1, 2, 1, 2, 1, 16], strides = [1, 1, 1, 1, 1, 1]} : vector<1x2x2x2x2x16xbf16> to vector<1x2x1x2x1x16xbf16>
    %177 = vector.shape_cast %176 : vector<1x2x1x2x1x16xbf16> to vector<1x2x2x16xbf16>
    %c3_344 = arith.constant 3 : index
    %c0_345 = arith.constant 0 : index
    %c0_346 = arith.constant 0 : index
    %c0_347 = arith.constant 0 : index
    %c0_348 = arith.constant 0 : index
    %178 = vector.load %arg14[%c3_344, %c0_345, %c0_346, %c0_347, %c0_348] : memref<4x1x3x3x16xbf16, #tpu.memory_space<vmem>>, vector<1x1x2x2x16xbf16>
    %179 = vector.shape_cast %178 : vector<1x1x2x2x16xbf16> to vector<1x2x2x16xbf16>
    %180 = vector.shape_cast %177 : vector<1x2x2x16xbf16> to vector<1x1x2x2x16xbf16>
    tpu.vector_store %arg14[%c3_344, %c0_345, %c0_346, %c0_347, %c0_348], %180 {strides = array<i32>} : memref<4x1x3x3x16xbf16, #tpu.memory_space<vmem>>, vector<1x1x2x2x16xbf16>,
    %181 = vector.extract_strided_slice %175 {offsets = [0, 0, 0, 0, 1, 0], sizes = [1, 2, 1, 2, 1, 16], strides = [1, 1, 1, 1, 1, 1]} : vector<1x2x2x2x2x16xbf16> to vector<1x2x1x2x1x16xbf16>
    %182 = vector.shape_cast %181 : vector<1x2x1x2x1x16xbf16> to vector<1x2x2x16xbf16>
    %c2_349 = arith.constant 2 : index
    %c0_350 = arith.constant 0 : index
    %c0_351 = arith.constant 0 : index
    %c1_352 = arith.constant 1 : index
    %c0_353 = arith.constant 0 : index
    %183 = vector.load %arg14[%c2_349, %c0_350, %c0_351, %c1_352, %c0_353] : memref<4x1x3x3x16xbf16, #tpu.memory_space<vmem>>, vector<1x1x2x2x16xbf16>
    %184 = vector.shape_cast %183 : vector<1x1x2x2x16xbf16> to vector<1x2x2x16xbf16>
    %185 = vector.shape_cast %182 : vector<1x2x2x16xbf16> to vector<1x1x2x2x16xbf16>
    tpu.vector_store %arg14[%c2_349, %c0_350, %c0_351, %c1_352, %c0_353], %185 {strides = array<i32>} : memref<4x1x3x3x16xbf16, #tpu.memory_space<vmem>>, vector<1x1x2x2x16xbf16>,
    %186 = vector.extract_strided_slice %175 {offsets = [0, 0, 1, 0, 0, 0], sizes = [1, 2, 1, 2, 1, 16], strides = [1, 1, 1, 1, 1, 1]} : vector<1x2x2x2x2x16xbf16> to vector<1x2x1x2x1x16xbf16>
    %187 = vector.shape_cast %186 : vector<1x2x1x2x1x16xbf16> to vector<1x2x2x16xbf16>
    %c1_354 = arith.constant 1 : index
    %c0_355 = arith.constant 0 : index
    %c1_356 = arith.constant 1 : index
    %c0_357 = arith.constant 0 : index
    %c0_358 = arith.constant 0 : index
    %188 = vector.load %arg14[%c1_354, %c0_355, %c1_356, %c0_357, %c0_358] : memref<4x1x3x3x16xbf16, #tpu.memory_space<vmem>>, vector<1x1x2x2x16xbf16>
    %189 = vector.shape_cast %188 : vector<1x1x2x2x16xbf16> to vector<1x2x2x16xbf16>
    %190 = vector.shape_cast %187 : vector<1x2x2x16xbf16> to vector<1x1x2x2x16xbf16>
    tpu.vector_store %arg14[%c1_354, %c0_355, %c1_356, %c0_357, %c0_358], %190 {strides = array<i32>} : memref<4x1x3x3x16xbf16, #tpu.memory_space<vmem>>, vector<1x1x2x2x16xbf16>,
    %191 = vector.extract_strided_slice %175 {offsets = [0, 0, 1, 0, 1, 0], sizes = [1, 2, 1, 2, 1, 16], strides = [1, 1, 1, 1, 1, 1]} : vector<1x2x2x2x2x16xbf16> to vector<1x2x1x2x1x16xbf16>
    %192 = vector.shape_cast %191 : vector<1x2x1x2x1x16xbf16> to vector<1x2x2x16xbf16>
    %c0_359 = arith.constant 0 : index
    %c0_360 = arith.constant 0 : index
    %c1_361 = arith.constant 1 : index
    %c1_362 = arith.constant 1 : index
    %c0_363 = arith.constant 0 : index
    %193 = vector.load %arg14[%c0_359, %c0_360, %c1_361, %c1_362, %c0_363] : memref<4x1x3x3x16xbf16, #tpu.memory_space<vmem>>, vector<1x1x2x2x16xbf16>
    %194 = vector.shape_cast %193 : vector<1x1x2x2x16xbf16> to vector<1x2x2x16xbf16>
    %195 = vector.shape_cast %192 : vector<1x2x2x16xbf16> to vector<1x1x2x2x16xbf16>
    tpu.vector_store %arg14[%c0_359, %c0_360, %c1_361, %c1_362, %c0_363], %195 {strides = array<i32>} : memref<4x1x3x3x16xbf16, #tpu.memory_space<vmem>>, vector<1x1x2x2x16xbf16>,
    %cst_364 = arith.constant 0.000000e+00 : bf16
    %196 = vector.broadcast %cst_364 : bf16 to vector<1x3x16xbf16>
    %c0_365 = arith.constant 0 : index
    %c0_366 = arith.constant 0 : index
    %c0_367 = arith.constant 0 : index
    %c0_368 = arith.constant 0 : index
    %c0_369 = arith.constant 0 : index
    %197 = vector.load %arg14[%c0_365, %c0_366, %c0_367, %c0_368, %c0_369] : memref<4x1x3x3x16xbf16, #tpu.memory_space<vmem>>, vector<1x1x1x3x16xbf16>
    %198 = vector.shape_cast %197 : vector<1x1x1x3x16xbf16> to vector<1x3x16xbf16>
    %199 = vector.shape_cast %196 : vector<1x3x16xbf16> to vector<1x1x1x3x16xbf16>
    tpu.vector_store %arg14[%c0_365, %c0_366, %c0_367, %c0_368, %c0_369], %199 {strides = array<i32>} : memref<4x1x3x3x16xbf16, #tpu.memory_space<vmem>>, vector<1x1x1x3x16xbf16>,
    %cst_370 = arith.constant 0.000000e+00 : bf16
    %200 = vector.broadcast %cst_370 : bf16 to vector<1x3x16xbf16>
    %c0_371 = arith.constant 0 : index
    %c0_372 = arith.constant 0 : index
    %c0_373 = arith.constant 0 : index
    %c0_374 = arith.constant 0 : index
    %c0_375 = arith.constant 0 : index
    %201 = vector.load %arg14[%c0_371, %c0_372, %c0_373, %c0_374, %c0_375] : memref<4x1x3x3x16xbf16, #tpu.memory_space<vmem>>, vector<1x1x3x1x16xbf16>
    %202 = vector.shape_cast %201 : vector<1x1x3x1x16xbf16> to vector<1x3x16xbf16>
    %203 = vector.shape_cast %200 : vector<1x3x16xbf16> to vector<1x1x3x1x16xbf16>
    tpu.vector_store %arg14[%c0_371, %c0_372, %c0_373, %c0_374, %c0_375], %203 {strides = array<i32>} : memref<4x1x3x3x16xbf16, #tpu.memory_space<vmem>>, vector<1x1x3x1x16xbf16>,
    %cst_376 = arith.constant 0.000000e+00 : bf16
    %204 = vector.broadcast %cst_376 : bf16 to vector<1x3x16xbf16>
    %c1_377 = arith.constant 1 : index
    %c0_378 = arith.constant 0 : index
    %c0_379 = arith.constant 0 : index
    %c0_380 = arith.constant 0 : index
    %c0_381 = arith.constant 0 : index
    %205 = vector.load %arg14[%c1_377, %c0_378, %c0_379, %c0_380, %c0_381] : memref<4x1x3x3x16xbf16, #tpu.memory_space<vmem>>, vector<1x1x1x3x16xbf16>
    %206 = vector.shape_cast %205 : vector<1x1x1x3x16xbf16> to vector<1x3x16xbf16>
    %207 = vector.shape_cast %204 : vector<1x3x16xbf16> to vector<1x1x1x3x16xbf16>
    tpu.vector_store %arg14[%c1_377, %c0_378, %c0_379, %c0_380, %c0_381], %207 {strides = array<i32>} : memref<4x1x3x3x16xbf16, #tpu.memory_space<vmem>>, vector<1x1x1x3x16xbf16>,
    %cst_382 = arith.constant 0.000000e+00 : bf16
    %208 = vector.broadcast %cst_382 : bf16 to vector<1x3x16xbf16>
    %c1_383 = arith.constant 1 : index
    %c0_384 = arith.constant 0 : index
    %c0_385 = arith.constant 0 : index
    %c2_386 = arith.constant 2 : index
    %c0_387 = arith.constant 0 : index
    %209 = vector.load %arg14[%c1_383, %c0_384, %c0_385, %c2_386, %c0_387] : memref<4x1x3x3x16xbf16, #tpu.memory_space<vmem>>, vector<1x1x3x1x16xbf16>
    %210 = vector.shape_cast %209 : vector<1x1x3x1x16xbf16> to vector<1x3x16xbf16>
    %211 = vector.shape_cast %208 : vector<1x3x16xbf16> to vector<1x1x3x1x16xbf16>
    tpu.vector_store %arg14[%c1_383, %c0_384, %c0_385, %c2_386, %c0_387], %211 {strides = array<i32>} : memref<4x1x3x3x16xbf16, #tpu.memory_space<vmem>>, vector<1x1x3x1x16xbf16>,
    %cst_388 = arith.constant 0.000000e+00 : bf16
    %212 = vector.broadcast %cst_388 : bf16 to vector<1x3x16xbf16>
    %c2_389 = arith.constant 2 : index
    %c0_390 = arith.constant 0 : index
    %c2_391 = arith.constant 2 : index
    %c0_392 = arith.constant 0 : index
    %c0_393 = arith.constant 0 : index
    %213 = vector.load %arg14[%c2_389, %c0_390, %c2_391, %c0_392, %c0_393] : memref<4x1x3x3x16xbf16, #tpu.memory_space<vmem>>, vector<1x1x1x3x16xbf16>
    %214 = vector.shape_cast %213 : vector<1x1x1x3x16xbf16> to vector<1x3x16xbf16>
    %215 = vector.shape_cast %212 : vector<1x3x16xbf16> to vector<1x1x1x3x16xbf16>
    tpu.vector_store %arg14[%c2_389, %c0_390, %c2_391, %c0_392, %c0_393], %215 {strides = array<i32>} : memref<4x1x3x3x16xbf16, #tpu.memory_space<vmem>>, vector<1x1x1x3x16xbf16>,
    %cst_394 = arith.constant 0.000000e+00 : bf16
    %216 = vector.broadcast %cst_394 : bf16 to vector<1x3x16xbf16>
    %c2_395 = arith.constant 2 : index
    %c0_396 = arith.constant 0 : index
    %c0_397 = arith.constant 0 : index
    %c0_398 = arith.constant 0 : index
    %c0_399 = arith.constant 0 : index
    %217 = vector.load %arg14[%c2_395, %c0_396, %c0_397, %c0_398, %c0_399] : memref<4x1x3x3x16xbf16, #tpu.memory_space<vmem>>, vector<1x1x3x1x16xbf16>
    %218 = vector.shape_cast %217 : vector<1x1x3x1x16xbf16> to vector<1x3x16xbf16>
    %219 = vector.shape_cast %216 : vector<1x3x16xbf16> to vector<1x1x3x1x16xbf16>
    tpu.vector_store %arg14[%c2_395, %c0_396, %c0_397, %c0_398, %c0_399], %219 {strides = array<i32>} : memref<4x1x3x3x16xbf16, #tpu.memory_space<vmem>>, vector<1x1x3x1x16xbf16>,
    %cst_400 = arith.constant 0.000000e+00 : bf16
    %220 = vector.broadcast %cst_400 : bf16 to vector<1x3x16xbf16>
    %c3_401 = arith.constant 3 : index
    %c0_402 = arith.constant 0 : index
    %c2_403 = arith.constant 2 : index
    %c0_404 = arith.constant 0 : index
    %c0_405 = arith.constant 0 : index
    %221 = vector.load %arg14[%c3_401, %c0_402, %c2_403, %c0_404, %c0_405] : memref<4x1x3x3x16xbf16, #tpu.memory_space<vmem>>, vector<1x1x1x3x16xbf16>
    %222 = vector.shape_cast %221 : vector<1x1x1x3x16xbf16> to vector<1x3x16xbf16>
    %223 = vector.shape_cast %220 : vector<1x3x16xbf16> to vector<1x1x1x3x16xbf16>
    tpu.vector_store %arg14[%c3_401, %c0_402, %c2_403, %c0_404, %c0_405], %223 {strides = array<i32>} : memref<4x1x3x3x16xbf16, #tpu.memory_space<vmem>>, vector<1x1x1x3x16xbf16>,
    %cst_406 = arith.constant 0.000000e+00 : bf16
    %224 = vector.broadcast %cst_406 : bf16 to vector<1x3x16xbf16>
    %c3_407 = arith.constant 3 : index
    %c0_408 = arith.constant 0 : index
    %c0_409 = arith.constant 0 : index
    %c2_410 = arith.constant 2 : index
    %c0_411 = arith.constant 0 : index
    %225 = vector.load %arg14[%c3_407, %c0_408, %c0_409, %c2_410, %c0_411] : memref<4x1x3x3x16xbf16, #tpu.memory_space<vmem>>, vector<1x1x3x1x16xbf16>
    %226 = vector.shape_cast %225 : vector<1x1x3x1x16xbf16> to vector<1x3x16xbf16>
    %227 = vector.shape_cast %224 : vector<1x3x16xbf16> to vector<1x1x3x1x16xbf16>
    tpu.vector_store %arg14[%c3_407, %c0_408, %c0_409, %c2_410, %c0_411], %227 {strides = array<i32>} : memref<4x1x3x3x16xbf16, #tpu.memory_space<vmem>>, vector<1x1x3x1x16xbf16>,
    %c0_412 = arith.constant 0 : index
    %c0_413 = arith.constant 0 : index
    %c0_414 = arith.constant 0 : index
    %c0_415 = arith.constant 0 : index
    %c0_416 = arith.constant 0 : index
    %228 = vector.load %arg14[%c0_412, %c0_413, %c0_414, %c0_415, %c0_416] : memref<4x1x3x3x16xbf16, #tpu.memory_space<vmem>>, vector<1x1x2x2x16xbf16>
    %229 = vector.shape_cast %228 : vector<1x1x2x2x16xbf16> to vector<1x2x2x16xbf16>
    %c0_417 = arith.constant 0 : index
    %c0_418 = arith.constant 0 : index
    %c0_419 = arith.constant 0 : index
    %c0_420 = arith.constant 0 : index
    %230 = vector.load %arg18[%c0_417, %c0_418, %c0_419, %c0_420] : memref<1x2x2x256xbf16, #tpu.memory_space<vmem>>, vector<1x2x2x16xbf16>
    tpu.vector_store %arg18[%c0_417, %c0_418, %c0_419, %c0_420], %229 {strides = array<i32>} : memref<1x2x2x256xbf16, #tpu.memory_space<vmem>>, vector<1x2x2x16xbf16>,
    %c1_421 = arith.constant 1 : index
    %c0_422 = arith.constant 0 : index
    %c0_423 = arith.constant 0 : index
    %c0_424 = arith.constant 0 : index
    %c0_425 = arith.constant 0 : index
    %231 = vector.load %arg14[%c1_421, %c0_422, %c0_423, %c0_424, %c0_425] : memref<4x1x3x3x16xbf16, #tpu.memory_space<vmem>>, vector<1x1x2x2x16xbf16>
    %232 = vector.shape_cast %231 : vector<1x1x2x2x16xbf16> to vector<1x2x2x16xbf16>
    %c0_426 = arith.constant 0 : index
    %c0_427 = arith.constant 0 : index
    %c0_428 = arith.constant 0 : index
    %c16_429 = arith.constant 16 : index
    %233 = vector.load %arg18[%c0_426, %c0_427, %c0_428, %c16_429] : memref<1x2x2x256xbf16, #tpu.memory_space<vmem>>, vector<1x2x2x16xbf16>
    tpu.vector_store %arg18[%c0_426, %c0_427, %c0_428, %c16_429], %232 {strides = array<i32>} : memref<1x2x2x256xbf16, #tpu.memory_space<vmem>>, vector<1x2x2x16xbf16>,
    %c0_430 = arith.constant 0 : index
    %c0_431 = arith.constant 0 : index
    %c0_432 = arith.constant 0 : index
    %c1_433 = arith.constant 1 : index
    %c0_434 = arith.constant 0 : index
    %234 = vector.load %arg14[%c0_430, %c0_431, %c0_432, %c1_433, %c0_434] : memref<4x1x3x3x16xbf16, #tpu.memory_space<vmem>>, vector<1x1x2x2x16xbf16>
    %235 = vector.shape_cast %234 : vector<1x1x2x2x16xbf16> to vector<1x2x2x16xbf16>
    %c0_435 = arith.constant 0 : index
    %c0_436 = arith.constant 0 : index
    %c0_437 = arith.constant 0 : index
    %c32_438 = arith.constant 32 : index
    %236 = vector.load %arg18[%c0_435, %c0_436, %c0_437, %c32_438] : memref<1x2x2x256xbf16, #tpu.memory_space<vmem>>, vector<1x2x2x16xbf16>
    tpu.vector_store %arg18[%c0_435, %c0_436, %c0_437, %c32_438], %235 {strides = array<i32>} : memref<1x2x2x256xbf16, #tpu.memory_space<vmem>>, vector<1x2x2x16xbf16>,
    %c1_439 = arith.constant 1 : index
    %c0_440 = arith.constant 0 : index
    %c0_441 = arith.constant 0 : index
    %c1_442 = arith.constant 1 : index
    %c0_443 = arith.constant 0 : index
    %237 = vector.load %arg14[%c1_439, %c0_440, %c0_441, %c1_442, %c0_443] : memref<4x1x3x3x16xbf16, #tpu.memory_space<vmem>>, vector<1x1x2x2x16xbf16>
    %238 = vector.shape_cast %237 : vector<1x1x2x2x16xbf16> to vector<1x2x2x16xbf16>
    %c0_444 = arith.constant 0 : index
    %c0_445 = arith.constant 0 : index
    %c0_446 = arith.constant 0 : index
    %c48_447 = arith.constant 48 : index
    %239 = vector.load %arg18[%c0_444, %c0_445, %c0_446, %c48_447] : memref<1x2x2x256xbf16, #tpu.memory_space<vmem>>, vector<1x2x2x16xbf16>
    tpu.vector_store %arg18[%c0_444, %c0_445, %c0_446, %c48_447], %238 {strides = array<i32>} : memref<1x2x2x256xbf16, #tpu.memory_space<vmem>>, vector<1x2x2x16xbf16>,
    %c2_448 = arith.constant 2 : index
    %c0_449 = arith.constant 0 : index
    %c0_450 = arith.constant 0 : index
    %c0_451 = arith.constant 0 : index
    %c0_452 = arith.constant 0 : index
    %240 = vector.load %arg14[%c2_448, %c0_449, %c0_450, %c0_451, %c0_452] : memref<4x1x3x3x16xbf16, #tpu.memory_space<vmem>>, vector<1x1x2x2x16xbf16>
    %241 = vector.shape_cast %240 : vector<1x1x2x2x16xbf16> to vector<1x2x2x16xbf16>
    %c0_453 = arith.constant 0 : index
    %c0_454 = arith.constant 0 : index
    %c0_455 = arith.constant 0 : index
    %c64_456 = arith.constant 64 : index
    %242 = vector.load %arg18[%c0_453, %c0_454, %c0_455, %c64_456] : memref<1x2x2x256xbf16, #tpu.memory_space<vmem>>, vector<1x2x2x16xbf16>
    tpu.vector_store %arg18[%c0_453, %c0_454, %c0_455, %c64_456], %241 {strides = array<i32>} : memref<1x2x2x256xbf16, #tpu.memory_space<vmem>>, vector<1x2x2x16xbf16>,
    %c3_457 = arith.constant 3 : index
    %c0_458 = arith.constant 0 : index
    %c0_459 = arith.constant 0 : index
    %c0_460 = arith.constant 0 : index
    %c0_461 = arith.constant 0 : index
    %243 = vector.load %arg14[%c3_457, %c0_458, %c0_459, %c0_460, %c0_461] : memref<4x1x3x3x16xbf16, #tpu.memory_space<vmem>>, vector<1x1x2x2x16xbf16>
    %244 = vector.shape_cast %243 : vector<1x1x2x2x16xbf16> to vector<1x2x2x16xbf16>
    %c0_462 = arith.constant 0 : index
    %c0_463 = arith.constant 0 : index
    %c0_464 = arith.constant 0 : index
    %c80_465 = arith.constant 80 : index
    %245 = vector.load %arg18[%c0_462, %c0_463, %c0_464, %c80_465] : memref<1x2x2x256xbf16, #tpu.memory_space<vmem>>, vector<1x2x2x16xbf16>
    tpu.vector_store %arg18[%c0_462, %c0_463, %c0_464, %c80_465], %244 {strides = array<i32>} : memref<1x2x2x256xbf16, #tpu.memory_space<vmem>>, vector<1x2x2x16xbf16>,
    %c2_466 = arith.constant 2 : index
    %c0_467 = arith.constant 0 : index
    %c0_468 = arith.constant 0 : index
    %c1_469 = arith.constant 1 : index
    %c0_470 = arith.constant 0 : index
    %246 = vector.load %arg14[%c2_466, %c0_467, %c0_468, %c1_469, %c0_470] : memref<4x1x3x3x16xbf16, #tpu.memory_space<vmem>>, vector<1x1x2x2x16xbf16>
    %247 = vector.shape_cast %246 : vector<1x1x2x2x16xbf16> to vector<1x2x2x16xbf16>
    %c0_471 = arith.constant 0 : index
    %c0_472 = arith.constant 0 : index
    %c0_473 = arith.constant 0 : index
    %c96_474 = arith.constant 96 : index
    %248 = vector.load %arg18[%c0_471, %c0_472, %c0_473, %c96_474] : memref<1x2x2x256xbf16, #tpu.memory_space<vmem>>, vector<1x2x2x16xbf16>
    tpu.vector_store %arg18[%c0_471, %c0_472, %c0_473, %c96_474], %247 {strides = array<i32>} : memref<1x2x2x256xbf16, #tpu.memory_space<vmem>>, vector<1x2x2x16xbf16>,
    %c3_475 = arith.constant 3 : index
    %c0_476 = arith.constant 0 : index
    %c0_477 = arith.constant 0 : index
    %c1_478 = arith.constant 1 : index
    %c0_479 = arith.constant 0 : index
    %249 = vector.load %arg14[%c3_475, %c0_476, %c0_477, %c1_478, %c0_479] : memref<4x1x3x3x16xbf16, #tpu.memory_space<vmem>>, vector<1x1x2x2x16xbf16>
    %250 = vector.shape_cast %249 : vector<1x1x2x2x16xbf16> to vector<1x2x2x16xbf16>
    %c0_480 = arith.constant 0 : index
    %c0_481 = arith.constant 0 : index
    %c0_482 = arith.constant 0 : index
    %c112_483 = arith.constant 112 : index
    %251 = vector.load %arg18[%c0_480, %c0_481, %c0_482, %c112_483] : memref<1x2x2x256xbf16, #tpu.memory_space<vmem>>, vector<1x2x2x16xbf16>
    tpu.vector_store %arg18[%c0_480, %c0_481, %c0_482, %c112_483], %250 {strides = array<i32>} : memref<1x2x2x256xbf16, #tpu.memory_space<vmem>>, vector<1x2x2x16xbf16>,
    %c0_484 = arith.constant 0 : index
    %c0_485 = arith.constant 0 : index
    %c1_486 = arith.constant 1 : index
    %c0_487 = arith.constant 0 : index
    %c0_488 = arith.constant 0 : index
    %252 = vector.load %arg14[%c0_484, %c0_485, %c1_486, %c0_487, %c0_488] : memref<4x1x3x3x16xbf16, #tpu.memory_space<vmem>>, vector<1x1x2x2x16xbf16>
    %253 = vector.shape_cast %252 : vector<1x1x2x2x16xbf16> to vector<1x2x2x16xbf16>
    %c0_489 = arith.constant 0 : index
    %c0_490 = arith.constant 0 : index
    %c0_491 = arith.constant 0 : index
    %c128 = arith.constant 128 : index
    %254 = vector.load %arg18[%c0_489, %c0_490, %c0_491, %c128] : memref<1x2x2x256xbf16, #tpu.memory_space<vmem>>, vector<1x2x2x16xbf16>
    tpu.vector_store %arg18[%c0_489, %c0_490, %c0_491, %c128], %253 {strides = array<i32>} : memref<1x2x2x256xbf16, #tpu.memory_space<vmem>>, vector<1x2x2x16xbf16>,
    %c1_492 = arith.constant 1 : index
    %c0_493 = arith.constant 0 : index
    %c1_494 = arith.constant 1 : index
    %c0_495 = arith.constant 0 : index
    %c0_496 = arith.constant 0 : index
    %255 = vector.load %arg14[%c1_492, %c0_493, %c1_494, %c0_495, %c0_496] : memref<4x1x3x3x16xbf16, #tpu.memory_space<vmem>>, vector<1x1x2x2x16xbf16>
    %256 = vector.shape_cast %255 : vector<1x1x2x2x16xbf16> to vector<1x2x2x16xbf16>
    %c0_497 = arith.constant 0 : index
    %c0_498 = arith.constant 0 : index
    %c0_499 = arith.constant 0 : index
    %c144 = arith.constant 144 : index
    %257 = vector.load %arg18[%c0_497, %c0_498, %c0_499, %c144] : memref<1x2x2x256xbf16, #tpu.memory_space<vmem>>, vector<1x2x2x16xbf16>
    tpu.vector_store %arg18[%c0_497, %c0_498, %c0_499, %c144], %256 {strides = array<i32>} : memref<1x2x2x256xbf16, #tpu.memory_space<vmem>>, vector<1x2x2x16xbf16>,
    %c0_500 = arith.constant 0 : index
    %c0_501 = arith.constant 0 : index
    %c1_502 = arith.constant 1 : index
    %c1_503 = arith.constant 1 : index
    %c0_504 = arith.constant 0 : index
    %258 = vector.load %arg14[%c0_500, %c0_501, %c1_502, %c1_503, %c0_504] : memref<4x1x3x3x16xbf16, #tpu.memory_space<vmem>>, vector<1x1x2x2x16xbf16>
    %259 = vector.shape_cast %258 : vector<1x1x2x2x16xbf16> to vector<1x2x2x16xbf16>
    %c0_505 = arith.constant 0 : index
    %c0_506 = arith.constant 0 : index
    %c0_507 = arith.constant 0 : index
    %c160 = arith.constant 160 : index
    %260 = vector.load %arg18[%c0_505, %c0_506, %c0_507, %c160] : memref<1x2x2x256xbf16, #tpu.memory_space<vmem>>, vector<1x2x2x16xbf16>
    tpu.vector_store %arg18[%c0_505, %c0_506, %c0_507, %c160], %259 {strides = array<i32>} : memref<1x2x2x256xbf16, #tpu.memory_space<vmem>>, vector<1x2x2x16xbf16>,
    %c1_508 = arith.constant 1 : index
    %c0_509 = arith.constant 0 : index
    %c1_510 = arith.constant 1 : index
    %c1_511 = arith.constant 1 : index
    %c0_512 = arith.constant 0 : index
    %261 = vector.load %arg14[%c1_508, %c0_509, %c1_510, %c1_511, %c0_512] : memref<4x1x3x3x16xbf16, #tpu.memory_space<vmem>>, vector<1x1x2x2x16xbf16>
    %262 = vector.shape_cast %261 : vector<1x1x2x2x16xbf16> to vector<1x2x2x16xbf16>
    %c0_513 = arith.constant 0 : index
    %c0_514 = arith.constant 0 : index
    %c0_515 = arith.constant 0 : index
    %c176 = arith.constant 176 : index
    %263 = vector.load %arg18[%c0_513, %c0_514, %c0_515, %c176] : memref<1x2x2x256xbf16, #tpu.memory_space<vmem>>, vector<1x2x2x16xbf16>
    tpu.vector_store %arg18[%c0_513, %c0_514, %c0_515, %c176], %262 {strides = array<i32>} : memref<1x2x2x256xbf16, #tpu.memory_space<vmem>>, vector<1x2x2x16xbf16>,
    %c2_516 = arith.constant 2 : index
    %c0_517 = arith.constant 0 : index
    %c1_518 = arith.constant 1 : index
    %c0_519 = arith.constant 0 : index
    %c0_520 = arith.constant 0 : index
    %264 = vector.load %arg14[%c2_516, %c0_517, %c1_518, %c0_519, %c0_520] : memref<4x1x3x3x16xbf16, #tpu.memory_space<vmem>>, vector<1x1x2x2x16xbf16>
    %265 = vector.shape_cast %264 : vector<1x1x2x2x16xbf16> to vector<1x2x2x16xbf16>
    %c0_521 = arith.constant 0 : index
    %c0_522 = arith.constant 0 : index
    %c0_523 = arith.constant 0 : index
    %c192 = arith.constant 192 : index
    %266 = vector.load %arg18[%c0_521, %c0_522, %c0_523, %c192] : memref<1x2x2x256xbf16, #tpu.memory_space<vmem>>, vector<1x2x2x16xbf16>
    tpu.vector_store %arg18[%c0_521, %c0_522, %c0_523, %c192], %265 {strides = array<i32>} : memref<1x2x2x256xbf16, #tpu.memory_space<vmem>>, vector<1x2x2x16xbf16>,
    %c3_524 = arith.constant 3 : index
    %c0_525 = arith.constant 0 : index
    %c1_526 = arith.constant 1 : index
    %c0_527 = arith.constant 0 : index
    %c0_528 = arith.constant 0 : index
    %267 = vector.load %arg14[%c3_524, %c0_525, %c1_526, %c0_527, %c0_528] : memref<4x1x3x3x16xbf16, #tpu.memory_space<vmem>>, vector<1x1x2x2x16xbf16>
    %268 = vector.shape_cast %267 : vector<1x1x2x2x16xbf16> to vector<1x2x2x16xbf16>
    %c0_529 = arith.constant 0 : index
    %c0_530 = arith.constant 0 : index
    %c0_531 = arith.constant 0 : index
    %c208 = arith.constant 208 : index
    %269 = vector.load %arg18[%c0_529, %c0_530, %c0_531, %c208] : memref<1x2x2x256xbf16, #tpu.memory_space<vmem>>, vector<1x2x2x16xbf16>
    tpu.vector_store %arg18[%c0_529, %c0_530, %c0_531, %c208], %268 {strides = array<i32>} : memref<1x2x2x256xbf16, #tpu.memory_space<vmem>>, vector<1x2x2x16xbf16>,
    %c2_532 = arith.constant 2 : index
    %c0_533 = arith.constant 0 : index
    %c1_534 = arith.constant 1 : index
    %c1_535 = arith.constant 1 : index
    %c0_536 = arith.constant 0 : index
    %270 = vector.load %arg14[%c2_532, %c0_533, %c1_534, %c1_535, %c0_536] : memref<4x1x3x3x16xbf16, #tpu.memory_space<vmem>>, vector<1x1x2x2x16xbf16>
    %271 = vector.shape_cast %270 : vector<1x1x2x2x16xbf16> to vector<1x2x2x16xbf16>
    %c0_537 = arith.constant 0 : index
    %c0_538 = arith.constant 0 : index
    %c0_539 = arith.constant 0 : index
    %c224 = arith.constant 224 : index
    %272 = vector.load %arg18[%c0_537, %c0_538, %c0_539, %c224] : memref<1x2x2x256xbf16, #tpu.memory_space<vmem>>, vector<1x2x2x16xbf16>
    tpu.vector_store %arg18[%c0_537, %c0_538, %c0_539, %c224], %271 {strides = array<i32>} : memref<1x2x2x256xbf16, #tpu.memory_space<vmem>>, vector<1x2x2x16xbf16>,
    %c3_540 = arith.constant 3 : index
    %c0_541 = arith.constant 0 : index
    %c1_542 = arith.constant 1 : index
    %c1_543 = arith.constant 1 : index
    %c0_544 = arith.constant 0 : index
    %273 = vector.load %arg14[%c3_540, %c0_541, %c1_542, %c1_543, %c0_544] : memref<4x1x3x3x16xbf16, #tpu.memory_space<vmem>>, vector<1x1x2x2x16xbf16>
    %274 = vector.shape_cast %273 : vector<1x1x2x2x16xbf16> to vector<1x2x2x16xbf16>
    %c0_545 = arith.constant 0 : index
    %c0_546 = arith.constant 0 : index
    %c0_547 = arith.constant 0 : index
    %c240 = arith.constant 240 : index
    %275 = vector.load %arg18[%c0_545, %c0_546, %c0_547, %c240] : memref<1x2x2x256xbf16, #tpu.memory_space<vmem>>, vector<1x2x2x16xbf16>
    tpu.vector_store %arg18[%c0_545, %c0_546, %c0_547, %c240], %274 {strides = array<i32>} : memref<1x2x2x256xbf16, #tpu.memory_space<vmem>>, vector<1x2x2x16xbf16>,
    %c0_548 = arith.constant 0 : index
    %c0_549 = arith.constant 0 : index
    %c0_550 = arith.constant 0 : index
    %c0_551 = arith.constant 0 : index
    %276 = vector.load %arg18[%c0_548, %c0_549, %c0_550, %c0_551] : memref<1x2x2x256xbf16, #tpu.memory_space<vmem>>, vector<1x2x2x256xbf16>
    %277 = vector.shape_cast %276 : vector<1x2x2x256xbf16> to vector<4x256xbf16>
    %c0_552 = arith.constant 0 : index
    %c0_553 = arith.constant 0 : index
    %278 = vector.load %arg6[%c0_552, %c0_553] : memref<256x32xbf16, #tpu.memory_space<vmem>>, vector<256x32xbf16>
    %cst_554 = arith.constant dense<0.000000e+00> : vector<4x32xf32>
    %279 = tpu.matmul %277, %278, %cst_554 {dimension_numbers = #tpu.dot_dimension_numbers<[1], [0], [0], [1], [0, 0, 1, 1], [], []>} : vector<4x256xbf16>, vector<256x32xbf16>, vector<4x32xf32> -> vector<4x32xf32>
    %c0_555 = arith.constant 0 : index
    %c0_556 = arith.constant 0 : index
    %280 = vector.load %arg7[%c0_555, %c0_556] : memref<1x32xf32, #tpu.memory_space<vmem>>, vector<1x32xf32>
    %281 = vector.broadcast %280 : vector<1x32xf32> to vector<4x32xf32>
    %282 = arith.addf %279, %281 : vector<4x32xf32>
    %cst_557 = arith.constant 0.000000e+00 : f32
    %283 = vector.broadcast %cst_557 : f32 to vector<4x32xf32>
    %284 = arith.cmpf oge, %282, %283 : vector<4x32xf32>
    %cst_558 = arith.constant 2.000000e-01 : f32
    %285 = vector.broadcast %cst_558 : f32 to vector<4x32xf32>
    %286 = arith.mulf %285, %282 : vector<4x32xf32>
    %287 = arith.select %284, %282, %286 : vector<4x32xi1>, vector<4x32xf32>
    %288 = arith.truncf %287 : vector<4x32xf32> to vector<4x32xbf16>
    %289 = vector.shape_cast %288 : vector<4x32xbf16> to vector<1x1x2x1x2x32xbf16>
    %290 = vector.extract_strided_slice %289 {offsets = [0, 0, 0, 0, 0, 0], sizes = [1, 1, 1, 1, 1, 32], strides = [1, 1, 1, 1, 1, 1]} : vector<1x1x2x1x2x32xbf16> to vector<1x1x1x1x1x32xbf16>
    %291 = vector.shape_cast %290 : vector<1x1x1x1x1x32xbf16> to vector<1x1x1x32xbf16>
    %c3_559 = arith.constant 3 : index
    %c0_560 = arith.constant 0 : index
    %c0_561 = arith.constant 0 : index
    %c0_562 = arith.constant 0 : index
    %c0_563 = arith.constant 0 : index
    %292 = vector.load %arg15[%c3_559, %c0_560, %c0_561, %c0_562, %c0_563] : memref<4x1x2x2x32xbf16, #tpu.memory_space<vmem>>, vector<1x1x1x1x32xbf16>
    %293 = vector.shape_cast %292 : vector<1x1x1x1x32xbf16> to vector<1x1x1x32xbf16>
    %294 = vector.shape_cast %291 : vector<1x1x1x32xbf16> to vector<1x1x1x1x32xbf16>
    tpu.vector_store %arg15[%c3_559, %c0_560, %c0_561, %c0_562, %c0_563], %294 {strides = array<i32>} : memref<4x1x2x2x32xbf16, #tpu.memory_space<vmem>>, vector<1x1x1x1x32xbf16>,
    %295 = vector.extract_strided_slice %289 {offsets = [0, 0, 0, 0, 1, 0], sizes = [1, 1, 1, 1, 1, 32], strides = [1, 1, 1, 1, 1, 1]} : vector<1x1x2x1x2x32xbf16> to vector<1x1x1x1x1x32xbf16>
    %296 = vector.shape_cast %295 : vector<1x1x1x1x1x32xbf16> to vector<1x1x1x32xbf16>
    %c2_564 = arith.constant 2 : index
    %c0_565 = arith.constant 0 : index
    %c0_566 = arith.constant 0 : index
    %c1_567 = arith.constant 1 : index
    %c0_568 = arith.constant 0 : index
    %297 = vector.load %arg15[%c2_564, %c0_565, %c0_566, %c1_567, %c0_568] : memref<4x1x2x2x32xbf16, #tpu.memory_space<vmem>>, vector<1x1x1x1x32xbf16>
    %298 = vector.shape_cast %297 : vector<1x1x1x1x32xbf16> to vector<1x1x1x32xbf16>
    %299 = vector.shape_cast %296 : vector<1x1x1x32xbf16> to vector<1x1x1x1x32xbf16>
    tpu.vector_store %arg15[%c2_564, %c0_565, %c0_566, %c1_567, %c0_568], %299 {strides = array<i32>} : memref<4x1x2x2x32xbf16, #tpu.memory_space<vmem>>, vector<1x1x1x1x32xbf16>,
    %300 = vector.extract_strided_slice %289 {offsets = [0, 0, 1, 0, 0, 0], sizes = [1, 1, 1, 1, 1, 32], strides = [1, 1, 1, 1, 1, 1]} : vector<1x1x2x1x2x32xbf16> to vector<1x1x1x1x1x32xbf16>
    %301 = vector.shape_cast %300 : vector<1x1x1x1x1x32xbf16> to vector<1x1x1x32xbf16>
    %c1_569 = arith.constant 1 : index
    %c0_570 = arith.constant 0 : index
    %c1_571 = arith.constant 1 : index
    %c0_572 = arith.constant 0 : index
    %c0_573 = arith.constant 0 : index
    %302 = vector.load %arg15[%c1_569, %c0_570, %c1_571, %c0_572, %c0_573] : memref<4x1x2x2x32xbf16, #tpu.memory_space<vmem>>, vector<1x1x1x1x32xbf16>
    %303 = vector.shape_cast %302 : vector<1x1x1x1x32xbf16> to vector<1x1x1x32xbf16>
    %304 = vector.shape_cast %301 : vector<1x1x1x32xbf16> to vector<1x1x1x1x32xbf16>
    tpu.vector_store %arg15[%c1_569, %c0_570, %c1_571, %c0_572, %c0_573], %304 {strides = array<i32>} : memref<4x1x2x2x32xbf16, #tpu.memory_space<vmem>>, vector<1x1x1x1x32xbf16>,
    %305 = vector.extract_strided_slice %289 {offsets = [0, 0, 1, 0, 1, 0], sizes = [1, 1, 1, 1, 1, 32], strides = [1, 1, 1, 1, 1, 1]} : vector<1x1x2x1x2x32xbf16> to vector<1x1x1x1x1x32xbf16>
    %306 = vector.shape_cast %305 : vector<1x1x1x1x1x32xbf16> to vector<1x1x1x32xbf16>
    %c0_574 = arith.constant 0 : index
    %c0_575 = arith.constant 0 : index
    %c1_576 = arith.constant 1 : index
    %c1_577 = arith.constant 1 : index
    %c0_578 = arith.constant 0 : index
    %307 = vector.load %arg15[%c0_574, %c0_575, %c1_576, %c1_577, %c0_578] : memref<4x1x2x2x32xbf16, #tpu.memory_space<vmem>>, vector<1x1x1x1x32xbf16>
    %308 = vector.shape_cast %307 : vector<1x1x1x1x32xbf16> to vector<1x1x1x32xbf16>
    %309 = vector.shape_cast %306 : vector<1x1x1x32xbf16> to vector<1x1x1x1x32xbf16>
    tpu.vector_store %arg15[%c0_574, %c0_575, %c1_576, %c1_577, %c0_578], %309 {strides = array<i32>} : memref<4x1x2x2x32xbf16, #tpu.memory_space<vmem>>, vector<1x1x1x1x32xbf16>,
    %cst_579 = arith.constant 0.000000e+00 : bf16
    %310 = vector.broadcast %cst_579 : bf16 to vector<1x2x32xbf16>
    %c0_580 = arith.constant 0 : index
    %c0_581 = arith.constant 0 : index
    %c0_582 = arith.constant 0 : index
    %c0_583 = arith.constant 0 : index
    %c0_584 = arith.constant 0 : index
    %311 = vector.load %arg15[%c0_580, %c0_581, %c0_582, %c0_583, %c0_584] : memref<4x1x2x2x32xbf16, #tpu.memory_space<vmem>>, vector<1x1x1x2x32xbf16>
    %312 = vector.shape_cast %311 : vector<1x1x1x2x32xbf16> to vector<1x2x32xbf16>
    %313 = vector.shape_cast %310 : vector<1x2x32xbf16> to vector<1x1x1x2x32xbf16>
    tpu.vector_store %arg15[%c0_580, %c0_581, %c0_582, %c0_583, %c0_584], %313 {strides = array<i32>} : memref<4x1x2x2x32xbf16, #tpu.memory_space<vmem>>, vector<1x1x1x2x32xbf16>,
    %cst_585 = arith.constant 0.000000e+00 : bf16
    %314 = vector.broadcast %cst_585 : bf16 to vector<1x2x32xbf16>
    %c0_586 = arith.constant 0 : index
    %c0_587 = arith.constant 0 : index
    %c0_588 = arith.constant 0 : index
    %c0_589 = arith.constant 0 : index
    %c0_590 = arith.constant 0 : index
    %315 = vector.load %arg15[%c0_586, %c0_587, %c0_588, %c0_589, %c0_590] : memref<4x1x2x2x32xbf16, #tpu.memory_space<vmem>>, vector<1x1x2x1x32xbf16>
    %316 = vector.shape_cast %315 : vector<1x1x2x1x32xbf16> to vector<1x2x32xbf16>
    %317 = vector.shape_cast %314 : vector<1x2x32xbf16> to vector<1x1x2x1x32xbf16>
    tpu.vector_store %arg15[%c0_586, %c0_587, %c0_588, %c0_589, %c0_590], %317 {strides = array<i32>} : memref<4x1x2x2x32xbf16, #tpu.memory_space<vmem>>, vector<1x1x2x1x32xbf16>,
    %cst_591 = arith.constant 0.000000e+00 : bf16
    %318 = vector.broadcast %cst_591 : bf16 to vector<1x2x32xbf16>
    %c1_592 = arith.constant 1 : index
    %c0_593 = arith.constant 0 : index
    %c0_594 = arith.constant 0 : index
    %c0_595 = arith.constant 0 : index
    %c0_596 = arith.constant 0 : index
    %319 = vector.load %arg15[%c1_592, %c0_593, %c0_594, %c0_595, %c0_596] : memref<4x1x2x2x32xbf16, #tpu.memory_space<vmem>>, vector<1x1x1x2x32xbf16>
    %320 = vector.shape_cast %319 : vector<1x1x1x2x32xbf16> to vector<1x2x32xbf16>
    %321 = vector.shape_cast %318 : vector<1x2x32xbf16> to vector<1x1x1x2x32xbf16>
    tpu.vector_store %arg15[%c1_592, %c0_593, %c0_594, %c0_595, %c0_596], %321 {strides = array<i32>} : memref<4x1x2x2x32xbf16, #tpu.memory_space<vmem>>, vector<1x1x1x2x32xbf16>,
    %cst_597 = arith.constant 0.000000e+00 : bf16
    %322 = vector.broadcast %cst_597 : bf16 to vector<1x2x32xbf16>
    %c1_598 = arith.constant 1 : index
    %c0_599 = arith.constant 0 : index
    %c0_600 = arith.constant 0 : index
    %c1_601 = arith.constant 1 : index
    %c0_602 = arith.constant 0 : index
    %323 = vector.load %arg15[%c1_598, %c0_599, %c0_600, %c1_601, %c0_602] : memref<4x1x2x2x32xbf16, #tpu.memory_space<vmem>>, vector<1x1x2x1x32xbf16>
    %324 = vector.shape_cast %323 : vector<1x1x2x1x32xbf16> to vector<1x2x32xbf16>
    %325 = vector.shape_cast %322 : vector<1x2x32xbf16> to vector<1x1x2x1x32xbf16>
    tpu.vector_store %arg15[%c1_598, %c0_599, %c0_600, %c1_601, %c0_602], %325 {strides = array<i32>} : memref<4x1x2x2x32xbf16, #tpu.memory_space<vmem>>, vector<1x1x2x1x32xbf16>,
    %cst_603 = arith.constant 0.000000e+00 : bf16
    %326 = vector.broadcast %cst_603 : bf16 to vector<1x2x32xbf16>
    %c2_604 = arith.constant 2 : index
    %c0_605 = arith.constant 0 : index
    %c1_606 = arith.constant 1 : index
    %c0_607 = arith.constant 0 : index
    %c0_608 = arith.constant 0 : index
    %327 = vector.load %arg15[%c2_604, %c0_605, %c1_606, %c0_607, %c0_608] : memref<4x1x2x2x32xbf16, #tpu.memory_space<vmem>>, vector<1x1x1x2x32xbf16>
    %328 = vector.shape_cast %327 : vector<1x1x1x2x32xbf16> to vector<1x2x32xbf16>
    %329 = vector.shape_cast %326 : vector<1x2x32xbf16> to vector<1x1x1x2x32xbf16>
    tpu.vector_store %arg15[%c2_604, %c0_605, %c1_606, %c0_607, %c0_608], %329 {strides = array<i32>} : memref<4x1x2x2x32xbf16, #tpu.memory_space<vmem>>, vector<1x1x1x2x32xbf16>,
    %cst_609 = arith.constant 0.000000e+00 : bf16
    %330 = vector.broadcast %cst_609 : bf16 to vector<1x2x32xbf16>
    %c2_610 = arith.constant 2 : index
    %c0_611 = arith.constant 0 : index
    %c0_612 = arith.constant 0 : index
    %c0_613 = arith.constant 0 : index
    %c0_614 = arith.constant 0 : index
    %331 = vector.load %arg15[%c2_610, %c0_611, %c0_612, %c0_613, %c0_614] : memref<4x1x2x2x32xbf16, #tpu.memory_space<vmem>>, vector<1x1x2x1x32xbf16>
    %332 = vector.shape_cast %331 : vector<1x1x2x1x32xbf16> to vector<1x2x32xbf16>
    %333 = vector.shape_cast %330 : vector<1x2x32xbf16> to vector<1x1x2x1x32xbf16>
    tpu.vector_store %arg15[%c2_610, %c0_611, %c0_612, %c0_613, %c0_614], %333 {strides = array<i32>} : memref<4x1x2x2x32xbf16, #tpu.memory_space<vmem>>, vector<1x1x2x1x32xbf16>,
    %cst_615 = arith.constant 0.000000e+00 : bf16
    %334 = vector.broadcast %cst_615 : bf16 to vector<1x2x32xbf16>
    %c3_616 = arith.constant 3 : index
    %c0_617 = arith.constant 0 : index
    %c1_618 = arith.constant 1 : index
    %c0_619 = arith.constant 0 : index
    %c0_620 = arith.constant 0 : index
    %335 = vector.load %arg15[%c3_616, %c0_617, %c1_618, %c0_619, %c0_620] : memref<4x1x2x2x32xbf16, #tpu.memory_space<vmem>>, vector<1x1x1x2x32xbf16>
    %336 = vector.shape_cast %335 : vector<1x1x1x2x32xbf16> to vector<1x2x32xbf16>
    %337 = vector.shape_cast %334 : vector<1x2x32xbf16> to vector<1x1x1x2x32xbf16>
    tpu.vector_store %arg15[%c3_616, %c0_617, %c1_618, %c0_619, %c0_620], %337 {strides = array<i32>} : memref<4x1x2x2x32xbf16, #tpu.memory_space<vmem>>, vector<1x1x1x2x32xbf16>,
    %cst_621 = arith.constant 0.000000e+00 : bf16
    %338 = vector.broadcast %cst_621 : bf16 to vector<1x2x32xbf16>
    %c3_622 = arith.constant 3 : index
    %c0_623 = arith.constant 0 : index
    %c0_624 = arith.constant 0 : index
    %c1_625 = arith.constant 1 : index
    %c0_626 = arith.constant 0 : index
    %339 = vector.load %arg15[%c3_622, %c0_623, %c0_624, %c1_625, %c0_626] : memref<4x1x2x2x32xbf16, #tpu.memory_space<vmem>>, vector<1x1x2x1x32xbf16>
    %340 = vector.shape_cast %339 : vector<1x1x2x1x32xbf16> to vector<1x2x32xbf16>
    %341 = vector.shape_cast %338 : vector<1x2x32xbf16> to vector<1x1x2x1x32xbf16>
    tpu.vector_store %arg15[%c3_622, %c0_623, %c0_624, %c1_625, %c0_626], %341 {strides = array<i32>} : memref<4x1x2x2x32xbf16, #tpu.memory_space<vmem>>, vector<1x1x2x1x32xbf16>,
    %c0_627 = arith.constant 0 : index
    %c0_628 = arith.constant 0 : index
    %c0_629 = arith.constant 0 : index
    %c0_630 = arith.constant 0 : index
    %c0_631 = arith.constant 0 : index
    %342 = vector.load %arg15[%c0_627, %c0_628, %c0_629, %c0_630, %c0_631] : memref<4x1x2x2x32xbf16, #tpu.memory_space<vmem>>, vector<1x1x1x1x32xbf16>
    %343 = vector.shape_cast %342 : vector<1x1x1x1x32xbf16> to vector<1x1x1x32xbf16>
    %c0_632 = arith.constant 0 : index
    %c0_633 = arith.constant 0 : index
    %c0_634 = arith.constant 0 : index
    %c0_635 = arith.constant 0 : index
    %344 = vector.load %arg19[%c0_632, %c0_633, %c0_634, %c0_635] : memref<1x1x1x512xbf16, #tpu.memory_space<vmem>>, vector<1x1x1x32xbf16>
    tpu.vector_store %arg19[%c0_632, %c0_633, %c0_634, %c0_635], %343 {strides = array<i32>} : memref<1x1x1x512xbf16, #tpu.memory_space<vmem>>, vector<1x1x1x32xbf16>,
    %c1_636 = arith.constant 1 : index
    %c0_637 = arith.constant 0 : index
    %c0_638 = arith.constant 0 : index
    %c0_639 = arith.constant 0 : index
    %c0_640 = arith.constant 0 : index
    %345 = vector.load %arg15[%c1_636, %c0_637, %c0_638, %c0_639, %c0_640] : memref<4x1x2x2x32xbf16, #tpu.memory_space<vmem>>, vector<1x1x1x1x32xbf16>
    %346 = vector.shape_cast %345 : vector<1x1x1x1x32xbf16> to vector<1x1x1x32xbf16>
    %c0_641 = arith.constant 0 : index
    %c0_642 = arith.constant 0 : index
    %c0_643 = arith.constant 0 : index
    %c32_644 = arith.constant 32 : index
    %347 = vector.load %arg19[%c0_641, %c0_642, %c0_643, %c32_644] : memref<1x1x1x512xbf16, #tpu.memory_space<vmem>>, vector<1x1x1x32xbf16>
    tpu.vector_store %arg19[%c0_641, %c0_642, %c0_643, %c32_644], %346 {strides = array<i32>} : memref<1x1x1x512xbf16, #tpu.memory_space<vmem>>, vector<1x1x1x32xbf16>,
    %c0_645 = arith.constant 0 : index
    %c0_646 = arith.constant 0 : index
    %c0_647 = arith.constant 0 : index
    %c1_648 = arith.constant 1 : index
    %c0_649 = arith.constant 0 : index
    %348 = vector.load %arg15[%c0_645, %c0_646, %c0_647, %c1_648, %c0_649] : memref<4x1x2x2x32xbf16, #tpu.memory_space<vmem>>, vector<1x1x1x1x32xbf16>
    %349 = vector.shape_cast %348 : vector<1x1x1x1x32xbf16> to vector<1x1x1x32xbf16>
    %c0_650 = arith.constant 0 : index
    %c0_651 = arith.constant 0 : index
    %c0_652 = arith.constant 0 : index
    %c64_653 = arith.constant 64 : index
    %350 = vector.load %arg19[%c0_650, %c0_651, %c0_652, %c64_653] : memref<1x1x1x512xbf16, #tpu.memory_space<vmem>>, vector<1x1x1x32xbf16>
    tpu.vector_store %arg19[%c0_650, %c0_651, %c0_652, %c64_653], %349 {strides = array<i32>} : memref<1x1x1x512xbf16, #tpu.memory_space<vmem>>, vector<1x1x1x32xbf16>,
    %c1_654 = arith.constant 1 : index
    %c0_655 = arith.constant 0 : index
    %c0_656 = arith.constant 0 : index
    %c1_657 = arith.constant 1 : index
    %c0_658 = arith.constant 0 : index
    %351 = vector.load %arg15[%c1_654, %c0_655, %c0_656, %c1_657, %c0_658] : memref<4x1x2x2x32xbf16, #tpu.memory_space<vmem>>, vector<1x1x1x1x32xbf16>
    %352 = vector.shape_cast %351 : vector<1x1x1x1x32xbf16> to vector<1x1x1x32xbf16>
    %c0_659 = arith.constant 0 : index
    %c0_660 = arith.constant 0 : index
    %c0_661 = arith.constant 0 : index
    %c96_662 = arith.constant 96 : index
    %353 = vector.load %arg19[%c0_659, %c0_660, %c0_661, %c96_662] : memref<1x1x1x512xbf16, #tpu.memory_space<vmem>>, vector<1x1x1x32xbf16>
    tpu.vector_store %arg19[%c0_659, %c0_660, %c0_661, %c96_662], %352 {strides = array<i32>} : memref<1x1x1x512xbf16, #tpu.memory_space<vmem>>, vector<1x1x1x32xbf16>,
    %c2_663 = arith.constant 2 : index
    %c0_664 = arith.constant 0 : index
    %c0_665 = arith.constant 0 : index
    %c0_666 = arith.constant 0 : index
    %c0_667 = arith.constant 0 : index
    %354 = vector.load %arg15[%c2_663, %c0_664, %c0_665, %c0_666, %c0_667] : memref<4x1x2x2x32xbf16, #tpu.memory_space<vmem>>, vector<1x1x1x1x32xbf16>
    %355 = vector.shape_cast %354 : vector<1x1x1x1x32xbf16> to vector<1x1x1x32xbf16>
    %c0_668 = arith.constant 0 : index
    %c0_669 = arith.constant 0 : index
    %c0_670 = arith.constant 0 : index
    %c128_671 = arith.constant 128 : index
    %356 = vector.load %arg19[%c0_668, %c0_669, %c0_670, %c128_671] : memref<1x1x1x512xbf16, #tpu.memory_space<vmem>>, vector<1x1x1x32xbf16>
    tpu.vector_store %arg19[%c0_668, %c0_669, %c0_670, %c128_671], %355 {strides = array<i32>} : memref<1x1x1x512xbf16, #tpu.memory_space<vmem>>, vector<1x1x1x32xbf16>,
    %c3_672 = arith.constant 3 : index
    %c0_673 = arith.constant 0 : index
    %c0_674 = arith.constant 0 : index
    %c0_675 = arith.constant 0 : index
    %c0_676 = arith.constant 0 : index
    %357 = vector.load %arg15[%c3_672, %c0_673, %c0_674, %c0_675, %c0_676] : memref<4x1x2x2x32xbf16, #tpu.memory_space<vmem>>, vector<1x1x1x1x32xbf16>
    %358 = vector.shape_cast %357 : vector<1x1x1x1x32xbf16> to vector<1x1x1x32xbf16>
    %c0_677 = arith.constant 0 : index
    %c0_678 = arith.constant 0 : index
    %c0_679 = arith.constant 0 : index
    %c160_680 = arith.constant 160 : index
    %359 = vector.load %arg19[%c0_677, %c0_678, %c0_679, %c160_680] : memref<1x1x1x512xbf16, #tpu.memory_space<vmem>>, vector<1x1x1x32xbf16>
    tpu.vector_store %arg19[%c0_677, %c0_678, %c0_679, %c160_680], %358 {strides = array<i32>} : memref<1x1x1x512xbf16, #tpu.memory_space<vmem>>, vector<1x1x1x32xbf16>,
    %c2_681 = arith.constant 2 : index
    %c0_682 = arith.constant 0 : index
    %c0_683 = arith.constant 0 : index
    %c1_684 = arith.constant 1 : index
    %c0_685 = arith.constant 0 : index
    %360 = vector.load %arg15[%c2_681, %c0_682, %c0_683, %c1_684, %c0_685] : memref<4x1x2x2x32xbf16, #tpu.memory_space<vmem>>, vector<1x1x1x1x32xbf16>
    %361 = vector.shape_cast %360 : vector<1x1x1x1x32xbf16> to vector<1x1x1x32xbf16>
    %c0_686 = arith.constant 0 : index
    %c0_687 = arith.constant 0 : index
    %c0_688 = arith.constant 0 : index
    %c192_689 = arith.constant 192 : index
    %362 = vector.load %arg19[%c0_686, %c0_687, %c0_688, %c192_689] : memref<1x1x1x512xbf16, #tpu.memory_space<vmem>>, vector<1x1x1x32xbf16>
    tpu.vector_store %arg19[%c0_686, %c0_687, %c0_688, %c192_689], %361 {strides = array<i32>} : memref<1x1x1x512xbf16, #tpu.memory_space<vmem>>, vector<1x1x1x32xbf16>,
    %c3_690 = arith.constant 3 : index
    %c0_691 = arith.constant 0 : index
    %c0_692 = arith.constant 0 : index
    %c1_693 = arith.constant 1 : index
    %c0_694 = arith.constant 0 : index
    %363 = vector.load %arg15[%c3_690, %c0_691, %c0_692, %c1_693, %c0_694] : memref<4x1x2x2x32xbf16, #tpu.memory_space<vmem>>, vector<1x1x1x1x32xbf16>
    %364 = vector.shape_cast %363 : vector<1x1x1x1x32xbf16> to vector<1x1x1x32xbf16>
    %c0_695 = arith.constant 0 : index
    %c0_696 = arith.constant 0 : index
    %c0_697 = arith.constant 0 : index
    %c224_698 = arith.constant 224 : index
    %365 = vector.load %arg19[%c0_695, %c0_696, %c0_697, %c224_698] : memref<1x1x1x512xbf16, #tpu.memory_space<vmem>>, vector<1x1x1x32xbf16>
    tpu.vector_store %arg19[%c0_695, %c0_696, %c0_697, %c224_698], %364 {strides = array<i32>} : memref<1x1x1x512xbf16, #tpu.memory_space<vmem>>, vector<1x1x1x32xbf16>,
    %c0_699 = arith.constant 0 : index
    %c0_700 = arith.constant 0 : index
    %c1_701 = arith.constant 1 : index
    %c0_702 = arith.constant 0 : index
    %c0_703 = arith.constant 0 : index
    %366 = vector.load %arg15[%c0_699, %c0_700, %c1_701, %c0_702, %c0_703] : memref<4x1x2x2x32xbf16, #tpu.memory_space<vmem>>, vector<1x1x1x1x32xbf16>
    %367 = vector.shape_cast %366 : vector<1x1x1x1x32xbf16> to vector<1x1x1x32xbf16>
    %c0_704 = arith.constant 0 : index
    %c0_705 = arith.constant 0 : index
    %c0_706 = arith.constant 0 : index
    %c256 = arith.constant 256 : index
    %368 = vector.load %arg19[%c0_704, %c0_705, %c0_706, %c256] : memref<1x1x1x512xbf16, #tpu.memory_space<vmem>>, vector<1x1x1x32xbf16>
    tpu.vector_store %arg19[%c0_704, %c0_705, %c0_706, %c256], %367 {strides = array<i32>} : memref<1x1x1x512xbf16, #tpu.memory_space<vmem>>, vector<1x1x1x32xbf16>,
    %c1_707 = arith.constant 1 : index
    %c0_708 = arith.constant 0 : index
    %c1_709 = arith.constant 1 : index
    %c0_710 = arith.constant 0 : index
    %c0_711 = arith.constant 0 : index
    %369 = vector.load %arg15[%c1_707, %c0_708, %c1_709, %c0_710, %c0_711] : memref<4x1x2x2x32xbf16, #tpu.memory_space<vmem>>, vector<1x1x1x1x32xbf16>
    %370 = vector.shape_cast %369 : vector<1x1x1x1x32xbf16> to vector<1x1x1x32xbf16>
    %c0_712 = arith.constant 0 : index
    %c0_713 = arith.constant 0 : index
    %c0_714 = arith.constant 0 : index
    %c288 = arith.constant 288 : index
    %371 = vector.load %arg19[%c0_712, %c0_713, %c0_714, %c288] : memref<1x1x1x512xbf16, #tpu.memory_space<vmem>>, vector<1x1x1x32xbf16>
    tpu.vector_store %arg19[%c0_712, %c0_713, %c0_714, %c288], %370 {strides = array<i32>} : memref<1x1x1x512xbf16, #tpu.memory_space<vmem>>, vector<1x1x1x32xbf16>,
    %c0_715 = arith.constant 0 : index
    %c0_716 = arith.constant 0 : index
    %c1_717 = arith.constant 1 : index
    %c1_718 = arith.constant 1 : index
    %c0_719 = arith.constant 0 : index
    %372 = vector.load %arg15[%c0_715, %c0_716, %c1_717, %c1_718, %c0_719] : memref<4x1x2x2x32xbf16, #tpu.memory_space<vmem>>, vector<1x1x1x1x32xbf16>
    %373 = vector.shape_cast %372 : vector<1x1x1x1x32xbf16> to vector<1x1x1x32xbf16>
    %c0_720 = arith.constant 0 : index
    %c0_721 = arith.constant 0 : index
    %c0_722 = arith.constant 0 : index
    %c320 = arith.constant 320 : index
    %374 = vector.load %arg19[%c0_720, %c0_721, %c0_722, %c320] : memref<1x1x1x512xbf16, #tpu.memory_space<vmem>>, vector<1x1x1x32xbf16>
    tpu.vector_store %arg19[%c0_720, %c0_721, %c0_722, %c320], %373 {strides = array<i32>} : memref<1x1x1x512xbf16, #tpu.memory_space<vmem>>, vector<1x1x1x32xbf16>,
    %c1_723 = arith.constant 1 : index
    %c0_724 = arith.constant 0 : index
    %c1_725 = arith.constant 1 : index
    %c1_726 = arith.constant 1 : index
    %c0_727 = arith.constant 0 : index
    %375 = vector.load %arg15[%c1_723, %c0_724, %c1_725, %c1_726, %c0_727] : memref<4x1x2x2x32xbf16, #tpu.memory_space<vmem>>, vector<1x1x1x1x32xbf16>
    %376 = vector.shape_cast %375 : vector<1x1x1x1x32xbf16> to vector<1x1x1x32xbf16>
    %c0_728 = arith.constant 0 : index
    %c0_729 = arith.constant 0 : index
    %c0_730 = arith.constant 0 : index
    %c352 = arith.constant 352 : index
    %377 = vector.load %arg19[%c0_728, %c0_729, %c0_730, %c352] : memref<1x1x1x512xbf16, #tpu.memory_space<vmem>>, vector<1x1x1x32xbf16>
    tpu.vector_store %arg19[%c0_728, %c0_729, %c0_730, %c352], %376 {strides = array<i32>} : memref<1x1x1x512xbf16, #tpu.memory_space<vmem>>, vector<1x1x1x32xbf16>,
    %c2_731 = arith.constant 2 : index
    %c0_732 = arith.constant 0 : index
    %c1_733 = arith.constant 1 : index
    %c0_734 = arith.constant 0 : index
    %c0_735 = arith.constant 0 : index
    %378 = vector.load %arg15[%c2_731, %c0_732, %c1_733, %c0_734, %c0_735] : memref<4x1x2x2x32xbf16, #tpu.memory_space<vmem>>, vector<1x1x1x1x32xbf16>
    %379 = vector.shape_cast %378 : vector<1x1x1x1x32xbf16> to vector<1x1x1x32xbf16>
    %c0_736 = arith.constant 0 : index
    %c0_737 = arith.constant 0 : index
    %c0_738 = arith.constant 0 : index
    %c384 = arith.constant 384 : index
    %380 = vector.load %arg19[%c0_736, %c0_737, %c0_738, %c384] : memref<1x1x1x512xbf16, #tpu.memory_space<vmem>>, vector<1x1x1x32xbf16>
    tpu.vector_store %arg19[%c0_736, %c0_737, %c0_738, %c384], %379 {strides = array<i32>} : memref<1x1x1x512xbf16, #tpu.memory_space<vmem>>, vector<1x1x1x32xbf16>,
    %c3_739 = arith.constant 3 : index
    %c0_740 = arith.constant 0 : index
    %c1_741 = arith.constant 1 : index
    %c0_742 = arith.constant 0 : index
    %c0_743 = arith.constant 0 : index
    %381 = vector.load %arg15[%c3_739, %c0_740, %c1_741, %c0_742, %c0_743] : memref<4x1x2x2x32xbf16, #tpu.memory_space<vmem>>, vector<1x1x1x1x32xbf16>
    %382 = vector.shape_cast %381 : vector<1x1x1x1x32xbf16> to vector<1x1x1x32xbf16>
    %c0_744 = arith.constant 0 : index
    %c0_745 = arith.constant 0 : index
    %c0_746 = arith.constant 0 : index
    %c416 = arith.constant 416 : index
    %383 = vector.load %arg19[%c0_744, %c0_745, %c0_746, %c416] : memref<1x1x1x512xbf16, #tpu.memory_space<vmem>>, vector<1x1x1x32xbf16>
    tpu.vector_store %arg19[%c0_744, %c0_745, %c0_746, %c416], %382 {strides = array<i32>} : memref<1x1x1x512xbf16, #tpu.memory_space<vmem>>, vector<1x1x1x32xbf16>,
    %c2_747 = arith.constant 2 : index
    %c0_748 = arith.constant 0 : index
    %c1_749 = arith.constant 1 : index
    %c1_750 = arith.constant 1 : index
    %c0_751 = arith.constant 0 : index
    %384 = vector.load %arg15[%c2_747, %c0_748, %c1_749, %c1_750, %c0_751] : memref<4x1x2x2x32xbf16, #tpu.memory_space<vmem>>, vector<1x1x1x1x32xbf16>
    %385 = vector.shape_cast %384 : vector<1x1x1x1x32xbf16> to vector<1x1x1x32xbf16>
    %c0_752 = arith.constant 0 : index
    %c0_753 = arith.constant 0 : index
    %c0_754 = arith.constant 0 : index
    %c448 = arith.constant 448 : index
    %386 = vector.load %arg19[%c0_752, %c0_753, %c0_754, %c448] : memref<1x1x1x512xbf16, #tpu.memory_space<vmem>>, vector<1x1x1x32xbf16>
    tpu.vector_store %arg19[%c0_752, %c0_753, %c0_754, %c448], %385 {strides = array<i32>} : memref<1x1x1x512xbf16, #tpu.memory_space<vmem>>, vector<1x1x1x32xbf16>,
    %c3_755 = arith.constant 3 : index
    %c0_756 = arith.constant 0 : index
    %c1_757 = arith.constant 1 : index
    %c1_758 = arith.constant 1 : index
    %c0_759 = arith.constant 0 : index
    %387 = vector.load %arg15[%c3_755, %c0_756, %c1_757, %c1_758, %c0_759] : memref<4x1x2x2x32xbf16, #tpu.memory_space<vmem>>, vector<1x1x1x1x32xbf16>
    %388 = vector.shape_cast %387 : vector<1x1x1x1x32xbf16> to vector<1x1x1x32xbf16>
    %c0_760 = arith.constant 0 : index
    %c0_761 = arith.constant 0 : index
    %c0_762 = arith.constant 0 : index
    %c480 = arith.constant 480 : index
    %389 = vector.load %arg19[%c0_760, %c0_761, %c0_762, %c480] : memref<1x1x1x512xbf16, #tpu.memory_space<vmem>>, vector<1x1x1x32xbf16>
    tpu.vector_store %arg19[%c0_760, %c0_761, %c0_762, %c480], %388 {strides = array<i32>} : memref<1x1x1x512xbf16, #tpu.memory_space<vmem>>, vector<1x1x1x32xbf16>,
    %c0_763 = arith.constant 0 : index
    %c0_764 = arith.constant 0 : index
    %c0_765 = arith.constant 0 : index
    %c0_766 = arith.constant 0 : index
    %390 = vector.load %arg19[%c0_763, %c0_764, %c0_765, %c0_766] : memref<1x1x1x512xbf16, #tpu.memory_space<vmem>>, vector<1x1x1x512xbf16>
    %391 = vector.shape_cast %390 : vector<1x1x1x512xbf16> to vector<1x512xbf16>
    %c0_767 = arith.constant 0 : index
    %c0_768 = arith.constant 0 : index
    %392 = vector.load %arg8[%c0_767, %c0_768] : memref<512x64xbf16, #tpu.memory_space<vmem>>, vector<512x64xbf16>
    %cst_769 = arith.constant dense<0.000000e+00> : vector<1x64xf32>
    %393 = tpu.matmul %391, %392, %cst_769 {dimension_numbers = #tpu.dot_dimension_numbers<[1], [0], [0], [1], [0, 0, 1, 1], [], []>} : vector<1x512xbf16>, vector<512x64xbf16>, vector<1x64xf32> -> vector<1x64xf32>
    %c0_770 = arith.constant 0 : index
    %c0_771 = arith.constant 0 : index
    %394 = vector.load %arg9[%c0_770, %c0_771] : memref<1x64xf32, #tpu.memory_space<vmem>>, vector<1x64xf32>
    %395 = arith.addf %393, %394 : vector<1x64xf32>
    %396 = vector.shape_cast %395 : vector<1x64xf32> to vector<1x1x64xf32>
    %c0_772 = arith.constant 0 : index
    %c0_773 = arith.constant 0 : index
    %397 = vector.load %arg10[%c0_772, %c0_773] : memref<1x64xf32, #tpu.memory_space<vmem>>, vector<1x64xf32>
    %398 = vector.shape_cast %397 : vector<1x64xf32> to vector<1x1x64xf32>
    %399 = arith.mulf %396, %398 : vector<1x1x64xf32>
    %cst_774 = arith.constant dense<0.000000e+00> : vector<1x1xf32>
    %400 = vector.multi_reduction <add>, %399, %cst_774 [2] : vector<1x1x64xf32> to vector<1x1xf32>
    %401 = vector.shape_cast %400 : vector<1x1xf32> to vector<1x1x1xf32>
    %cst_775 = arith.constant dense<0.000000e+00> : vector<1x1xf32>
    %402 = vector.multi_reduction <add>, %401, %cst_775 [1] : vector<1x1x1xf32> to vector<1x1xf32>
    %403 = vector.shape_cast %402 : vector<1x1xf32> to vector<1x1x1xf32>
    %c0_776 = arith.constant 0 : index
    %c0_777 = arith.constant 0 : index
    %404 = vector.load %arg11[%c0_776, %c0_777] : memref<1x1xf32, #tpu.memory_space<vmem>>, vector<1x1xf32>
    %405 = vector.shape_cast %404 : vector<1x1xf32> to vector<1x1x1xf32>
    %406 = arith.addf %403, %405 : vector<1x1x1xf32>
    %cst_778 = arith.constant 0.000000e+00 : f32
    %407 = vector.broadcast %cst_778 : f32 to vector<1x1x1xf32>
    %408 = arith.subf %407, %406 : vector<1x1x1xf32>
    %409 = math.exp %408 : vector<1x1x1xf32>
    %cst_779 = arith.constant 1.000000e+00 : f32
    %410 = vector.broadcast %cst_779 : f32 to vector<1x1x1xf32>
    %411 = arith.addf %410, %409 : vector<1x1x1xf32>
    %cst_780 = arith.constant 1.000000e+00 : f32
    %412 = vector.broadcast %cst_780 : f32 to vector<1x1x1xf32>
    %413 = arith.divf %412, %411 : vector<1x1x1xf32>
    %c0_781 = arith.constant 0 : index
    %c0_782 = arith.constant 0 : index
    %c0_783 = arith.constant 0 : index
    %414 = vector.load %arg12[%c0_781, %c0_782, %c0_783] : memref<1x1x1xf32, #tpu.memory_space<vmem>>, vector<1x1x1xf32>
    tpu.vector_store %arg12[%c0_781, %c0_782, %c0_783], %413 {strides = array<i32>} : memref<1x1x1xf32, #tpu.memory_space<vmem>>, vector<1x1x1xf32>,
    return
  }
  func.func @transform_0(%arg0: i32) -> (i32, i32, i32, i32, i32) {
    %c0_i32 = arith.constant 0 : i32
    %c0_i32_0 = arith.constant 0 : i32
    %c0_i32_1 = arith.constant 0 : i32
    %c0_i32_2 = arith.constant 0 : i32
    %c0_i32_3 = arith.constant 0 : i32
    return %c0_i32, %arg0, %c0_i32_0, %c0_i32_1, %c0_i32_2 : i32, i32, i32, i32, i32
  }
  func.func @transform_1(%arg0: i32) -> (i32, i32) {
    %c0_i32 = arith.constant 0 : i32
    %c0_i32_0 = arith.constant 0 : i32
    %c0_i32_1 = arith.constant 0 : i32
    return %c0_i32, %c0_i32_0 : i32, i32
  }
  func.func @transform_2(%arg0: i32) -> (i32, i32) {
    %c0_i32 = arith.constant 0 : i32
    %c0_i32_0 = arith.constant 0 : i32
    %c0_i32_1 = arith.constant 0 : i32
    return %c0_i32, %c0_i32_0 : i32, i32
  }
  func.func @transform_3(%arg0: i32) -> (i32, i32) {
    %c0_i32 = arith.constant 0 : i32
    %c0_i32_0 = arith.constant 0 : i32
    %c0_i32_1 = arith.constant 0 : i32
    return %c0_i32, %c0_i32_0 : i32, i32
  }
  func.func @transform_4(%arg0: i32) -> (i32, i32) {
    %c0_i32 = arith.constant 0 : i32
    %c0_i32_0 = arith.constant 0 : i32
    %c0_i32_1 = arith.constant 0 : i32
    return %c0_i32, %c0_i32_0 : i32, i32
  }
  func.func @transform_5(%arg0: i32) -> (i32, i32) {
    %c0_i32 = arith.constant 0 : i32
    %c0_i32_0 = arith.constant 0 : i32
    %c0_i32_1 = arith.constant 0 : i32
    return %c0_i32, %c0_i32_0 : i32, i32
  }
  func.func @transform_6(%arg0: i32) -> (i32, i32) {
    %c0_i32 = arith.constant 0 : i32
    %c0_i32_0 = arith.constant 0 : i32
    %c0_i32_1 = arith.constant 0 : i32
    return %c0_i32, %c0_i32_0 : i32, i32
  }
  func.func @transform_7(%arg0: i32) -> (i32, i32) {
    %c0_i32 = arith.constant 0 : i32
    %c0_i32_0 = arith.constant 0 : i32
    %c0_i32_1 = arith.constant 0 : i32
    return %c0_i32, %c0_i32_0 : i32, i32
  }
  func.func @transform_8(%arg0: i32) -> (i32, i32) {
    %c0_i32 = arith.constant 0 : i32
    %c0_i32_0 = arith.constant 0 : i32
    %c0_i32_1 = arith.constant 0 : i32
    return %c0_i32, %c0_i32_0 : i32, i32
  }
  func.func @transform_9(%arg0: i32) -> (i32, i32) {
    %c0_i32 = arith.constant 0 : i32
    %c0_i32_0 = arith.constant 0 : i32
    %c0_i32_1 = arith.constant 0 : i32
    return %c0_i32, %c0_i32_0 : i32, i32
  }
  func.func @transform_10(%arg0: i32) -> (i32, i32) {
    %c0_i32 = arith.constant 0 : i32
    %c0_i32_0 = arith.constant 0 : i32
    %c0_i32_1 = arith.constant 0 : i32
    return %c0_i32, %c0_i32_0 : i32, i32
  }
  func.func @transform_11(%arg0: i32) -> (i32, i32, i32) {
    %c0_i32 = arith.constant 0 : i32
    %c0_i32_0 = arith.constant 0 : i32
    %c0_i32_1 = arith.constant 0 : i32
    return %arg0, %c0_i32, %c0_i32_0 : i32, i32, i32
  }
}

</mosaic_0001>

<bundles_post_ra>
// kernel: discriminator_forward.1
= control target key start
LH: loop header
LB: loop body
LE: loop exit
PB: predicated region body
PF: predicated region fallthrough
CT: control target
= control target key end

     0   :  { %s9225_s0 = inlined_call_operand.vmem [shape: bf16[4,2,9,9,3], index: 0, kind: input, shape index: {}]   ;;  %s9226_s1 = inlined_call_operand.vmem [shape: bf16[48,8], index: 1, kind: input, shape index: {}]   ;;  %s9227_s2 = inlined_call_operand.vmem [shape: f32[1,8], index: 2, kind: input, shape index: {}]   ;;  %s9228_s3 = inlined_call_operand.vmem [shape: bf16[128,16], index: 3, kind: input, shape index: {}]   ;;  %s9229_s4 = inlined_call_operand.vmem [shape: f32[1,16], index: 4, kind: input, shape index: {}]   ;;  %s9230_s5 = inlined_call_operand.vmem [shape: bf16[256,32], index: 5, kind: input, shape index: {}]   ;;  %s9231_s6 = inlined_call_operand.vmem [shape: f32[1,32], index: 6, kind: input, shape index: {}]   ;;  %s9232_s7 = inlined_call_operand.vmem [shape: bf16[512,64], index: 7, kind: input, shape index: {}]   ;;  %s9233_s8 = inlined_call_operand.vmem [shape: f32[1,64], index: 8, kind: input, shape index: {}]   ;;  %s9234_s9 = inlined_call_operand.vmem [shape: f32[1,64], index: 9, kind: input, shape index: {}]   ;;  %s9235_s10 = inlined_call_operand.<no memory space> [shape: f32[1,1], index: 10, kind: input, shape index: {}]   ;;  %s9236_s11 = inlined_call_operand.vmem [shape: f32[2,1,1], index: 11, kind: output, shape index: {}]  }
   0x1   :  { %v16_v0 = vstv %s9235_s10 }
   0x2   :  { %17 = vst [vmem:[#allocation9] sm:$0x1] %v16_v0 }
   0x3   :  { %s7368_s19 = smov 0   ;;  %s7370_s20 = smov 0  }
   0x4   :  { %s7372_s21 = smov 0  }
   0x5 LB: > { %s6637_s10 = sadd.s32 4294967295, %s7268_s21   ;;  %s7385_s22 = sadd.s32 1, %s7268_s21   ;;  %s7268_s21 = sphi %s7372_s21, %s9285_s21   ;;  %s7264_s20 = sphi %s7370_s20, %s9284_s20   ;;  %s7260_s19 = sphi %s7368_s19, %s9283_s19  }
   0x6   : > { %s27_s23 = ssub.s32 %s7268_s21, %s7385_s22  ;;  %s30_s24 = sadd.s32 1, %s7264_s20 }
   0x7   : > { %p28_p0 = scmp.eq.s32.totalorder %s27_s23, 0  ;;  %p37_p1 = scmp.ne.s32.totalorder %s7264_s20, %s7260_s19 }
   0x8   : > { %p38_p2 = scmp.eq.s32.totalorder %s7268_s21, 0  ;;  %p6640_p4 = scmp.ge.s32.totalorder %s7268_s21, 2 }
   0x9   : > { %s7394_s25 = scalar_select %p28_p0, %s7264_s20, %s30_s24  }
   0xa   : > { %p39_p3 = por %p38_p2, %p37_p1  ;;  %329 = sbr.rel (%p6640_p4) target bundleno = 38 (0x26), region = 56 }
   0xf   : > { %332 = sbr.rel (!%p39_p3) target bundleno = 38 (0x26), region = 60  ;;  %s334_s26 = sand.u32 (%p39_p3), 1, %s7264_s20  }
  0x10   : > { %s7118_s27 = smul.u32 (%p39_p3), 72, %s7268_s21 }
  0x11   : > { %s7117_s28 = smul.u32 (%p39_p3), 288, %s334_s26 }
  0x12   : > { %s7402_s12 = scalar_lea.vmem (%p39_p3), %s9225_s0, %s7118_s27 }
  0x13   : > { %v356_v1 = vld [vmem:[%s7402_s12] sm:$0xff] (%p39_p3)   ;;  %v360_v2 = vld [vmem:[%s7402_s12 + $0x8] sm:$0xff] (%p39_p3)   ;;  %v364_v3 = vld [vmem:[%s7402_s12 + $0x10] sm:$0xff] (%p39_p3)   ;;  %s7407_s13 = scalar_lea.vmem (%p39_p3), [#allocation10], %s7117_s28 }
  0x14   : > { %357 = vst [vmem:[%s7407_s13] sm:$0xff] %v356_v1   ;;  %361 = vst [vmem:[%s7407_s13 + $0x8] sm:$0xff] %v360_v2   ;;  %v368_v4 = vld [vmem:[%s7402_s12 + $0x18] sm:$0xff]   ;;  %v372_v5 = vld [vmem:[%s7402_s12 + $0x20] sm:$0xff]  }
  0x15   : > { %365 = vst [vmem:[%s7407_s13 + $0x10] sm:$0xff] %v364_v3   ;;  %v376_v6 = vld [vmem:[%s7402_s12 + $0x28] sm:$0xff]   ;;  %369 = vst [vmem:[%s7407_s13 + $0x18] sm:$0xff] %v368_v4   ;;  %v380_v7 = vld [vmem:[%s7402_s12 + $0x30] sm:$0xff]  }
  0x16   : > { %373 = vst [vmem:[%s7407_s13 + $0x20] sm:$0xff] %v372_v5   ;;  %377 = vst [vmem:[%s7407_s13 + $0x28] sm:$0xff] %v376_v6   ;;  %v384_v8 = vld [vmem:[%s7402_s12 + $0x38] sm:$0xff]   ;;  %v388_v9 = vld [vmem:[%s7402_s12 + $0x40] sm:$0xff]  }
  0x17   : > { %381 = vst [vmem:[%s7407_s13 + $0x30] sm:$0xff] %v380_v7   ;;  %385 = vst [vmem:[%s7407_s13 + $0x38] sm:$0xff] %v384_v8   ;;  %v392_v10 = vld [vmem:[%s7402_s12 + $0x90] sm:$0xff]   ;;  %v396_v11 = vld [vmem:[%s7402_s12 + $0x98] sm:$0xff]  }
  0x18   : > { %389 = vst [vmem:[%s7407_s13 + $0x40] sm:$0xff] %v388_v9   ;;  %v400_v12 = vld [vmem:[%s7402_s12 + $0xa0] sm:$0xff]   ;;  %393 = vst [vmem:[%s7407_s13 + $0x48] sm:$0xff] %v392_v10   ;;  %v404_v13 = vld [vmem:[%s7402_s12 + $0xa8] sm:$0xff]  }
  0x19   : > { %397 = vst [vmem:[%s7407_s13 + $0x50] sm:$0xff] %v396_v11   ;;  %401 = vst [vmem:[%s7407_s13 + $0x58] sm:$0xff] %v400_v12   ;;  %v408_v14 = vld [vmem:[%s7402_s12 + $0xb0] sm:$0xff]   ;;  %v412_v15 = vld [vmem:[%s7402_s12 + $0xb8] sm:$0xff]  }
  0x1a   : > { %405 = vst [vmem:[%s7407_s13 + $0x60] sm:$0xff] %v404_v13   ;;  %409 = vst [vmem:[%s7407_s13 + $0x68] sm:$0xff] %v408_v14   ;;  %v416_v16 = vld [vmem:[%s7402_s12 + $0xc0] sm:$0xff]   ;;  %v420_v17 = vld [vmem:[%s7402_s12 + $0xc8] sm:$0xff]  }
  0x1b   : > { %413 = vst [vmem:[%s7407_s13 + $0x70] sm:$0xff] %v412_v15   ;;  %v424_v18 = vld [vmem:[%s7402_s12 + $0xd0] sm:$0xff]   ;;  %417 = vst [vmem:[%s7407_s13 + $0x78] sm:$0xff] %v416_v16   ;;  %v428_v19 = vld [vmem:[%s7402_s12 + $0x120] sm:$0xff]  }
  0x1c   : > { %421 = vst [vmem:[%s7407_s13 + $0x80] sm:$0xff] %v420_v17   ;;  %425 = vst [vmem:[%s7407_s13 + $0x88] sm:$0xff] %v424_v18   ;;  %v432_v20 = vld [vmem:[%s7402_s12 + $0x128] sm:$0xff]   ;;  %v436_v21 = vld [vmem:[%s7402_s12 + $0x130] sm:$0xff]  }
  0x1d   : > { %429 = vst [vmem:[%s7407_s13 + $0x90] sm:$0xff] %v428_v19   ;;  %433 = vst [vmem:[%s7407_s13 + $0x98] sm:$0xff] %v432_v20   ;;  %v440_v22 = vld [vmem:[%s7402_s12 + $0x138] sm:$0xff]   ;;  %v444_v23 = vld [vmem:[%s7402_s12 + $0x140] sm:$0xff]  }
  0x1e   : > { %437 = vst [vmem:[%s7407_s13 + $0xa0] sm:$0xff] %v436_v21   ;;  %v448_v24 = vld [vmem:[%s7402_s12 + $0x148] sm:$0xff]   ;;  %441 = vst [vmem:[%s7407_s13 + $0xa8] sm:$0xff] %v440_v22   ;;  %v452_v25 = vld [vmem:[%s7402_s12 + $0x150] sm:$0xff]  }
  0x1f   : > { %445 = vst [vmem:[%s7407_s13 + $0xb0] sm:$0xff] %v444_v23   ;;  %449 = vst [vmem:[%s7407_s13 + $0xb8] sm:$0xff] %v448_v24   ;;  %v456_v26 = vld [vmem:[%s7402_s12 + $0x158] sm:$0xff]   ;;  %v460_v27 = vld [vmem:[%s7402_s12 + $0x160] sm:$0xff]  }
  0x20   : > { %453 = vst [vmem:[%s7407_s13 + $0xc0] sm:$0xff] %v452_v25   ;;  %457 = vst [vmem:[%s7407_s13 + $0xc8] sm:$0xff] %v456_v26   ;;  %v464_v28 = vld [vmem:[%s7402_s12 + $0x1b0] sm:$0xff]   ;;  %v468_v29 = vld [vmem:[%s7402_s12 + $0x1b8] sm:$0xff]  }
  0x21   : > { %461 = vst [vmem:[%s7407_s13 + $0xd0] sm:$0xff] %v460_v27   ;;  %v472_v30 = vld [vmem:[%s7402_s12 + $0x1c0] sm:$0xff]   ;;  %465 = vst [vmem:[%s7407_s13 + $0xd8] sm:$0xff] %v464_v28   ;;  %v476_v31 = vld [vmem:[%s7402_s12 + $0x1c8] sm:$0xff]  }
  0x22   : > { %469 = vst [vmem:[%s7407_s13 + $0xe0] sm:$0xff] %v468_v29   ;;  %473 = vst [vmem:[%s7407_s13 + $0xe8] sm:$0xff] %v472_v30   ;;  %v480_v32 = vld [vmem:[%s7402_s12 + $0x1d0] sm:$0xff]   ;;  %v484_v33 = vld [vmem:[%s7402_s12 + $0x1d8] sm:$0xff]  }
  0x23   : > { %477 = vst [vmem:[%s7407_s13 + $0xf0] sm:$0xff] %v476_v31   ;;  %481 = vst [vmem:[%s7407_s13 + $0xf8] sm:$0xff] %v480_v32   ;;  %v488_v34 = vld [vmem:[%s7402_s12 + $0x1e0] sm:$0xff]   ;;  %v492_v35 = vld [vmem:[%s7402_s12 + $0x1e8] sm:$0xff]  }
  0x24   : > { %485 = vst [vmem:[%s7407_s13 + $0x100] sm:$0xff] %v484_v33   ;;  %v496_v36 = vld [vmem:[%s7402_s12 + $0x1f0] sm:$0xff]   ;;  %489 = vst [vmem:[%s7407_s13 + $0x108] sm:$0xff] %v488_v34  }
  0x25   : > { %493 = vst [vmem:[%s7407_s13 + $0x110] sm:$0xff] %v492_v35   ;;  %497 = vst [vmem:[%s7407_s13 + $0x118] sm:$0xff] %v496_v36  }
  0x26 PF: > { %p6642_p5 = scmp.ge.s32.totalorder %s7268_s21, 1  ;;  %p666_p6 = scmp.lt.s32.totalorder %s7268_s21, 3 }
  0x28   : > { %p667_p7 = pnand %p6642_p5, %p666_p6 }
  0x29   : > { %s673_s14 = sand.u32 (!%p667_p7), 1, %s7260_s19   ;;  %s7270_s17 = smov (!%p667_p7), 3  }
  0x2a   : > { %670 = sbr.rel (%p667_p7) target bundleno = 2046 (0x7fe), region = 101  ;;  %s7271_s18 = smov (!%p667_p7), 6  }
  0x2b   : > { %s7119_s15 = smul.u32 (!%p667_p7), 288, %s673_s14  ;;  %s7272_s19 = smov (!%p667_p7), 9  }
  0x2c   : > { %s7273_s23 = smov (!%p667_p7), 12   ;;  %s7274_s24 = smov (!%p667_p7), 15  }
  0x2d   : > { %s7481_s16 = scalar_lea.vmem (!%p667_p7), [#allocation10], %s7119_s15  ;;  %s7275_s26 = smov (!%p667_p7), 18  }
  0x2e   : > { %s7276_s27 = smov (!%p667_p7), 21   ;;  %s7277_s28 = smov (!%p667_p7), 24  }
  0x2f   : > { %vm797_vm0 = vsmask.f32 3328  ;;  %v6645_v37 = vld [vmem:[%s7481_s16 + $0x58] sm:$0xf]  ;;  %v6643_v38 = vld [vmem:[%s7481_s16 + $0x48] sm:$0xf] }
  0x30   : > { %v6646_v39 = vld [vmem:[%s7481_s16 + $0x60] sm:$0xf]  ;;  %752 = vrot.lane.b32.xlu1 %v6645_v37, %s7270_s17  ;;  %748 = vrot.lane.b32.xlu0 %v6643_v38, %s7270_s17  ;;  %v6644_v40 = vld [vmem:[%s7481_s16 + $0x50] sm:$0xf]  ;;  %vm798_vm1 = vsmask.f32 7440 }
  0x31   : > { %v783_v41 = vld [vmem:[%s7481_s16 + $0x8] sm:$0xf]  ;;  %v784_v42 = vld [vmem:[%s7481_s16 + $0xc] sm:$0x1]  ;;  %v781_v45 = vld [vmem:[%s7481_s16] sm:$0xf] }
  0x32   : > { %v815_v43 = vshrl.u32 %v783_v41, 16  ;;  %v818_v44 = vshll.u32 %v783_v41, 16  ;;  %v824_v46 = vshll.u32 %v784_v42, 16  ;;  %v782_v47 = vld [vmem:[%s7481_s16 + $0x4] sm:$0x1]  ;;  %v801_v48 = vshrl.u32 %v781_v45, 16  ;;  %vm7500_vm2 = vmor %vm797_vm0, %vm798_vm1 }
  0x33   : > { %v804_v49 = vshll.u32 %v781_v45, 16  ;;  %v810_v52 = vshll.u32 %v782_v47, 16  ;;  %v787_v53 = vld [vmem:[%s7481_s16 + $0x18] sm:$0xf]  ;;  %v788_v57 = vld [vmem:[%s7481_s16 + $0x1c] sm:$0x1] }
  0x34   : > { %v817_v50 = vrot.slane %v815_v43, 4  ;;  %v820_v51 = vrot.slane %v818_v44, 5  ;;  %754 = vrot.lane.b32.xlu1 %v6646_v39, %s7270_s17  ;;  %750 = vrot.lane.b32.xlu0 %v6644_v40, %s7270_s17  ;;  %v826_v54 = vrot.slane %v824_v46, 5  ;;  %v803_v55 = vrot.slane %v801_v48, 4  ;;  %v785_v63 = vld [vmem:[%s7481_s16 + $0x10] sm:$0xf] }
  0x35   : > { %v806_v56 = vrot.slane %v804_v49, 5  ;;  %v843_v58 = vshrl.u32 %v787_v53, 16  ;;  %v812_v60 = vrot.slane %v810_v52, 5  ;;  %v846_v61 = vshll.u32 %v787_v53, 16  ;;  %v786_v3 = vld [vmem:[%s7481_s16 + $0x14] sm:$0x1] }
  0x36   : > { %v821_v59 = vor.u32 %v820_v51, %v817_v50  ;;  %v852_v62 = vshll.u32 %v788_v57, 16  ;;  %v829_v4 = vshrl.u32 %v785_v63, 16  ;;  %v832_v5 = vshll.u32 %v785_v63, 16  ;;  %v6653_v10 = vld [vmem:[%s7481_s16 + $0x50] sm:$0xf]  ;;  %s7278_s29 = smov 27  }
  0x37   : > { %v807_v1 = vor.u32 %v806_v56, %v803_v55  ;;  %v845_v2 = vrot.slane %v843_v58, 4  ;;  %v848_v7 = vrot.slane %v846_v61, 5  ;;  %v838_v9 = vshll.u32 %v786_v3, 16  ;;  %v6654_v14 = vld [vmem:[%s7481_s16 + $0x54] sm:$0x1]  ;;  %s7279_s30 = smov 30  }
  0x38   : > { %v822_v6 = vrot.slane %v821_v59, 4  ;;  %v854_v8 = vrot.slane %v852_v62, 5  ;;  %v831_v12 = vrot.slane %v829_v4, 4  ;;  %v834_v13 = vrot.slane %v832_v5, 5  ;;  %v6651_v20 = vld [vmem:[%s7481_s16 + $0x48] sm:$0xf] }
  0x39   : > { %v808_v11 = vrot.slane %v807_v1, 4  ;;  %v976_v15 = vshrl.u32 %v6653_v10, 16  ;;  %v849_v17 = vor.u32 %v848_v7, %v845_v2  ;;  %v840_v18 = vrot.slane %v838_v9, 5  ;;  %v6652_v21 = vld [vmem:[%s7481_s16 + $0x4c] sm:$0x1]  ;;  %s7280_s12 = smov 33  }
  0x3a   : > { %v827_v16 = vsel %vm7500_vm2, %v822_v6, %v826_v54  ;;  %v979_v19 = vshll.u32 %v6653_v10, 16  ;;  %v835_v23 = vor.u32 %v834_v13, %v831_v12  ;;  %v985_v25 = vshll.u32 %v6654_v14, 16  ;;  %v6657_v26 = vld [vmem:[%s7481_s16 + $0x60] sm:$0xf]  ;;  %v6658_v31 = vld [vmem:[%s7481_s16 + $0x64] sm:$0x1] }
  0x3b   : > { %914 = vrot.lane.b32.xlu1 %v827_v16, %s7271_s18  ;;  %v813_v22 = vsel %vm7500_vm2, %v808_v11, %v812_v60  ;;  %v978_v24 = vrot.slane %v976_v15, 4  ;;  %v850_v27 = vrot.slane %v849_v17, 4  ;;  %v962_v29 = vshrl.u32 %v6651_v20, 16  ;;  %v6655_v36 = vld [vmem:[%s7481_s16 + $0x58] sm:$0xf]  ;;  %s7281_s13 = smov 36  }
  0x3c   : > { %912 = vrot.lane.b32.xlu0 %v813_v22, %s7271_s18  ;;  %v981_v28 = vrot.slane %v979_v19, 5  ;;  %v965_v30 = vshll.u32 %v6651_v20, 16  ;;  %v836_v32 = vrot.slane %v835_v23, 4  ;;  %v987_v33 = vrot.slane %v985_v25, 5  ;;  %v6656_v41 = vld [vmem:[%s7481_s16 + $0x5c] sm:$0x1] }
  0x3d   : > { %v971_v34 = vshll.u32 %v6652_v21, 16  ;;  %v1004_v35 = vshrl.u32 %v6657_v26, 16  ;;  %v855_v37 = vsel %vm7500_vm2, %v850_v27, %v854_v8  ;;  %v964_v39 = vrot.slane %v962_v29, 4  ;;  %v6685_v63 = vld [vmem:[%s7481_s16 + $0x98] sm:$0xf]  ;;  %s7282_s14 = smov 39  }
  0x3e   : > { %v982_v38 = vor.u32 %v981_v28, %v978_v24  ;;  %v967_v40 = vrot.slane %v965_v30, 5  ;;  %v841_v42 = vsel %vm7500_vm2, %v836_v32, %v840_v18  ;;  %v1007_v45 = vshll.u32 %v6657_v26, 16  ;;  %v6683_v3 = vld [vmem:[%s7481_s16 + $0x90] sm:$0xf]  ;;  %v6668_v7 = vld [vmem:[%s7481_s16 + $0x98] sm:$0xf] }
  0x3f   : > { %918 = vrot.lane.b32.xlu1 %v855_v37, %s7271_s18  ;;  %v973_v43 = vrot.slane %v971_v34, 5  ;;  %v1006_v44 = vrot.slane %v1004_v35, 4  ;;  %v1013_v48 = vshll.u32 %v6658_v31, 16  ;;  %v990_v49 = vshrl.u32 %v6655_v36, 16  ;;  %v6689_v8 = vld [vmem:[%s7481_s16 + $0xa8] sm:$0xf] }
  0x40   : > { %916 = vrot.lane.b32.xlu0 %v841_v42, %s7271_s18  ;;  %v983_v46 = vrot.slane %v982_v38, 4  ;;  %v968_v47 = vor.u32 %v967_v40, %v964_v39  ;;  %v1009_v50 = vrot.slane %v1007_v45, 5  ;;  %v993_v51 = vshll.u32 %v6655_v36, 16  ;;  %v6667_v11 = vld [vmem:[%s7481_s16 + $0x90] sm:$0xf]  ;;  %s7283_s15 = smov 42  }
  0x41   : > { %v999_v52 = vshll.u32 %v6656_v41, 16  ;;  %v992_v55 = vrot.slane %v990_v49, 4  ;;  %v1015_v57 = vrot.slane %v1013_v48, 5  ;;  %v1237_v4 = vshrl.u32 %v6685_v63, 16  ;;  %v6687_v12 = vld [vmem:[%s7481_s16 + $0xa0] sm:$0xf] }
  0x42   : > { %v988_v53 = vsel %vm7500_vm2, %v983_v46, %v987_v33  ;;  %v969_v54 = vrot.slane %v968_v47, 4  ;;  %v1010_v56 = vor.u32 %v1009_v50, %v1006_v44  ;;  %v995_v58 = vrot.slane %v993_v51, 5  ;;  %v6670_v17 = vld [vmem:[%s7481_s16 + $0xa8] sm:$0xf]  ;;  %v6686_v18 = vld [vmem:[%s7481_s16 + $0x9c] sm:$0x1] }
  0x43   : > { %1075 = vrot.lane.b32.xlu1 %v988_v53, %s7272_s19  ;;  %v1001_v62 = vrot.slane %v999_v52, 5  ;;  %v1240_v5 = vshll.u32 %v6685_v63, 16  ;;  %v1223_v9 = vshrl.u32 %v6683_v3, 16  ;;  %v1226_v10 = vshll.u32 %v6683_v3, 16  ;;  %v6701_v23 = vld [vmem:[%s7481_s16 + $0xe0] sm:$0xf] }
  0x44   : > { %v974_v59 = vsel %vm7500_vm2, %v969_v54, %v973_v43  ;;  %v1011_v60 = vrot.slane %v1010_v56, 4  ;;  %v996_v61 = vor.u32 %v995_v58, %v992_v55  ;;  %v1239_v13 = vrot.slane %v1237_v4, 4  ;;  %v6669_v24 = vld [vmem:[%s7481_s16 + $0xa0] sm:$0xf]  ;;  %v6684_v26 = vld [vmem:[%s7481_s16 + $0x94] sm:$0x1] }
  0x45   : > { %1073 = vrot.lane.b32.xlu0 %v974_v59, %s7272_s19  ;;  %v1242_v14 = vrot.slane %v1240_v5, 5  ;;  %v1265_v15 = vshrl.u32 %v6689_v8, 16  ;;  %v1268_v16 = vshll.u32 %v6689_v8, 16  ;;  %v1225_v19 = vrot.slane %v1223_v9, 4  ;;  %v6676_v25 = vld [vmem:[%s7481_s16 + $0xe0] sm:$0xf] }
  0x46   : > { %v1016_v1 = vsel %vm7500_vm2, %v1011_v60, %v1015_v57  ;;  %v997_v2 = vrot.slane %v996_v61, 4  ;;  %v1228_v20 = vrot.slane %v1226_v10, 5  ;;  %v1251_v21 = vshrl.u32 %v6687_v12, 16  ;;  %v6699_v31 = vld [vmem:[%s7481_s16 + $0xd8] sm:$0xf]  ;;  %p710_p8 = scmp.lt.s32.totalorder %s6637_s10, 1 }
  0x47   : > { %1079 = vrot.lane.b32.xlu1 %v1016_v1, %s7272_s19  ;;  %v1254_v22 = vshll.u32 %v6687_v12, 16  ;;  %v1243_v27 = vor.u32 %v1242_v14, %v1239_v13  ;;  %v1246_v28 = vshll.u32 %v6686_v18, 16  ;;  %v1267_v29 = vrot.slane %v1265_v15, 4  ;;  %v6675_v32 = vld [vmem:[%s7481_s16 + $0xd8] sm:$0xf] }
  0x48   : > { %v1002_v6 = vsel %vm7500_vm2, %v997_v2, %v1001_v62  ;;  %v1270_v30 = vrot.slane %v1268_v16, 5  ;;  %v6690_v33 = vld [vmem:[%s7481_s16 + $0xac] sm:$0x1]  ;;  %v1398_v34 = vshrl.u32 %v6701_v23, 16  ;;  %v1401_v35 = vshll.u32 %v6701_v23, 16  ;;  %s9287_s10 = smov (!%p710_p8, %s6637_s10), 1 }
  0x49   : > { %1077 = vrot.lane.b32.xlu0 %v1002_v6, %s7272_s19  ;;  %v1229_v36 = vor.u32 %v1228_v20, %v1225_v19  ;;  %v1232_v37 = vshll.u32 %v6684_v26, 16  ;;  %v1253_v38 = vrot.slane %v1251_v21, 4  ;;  %v1256_v39 = vrot.slane %v1254_v22, 5  ;;  %v6705_v40 = vld [vmem:[%s7481_s16 + $0xf0] sm:$0xf] }
  0x4a   : > { %v6678_v41 = vld [vmem:[%s7481_s16 + $0xf0] sm:$0xf]  ;;  %v6688_v42 = vld [vmem:[%s7481_s16 + $0xa4] sm:$0x1]  ;;  %v1384_v43 = vshrl.u32 %v6699_v31, 16  ;;  %v1387_v44 = vshll.u32 %v6699_v31, 16  ;;  %v1271_v47 = vor.u32 %v1270_v30, %v1267_v29 }
  0x4b   : > { %1125 = vrot.lane.b32.xlu1 %v6668_v7, %s7273_s23  ;;  %v1244_v45 = vrot.slane %v1243_v27, 4  ;;  %v1248_v46 = vrot.slane %v1246_v28, 5  ;;  %v1274_v48 = vshll.u32 %v6690_v33, 16  ;;  %v6703_v49 = vld [vmem:[%s7481_s16 + $0xe8] sm:$0xf]  ;;  %v1400_v51 = vrot.slane %v1398_v34, 4 }
  0x4c   : > { %v6702_v50 = vld [vmem:[%s7481_s16 + $0xe4] sm:$0x1]  ;;  %v1403_v52 = vrot.slane %v1401_v35, 5  ;;  %v1426_v53 = vshrl.u32 %v6705_v40, 16  ;;  %v1429_v54 = vshll.u32 %v6705_v40, 16  ;;  %v1230_v55 = vrot.slane %v1229_v36, 4 }
  0x4d   : > { %1123 = vrot.lane.b32.xlu0 %v6667_v11, %s7273_s23  ;;  %v1234_v56 = vrot.slane %v1232_v37, 5  ;;  %v1257_v57 = vor.u32 %v1256_v39, %v1253_v38  ;;  %v1260_v58 = vshll.u32 %v6688_v42, 16  ;;  %v6677_v59 = vld [vmem:[%s7481_s16 + $0xe8] sm:$0xf]  ;;  %v1386_v60 = vrot.slane %v1384_v43, 4 }
  0x4e   : > { %v1389_v61 = vrot.slane %v1387_v44, 5  ;;  %v1412_v62 = vshrl.u32 %v6703_v49, 16  ;;  %v1415_v63 = vshll.u32 %v6703_v49, 16  ;;  %v1249_v1 = vsel %vm7500_vm2, %v1244_v45, %v1248_v46  ;;  %v6700_v4 = vld [vmem:[%s7481_s16 + $0xdc] sm:$0x1] }
  0x4f   : > { %1129 = vrot.lane.b32.xlu1 %v6670_v17, %s7273_s23  ;;  %v1276_v2 = vrot.slane %v1274_v48, 5  ;;  %v1407_v3 = vshll.u32 %v6702_v50, 16  ;;  %v1272_v5 = vrot.slane %v1271_v47, 4  ;;  %v1404_v6 = vor.u32 %v1403_v52, %v1400_v51  ;;  %v6706_v12 = vld [vmem:[%s7481_s16 + $0xf4] sm:$0x1] }
  0x50   : > { %v1428_v7 = vrot.slane %v1426_v53, 4  ;;  %v1431_v8 = vrot.slane %v1429_v54, 5  ;;  %v1235_v9 = vsel %vm7500_vm2, %v1230_v55, %v1234_v56  ;;  %v1258_v10 = vrot.slane %v1257_v57, 4  ;;  %v6704_v18 = vld [vmem:[%s7481_s16 + $0xec] sm:$0x1] }
  0x51   : > { %1127 = vrot.lane.b32.xlu0 %v6669_v24, %s7273_s23  ;;  %v1262_v11 = vrot.slane %v1260_v58, 5  ;;  %v1390_v13 = vor.u32 %v1389_v61, %v1386_v60  ;;  %v1393_v14 = vshll.u32 %v6700_v4, 16  ;;  %v1414_v15 = vrot.slane %v1412_v62, 4  ;;  %v6716_v36 = vld [vmem:[%s7481_s16 + $0x10] sm:$0xf] }
  0x52   : > { %v1417_v16 = vrot.slane %v1415_v63, 5  ;;  %v1409_v17 = vrot.slane %v1407_v3, 5  ;;  %v1277_v19 = vsel %vm7500_vm2, %v1272_v5, %v1276_v2  ;;  %v1405_v20 = vrot.slane %v1404_v6, 4  ;;  %v791_v37 = vld [vmem:[%s7481_s16 + $0x28] sm:$0xf] }
  0x53   : > { %1175 = vrot.lane.b32.xlu1 %v6676_v25, %s7274_s24  ;;  %v1432_v21 = vor.u32 %v1431_v8, %v1428_v7  ;;  %v1435_v22 = vshll.u32 %v6706_v12, 16  ;;  %v1263_v23 = vsel %vm7500_vm2, %v1258_v10, %v1262_v11  ;;  %v1391_v24 = vrot.slane %v1390_v13, 4  ;;  %v6715_v38 = vld [vmem:[%s7481_s16 + $0x8] sm:$0xf]  ;;  %v789_v39 = vld [vmem:[%s7481_s16 + $0x20] sm:$0xf] }
  0x54   : > { %v1395_v25 = vrot.slane %v1393_v14, 5  ;;  %v1418_v26 = vor.u32 %v1417_v16, %v1414_v15  ;;  %v1421_v27 = vshll.u32 %v6704_v18, 16  ;;  %v1410_v28 = vsel %vm7500_vm2, %v1405_v20, %v1409_v17  ;;  %v6648_v42 = vld [vmem:[%s7481_s16 + $0x70] sm:$0xf]  ;;  %v6647_v45 = vld [vmem:[%s7481_s16 + $0x68] sm:$0xf] }
  0x55   : > { %1173 = vrot.lane.b32.xlu0 %v6675_v32, %s7274_s24  ;;  %v1433_v29 = vrot.slane %v1432_v21, 4  ;;  %v1437_v30 = vrot.slane %v1435_v22, 5  ;;  %v871_v40 = vshrl.u32 %v791_v37, 16  ;;  %v857_v43 = vshrl.u32 %v789_v39, 16  ;;  %v6733_v48 = vld [vmem:[%s7481_s16 + $0x10] sm:$0xf] }
  0x56   : > { %v1396_v31 = vsel %vm7500_vm2, %v1391_v24, %v1395_v25  ;;  %v1419_v32 = vrot.slane %v1418_v26, 4  ;;  %v1423_v33 = vrot.slane %v1421_v27, 5  ;;  %v860_v44 = vshll.u32 %v789_v39, 16  ;;  %v6718_v49 = vld [vmem:[%s7481_s16 + $0x20] sm:$0xf] }
  0x57   : > { %1179 = vrot.lane.b32.xlu1 %v6678_v41, %s7274_s24  ;;  %v1438_v34 = vsel %vm7500_vm2, %v1433_v29, %v1437_v30  ;;  %v874_v41 = vshll.u32 %v791_v37, 16  ;;  %v873_v46 = vrot.slane %v871_v40, 4  ;;  %vm722_vm3 = vcmask 19456   ;;  %v792_v50 = vld [vmem:[%s7481_s16 + $0x2c] sm:$0x1] }
  0x58   : > { %v1424_v35 = vsel %vm7500_vm2, %v1419_v32, %v1423_v33  ;;  %v790_v51 = vld [vmem:[%s7481_s16 + $0x24] sm:$0x1]  ;;  %v859_v52 = vrot.slane %v857_v43, 4  ;;  %v862_v53 = vrot.slane %v860_v44, 5  ;;  %v6731_v54 = vld [vmem:[%s7481_s16 + $0x8] sm:$0xf] }
  0x59   : > { %1177 = vrot.lane.b32.xlu0 %v6677_v59, %s7274_s24  ;;  %v876_v47 = vrot.slane %v874_v41, 5  ;;  %v716_v55 = vld [vmem:[%s7481_s16 + $0x10] sm:$0xf]  ;;  %v6717_v56 = vld [vmem:[%s7481_s16 + $0x18] sm:$0xf]  ;;  %v1659_v57 = vshrl.u32 %v6733_v48, 16 }
  0x5a   : > { %v1662_v58 = vshll.u32 %v6733_v48, 16  ;;  %725 = vst.msk [vmem:[#allocation5 + $0x8] sm:$0xf] %vm722_vm3, %v716_v55  ;;  %v714_v59 = vld [vmem:[%s7481_s16] sm:$0xf]  ;;  %v880_v62 = vshll.u32 %v792_v50, 16  ;;  %v863_v5 = vor.u32 %v862_v53, %v859_v52 }
  0x5b   : > { %1336 = vrot.lane.b32.xlu1 %v1249_v1, %s7275_s26  ;;  %v6724_v60 = vld [vmem:[%s7481_s16 + $0x58] sm:$0xf]  ;;  %v877_v61 = vor.u32 %v876_v47, %v873_v46  ;;  %723 = vst.msk [vmem:[#allocation5] sm:$0xf] %vm722_vm3, %v714_v59  ;;  %v6723_v1 = vld [vmem:[%s7481_s16 + $0x50] sm:$0xf] }
  0x5c   : > { %v795_v63 = vld [vmem:[%s7481_s16 + $0x38] sm:$0xf]  ;;  %v866_v2 = vshll.u32 %v790_v51, 16  ;;  %v1645_v3 = vshrl.u32 %v6731_v54, 16  ;;  %v1648_v4 = vshll.u32 %v6731_v54, 16  ;;  %v1664_v10 = vrot.slane %v1662_v58, 5 }
  0x5d   : > { %1334 = vrot.lane.b32.xlu0 %v1235_v9, %s7275_s26  ;;  %v6734_v6 = vld [vmem:[%s7481_s16 + $0x14] sm:$0x1]  ;;  %v793_v7 = vld [vmem:[%s7481_s16 + $0x30] sm:$0xf]  ;;  %v717_v8 = vld [vmem:[%s7481_s16 + $0x18] sm:$0xf] }
  0x5e   : > { %v1661_v9 = vrot.slane %v1659_v57, 4  ;;  %v899_v11 = vshrl.u32 %v795_v63, 16  ;;  %v902_v12 = vshll.u32 %v795_v63, 16  ;;  %726 = vst.msk [vmem:[#allocation5 + $0xc] sm:$0xf] %vm722_vm3, %v717_v8  ;;  %v878_v15 = vrot.slane %v877_v61, 4 }
  0x5f   : > { %1340 = vrot.lane.b32.xlu1 %v1277_v19, %s7275_s26  ;;  %v715_v13 = vld [vmem:[%s7481_s16 + $0x8] sm:$0xf]  ;;  %v6650_v14 = vld [vmem:[%s7481_s16 + $0x80] sm:$0xf]  ;;  %v882_v16 = vrot.slane %v880_v62, 5  ;;  %v1647_v18 = vrot.slane %v1645_v3, 4 }
  0x60   : > { %v6732_v17 = vld [vmem:[%s7481_s16 + $0xc] sm:$0x1]  ;;  %724 = vst.msk [vmem:[#allocation5 + $0x4] sm:$0xf] %vm722_vm3, %v715_v13  ;;  %v1650_v19 = vrot.slane %v1648_v4, 5  ;;  %v885_v20 = vshrl.u32 %v793_v7, 16  ;;  %v1665_v27 = vor.u32 %v1664_v10, %v1661_v9 }
  0x61   : > { %1338 = vrot.lane.b32.xlu0 %v1263_v23, %s7275_s26  ;;  %v888_v21 = vshll.u32 %v793_v7, 16  ;;  %v6661_v22 = vld [vmem:[%s7481_s16 + $0x70] sm:$0xf]  ;;  %v6649_v23 = vld [vmem:[%s7481_s16 + $0x78] sm:$0xf]  ;;  %v868_v24 = vrot.slane %v866_v2, 5 }
  0x62   : > { %v1668_v25 = vshll.u32 %v6734_v6, 16  ;;  %v864_v26 = vrot.slane %v863_v5, 4  ;;  %v904_v29 = vrot.slane %v902_v12, 5  ;;  %v6659_v30 = vld [vmem:[%s7481_s16 + $0x68] sm:$0xf]  ;;  %v1032_v33 = vshrl.u32 %v6661_v22, 16 }
  0x63   : > { %1497 = vrot.lane.b32.xlu1 %v1410_v28, %s7276_s27  ;;  %v901_v28 = vrot.slane %v899_v11, 4  ;;  %v796_v32 = vld [vmem:[%s7481_s16 + $0x3c] sm:$0x1]  ;;  %v887_v37 = vrot.slane %v885_v20, 4  ;;  %v6737_v39 = vld [vmem:[%s7481_s16 + $0x20] sm:$0xf] }
  0x64   : > { %v1670_v40 = vrot.slane %v1668_v25, 5  ;;  %v794_v41 = vld [vmem:[%s7481_s16 + $0x34] sm:$0x1]  ;;  %v1021_v43 = vshll.u32 %v6659_v30, 16  ;;  %v869_v44 = vsel %vm7500_vm2, %v864_v26, %v868_v24  ;;  %v1666_v46 = vrot.slane %v1665_v27, 4 }
  0x65   : > { %1495 = vrot.lane.b32.xlu0 %v1396_v31, %s7276_s27  ;;  %v1654_v31 = vshll.u32 %v6732_v17, 16  ;;  %v905_v47 = vor.u32 %v904_v29, %v901_v28  ;;  %v908_v48 = vshll.u32 %v796_v32, 16  ;;  %v6662_v50 = vld [vmem:[%s7481_s16 + $0x74] sm:$0x1]  ;;  %v1034_v51 = vrot.slane %v1032_v33, 4 }
  0x66   : > { %v1687_v53 = vshrl.u32 %v6737_v39, 16  ;;  %v1690_v54 = vshll.u32 %v6737_v39, 16  ;;  %v894_v58 = vshll.u32 %v794_v41, 16  ;;  %v6660_v59 = vld [vmem:[%s7481_s16 + $0x6c] sm:$0x1]  ;;  %v1023_v61 = vrot.slane %v1021_v43, 5 }
  0x67   : > { %1501 = vrot.lane.b32.xlu1 %v1438_v34, %s7276_s27  ;;  %v1035_v34 = vshll.u32 %v6661_v22, 16  ;;  %v6725_v2 = vld [vmem:[%s7481_s16 + $0x60] sm:$0xf]  ;;  %v1671_v3 = vsel %vm7500_vm2, %v1666_v46, %v1670_v40  ;;  %v906_v4 = vrot.slane %v905_v47, 4  ;;  %v910_v5 = vrot.slane %v908_v48, 5 }
  0x68   : > { %v1041_v6 = vshll.u32 %v6662_v50, 16  ;;  %v1027_v8 = vshll.u32 %v6660_v59, 16  ;;  %v1689_v9 = vrot.slane %v1687_v53, 4  ;;  %v1692_v10 = vrot.slane %v1690_v54, 5  ;;  %v6747_v11 = vld [vmem:[%s7481_s16 + $0x50] sm:$0xf] }
  0x69   : > { %1499 = vrot.lane.b32.xlu0 %v1424_v35, %s7276_s27  ;;  %v883_v35 = vsel %vm7500_vm2, %v878_v15, %v882_v16  ;;  %v1037_v52 = vrot.slane %v1035_v34, 5  ;;  %v896_v13 = vrot.slane %v894_v58, 5  ;;  %v911_v22 = vsel %vm7500_vm2, %v906_v4, %v910_v5  ;;  %v6736_v24 = vld [vmem:[%s7481_s16 + $0x1c] sm:$0x1]  ;;  %v6748_v41 = vld [vmem:[%s7481_s16 + $0x54] sm:$0x1] }
  0x6a   : > { %v1806_v25 = vshrl.u32 %v6747_v11, 16  ;;  %v1809_v26 = vshll.u32 %v6747_v11, 16  ;;  %v1029_v28 = vrot.slane %v1027_v8, 5  ;;  %v1693_v29 = vor.u32 %v1692_v10, %v1689_v9  ;;  %v6750_v32 = vld [vmem:[%s7481_s16 + $0x5c] sm:$0x1] }
  0x6b   : > { %1547 = vrot.lane.b32.xlu1 %v6716_v36, %s7277_s28  ;;  %v1651_v36 = vor.u32 %v1650_v19, %v1647_v18  ;;  %v1038_v7 = vor.u32 %v1037_v52, %v1034_v51  ;;  %v1682_v40 = vshll.u32 %v6736_v24, 16  ;;  %v1829_v48 = vshll.u32 %v6750_v32, 16  ;;  %v6666_v51 = vld [vmem:[%s7481_s16 + $0x84] sm:$0x1]  ;;  %v719_v24 = vld [vmem:[%s7481_s16 + $0x28] sm:$0xf] }
  0x6c   : > { %v1811_v43 = vrot.slane %v1809_v26, 5  ;;  %v1694_v46 = vrot.slane %v1693_v29, 4  ;;  %728 = vst.msk [vmem:[#allocation5 + $0x14] sm:$0xf] %vm722_vm3, %v719_v24  ;;  %v718_v29 = vld [vmem:[%s7481_s16 + $0x20] sm:$0xf] }
  0x6d   : > { %1545 = vrot.lane.b32.xlu0 %v6715_v38, %s7277_s28  ;;  %v890_v38 = vrot.slane %v888_v21, 5  ;;  %v1652_v55 = vrot.slane %v1651_v36, 4  ;;  %v6665_v21 = vld [vmem:[%s7481_s16 + $0x80] sm:$0xf]  ;;  %v1039_v27 = vrot.slane %v1038_v7, 4  ;;  %vm772_vm4 = vcmask 44056  }
  0x6e   : > { %v1063_v36 = vshll.u32 %v6665_v21, 16  ;;  %727 = vst.msk [vmem:[#allocation5 + $0x10] sm:$0xf] %vm722_vm3, %v718_v29  ;;  %vm936_vm5 = vcmask 68656   ;;  %vm1097_vm6 = vcmask 93256   ;;  %vm1147_vm7 = vcmask 117856  }
  0x6f   : > { %758 = vrot.lane.b32.xlu1 %v6648_v42, %s7270_s17  ;;  %v1018_v42 = vshrl.u32 %v6659_v30, 16  ;;  %v891_v57 = vor.u32 %v890_v38, %v887_v37  ;;  %vm1197_vm8 = vcmask 142456   ;;  %vm1358_vm9 = vcmask 167056  }
  0x70   : > { %v1065_v53 = vrot.slane %v1063_v36, 5  ;;  %vm1519_vm10 = vcmask 191656   ;;  %vm1569_vm11 = vcmask 216256   ;;  %vm1619_vm12 = vcmask 240856  }
  0x71   : > { %756 = vrot.lane.b32.xlu0 %v6647_v45, %s7270_s17  ;;  %v6726_v45 = vld [vmem:[%s7481_s16 + $0x68] sm:$0xf]  ;;  %v892_v17 = vrot.slane %v891_v57, 4  ;;  %vm1780_vm13 = vcmask 265456   ;;  %vm1941_vm14 = vcmask 290056   ;;  %vm1991_vm15 = vcmask 314656  }
  0x72   : > { %v6753_v57 = vld [vmem:[%s7481_s16 + $0x68] sm:$0xf]  ;;  %vm2041_vm0 = vcmask 339256   ;;  %vm2202_vm1 = vcmask 363856  }
  0x73   : > { %1551 = vrot.lane.b32.xlu1 %v6718_v49, %s7277_s28  ;;  %v6735_v49 = vld [vmem:[%s7481_s16 + $0x18] sm:$0xf]  ;;  %v897_v37 = vsel %vm7500_vm2, %v892_v17, %v896_v13  ;;  %v1851_v7 = vshll.u32 %v6753_v57, 16 }
  0x74   : > { %v1673_v62 = vshrl.u32 %v6735_v49, 16  ;;  %v1676_v63 = vshll.u32 %v6735_v49, 16 }
  0x75   : > { %1549 = vrot.lane.b32.xlu0 %v6717_v56, %s7277_s28  ;;  %v1656_v56 = vrot.slane %v1654_v31, 5  ;;  %v6663_v31 = vld [vmem:[%s7481_s16 + $0x78] sm:$0xf] }
  0x76   : > { %v1675_v19 = vrot.slane %v1673_v62, 4  ;;  %v1678_v20 = vrot.slane %v1676_v63, 5  ;;  %v6751_v62 = vld [vmem:[%s7481_s16 + $0x60] sm:$0xf] }
  0x77   : > { %1597 = vrot.lane.b32.xlu1 %v6724_v60, %s7278_s29  ;;  %v1020_v60 = vrot.slane %v1018_v42, 4  ;;  %v1657_v12 = vsel %vm7500_vm2, %v1652_v55, %v1656_v56  ;;  %v1808_v42 = vrot.slane %v1806_v25, 4  ;;  %v1684_v55 = vrot.slane %v1682_v40, 5  ;;  %v6671_v40 = vld [vmem:[%s7481_s16 + $0xb0] sm:$0xf] }
  0x78   : > { %v1679_v39 = vor.u32 %v1678_v20, %v1675_v19  ;;  %v1815_v56 = vshll.u32 %v6748_v41, 16  ;;  %v1834_v9 = vshrl.u32 %v6751_v62, 16  ;;  %v1837_v10 = vshll.u32 %v6751_v62, 16 }
  0x79   : > { %1595 = vrot.lane.b32.xlu0 %v6723_v1, %s7278_s29  ;;  %v6749_v1 = vld [vmem:[%s7481_s16 + $0x58] sm:$0xf]  ;;  %v1024_v18 = vor.u32 %v1023_v61, %v1020_v60  ;;  %v1812_v59 = vor.u32 %v1811_v43, %v1808_v42  ;;  %v1853_v20 = vrot.slane %v1851_v7, 5 }
  0x7a   : > { %v1820_v15 = vshrl.u32 %v6749_v1, 16  ;;  %v1823_v16 = vshll.u32 %v6749_v1, 16  ;;  %v1680_v58 = vrot.slane %v1679_v39, 4  ;;  %v1831_v1 = vrot.slane %v1829_v48, 5  ;;  %v6672_v39 = vld [vmem:[%s7481_s16 + $0xb8] sm:$0xf] }
  0x7b   : > { %762 = vrot.lane.b32.xlu1 %v6650_v14, %s7270_s17  ;;  %v6738_v14 = vld [vmem:[%s7481_s16 + $0x24] sm:$0x1]  ;;  %v1025_v38 = vrot.slane %v1024_v18, 4  ;;  %v1817_v8 = vrot.slane %v1815_v56, 5  ;;  %v6754_v18 = vld [vmem:[%s7481_s16 + $0x6c] sm:$0x1] }
  0x7c   : > { %v1696_v30 = vshll.u32 %v6738_v14, 16  ;;  %v1822_v33 = vrot.slane %v1820_v15, 4  ;;  %v1825_v34 = vrot.slane %v1823_v16, 5  ;;  %v1685_v11 = vsel %vm7500_vm2, %v1680_v58, %v1684_v55  ;;  %v6694_v48 = vld [vmem:[%s7481_s16 + $0xbc] sm:$0x1] }
  0x7d   : > { %760 = vrot.lane.b32.xlu0 %v6649_v23, %s7270_s17  ;;  %v1043_v23 = vrot.slane %v1041_v6, 5  ;;  %v1030_v54 = vsel %vm7500_vm2, %v1025_v38, %v1029_v28  ;;  %v1848_v6 = vshrl.u32 %v6753_v57, 16  ;;  %v6693_v28 = vld [vmem:[%s7481_s16 + $0xb8] sm:$0xf]  ;;  %v1857_v32 = vshll.u32 %v6754_v18, 16  ;;  %s7299_s17 = smov 80  }
  0x7e   : > { %v1698_v47 = vrot.slane %v1696_v30, 5  ;;  %v1826_v50 = vor.u32 %v1825_v34, %v1822_v33  ;;  %v1296_v36 = vshll.u32 %v6693_v28, 16  ;;  %v6779_v56 = vld [vmem:[%s7481_s16 + $0x98] sm:$0xf]  ;;  %v720_v57 = vld [vmem:[%s7481_s16 + $0x30] sm:$0xf] }
  0x7f   : > { %922 = vrot.lane.b32.xlu1 %v883_v35, %s7271_s18  ;;  %v1060_v35 = vshrl.u32 %v6665_v21, 16  ;;  %v1044_v49 = vsel %vm7500_vm2, %v1039_v27, %v1043_v23  ;;  %v1850_v19 = vrot.slane %v1848_v6, 4  ;;  %v6752_v21 = vld [vmem:[%s7481_s16 + $0x64] sm:$0x1]  ;;  %v1839_v23 = vrot.slane %v1837_v10, 5 }
  0x80   : > { %v1699_v63 = vsel %vm7500_vm2, %v1694_v46, %v1698_v47  ;;  %v1827_v4 = vrot.slane %v1826_v50, 4  ;;  %v1843_v34 = vshll.u32 %v6752_v21, 16  ;;  %v1859_v42 = vrot.slane %v1857_v32, 5  ;;  %729 = vst.msk [vmem:[#allocation5 + $0x18] sm:$0xf] %vm722_vm3, %v720_v57 }
  0x81   : > { %920 = vrot.lane.b32.xlu0 %v869_v44, %s7271_s18  ;;  %v1046_v44 = vshrl.u32 %v6663_v31, 16  ;;  %v1062_v52 = vrot.slane %v1060_v35, 4  ;;  %v1293_v35 = vshrl.u32 %v6693_v28, 16  ;;  %v1298_v50 = vrot.slane %v1296_v36, 5  ;;  %v6709_v18 = vld [vmem:[%s7481_s16 + $0x100] sm:$0xf] }
  0x82   : > { %v1832_v16 = vsel %vm7500_vm2, %v1827_v4, %v1831_v1  ;;  %v1845_v47 = vrot.slane %v1843_v34, 5  ;;  %v6697_v1 = vld [vmem:[%s7481_s16 + $0xc8] sm:$0xf]  ;;  %v2067_v6 = vshrl.u32 %v6779_v56, 16  ;;  %v2070_v7 = vshll.u32 %v6779_v56, 16 }
  0x83   : > { %1601 = vrot.lane.b32.xlu1 %v6726_v45, %s7278_s29  ;;  %v1049_v45 = vshll.u32 %v6663_v31, 16  ;;  %v1048_v60 = vrot.slane %v1046_v44, 4  ;;  %v1066_v5 = vor.u32 %v1065_v53, %v1062_v52  ;;  %v1854_v31 = vor.u32 %v1853_v20, %v1850_v19  ;;  %v6782_v52 = vld [vmem:[%s7481_s16 + $0xa4] sm:$0x1]  ;;  %v721_v53 = vld [vmem:[%s7481_s16 + $0x38] sm:$0xf] }
  0x84   : > { %730 = vst.msk [vmem:[#allocation5 + $0x1c] sm:$0xf] %vm722_vm3, %v721_v53  ;;  %v6698_v21 = vld [vmem:[%s7481_s16 + $0xcc] sm:$0x1]  ;;  %v2069_v28 = vrot.slane %v2067_v6, 4  ;;  %v2072_v29 = vrot.slane %v2070_v7, 5 }
  0x85   : > { %1599 = vrot.lane.b32.xlu0 %v6725_v2, %s7278_s29  ;;  %v1051_v61 = vrot.slane %v1049_v45, 5  ;;  %v1069_v2 = vshll.u32 %v6666_v51, 16  ;;  %v1067_v17 = vrot.slane %v1066_v5, 4  ;;  %v1855_v41 = vrot.slane %v1854_v31, 4  ;;  %v6781_v45 = vld [vmem:[%s7481_s16 + $0xa0] sm:$0xf] }
  0x86   : > { %v6692_v51 = vld [vmem:[%s7481_s16 + $0xb4] sm:$0x1]  ;;  %v2084_v55 = vshll.u32 %v6781_v45, 16  ;;  %v2090_v5 = vshll.u32 %v6782_v52, 16  ;;  %v6707_v31 = vld [vmem:[%s7481_s16 + $0xf8] sm:$0xf] }
  0x87   : > { %1758 = vrot.lane.b32.xlu1 %v1671_v3, %s7279_s30  ;;  %v6664_v3 = vld [vmem:[%s7481_s16 + $0x7c] sm:$0x1]  ;;  %v1052_v13 = vor.u32 %v1051_v61, %v1048_v60  ;;  %v1071_v15 = vrot.slane %v1069_v2, 5  ;;  %v1860_v58 = vsel %vm7500_vm2, %v1855_v41, %v1859_v42  ;;  %v1454_v34 = vshrl.u32 %v6709_v18, 16  ;;  %v6785_v36 = vld [vmem:[%s7481_s16 + $0xb0] sm:$0xf] }
  0x88   : > { %v1055_v14 = vshll.u32 %v6664_v3, 16  ;;  %v1330_v41 = vshll.u32 %v6698_v21, 16  ;;  %v6710_v42 = vld [vmem:[%s7481_s16 + $0x104] sm:$0x1]  ;;  %v2112_v52 = vshll.u32 %v6785_v36, 16  ;;  %vm2431_vm3 = vcmask 392192  }
  0x89   : > { %1756 = vrot.lane.b32.xlu0 %v1657_v12, %s7279_s30  ;;  %v1813_v12 = vrot.slane %v1812_v59, 4  ;;  %v1053_v26 = vrot.slane %v1052_v13, 4  ;;  %v1072_v30 = vsel %vm7500_vm2, %v1067_v17, %v1071_v15  ;;  %v1302_v59 = vshll.u32 %v6694_v48, 16  ;;  %v6763_v13 = vld [vmem:[%s7481_s16 + $0x98] sm:$0xf] }
  0x8a   : > { %v1057_v27 = vrot.slane %v1055_v14, 5  ;;  %v1324_v17 = vshll.u32 %v6697_v1, 16  ;;  %v6680_v48 = vld [vmem:[%s7481_s16 + $0x100] sm:$0xf]  ;;  %v6708_v57 = vld [vmem:[%s7481_s16 + $0xfc] sm:$0x1] }
  0x8b   : > { %926 = vrot.lane.b32.xlu1 %v911_v22, %s7271_s18  ;;  %v1836_v22 = vrot.slane %v1834_v9, 4  ;;  %v1818_v25 = vsel %vm7500_vm2, %v1813_v12, %v1817_v8  ;;  %v6695_v8 = vld [vmem:[%s7481_s16 + $0xc0] sm:$0xf]  ;;  %v6780_v12 = vld [vmem:[%s7481_s16 + $0x9c] sm:$0x1]  ;;  %v7730_v14 = vrot.slane %v1302_v59, 5 }
  0x8c   : > { %v1058_v38 = vsel %vm7500_vm2, %v1053_v26, %v1057_v27  ;;  %v6764_v9 = vld [vmem:[%s7481_s16 + $0xa0] sm:$0xf]  ;;  %v6674_v26 = vld [vmem:[%s7481_s16 + $0xc8] sm:$0xf]  ;;  %v7740_v27 = vrot.slane %v2090_v5, 5 }
  0x8d   : > { %924 = vrot.lane.b32.xlu0 %v897_v37, %s7271_s18  ;;  %v1840_v33 = vor.u32 %v1839_v23, %v1836_v22  ;;  %v6691_v37 = vld [vmem:[%s7481_s16 + $0xb0] sm:$0xf]  ;;  %v1307_v22 = vshrl.u32 %v6695_v8, 16  ;;  %v1310_v23 = vshll.u32 %v6695_v8, 16  ;;  %s7293_s18 = smov 56  }
  0x8e   : > { %v1279_v43 = vshrl.u32 %v6691_v37, 16  ;;  %v1282_v44 = vshll.u32 %v6691_v37, 16  ;;  %v6673_v37 = vld [vmem:[%s7481_s16 + $0xc0] sm:$0xf]  ;;  %v6766_v7 = vld [vmem:[%s7481_s16 + $0xb0] sm:$0xf] }
  0x8f   : > { %1083 = vrot.lane.b32.xlu1 %v1044_v49, %s7272_s19  ;;  %v1841_v46 = vrot.slane %v1840_v33, 4  ;;  %v1295_v49 = vrot.slane %v1293_v35, 4  ;;  %v6696_v33 = vld [vmem:[%s7481_s16 + $0xc4] sm:$0x1]  ;;  %v1457_v35 = vshll.u32 %v6709_v18, 16 }
  0x90   : > { %v1281_v60 = vrot.slane %v1279_v43, 4  ;;  %v1284_v61 = vrot.slane %v1282_v44, 5  ;;  %v1309_v43 = vrot.slane %v1307_v22, 4  ;;  %v1312_v44 = vrot.slane %v1310_v23, 5  ;;  %v6795_v18 = vld [vmem:[%s7481_s16 + $0xe0] sm:$0xf] }
  0x91   : > { %1081 = vrot.lane.b32.xlu0 %v1030_v54, %s7272_s19  ;;  %v2081_v54 = vshrl.u32 %v6781_v45, 16  ;;  %v1299_v62 = vor.u32 %v1298_v50, %v1295_v49  ;;  %v1846_v2 = vsel %vm7500_vm2, %v1841_v46, %v1845_v47  ;;  %v1440_v45 = vshrl.u32 %v6707_v31, 16  ;;  %v6783_v47 = vld [vmem:[%s7481_s16 + $0xa8] sm:$0xf] }
  0x92   : > { %v1285_v15 = vor.u32 %v1284_v61, %v1281_v60  ;;  %v1443_v46 = vshll.u32 %v6707_v31, 16  ;;  %v2073_v49 = vor.u32 %v2072_v29, %v2069_v28  ;;  %v1316_v50 = vshll.u32 %v6696_v33, 16  ;;  %v6786_v61 = vld [vmem:[%s7481_s16 + $0xb4] sm:$0x1]  ;;  %v6765_v22 = vld [vmem:[%s7481_s16 + $0xa8] sm:$0xf] }
  0x93   : > { %1762 = vrot.lane.b32.xlu1 %v1699_v63, %s7279_s30  ;;  %v1288_v63 = vshll.u32 %v6692_v51, 16  ;;  %v2083_v10 = vrot.slane %v2081_v54, 4  ;;  %v7734_v19 = vrot.slane %v1299_v62, 4  ;;  %v2109_v51 = vshrl.u32 %v6785_v36, 16  ;;  %v6713_v33 = vld [vmem:[%s7481_s16 + $0x110] sm:$0xf] }
  0x94   : > { %v1459_v56 = vrot.slane %v1457_v35, 5  ;;  %v1463_v60 = vshll.u32 %v6710_v42, 16  ;;  %v2095_v62 = vshrl.u32 %v6783_v47, 16  ;;  %v1442_v5 = vrot.slane %v1440_v45, 4 }
  0x95   : > { %1760 = vrot.lane.b32.xlu0 %v1685_v11, %s7279_s30  ;;  %v2086_v11 = vrot.slane %v2084_v55, 5  ;;  %v7736_v20 = vrot.slane %v1288_v63, 5  ;;  %v1456_v55 = vrot.slane %v1454_v34, 4  ;;  %v2098_v63 = vshll.u32 %v6783_v47, 16  ;;  %v6772_v34 = vld [vmem:[%s7481_s16 + $0xe8] sm:$0xf] }
  0x96   : > { %v1445_v6 = vrot.slane %v1443_v46, 5  ;;  %v7769_v8 = vrot.slane %v2073_v49, 4  ;;  %v2231_v45 = vshll.u32 %v6795_v18, 16  ;;  %v1482_v49 = vshrl.u32 %v6713_v33, 16 }
  0x97   : > { %1919 = vrot.lane.b32.xlu1 %v1832_v16, %s7280_s12  ;;  %v1321_v16 = vshrl.u32 %v6697_v1, 16  ;;  %v2087_v32 = vor.u32 %v2086_v11, %v2083_v10  ;;  %v2111_v10 = vrot.slane %v2109_v51, 4  ;;  %v2114_v11 = vrot.slane %v2112_v52, 5  ;;  %v6801_v51 = vld [vmem:[%s7481_s16 + $0xf8] sm:$0xf] }
  0x98   : > { %v6771_v52 = vld [vmem:[%s7481_s16 + $0xe0] sm:$0xf] }
  0x99   : > { %1917 = vrot.lane.b32.xlu0 %v1818_v25, %s7280_s12  ;;  %v7756_v53 = vrot.slane %v2087_v32, 4  ;;  %v6798_v32 = vld [vmem:[%s7481_s16 + $0xec] sm:$0x1]  ;;  %v2115_v35 = vor.u32 %v2114_v11, %v2111_v10  ;;  %v6799_v10 = vld [vmem:[%s7481_s16 + $0xf0] sm:$0xf] }
  0x9a   : > { %v6681_v11 = vld [vmem:[%s7481_s16 + $0x108] sm:$0xf] }
  0x9b   : > { %1087 = vrot.lane.b32.xlu1 %v1072_v30, %s7272_s19  ;;  %v2076_v30 = vshll.u32 %v6780_v12, 16  ;;  %v6784_v12 = vld [vmem:[%s7481_s16 + $0xac] sm:$0x1] }
  0x9c   : > { %v2104_v31 = vshll.u32 %v6784_v12, 16 }
  0x9d   : > { %1085 = vrot.lane.b32.xlu0 %v1058_v38, %s7272_s19  ;;  %v7749_v38 = vrot.slane %v1285_v15, 4  ;;  %v7758_v54 = vrot.slane %v2076_v30, 5  ;;  %v1449_v15 = vshll.u32 %v6708_v57, 16  ;;  %v1446_v30 = vor.u32 %v1445_v6, %v1442_v5  ;;  %s7284_s19 = smov 45  }
  0x9e   : > { %v2270_v6 = vshrl.u32 %v6801_v51, 16 }
  0x9f   : > { %1133 = vrot.lane.b32.xlu1 %v6672_v39, %s7273_s23  ;;  %v1323_v39 = vrot.slane %v1321_v16, 4  ;;  %v2118_v16 = vshll.u32 %v6786_v61, 16  ;;  %v7794_v42 = vrot.slane %v1449_v15, 5  ;;  %v7808_v61 = vrot.slane %v2115_v35, 4 }
  0xa0   : > { %v1484_v15 = vrot.slane %v1482_v49, 4  ;;  %v2259_v35 = vshll.u32 %v6799_v10, 16 }
  0xa1   : > { %1131 = vrot.lane.b32.xlu0 %v6671_v40, %s7273_s23  ;;  %v1326_v40 = vrot.slane %v1324_v17, 5  ;;  %v6797_v17 = vld [vmem:[%s7481_s16 + $0xe8] sm:$0xf] }
  0xa2   : > { %v753_v3 = vpop.permute.xlu1 %752  ;;  %v749_v4 = vpop.permute.xlu0 %748  ;;  %v2242_v36 = vshrl.u32 %v6797_v17, 16 }
  0xa3   : > { %1923 = vrot.lane.b32.xlu1 %v1860_v58, %s7280_s12  ;;  %775 = vst.msk [vmem:[#allocation5 + $0x8] sm:$0xf] %vm772_vm4, %v753_v3  ;;  %773 = vst.msk [vmem:[#allocation5] sm:$0xf] %vm772_vm4, %v749_v4  ;;  %v1327_v59 = vor.u32 %v1326_v40, %v1323_v39  ;;  %v7765_v3 = vrot.slane %v1330_v41, 5  ;;  %v1313_v4 = vor.u32 %v1312_v44, %v1309_v43  ;;  %v2228_v39 = vshrl.u32 %v6795_v18, 16 }
  0xa4   : > { %v6711_v40 = vld [vmem:[%s7481_s16 + $0x108] sm:$0xf]  ;;  %v7796_v43 = vrot.slane %v2118_v16, 5  ;;  %v6796_v44 = vld [vmem:[%s7481_s16 + $0xe4] sm:$0x1] }
  0xa5   : > { %1921 = vrot.lane.b32.xlu0 %v1846_v2, %s7280_s12  ;;  %v6679_v2 = vld [vmem:[%s7481_s16 + $0xf8] sm:$0xf]  ;;  %v7778_v23 = vrot.slane %v1327_v59, 4  ;;  %v7784_v29 = vrot.slane %v1313_v4, 4  ;;  %v1468_v57 = vshrl.u32 %v6711_v40, 16  ;;  %v2233_v4 = vrot.slane %v2231_v45, 5 }
  0xa6   : > { %v755_v24 = vpop.permute.xlu1 %754  ;;  %v751_v25 = vpop.permute.xlu0 %750  ;;  %v2237_v5 = vshll.u32 %v6796_v44, 16 }
  0xa7   : > { %1969 = vrot.lane.b32.xlu1 %v6764_v9, %s7281_s13  ;;  %776 = vst.msk [vmem:[#allocation5 + $0xc] sm:$0xf] %vm772_vm4, %v755_v24  ;;  %774 = vst.msk [vmem:[#allocation5 + $0x4] sm:$0xf] %vm772_vm4, %v751_v25  ;;  %v7771_v9 = vrot.slane %v1316_v50, 5  ;;  %v7780_v24 = vrot.slane %v1463_v60, 5 }
  0xa8   : > { %v2097_v25 = vrot.slane %v2095_v62, 4  ;;  %v1485_v50 = vshll.u32 %v6713_v33, 16  ;;  %v6682_v60 = vld [vmem:[%s7481_s16 + $0x110] sm:$0xf]  ;;  %v2244_v62 = vrot.slane %v2242_v36, 4 }
  0xa9   : > { %1967 = vrot.lane.b32.xlu0 %v6763_v13, %s7281_s13  ;;  %v1460_v13 = vor.u32 %v1459_v56, %v1456_v55  ;;  %v7803_v55 = vrot.slane %v1446_v30, 4  ;;  %v7805_v56 = vrot.slane %v2104_v31, 5  ;;  %v6739_v30 = vld [vmem:[%s7481_s16 + $0x28] sm:$0xf]  ;;  %v6802_v33 = vld [vmem:[%s7481_s16 + $0xfc] sm:$0x1] }
  0xaa   : > { %v1487_v16 = vrot.slane %v1485_v50, 5  ;;  %v1701_v44 = vshrl.u32 %v6739_v30, 16  ;;  %v1704_v45 = vshll.u32 %v6739_v30, 16  ;;  %v2279_v50 = vshll.u32 %v6802_v33, 16 }
  0xab   : > { %1137 = vrot.lane.b32.xlu1 %v6674_v26, %s7273_s23  ;;  %v2100_v26 = vrot.slane %v2098_v63, 5  ;;  %v7792_v41 = vrot.slane %v1460_v13, 4 }
  0xad   : > { %v915_v58 = vpop.permute.xlu1 %914  ;;  %1135 = vrot.lane.b32.xlu0 %v6673_v37, %s7273_s23  ;;  %v2245_v37 = vshll.u32 %v6797_v17, 16  ;;  %v2101_v47 = vor.u32 %v2100_v26, %v2097_v25  ;;  %v6712_v17 = vld [vmem:[%s7481_s16 + $0x10c] sm:$0x1]  ;;  %v1470_v25 = vrot.slane %v1468_v57, 4  ;;  %s7295_s23 = smov 32  }
  0xae   : > { %938 = vst.msk [vmem:[#allocation5 + $0x4] sm:$0xf] %vm936_vm5, %v915_v58  ;;  %v913_v1 = vpop.permute.xlu0 %912  ;;  %v1471_v58 = vshll.u32 %v6711_v40, 16  ;;  %v1477_v49 = vshll.u32 %v6712_v17, 16 }
  0xaf   : > { %937 = vst.msk [vmem:[#allocation5] sm:$0xf] %vm936_vm5, %v913_v1  ;;  %1183 = vrot.lane.b32.xlu1 %v6680_v48, %s7274_s24  ;;  %v2251_v48 = vshll.u32 %v6798_v32, 16  ;;  %v2247_v63 = vrot.slane %v2245_v37, 5  ;;  %v2230_v1 = vrot.slane %v2228_v39, 4  ;;  %v7815_v12 = vrot.slane %v2101_v47, 4 }
  0xb0   : > { %v1473_v26 = vrot.slane %v1471_v58, 5  ;;  %v6800_v37 = vld [vmem:[%s7481_s16 + $0xf4] sm:$0x1]  ;;  %v1488_v47 = vor.u32 %v1487_v16, %v1484_v15  ;;  %v6745_v15 = vld [vmem:[%s7481_s16 + $0x40] sm:$0xf] }
  0xb1   : > { %v919_v21 = vpop.permute.xlu1 %918  ;;  %1181 = vrot.lane.b32.xlu0 %v6679_v2, %s7274_s24  ;;  %v6714_v2 = vld [vmem:[%s7481_s16 + $0x114] sm:$0x1]  ;;  %v7817_v13 = vrot.slane %v2251_v48, 5  ;;  %v2248_v31 = vor.u32 %v2247_v63, %v2244_v62 }
  0xb2   : > { %940 = vst.msk [vmem:[#allocation5 + $0xc] sm:$0xf] %vm936_vm5, %v919_v21  ;;  %v917_v28 = vpop.permute.xlu0 %916  ;;  %v1305_v21 = vsel %vm7500_vm2, %v7734_v19, %v7730_v14  ;;  %v1491_v32 = vshll.u32 %v6714_v2, 16  ;;  %v2234_v14 = vor.u32 %v2233_v4, %v2230_v1  ;;  %v7834_v19 = vrot.slane %v2237_v5, 5  ;;  %v6742_v2 = vld [vmem:[%s7481_s16 + $0x34] sm:$0x1] }
  0xb3   : > { %939 = vst.msk [vmem:[#allocation5 + $0x8] sm:$0xf] %vm936_vm5, %v917_v28  ;;  %1973 = vrot.lane.b32.xlu1 %v6766_v7, %s7281_s13  ;;  %v2273_v7 = vshll.u32 %v6801_v51, 16  ;;  %v6741_v28 = vld [vmem:[%s7481_s16 + $0x30] sm:$0xf]  ;;  %v1474_v48 = vor.u32 %v1473_v26, %v1470_v25  ;;  %v2265_v1 = vshll.u32 %v6800_v37, 16 }
  0xb4   : > { %v1715_v39 = vshrl.u32 %v6741_v28, 16  ;;  %v1718_v40 = vshll.u32 %v6741_v28, 16  ;;  %v6774_v51 = vld [vmem:[%s7481_s16 + $0xf8] sm:$0xf]  ;;  %v7843_v57 = vrot.slane %v1491_v32, 5  ;;  %v7846_v62 = vrot.slane %v2234_v14, 4 }
  0xb5   : > { %v1076_v46 = vpop.permute.xlu1 %1075  ;;  %1971 = vrot.lane.b32.xlu0 %v6765_v22, %s7281_s13  ;;  %v1291_v22 = vsel %vm7500_vm2, %v7749_v38, %v7736_v20  ;;  %v2272_v20 = vrot.slane %v2270_v6, 4  ;;  %v2275_v38 = vrot.slane %v2273_v7, 5  ;;  %v6740_v4 = vld [vmem:[%s7481_s16 + $0x2c] sm:$0x1]  ;;  %v6773_v5 = vld [vmem:[%s7481_s16 + $0xf0] sm:$0xf] }
  0xb6   : > { %1099 = vst.msk [vmem:[#allocation5 + $0x4] sm:$0xf] %vm1097_vm6, %v1076_v46  ;;  %v1717_v6 = vrot.slane %v1715_v39, 4  ;;  %v1720_v7 = vrot.slane %v1718_v40, 5  ;;  %v7854_v17 = vrot.slane %v1488_v47, 4  ;;  %v7860_v25 = vrot.slane %v2279_v50, 5 }
  0xb7   : > { %v1074_v59 = vpop.permute.xlu0 %1073  ;;  %2019 = vrot.lane.b32.xlu1 %v6772_v34, %s7282_s14  ;;  %v2256_v34 = vshrl.u32 %v6799_v10, 16  ;;  %v2276_v63 = vor.u32 %v2275_v38, %v2272_v20  ;;  %v1703_v10 = vrot.slane %v1701_v44, 4  ;;  %v1724_v28 = vshll.u32 %v6742_v2, 16  ;;  %v6757_v37 = vld [vmem:[%s7481_s16 + $0x78] sm:$0xf] }
  0xb8   : > { %1098 = vst.msk [vmem:[#allocation5] sm:$0xf] %vm1097_vm6, %v1074_v59  ;;  %v2261_v59 = vrot.slane %v2259_v35, 5  ;;  %v1710_v30 = vshll.u32 %v6740_v4, 16  ;;  %v7869_v33 = vrot.slane %v2265_v1, 5  ;;  %v1743_v35 = vshrl.u32 %v6745_v15, 16 }
  0xb9   : > { %2017 = vrot.lane.b32.xlu0 %v6771_v52, %s7282_s14  ;;  %v1080_v18 = vpop.permute.xlu1 %1079  ;;  %v7841_v52 = vrot.slane %v2248_v31, 4  ;;  %v2258_v58 = vrot.slane %v2256_v34, 4  ;;  %v6743_v31 = vld [vmem:[%s7481_s16 + $0x38] sm:$0xf]  ;;  %v7872_v34 = vld [vmem:[%s7481_s16 + $0x44] sm:$0x1]  ;;  %v1721_v14 = vor.u32 %v1720_v7, %v1717_v6  ;;  %v1466_v6 = vsel %vm7500_vm2, %v7792_v41, %v7780_v24 }
  0xba   : > { %1101 = vst.msk [vmem:[#allocation5 + $0xc] sm:$0xf] %vm1097_vm6, %v1080_v18  ;;  %v7856_v18 = vrot.slane %v1474_v48, 4  ;;  %v1746_v38 = vshll.u32 %v6745_v15, 16  ;;  %v1729_v40 = vshrl.u32 %v6743_v31, 16  ;;  %v1732_v44 = vshll.u32 %v6743_v31, 16 }
  0xbb   : > { %v1078_v36 = vpop.permute.xlu0 %1077  ;;  %1187 = vrot.lane.b32.xlu1 %v6682_v60, %s7274_s24  ;;  %v2262_v26 = vor.u32 %v2261_v59, %v2258_v58  ;;  %v7891_v47 = vrot.slane %v1710_v30, 5  ;;  %v1752_v48 = vshll.u32 %v7872_v34, 16  ;;  %v1876_v50 = vshrl.u32 %v6757_v37, 16  ;;  %v6720_v31 = vld [vmem:[%s7481_s16 + $0x30] sm:$0xf] }
  0xbc   : > { %1100 = vst.msk [vmem:[#allocation5 + $0x8] sm:$0xf] %vm1097_vm6, %v1078_v36  ;;  %v7875_v36 = vrot.slane %v2276_v63, 4  ;;  %v7906_v59 = vrot.slane %v1746_v38, 5  ;;  %v7910_v1 = vrot.slane %v1729_v40, 4  ;;  %v2121_v24 = vsel %vm7500_vm2, %v7808_v61, %v7796_v43  ;;  %v7179_v43 = vld [vmem:[%s9226_s1 + $0x10] sm:$0xff]  }
  0xbd   : > { %1185 = vrot.lane.b32.xlu0 %v6681_v11, %s7274_s24  ;;  %v1126_v46 = vpop.permute.xlu1 %1125  ;;  %v1706_v11 = vrot.slane %v1704_v45, 5  ;;  %v7887_v45 = vrot.slane %v2262_v26, 4  ;;  %v7920_v4 = vrot.slane %v1876_v50, 4  ;;  %v2254_v61 = vsel %vm7500_vm2, %v7841_v52, %v7817_v13  ;;  %7083 = vmatprep.subr.bf16.mxu0 %v7179_v43  ;;  %v7181_v52 = vld [vmem:[%s9226_s1 + $0x8] sm:$0xff]   ;;  %v6722_v38 = vld [vmem:[%s7481_s16 + $0x40] sm:$0xf] }
  0xbe   : > { %1149 = vst.msk [vmem:[#allocation5 + $0x4] sm:$0xf] %vm1147_vm7, %v1126_v46  ;;  %v7889_v46 = vrot.slane %v1724_v28, 5  ;;  %v2240_v26 = vsel %vm7500_vm2, %v7846_v62, %v7834_v19  ;;  %7084 = vmatpush3.bf16.msra.mxu0 %v7179_v43  ;;  %v1494_v30 = vsel %vm7500_vm2, %v7854_v17, %v7843_v57  ;;  %v7182_v57 = vld [vmem:[%s9226_s1] sm:$0xff]   ;;  %v6719_v17 = vld [vmem:[%s7481_s16 + $0x28] sm:$0xf] }
  0xbf   : > { %v1124_v60 = vpop.permute.xlu0 %1123  ;;  %1344 = vrot.lane.b32.xlu1 %v1305_v21, %s7275_s26  ;;  %v7858_v21 = vrot.slane %v1477_v49, 5  ;;  %v1707_v20 = vor.u32 %v1706_v11, %v1703_v10  ;;  %7085 = vmatprep.subr.bf16.mxu0 %v7181_v52  ;;  %v6729_v50 = vld [vmem:[%s7481_s16 + $0x80] sm:$0xf]  ;;  %s7296_s24 = smov 64  }
  0xc0   : > { %1148 = vst.msk [vmem:[#allocation5] sm:$0xf] %vm1147_vm7, %v1124_v60 }
  0xc1   : > { %1342 = vrot.lane.b32.xlu0 %v1291_v22, %s7275_s26  ;;  %v1130_v16 = vpop.permute.xlu1 %1129  ;;  %v2093_v22 = vsel %vm7500_vm2, %v7756_v53, %v7740_v27  ;;  %v2079_v27 = vsel %vm7500_vm2, %v7769_v8, %v7758_v54  ;;  %v7884_v53 = vld [vmem:[%s7481_s16 + $0x3c] sm:$0x1]  ;;  %v1333_v54 = vsel %vm7500_vm2, %v7778_v23, %v7765_v3  ;;  %v7899_v8 = vrot.slane %v1743_v35, 4 }
  0xc2   : > { %1151 = vst.msk [vmem:[#allocation5 + $0xc] sm:$0xf] %vm1147_vm7, %v1130_v16  ;;  %v7904_v58 = vrot.slane %v1707_v20, 4  ;;  %v1738_v60 = vshll.u32 %v7884_v53, 16  ;;  %v7912_v3 = vrot.slane %v1732_v44, 5  ;;  %v1319_v23 = vsel %vm7500_vm2, %v7784_v29, %v7771_v9  ;;  %7086 = vmatpush3.bf16.msra.mxu0 %v7181_v52 }
  0xc3   : > { %v1128_v32 = vpop.permute.xlu0 %1127  ;;  %2023 = vrot.lane.b32.xlu1 %v6774_v51, %s7282_s14  ;;  %v7902_v51 = vrot.slane %v1721_v14, 4  ;;  %v1452_v9 = vsel %vm7500_vm2, %v7803_v55, %v7794_v42  ;;  %v7934_v29 = vld [vmem:[%s7481_s16 + $0x70] sm:$0xf]  ;;  %v2107_v42 = vsel %vm7500_vm2, %v7815_v12, %v7805_v56  ;;  %v7949_v55 = vld [vmem:[%s7481_s16 + $0x88] sm:$0xf]  ;;  %v1480_v62 = vsel %vm7500_vm2, %v7856_v18, %v7858_v21  ;;  %7087 = vmatprep.subr.bf16.mxu0 %v7182_v57 }
  0xc4   : > { %1150 = vst.msk [vmem:[#allocation5 + $0x8] sm:$0xf] %vm1147_vm7, %v1128_v32  ;;  %v1862_v15 = vshrl.u32 %v7934_v29, 16  ;;  %v1865_v12 = vshll.u32 %v7934_v29, 16  ;;  %v1904_v13 = vshrl.u32 %v7949_v55, 16  ;;  %v2282_v21 = vsel %vm7500_vm2, %v7875_v36, %v7860_v25 }
  0xc5   : > { %2021 = vrot.lane.b32.xlu0 %v6773_v5, %s7282_s14  ;;  %v1176_v39 = vpop.permute.xlu1 %1175  ;;  %v1879_v5 = vshll.u32 %v6757_v37, 16  ;;  %v2268_v20 = vsel %vm7500_vm2, %v7887_v45, %v7869_v33  ;;  %v6721_v25 = vld [vmem:[%s7481_s16 + $0x38] sm:$0xf]  ;;  %v6727_v33 = vld [vmem:[%s7481_s16 + $0x70] sm:$0xf]  ;;  %v1713_v34 = vsel %vm7500_vm2, %v7904_v58, %v7891_v47 }
  0xc6   : > { %1199 = vst.msk [vmem:[#allocation5 + $0x4] sm:$0xf] %vm1197_vm8, %v1176_v39  ;;  %7088 = vmatpush3.bf16.msra.mxu0 %v7182_v57  ;;  %v6728_v39 = vld [vmem:[%s7481_s16 + $0x78] sm:$0xf]  ;;  %v6759_v44 = vld [vmem:[%s7481_s16 + $0x80] sm:$0xf] }
  0xc7   : > { %v1174_v49 = vpop.permute.xlu0 %1173  ;;  %2180 = vrot.lane.b32.xlu1 %v2093_v22, %s7283_s15  ;;  %v7961_v56 = vrot.slane %v1879_v5, 5  ;;  %v1907_v22 = vshll.u32 %v7949_v55, 16  ;;  %v6730_v45 = vld [vmem:[%s7481_s16 + $0x88] sm:$0xf]  ;;  %v6756_v5 = vld [vmem:[%s7481_s16 + $0x74] sm:$0x1] }
  0xc8   : > { %1198 = vst.msk [vmem:[#allocation5] sm:$0xf] %vm1197_vm8, %v1174_v49  ;;  %v6758_v49 = vld [vmem:[%s7481_s16 + $0x7c] sm:$0x1] }
  0xc9   : > { %2178 = vrot.lane.b32.xlu0 %v2079_v27, %s7283_s15  ;;  %v1180_v63 = vpop.permute.xlu1 %1179  ;;  %v1882_v29 = vor.u32 %v7961_v56, %v7920_v4 }
  0xca   : > { %1201 = vst.msk [vmem:[#allocation5 + $0xc] sm:$0xf] %vm1197_vm8, %v1180_v63  ;;  %v1749_v63 = vor.u32 %v7906_v59, %v7899_v8  ;;  %v1727_v8 = vsel %vm7500_vm2, %v7902_v51, %v7889_v46  ;;  %v1754_v59 = vrot.slane %v1752_v48, 5  ;;  %v1740_v46 = vrot.slane %v1738_v60, 5  ;;  %v6762_v51 = vld [vmem:[%s7481_s16 + $0x8c] sm:$0x1] }
  0xcb   : > { %v1178_v2 = vpop.permute.xlu0 %1177  ;;  %1348 = vrot.lane.b32.xlu1 %v1333_v54, %s7275_s26  ;;  %v1871_v48 = vshll.u32 %v6756_v5, 16  ;;  %v1883_v53 = vrot.slane %v1882_v29, 4  ;;  %v1913_v60 = vshll.u32 %v6762_v51, 16  ;;  %v6776_v29 = vld [vmem:[%s7481_s16 + $0x108] sm:$0xf] }
  0xcc   : > { %1200 = vst.msk [vmem:[#allocation5 + $0x8] sm:$0xf] %vm1197_vm8, %v1178_v2  ;;  %v1735_v2 = vor.u32 %v7912_v3, %v7910_v1  ;;  %v1885_v1 = vshll.u32 %v6758_v49, 16  ;;  %v1750_v3 = vrot.slane %v1749_v63, 4  ;;  %v6767_v49 = vld [vmem:[%s7481_s16 + $0xb8] sm:$0xf] }
  0xcd   : > { %1346 = vrot.lane.b32.xlu0 %v1319_v23, %s7275_s26  ;;  %v1337_v7 = vpop.permute.xlu1 %1336  ;;  %v6803_v51 = vld [vmem:[%s7481_s16 + $0x100] sm:$0xf]  ;;  %s7297_s26 = smov 48  }
  0xce   : > { %1360 = vst.msk [vmem:[#allocation5 + $0x4] sm:$0xf] %vm1358_vm9, %v1337_v7  ;;  %v1867_v7 = vrot.slane %v1865_v12, 5  ;;  %v1736_v4 = vrot.slane %v1735_v2, 4  ;;  %v1887_v56 = vrot.slane %v1885_v1, 5  ;;  %v1755_v47 = vsel %vm7500_vm2, %v1750_v3, %v1754_v59 }
  0xcf   : > { %v1335_v10 = vpop.permute.xlu0 %1334  ;;  %1505 = vrot.lane.b32.xlu1 %v1466_v6, %s7276_s27  ;;  %v1864_v6 = vrot.slane %v1862_v15, 4  ;;  %v6760_v12 = vld [vmem:[%s7481_s16 + $0x84] sm:$0x1]  ;;  %v6805_v3 = vld [vmem:[%s7481_s16 + $0x108] sm:$0xf] }
  0xd0   : > { %1359 = vst.msk [vmem:[#allocation5] sm:$0xf] %vm1358_vm9, %v1335_v10  ;;  %v1893_v10 = vshll.u32 %v6759_v44, 16 }
  0xd1   : > { %1503 = vrot.lane.b32.xlu0 %v1452_v9, %s7276_s27  ;;  %v1341_v41 = vpop.permute.xlu1 %1340  ;;  %v1890_v9 = vshrl.u32 %v6759_v44, 16  ;;  %v1868_v55 = vor.u32 %v1867_v7, %v1864_v6  ;;  %v6770_v6 = vld [vmem:[%s7481_s16 + $0xd0] sm:$0xf]  ;;  %v6769_v7 = vld [vmem:[%s7481_s16 + $0xc8] sm:$0xf] }
  0xd2   : > { %1362 = vst.msk [vmem:[#allocation5 + $0xc] sm:$0xf] %vm1358_vm9, %v1341_v41  ;;  %v1906_v41 = vrot.slane %v1904_v13, 4  ;;  %v1895_v43 = vrot.slane %v1893_v10, 5 }
  0xd3   : > { %v1339_v11 = vpop.permute.xlu0 %1338  ;;  %2184 = vrot.lane.b32.xlu1 %v2121_v24, %s7283_s15  ;;  %v1892_v15 = vrot.slane %v1890_v9, 4  ;;  %v1869_v13 = vrot.slane %v1868_v55, 4  ;;  %v6790_v9 = vld [vmem:[%s7481_s16 + $0xc4] sm:$0x1]  ;;  %v6794_v55 = vld [vmem:[%s7481_s16 + $0xd4] sm:$0x1] }
  0xd4   : > { %1361 = vst.msk [vmem:[#allocation5 + $0x8] sm:$0xf] %vm1358_vm9, %v1339_v11 }
  0xd5   : > { %2182 = vrot.lane.b32.xlu0 %v2107_v42, %s7283_s15  ;;  %v1498_v16 = vpop.permute.xlu1 %1497  ;;  %v1909_v42 = vrot.slane %v1907_v22, 5  ;;  %v1896_v52 = vor.u32 %v1895_v43, %v1892_v15  ;;  %v2298_v15 = vshrl.u32 %v6805_v3, 16  ;;  %v2301_v43 = vshll.u32 %v6805_v3, 16 }
  0xd6   : > { %1521 = vst.msk [vmem:[#allocation5 + $0x4] sm:$0xf] %vm1519_vm10, %v1498_v16 }
  0xd7   : > { %v1496_v28 = vpop.permute.xlu0 %1495  ;;  %2341 = vrot.lane.b32.xlu1 %v2254_v61, %s7284_s19  ;;  %v1910_v58 = vor.u32 %v1909_v42, %v1906_v41  ;;  %v6788_v41 = vld [vmem:[%s7481_s16 + $0xbc] sm:$0x1] }
  0xd8   : > { %1520 = vst.msk [vmem:[#allocation5] sm:$0xf] %vm1519_vm10, %v1496_v28  ;;  %v1741_v28 = vsel %vm7500_vm2, %v1736_v4, %v1740_v46  ;;  %v6775_v4 = vld [vmem:[%s7481_s16 + $0x100] sm:$0xf] }
  0xd9   : > { %2339 = vrot.lane.b32.xlu0 %v2240_v26, %s7284_s19  ;;  %v1502_v19 = vpop.permute.xlu1 %1501  ;;  %v1873_v26 = vrot.slane %v1871_v48, 5 }
  0xda   : > { %1523 = vst.msk [vmem:[#allocation5 + $0xc] sm:$0xf] %vm1519_vm10, %v1502_v19 }
  0xdb   : > { %v1500_v32 = vpop.permute.xlu0 %1499  ;;  %1509 = vrot.lane.b32.xlu1 %v1494_v30, %s7276_s27  ;;  %v1899_v30 = vshll.u32 %v6760_v12, 16  ;;  %v1874_v57 = vsel %vm7500_vm2, %v1869_v13, %v1873_v26  ;;  %v2132_v12 = vshll.u32 %v6788_v41, 16  ;;  %v2284_v26 = vshrl.u32 %v6803_v51, 16 }
  0xdc   : > { %1522 = vst.msk [vmem:[#allocation5 + $0x8] sm:$0xf] %vm1519_vm10, %v1500_v32  ;;  %v1915_v32 = vrot.slane %v1913_v60, 5  ;;  %v6778_v60 = vld [vmem:[%s7481_s16 + $0x118] sm:$0xf] }
  0xdd   : > { %1507 = vrot.lane.b32.xlu0 %v1480_v62, %s7276_s27  ;;  %v1548_v35 = vpop.permute.xlu1 %1547  ;;  %v1888_v62 = vsel %vm7500_vm2, %v1883_v53, %v1887_v56  ;;  %s7286_s27 = smov 96  }
  0xde   : > { %1571 = vst.msk [vmem:[#allocation5 + $0x4] sm:$0xf] %vm1569_vm11, %v1548_v35  ;;  %v1901_v35 = vrot.slane %v1899_v30, 5 }
  0xdf   : > { %v1546_v18 = vpop.permute.xlu0 %1545  ;;  %1555 = vrot.lane.b32.xlu1 %v6720_v31, %s7277_s28  ;;  %v1911_v31 = vrot.slane %v1910_v58, 4  ;;  %v6809_v58 = vld [vmem:[%s7481_s16 + $0x118] sm:$0xf] }
  0xe0   : > { %1570 = vst.msk [vmem:[#allocation5] sm:$0xf] %vm1569_vm11, %v1546_v18 }
  0xe1   : > { %1553 = vrot.lane.b32.xlu0 %v6719_v17, %s7277_s28  ;;  %v759_v14 = vpop.permute.xlu1 %758  ;;  %v1897_v17 = vrot.slane %v1896_v52, 4 }
  0xe2   : > { %778 = vst.msk [vmem:[#allocation5 + $0x14] sm:$0xf] %vm772_vm4, %v759_v14  ;;  %v6789_v14 = vld [vmem:[%s7481_s16 + $0xc0] sm:$0xf] }
  0xe3   : > { %v757_v37 = vpop.permute.xlu0 %756  ;;  %2345 = vrot.lane.b32.xlu1 %v2282_v21, %s7284_s19  ;;  %v1916_v21 = vsel %vm7500_vm2, %v1911_v31, %v1915_v32  ;;  %v6807_v31 = vld [vmem:[%s7481_s16 + $0x110] sm:$0xf]  ;;  %v6806_v32 = vld [vmem:[%s7481_s16 + $0x10c] sm:$0x1] }
  0xe4   : > { %777 = vst.msk [vmem:[#allocation5 + $0x10] sm:$0xf] %vm772_vm4, %v757_v37  ;;  %v6787_v37 = vld [vmem:[%s7481_s16 + $0xb8] sm:$0xf] }
  0xe5   : > { %2343 = vrot.lane.b32.xlu0 %v2268_v20, %s7284_s19  ;;  %v1552_v36 = vpop.permute.xlu1 %1551  ;;  %v2123_v44 = vshrl.u32 %v6787_v37, 16 }
  0xe6   : > { %1573 = vst.msk [vmem:[#allocation5 + $0xc] sm:$0xf] %vm1569_vm11, %v1552_v36  ;;  %v2137_v36 = vshrl.u32 %v6789_v14, 16 }
  0xe7   : > { %v1550_v27 = vpop.permute.xlu0 %1549  ;;  %1559 = vrot.lane.b32.xlu1 %v6722_v38, %s7277_s28  ;;  %v1902_v38 = vsel %vm7500_vm2, %v1897_v17, %v1901_v35  ;;  %v2326_v17 = vshrl.u32 %v6809_v58, 16  ;;  %v2329_v35 = vshll.u32 %v6809_v58, 16 }
  0xe8   : > { %1572 = vst.msk [vmem:[#allocation5 + $0x8] sm:$0xf] %vm1569_vm11, %v1550_v27  ;;  %v6768_v27 = vld [vmem:[%s7481_s16 + $0xc0] sm:$0xf]  ;;  %v2139_v63 = vrot.slane %v2137_v36, 4  ;;  %v2286_v36 = vrot.slane %v2284_v26, 4 }
  0xe9   : > { %1557 = vrot.lane.b32.xlu0 %v6721_v25, %s7277_s28  ;;  %v1598_v40 = vpop.permute.xlu1 %1597 }
  0xea   : > { %1621 = vst.msk [vmem:[#allocation5 + $0x4] sm:$0xf] %vm1619_vm12, %v1598_v40 }
  0xeb   : > { %v1596_v54 = vpop.permute.xlu0 %1595  ;;  %1605 = vrot.lane.b32.xlu1 %v6728_v39, %s7278_s29  ;;  %v2140_v39 = vshll.u32 %v6789_v14, 16 }
  0xec   : > { %1620 = vst.msk [vmem:[#allocation5] sm:$0xf] %vm1619_vm12, %v1596_v54  ;;  %v6791_v54 = vld [vmem:[%s7481_s16 + $0xc8] sm:$0xf] }
  0xed   : > { %1603 = vrot.lane.b32.xlu0 %v6727_v33, %s7278_s29  ;;  %v763_v23 = vpop.permute.xlu1 %762  ;;  %v6793_v33 = vld [vmem:[%s7481_s16 + $0xd0] sm:$0xf]  ;;  %v2151_v59 = vshrl.u32 %v6791_v54, 16  ;;  %v2154_v1 = vshll.u32 %v6791_v54, 16 }
  0xee   : > { %780 = vst.msk [vmem:[#allocation5 + $0x1c] sm:$0xf] %vm772_vm4, %v763_v23  ;;  %v2142_v23 = vrot.slane %v2140_v39, 5  ;;  %v2165_v2 = vshrl.u32 %v6793_v33, 16  ;;  %v2168_v5 = vshll.u32 %v6793_v33, 16  ;;  %v2315_v33 = vshll.u32 %v6807_v31, 16 }
  0xef   : > { %v761_v24 = vpop.permute.xlu0 %760  ;;  %1609 = vrot.lane.b32.xlu1 %v6730_v45, %s7278_s29  ;;  %v2126_v45 = vshll.u32 %v6787_v37, 16  ;;  %v2156_v53 = vrot.slane %v2154_v1, 5 }
  0xf0   : > { %779 = vst.msk [vmem:[#allocation5 + $0x18] sm:$0xf] %vm772_vm4, %v761_v24  ;;  %v2125_v24 = vrot.slane %v2123_v44, 4  ;;  %v2167_v46 = vrot.slane %v2165_v2, 4  ;;  %v2170_v48 = vrot.slane %v2168_v5, 5  ;;  %vm3040_vm4 = vcmask 59392  }
  0xf1   : > { %1607 = vrot.lane.b32.xlu0 %v6729_v50, %s7278_s29  ;;  %v923_v11 = vpop.permute.xlu1 %922  ;;  %s7287_s29 = smov 16  }
  0xf2   : > { %942 = vst.msk [vmem:[#allocation5 + $0x14] sm:$0xf] %vm936_vm5, %v923_v11  ;;  %v2143_v11 = vor.u32 %v2142_v23, %v2139_v63  ;;  %v2328_v63 = vrot.slane %v2326_v17, 4  ;;  %v2331_v23 = vrot.slane %v2329_v35, 5 }
  0xf3   : > { %v921_v61 = vpop.permute.xlu0 %920  ;;  %1766 = vrot.lane.b32.xlu1 %v1727_v8, %s7279_s30  ;;  %v2128_v8 = vrot.slane %v2126_v45, 5 }
  0xf4   : > { %941 = vst.msk [vmem:[#allocation5 + $0x10] sm:$0xf] %vm936_vm5, %v921_v61  ;;  %v2144_v52 = vrot.slane %v2143_v11, 4  ;;  %v2332_v11 = vor.u32 %v2331_v23, %v2328_v63 }
  0xf5   : > { %1764 = vrot.lane.b32.xlu0 %v1713_v34, %s7279_s30  ;;  %v1602_v16 = vpop.permute.xlu1 %1601  ;;  %v2146_v34 = vshll.u32 %v6790_v9, 16  ;;  %v2129_v56 = vor.u32 %v2128_v8, %v2125_v24  ;;  %v6810_v9 = vld [vmem:[%s7481_s16 + $0x11c] sm:$0x1] }
  0xf6   : > { %1623 = vst.msk [vmem:[#allocation5 + $0xc] sm:$0xf] %vm1619_vm12, %v1602_v16  ;;  %v6792_v16 = vld [vmem:[%s7481_s16 + $0xcc] sm:$0x1] }
  0xf7   : > { %v1600_v19 = vpop.permute.xlu0 %1599  ;;  %1770 = vrot.lane.b32.xlu1 %v1755_v47, %s7279_s30  ;;  %v2153_v47 = vrot.slane %v2151_v59, 4  ;;  %v2148_v30 = vrot.slane %v2146_v34, 5  ;;  %v2130_v14 = vrot.slane %v2129_v56, 4  ;;  %v2160_v37 = vshll.u32 %v6792_v16, 16 }
  0xf8   : > { %1622 = vst.msk [vmem:[#allocation5 + $0x8] sm:$0xf] %vm1619_vm12, %v1600_v19  ;;  %v2171_v19 = vor.u32 %v2170_v48, %v2167_v46  ;;  %v2317_v59 = vrot.slane %v2315_v33, 5  ;;  %v2335_v34 = vshll.u32 %v6810_v9, 16  ;;  %v2333_v56 = vrot.slane %v2332_v11, 4 }
  0xf9   : > { %1768 = vrot.lane.b32.xlu0 %v1741_v28, %s7279_s30  ;;  %v1759_v22 = vpop.permute.xlu1 %1758  ;;  %v2287_v28 = vshll.u32 %v6803_v51, 16  ;;  %v2149_v44 = vsel %vm7500_vm2, %v2144_v52, %v2148_v30  ;;  %s7288_s30 = smov 104  }
  0xfa   : > { %1782 = vst.msk [vmem:[#allocation5 + $0x4] sm:$0xf] %vm1780_vm13, %v1759_v22  ;;  %v2300_v22 = vrot.slane %v2298_v15, 4  ;;  %v2172_v54 = vrot.slane %v2171_v19, 4 }
  0xfb   : > { %v1757_v18 = vpop.permute.xlu0 %1756  ;;  %1927 = vrot.lane.b32.xlu1 %v1888_v62, %s7280_s12  ;;  %v2174_v62 = vshll.u32 %v6794_v55, 16  ;;  %v2289_v39 = vrot.slane %v2287_v28, 5 }
  0xfc   : > { %1781 = vst.msk [vmem:[#allocation5] sm:$0xf] %vm1780_vm13, %v1757_v18 }
  0xfd   : > { %1925 = vrot.lane.b32.xlu0 %v1874_v57, %s7280_s12  ;;  %v927_v20 = vpop.permute.xlu1 %926  ;;  %v2303_v57 = vrot.slane %v2301_v43, 5  ;;  %v2176_v45 = vrot.slane %v2174_v62, 5  ;;  %v2290_v24 = vor.u32 %v2289_v39, %v2286_v36 }
  0xfe   : > { %944 = vst.msk [vmem:[#allocation5 + $0x1c] sm:$0xf] %vm936_vm5, %v927_v20  ;;  %v2134_v20 = vrot.slane %v2132_v12, 5  ;;  %v2337_v12 = vrot.slane %v2335_v34, 5 }
  0xff   : > { %v925_v25 = vpop.permute.xlu0 %924  ;;  %1931 = vrot.lane.b32.xlu1 %v1916_v21, %s7280_s12  ;;  %v6777_v21 = vld [vmem:[%s7481_s16 + $0x110] sm:$0xf]  ;;  %v2177_v41 = vsel %vm7500_vm2, %v2172_v54, %v2176_v45 }
 0x100   : > { %943 = vst.msk [vmem:[#allocation5 + $0x18] sm:$0xf] %vm936_vm5, %v925_v25  ;;  %v6804_v25 = vld [vmem:[%s7481_s16 + $0x104] sm:$0x1]  ;;  %v2135_v5 = vsel %vm7500_vm2, %v2130_v14, %v2134_v20  ;;  %v2338_v26 = vsel %vm7500_vm2, %v2333_v56, %v2337_v12  ;;  %vm3365_vm5 = vsmask.f32 2304 }
 0x101   : > { %1929 = vrot.lane.b32.xlu0 %v1902_v38, %s7280_s12  ;;  %v1084_v40 = vpop.permute.xlu1 %1083  ;;  %v2157_v38 = vor.u32 %v2156_v53, %v2153_v47  ;;  %s7302_s12 = smov 120  }
 0x102   : > { %1103 = vst.msk [vmem:[#allocation5 + $0x14] sm:$0xf] %vm1097_vm6, %v1084_v40 }
 0x103   : > { %v1082_v50 = vpop.permute.xlu0 %1081  ;;  %1977 = vrot.lane.b32.xlu1 %v6768_v27, %s7281_s13  ;;  %v2312_v27 = vshrl.u32 %v6807_v31, 16 }
 0x104   : > { %1102 = vst.msk [vmem:[#allocation5 + $0x10] sm:$0xf] %vm1097_vm6, %v1082_v50  ;;  %v2304_v50 = vor.u32 %v2303_v57, %v2300_v22 }
 0x105   : > { %1975 = vrot.lane.b32.xlu0 %v6767_v49, %s7281_s13  ;;  %v1763_v10 = vpop.permute.xlu1 %1762  ;;  %v2307_v49 = vshll.u32 %v6806_v32, 16  ;;  %v2314_v8 = vrot.slane %v2312_v27, 4 }
 0x106   : > { %1784 = vst.msk [vmem:[#allocation5 + $0xc] sm:$0xf] %vm1780_vm13, %v1763_v10  ;;  %v2158_v10 = vrot.slane %v2157_v38, 4 }
 0x107   : > { %v1761_v42 = vpop.permute.xlu0 %1760  ;;  %1981 = vrot.lane.b32.xlu1 %v6770_v6, %s7281_s13  ;;  %v2162_v6 = vrot.slane %v2160_v37, 5  ;;  %v2309_v3 = vrot.slane %v2307_v49, 5  ;;  %v2318_v55 = vor.u32 %v2317_v59, %v2314_v8 }
 0x108   : > { %1783 = vst.msk [vmem:[#allocation5 + $0x8] sm:$0xf] %vm1780_vm13, %v1761_v42  ;;  %v2305_v42 = vrot.slane %v2304_v50, 4 }
 0x109   : > { %1979 = vrot.lane.b32.xlu0 %v6769_v7, %s7281_s13  ;;  %v1920_v61 = vpop.permute.xlu1 %1919  ;;  %v2293_v7 = vshll.u32 %v6804_v25, 16  ;;  %v2163_v51 = vsel %vm7500_vm2, %v2158_v10, %v2162_v6  ;;  %v2319_v58 = vrot.slane %v2318_v55, 4 }
 0x10a   : > { %1943 = vst.msk [vmem:[#allocation5 + $0x4] sm:$0xf] %vm1941_vm14, %v1920_v61  ;;  %v2310_v61 = vsel %vm7500_vm2, %v2305_v42, %v2309_v3 }
 0x10b   : > { %v1918_v13 = vpop.permute.xlu0 %1917  ;;  %2027 = vrot.lane.b32.xlu1 %v6776_v29, %s7282_s14  ;;  %v6808_v29 = vld [vmem:[%s7481_s16 + $0x114] sm:$0x1]  ;;  %v2295_v48 = vrot.slane %v2293_v7, 5  ;;  %s7285_s16 = smov 8  }
 0x10c   : > { %1942 = vst.msk [vmem:[#allocation5] sm:$0xf] %vm1941_vm14, %v1918_v13  ;;  %v2321_v15 = vshll.u32 %v6808_v29, 16 }
 0x10d   : > { %2025 = vrot.lane.b32.xlu0 %v6775_v4, %s7282_s14  ;;  %v1088_v18 = vpop.permute.xlu1 %1087  ;;  %v2291_v4 = vrot.slane %v2290_v24, 4 }
 0x10e   : > { %1105 = vst.msk [vmem:[#allocation5 + $0x1c] sm:$0xf] %vm1097_vm6, %v1088_v18 }
 0x10f   : > { %v1086_v40 = vpop.permute.xlu0 %1085  ;;  %2031 = vrot.lane.b32.xlu1 %v6778_v60, %s7282_s14  ;;  %v2296_v53 = vsel %vm7500_vm2, %v2291_v4, %v2295_v48  ;;  %v2323_v60 = vrot.slane %v2321_v15, 5 }
 0x110   : > { %1104 = vst.msk [vmem:[#allocation5 + $0x18] sm:$0xf] %vm1097_vm6, %v1086_v40  ;;  %vm8222_vm6 = vmand %vm3040_vm4, %vm3365_vm5 }
 0x111   : > { %2029 = vrot.lane.b32.xlu0 %v6777_v21, %s7282_s14  ;;  %v1134_v2 = vpop.permute.xlu1 %1133  ;;  %v2324_v13 = vsel %vm7500_vm2, %v2319_v58, %v2323_v60  ;;  %vm2363_vm2 = vcmask 388456   ;;  %s7291_s14 = smov 40  }
 0x112   : > { %1153 = vst.msk [vmem:[#allocation5 + $0x14] sm:$0xf] %vm1147_vm7, %v1134_v2 }
 0x113   : > { %v1132_v1 = vpop.permute.xlu0 %1131  ;;  %2188 = vrot.lane.b32.xlu1 %v2149_v44, %s7283_s15 }
 0x114   : > { %1152 = vst.msk [vmem:[#allocation5 + $0x10] sm:$0xf] %vm1147_vm7, %v1132_v1 }
 0x115   : > { %2186 = vrot.lane.b32.xlu0 %v2135_v5, %s7283_s15  ;;  %v1924_v46 = vpop.permute.xlu1 %1923 }
 0x116   : > { %1945 = vst.msk [vmem:[#allocation5 + $0xc] sm:$0xf] %vm1941_vm14, %v1924_v46 }
 0x117   : > { %v1922_v43 = vpop.permute.xlu0 %1921  ;;  %2192 = vrot.lane.b32.xlu1 %v2177_v41, %s7283_s15 }
 0x118   : > { %1944 = vst.msk [vmem:[#allocation5 + $0x8] sm:$0xf] %vm1941_vm14, %v1922_v43 }
 0x119   : > { %2190 = vrot.lane.b32.xlu0 %v2163_v51, %s7283_s15  ;;  %v1970_v47 = vpop.permute.xlu1 %1969  ;;  %s7292_s15 = smov 72  }
 0x11a   : > { %1993 = vst.msk [vmem:[#allocation5 + $0x4] sm:$0xf] %vm1991_vm15, %v1970_v47 }
 0x11b   : > { %v1968_v16 = vpop.permute.xlu0 %1967  ;;  %2349 = vrot.lane.b32.xlu1 %v2310_v61, %s7284_s19 }
 0x11c   : > { %1992 = vst.msk [vmem:[#allocation5] sm:$0xf] %vm1991_vm15, %v1968_v16 }
 0x11d   : > { %2347 = vrot.lane.b32.xlu0 %v2296_v53, %s7284_s19  ;;  %v1138_v28 = vpop.permute.xlu1 %1137 }
 0x11e   : > { %1155 = vst.msk [vmem:[#allocation5 + $0x1c] sm:$0xf] %vm1147_vm7, %v1138_v28 }
 0x11f   : > { %v1136_v52 = vpop.permute.xlu0 %1135  ;;  %2353 = vrot.lane.b32.xlu1 %v2338_v26, %s7284_s19 }
 0x120   : > { %1154 = vst.msk [vmem:[#allocation5 + $0x18] sm:$0xf] %vm1147_vm7, %v1136_v52  ;;  %v3367_v52 = vld [vmem:[#allocation2] sm:$0x7]  ;;  %vm3370_vm7 = vcmask 57344  }
 0x121   : > { %2351 = vrot.lane.b32.xlu0 %v2324_v13, %s7284_s19  ;;  %v1184_v30 = vpop.permute.xlu1 %1183  ;;  %s7294_s19 = smov 88  }
 0x122   : > { %1203 = vst.msk [vmem:[#allocation5 + $0x14] sm:$0xf] %vm1197_vm8, %v1184_v30  ;;  %v3368_v30 = vsel %vm8222_vm6, 0, %v3367_v52  ;;  %v2545_v52 = vlaneseq }
 0x123   : > { %v1182_v19 = vpop.permute.xlu0 %1181  ;;  %3369 = vst [vmem:[#allocation2] sm:$0x7] %v3368_v30 }
 0x124   : > { %1202 = vst.msk [vmem:[#allocation5 + $0x10] sm:$0xf] %vm1197_vm8, %v1182_v19  ;;  %v3389_v19 = vld [vmem:[#allocation2 + $0x14] sm:$0x7] }
 0x125   : > { %v1974_v62 = vpop.permute.xlu1 %1973 }
 0x126   : > { %1995 = vst.msk [vmem:[#allocation5 + $0xc] sm:$0xf] %vm1991_vm15, %v1974_v62  ;;  %v3390_v62 = vsel %vm8222_vm6, 0, %v3389_v19 }
 0x127   : > { %v1972_v31 = vpop.permute.xlu0 %1971  ;;  %3391 = vst [vmem:[#allocation2 + $0x14] sm:$0x7] %v3390_v62 }
 0x128   : > { %1994 = vst.msk [vmem:[#allocation5 + $0x8] sm:$0xf] %vm1991_vm15, %v1972_v31 }
 0x129   : > { %v2020_v0 = vpop.permute.xlu1 %2019 }
 0x12a   : > { %2043 = vst.msk [vmem:[#allocation5 + $0x4] sm:$0xf] %vm2041_vm0, %v2020_v0  ;;  %v3410_v0 = vld [vmem:[#allocation2 + $0x38] sm:$0x7] }
 0x12b   : > { %v2018_v32 = vpop.permute.xlu0 %2017 }
 0x12c   : > { %2042 = vst.msk [vmem:[#allocation5] sm:$0xf] %vm2041_vm0, %v2018_v32  ;;  %v3373_v32 = vld [vmem:[#allocation2] sm:$0x1] }
 0x12d   : > { %v1188_v22 = vpop.permute.xlu1 %1187 }
 0x12e   : > { %1205 = vst.msk [vmem:[#allocation5 + $0x1c] sm:$0xf] %vm1197_vm8, %v1188_v22  ;;  %v3411_v22 = vsel %vm8222_vm6, 0, %v3410_v0 }
 0x12f   : > { %v1186_v57 = vpop.permute.xlu0 %1185  ;;  %3412 = vst [vmem:[#allocation2 + $0x38] sm:$0x7] %v3411_v22  ;;  %v8289_v22 = vshrl.u32 %v2545_v52, 7 }
 0x130   : > { %1204 = vst.msk [vmem:[#allocation5 + $0x18] sm:$0xf] %vm1197_vm8, %v1186_v57  ;;  %vm9237_vm8 = vsmask.f32 256 }
 0x131   : > { %v1345_v17 = vpop.permute.xlu1 %1344 }
 0x132   : > { %1364 = vst.msk [vmem:[#allocation5 + $0x14] sm:$0xf] %vm1358_vm9, %v1345_v17 }
 0x133   : > { %v1343_v35 = vpop.permute.xlu0 %1342 }
 0x134   : > { %1363 = vst.msk [vmem:[#allocation5 + $0x10] sm:$0xf] %vm1358_vm9, %v1343_v35  ;;  %v3394_v35 = vld [vmem:[#allocation2 + $0x14] sm:$0x4] }
 0x135   : > { %v2024_v18 = vpop.permute.xlu1 %2023 }
 0x136   : > { %2045 = vst.msk [vmem:[#allocation5 + $0xc] sm:$0xf] %vm2041_vm0, %v2024_v18 }
 0x137   : > { %v2022_v21 = vpop.permute.xlu0 %2021 }
 0x138   : > { %2044 = vst.msk [vmem:[#allocation5 + $0x8] sm:$0xf] %vm2041_vm0, %v2022_v21  ;;  %v3425_v21 = vld [vmem:[#allocation2 + $0x38] sm:$0x1] }
 0x139   : > { %v2181_v14 = vpop.permute.xlu1 %2180 }
 0x13a   : > { %2204 = vst.msk [vmem:[#allocation5 + $0x4] sm:$0xf] %vm2202_vm1, %v2181_v14 }
 0x13b   : > { %v2179_v20 = vpop.permute.xlu0 %2178 }
 0x13c   : > { %2203 = vst.msk [vmem:[#allocation5] sm:$0xf] %vm2202_vm1, %v2179_v20 }
 0x13d   : > { %v1349_v38 = vpop.permute.xlu1 %1348 }
 0x13e   : > { %1366 = vst.msk [vmem:[#allocation5 + $0x1c] sm:$0xf] %vm1358_vm9, %v1349_v38 }
 0x13f   : > { %v1347_v37 = vpop.permute.xlu0 %1346 }
 0x140   : > { %1365 = vst.msk [vmem:[#allocation5 + $0x18] sm:$0xf] %vm1358_vm9, %v1347_v37  ;;  %vm8231_vm9 = vmand %vm3370_vm7, %vm9237_vm8 }
 0x141   : > { %v1506_v25 = vpop.permute.xlu1 %1505  ;;  %v3374_v57 = vsel %vm8231_vm9, 0, %v3373_v32  ;;  %v3426_v20 = vsel %vm8231_vm9, 0, %v3425_v21 }
 0x142   : > { %1525 = vst.msk [vmem:[#allocation5 + $0x14] sm:$0xf] %vm1519_vm10, %v1506_v25  ;;  %3375 = vst [vmem:[#allocation2] sm:$0x1] %v3374_v57  ;;  %v7290_v57 = vmov 1935823168  }
 0x143   : > { %v1504_v36 = vpop.permute.xlu0 %1503  ;;  %3427 = vst [vmem:[#allocation2 + $0x38] sm:$0x1] %v3426_v20  ;;  %v2738_v17 = vunpack.c.l.s4 %v7290_v57 }
 0x144   : > { %1524 = vst.msk [vmem:[#allocation5 + $0x10] sm:$0xf] %vm1519_vm10, %v1504_v36 }
 0x145   : > { %v2185_v39 = vpop.permute.xlu1 %2184 }
 0x146   : > { %2206 = vst.msk [vmem:[#allocation5 + $0xc] sm:$0xf] %vm2202_vm1, %v2185_v39 }
 0x147   : > { %v2183_v27 = vpop.permute.xlu0 %2182 }
 0x148   : > { %2205 = vst.msk [vmem:[#allocation5 + $0x8] sm:$0xf] %vm2202_vm1, %v2183_v27  ;;  %v3429_v27 = vld [vmem:[#allocation2 + $0x4c] sm:$0x7] }
 0x149   : > { %v2342_v33 = vpop.permute.xlu1 %2341  ;;  %v6831_v14 = vld.sshfl [vmem:[#allocation2] sm:$0x13 pattern:$0x76325410] }
 0x14a   : > { %2365 = vst.msk [vmem:[#allocation5 + $0x4] sm:$0xf] %vm2363_vm2, %v2342_v33  ;;  %v3556_v38 = vshrl.u32 %v6831_v14, 16  ;;  %v3559_v37 = vshll.u32 %v6831_v14, 16  ;;  %v3523_v25 = vcombine.high %v6831_v14, %v6831_v14 }
 0x14b   : > { %v2340_v40 = vpop.permute.xlu0 %2339 }
 0x14c   : > { %2364 = vst.msk [vmem:[#allocation5] sm:$0xf] %vm2363_vm2, %v2340_v40  ;;  %v3558_v36 = vrot.slane %v3556_v38, 6  ;;  %v3561_v39 = vrot.slane %v3559_v37, 7 }
 0x14d   : > { %v1510_v44 = vpop.permute.xlu1 %1509  ;;  %v6827_v40 = vld.sshfl [vmem:[#allocation2 + $0x14] sm:$0x3 pattern:$0x76325410] }
 0x14e   : > { %1527 = vst.msk [vmem:[#allocation5 + $0x1c] sm:$0xf] %vm1519_vm10, %v1510_v44  ;;  %v3562_v44 = vor.u32 %v3561_v39, %v3558_v36  ;;  %3491 = vrot.lane.b32.xlu0 %v6827_v40, %s7285_s16 }
 0x14f   : > { %v1508_v45 = vpop.permute.xlu0 %1507 }
 0x150   : > { %1526 = vst.msk [vmem:[#allocation5 + $0x18] sm:$0xf] %vm1519_vm10, %v1508_v45  ;;  %vm3392_vm10 = vcmask 59394   ;;  %v3565_v45 = vshll.u32 %v3523_v25, 16  ;;  %v2739_v25 = vunpack.c.0.s8 %v2738_v17 }
 0x151   : > { %v1556_v49 = vpop.permute.xlu1 %1555 }
 0x152   : > { %1575 = vst.msk [vmem:[#allocation5 + $0x14] sm:$0xf] %vm1569_vm11, %v1556_v49  ;;  %v3563_v49 = vrot.slane %v3562_v44, 2 }
 0x153   : > { %v1554_v54 = vpop.permute.xlu0 %1553  ;;  %v7180_v50 = vld [vmem:[#allocation5] sm:$0xff]  }
 0x154   : > { %1574 = vst.msk [vmem:[#allocation5 + $0x10] sm:$0xf] %vm1569_vm11, %v1554_v54  ;;  %7089 = vmatprep.mubr.msk.bf16.mxu0 %vm2431_vm3, %v7180_v50  ;;  %v3567_v54 = vrot.slane %v3565_v45, 7  ;;  %v3430_v50 = vsel %vm8222_vm6, 0, %v3429_v27 }
 0x155   : > { %v2346_v63 = vpop.permute.xlu1 %2345  ;;  %3431 = vst [vmem:[#allocation2 + $0x4c] sm:$0x7] %v3430_v50 }
 0x156   : > { %2367 = vst.msk [vmem:[#allocation5 + $0xc] sm:$0xf] %vm2363_vm2, %v2346_v63 }
 0x157   : > { %v2344_v23 = vpop.permute.xlu0 %2343 }
 0x158   : > { %2366 = vst.msk [vmem:[#allocation5 + $0x8] sm:$0xf] %vm2363_vm2, %v2344_v23 }
 0x159   : > { %v1560_v2 = vpop.permute.xlu1 %1559 }
 0x15a   : > { %1577 = vst.msk [vmem:[#allocation5 + $0x1c] sm:$0xf] %vm1569_vm11, %v1560_v2 }
 0x15b   : > { %v1558_v5 = vpop.permute.xlu0 %1557 }
 0x15c   : > { %1576 = vst.msk [vmem:[#allocation5 + $0x18] sm:$0xf] %vm1569_vm11, %v1558_v5  ;;  %vm8240_vm11 = vmand %vm3392_vm10, %vm3365_vm5  ;;  %v3400_v5 = vld [vmem:[#allocation2 + $0x1c] sm:$0x4]  ;;  %vm2978_vm10 = vcmask 1041409  }
 0x15d   : > { %v1606_v6 = vpop.permute.xlu1 %1605  ;;  %v3395_v18 = vsel %vm8240_vm11, 0, %v3394_v35 }
 0x15e   : > { %1625 = vst.msk [vmem:[#allocation5 + $0x14] sm:$0xf] %vm1619_vm12, %v1606_v6  ;;  %3396 = vst [vmem:[#allocation2 + $0x14] sm:$0x4] %v3395_v18  ;;  %v3435_v6 = vld [vmem:[#allocation2 + $0x40] sm:$0x4] }
 0x15f   : > { %v1604_v7 = vpop.permute.xlu0 %1603  ;;  %v7183_v9 = vld [vmem:[#allocation5 + $0x8] sm:$0xff]  }
 0x160   : > { %1624 = vst.msk [vmem:[#allocation5 + $0x10] sm:$0xf] %vm1619_vm12, %v1604_v7  ;;  %7090 = vmatmul.mubr.msk.bf16.vlgmr.msra.gmra.mxu0 %vm2431_vm3, %v7183_v9  ;;  %v6874_v7 = vld.sshfl [vmem:[#allocation2 + $0x38] sm:$0x3 pattern:$0x76325410] }
 0x161   : > { %v1610_v10 = vpop.permute.xlu1 %1609  ;;  %4448 = vrot.lane.b32.xlu1 %v6874_v7, %s7286_s27 }
 0x162   : > { %1627 = vst.msk [vmem:[#allocation5 + $0x1c] sm:$0xf] %vm1619_vm12, %v1610_v10 }
 0x163   : > { %v1608_v24 = vpop.permute.xlu0 %1607 }
 0x164   : > { %1626 = vst.msk [vmem:[#allocation5 + $0x18] sm:$0xf] %vm1619_vm12, %v1608_v24  ;;  %vm3548_vm12 = vsmask.f32 1280 }
 0x165   : > { %v1767_v8 = vpop.permute.xlu1 %1766  ;;  %v6835_v33 = vld.sshfl [vmem:[#allocation2 + $0x14] sm:$0x13 pattern:$0x76325410] }
 0x166   : > { %1786 = vst.msk [vmem:[#allocation5 + $0x14] sm:$0xf] %vm1780_vm13, %v1767_v8  ;;  %v3643_v63 = vcombine.high %v6835_v33, %v6835_v33  ;;  %v3669_v23 = vshrl.u32 %v6835_v33, 16  ;;  %v3672_v2 = vshll.u32 %v6835_v33, 16 }
 0x167   : > { %v1765_v59 = vpop.permute.xlu0 %1764 }
 0x168   : > { %1785 = vst.msk [vmem:[#allocation5 + $0x10] sm:$0xf] %vm1780_vm13, %v1765_v59  ;;  %v3671_v24 = vrot.slane %v3669_v23, 6  ;;  %v3674_v8 = vrot.slane %v3672_v2, 7  ;;  %v3678_v59 = vshll.u32 %v3643_v63, 16  ;;  %v8299_v23 = vsub.s32 %v2739_v25, %v8289_v22 }
 0x169   : > { %v1771_v1 = vpop.permute.xlu1 %1770 }
 0x16a   : > { %1788 = vst.msk [vmem:[#allocation5 + $0x1c] sm:$0xf] %vm1780_vm13, %v1771_v1  ;;  %v3401_v1 = vsel %vm8240_vm11, 0, %v3400_v5 }
 0x16b   : > { %v1769_v3 = vpop.permute.xlu0 %1768  ;;  %3402 = vst [vmem:[#allocation2 + $0x1c] sm:$0x4] %v3401_v1 }
 0x16c   : > { %1787 = vst.msk [vmem:[#allocation5 + $0x18] sm:$0xf] %vm1780_vm13, %v1769_v3  ;;  %vm3549_vm13 = vsmask.f32 3336  ;;  %v3436_v3 = vsel %vm8240_vm11, 0, %v3435_v6 }
 0x16d   : > { %v1928_v29 = vpop.permute.xlu1 %1927  ;;  %3437 = vst [vmem:[#allocation2 + $0x40] sm:$0x4] %v3436_v3 }
 0x16e   : > { %1947 = vst.msk [vmem:[#allocation5 + $0x14] sm:$0xf] %vm1941_vm14, %v1928_v29  ;;  %v3432_v29 = vld [vmem:[#allocation2 + $0x3c] sm:$0x4] }
 0x16f   : > { %v1926_v41 = vpop.permute.xlu0 %1925 }
 0x170   : > { %1946 = vst.msk [vmem:[#allocation5 + $0x10] sm:$0xf] %vm1941_vm14, %v1926_v41  ;;  %v3675_v41 = vor.u32 %v3674_v8, %v3671_v24 }
 0x171   : > { %v1932_v42 = vpop.permute.xlu1 %1931 }
 0x172   : > { %1949 = vst.msk [vmem:[#allocation5 + $0x1c] sm:$0xf] %vm1941_vm14, %v1932_v42  ;;  %v3680_v42 = vrot.slane %v3678_v59, 7 }
 0x173   : > { %v1930_v11 = vpop.permute.xlu0 %1929 }
 0x174   : > { %1948 = vst.msk [vmem:[#allocation5 + $0x18] sm:$0xf] %vm1941_vm14, %v1930_v11  ;;  %vm3551_vm14 = vsmask.f32 5392  ;;  %v3433_v11 = vsel %vm8240_vm11, 0, %v3432_v29 }
 0x175   : > { %v1978_v34 = vpop.permute.xlu1 %1977  ;;  %3434 = vst [vmem:[#allocation2 + $0x3c] sm:$0x4] %v3433_v11 }
 0x176   : > { %1997 = vst.msk [vmem:[#allocation5 + $0x14] sm:$0xf] %vm1991_vm15, %v1978_v34  ;;  %v3397_v34 = vld [vmem:[#allocation2 + $0x18] sm:$0x4] }
 0x177   : > { %v1976_v46 = vpop.permute.xlu0 %1975 }
 0x178   : > { %1996 = vst.msk [vmem:[#allocation5 + $0x10] sm:$0xf] %vm1991_vm15, %v1976_v46  ;;  %v3398_v46 = vsel %vm8240_vm11, 0, %v3397_v34  ;;  %v3447_v34 = vld [vmem:[#allocation2] sm:$0x3] }
 0x179   : > { %v1982_v48 = vpop.permute.xlu1 %1981  ;;  %3399 = vst [vmem:[#allocation2 + $0x18] sm:$0x4] %v3398_v46 }
 0x17a   : > { %1999 = vst.msk [vmem:[#allocation5 + $0x1c] sm:$0xf] %vm1991_vm15, %v1982_v48  ;;  %v3676_v48 = vrot.slane %v3675_v41, 2 }
 0x17b   : > { %v1980_v51 = vpop.permute.xlu0 %1979 }
 0x17c   : > { %1998 = vst.msk [vmem:[#allocation5 + $0x18] sm:$0xf] %vm1991_vm15, %v1980_v51  ;;  %vm3550_vm15 = vmor %vm3548_vm12, %vm3549_vm13  ;;  %v6878_v51 = vld.sshfl [vmem:[#allocation2 + $0x4c] sm:$0x3 pattern:$0x76325410] }
 0x17d   : > { %v2028_v4 = vpop.permute.xlu1 %2027  ;;  %4502 = vrot.lane.b32.xlu1 %v6878_v51, %s7288_s30  ;;  %vm3013_vm13 = vcmask 58368  }
 0x17e   : > { %2047 = vst.msk [vmem:[#allocation5 + $0x14] sm:$0xf] %vm2041_vm0, %v2028_v4 }
 0x17f   : > { %v2026_v55 = vpop.permute.xlu0 %2025  ;;  %3451 = vst.msk [vmem:[#allocation6] sm:$0x3] %vm3013_vm13, %v3447_v34 }
 0x180   : > { %2046 = vst.msk [vmem:[#allocation5 + $0x10] sm:$0xf] %vm2041_vm0, %v2026_v55  ;;  %v3444_v55 = vld [vmem:[#allocation2 + $0x4c] sm:$0x4] }
 0x181   : > { %v2032_v15 = vpop.permute.xlu1 %2031 }
 0x182   : > { %2049 = vst.msk [vmem:[#allocation5 + $0x1c] sm:$0xf] %vm2041_vm0, %v2032_v15  ;;  %v3445_v15 = vsel %vm8240_vm11, 0, %v3444_v55 }
 0x183   : > { %v2030_v43 = vpop.permute.xlu0 %2029  ;;  %3446 = vst [vmem:[#allocation2 + $0x4c] sm:$0x4] %v3445_v15 }
 0x184   : > { %2048 = vst.msk [vmem:[#allocation5 + $0x18] sm:$0xf] %vm2041_vm0, %v2030_v43  ;;  %vm3553_vm0 = vsmask.f32 7448  ;;  %v3441_v43 = vld [vmem:[#allocation2 + $0x48] sm:$0x4] }
 0x185   : > { %v2189_v61 = vpop.permute.xlu1 %2188 }
 0x186   : > { %2208 = vst.msk [vmem:[#allocation5 + $0x14] sm:$0xf] %vm2202_vm1, %v2189_v61  ;;  %v3406_v61 = vld [vmem:[#allocation2 + $0x24] sm:$0x4] }
 0x187   : > { %v2187_v56 = vpop.permute.xlu0 %2186 }
 0x188   : > { %2207 = vst.msk [vmem:[#allocation5 + $0x10] sm:$0xf] %vm2202_vm1, %v2187_v56  ;;  %v3442_v56 = vsel %vm8240_vm11, 0, %v3441_v43 }
 0x189   : > { %v2193_v12 = vpop.permute.xlu1 %2192  ;;  %3443 = vst [vmem:[#allocation2 + $0x48] sm:$0x4] %v3442_v56 }
 0x18a   : > { %2210 = vst.msk [vmem:[#allocation5 + $0x1c] sm:$0xf] %vm2202_vm1, %v2193_v12  ;;  %v3407_v12 = vsel %vm8240_vm11, 0, %v3406_v61 }
 0x18b   : > { %v2191_v47 = vpop.permute.xlu0 %2190  ;;  %3408 = vst [vmem:[#allocation2 + $0x24] sm:$0x4] %v3407_v12 }
 0x18c   : > { %2209 = vst.msk [vmem:[#allocation5 + $0x18] sm:$0xf] %vm2202_vm1, %v2191_v47  ;;  %vm3552_vm1 = vmor %vm3550_vm15, %vm3551_vm14  ;;  %v3438_v47 = vld [vmem:[#allocation2 + $0x44] sm:$0x4]  ;;  %vm2984_vm14 = vcmask 1043459   ;;  %vm3020_vm15 = vcmask 1044484  }
 0x18d   : > { %v2350_v53 = vpop.permute.xlu1 %2349 }
 0x18e   : > { %2369 = vst.msk [vmem:[#allocation5 + $0x14] sm:$0xf] %vm2363_vm2, %v2350_v53  ;;  %v3403_v53 = vld [vmem:[#allocation2 + $0x20] sm:$0x4] }
 0x18f   : > { %v2348_v58 = vpop.permute.xlu0 %2347 }
 0x190   : > { %2368 = vst.msk [vmem:[#allocation5 + $0x10] sm:$0xf] %vm2363_vm2, %v2348_v58  ;;  %v3439_v58 = vsel %vm8240_vm11, 0, %v3438_v47 }
 0x191   : > { %v2354_v60 = vpop.permute.xlu1 %2353  ;;  %3440 = vst [vmem:[#allocation2 + $0x44] sm:$0x4] %v3439_v58 }
 0x192   : > { %2371 = vst.msk [vmem:[#allocation5 + $0x1c] sm:$0xf] %vm2363_vm2, %v2354_v60  ;;  %v3404_v60 = vsel %vm8240_vm11, 0, %v3403_v53  ;;  %vm9239_vm11 = vcmask 1042434  }
 0x193   : > { %v2352_v16 = vpop.permute.xlu0 %2351  ;;  %3405 = vst [vmem:[#allocation2 + $0x20] sm:$0x4] %v3404_v60 }
 0x194   : > { %2370 = vst.msk [vmem:[#allocation5 + $0x18] sm:$0xf] %vm2363_vm2, %v2352_v16  ;;  %vm8252_vm2 = vmor %vm3552_vm1, %vm3553_vm0  ;;  %v8285_v16 = vld [vmem:[%s9227_s2] ss:$0 sm:$0xff]  ;;  %vm3041_vm0 = vsmask.f32 2306 }
 0x195   : > { %v3568_v10 = vsel %vm8252_vm2, %v3563_v49, %v3567_v54  ;;  %v3681_v4 = vsel %vm8252_vm2, %v3676_v48, %v3680_v42  ;;  %vm8338_vm1 = vmand %vm3040_vm4, %vm3041_vm0  ;;  %vm3503_vm4 = vcmask 123968  }
 0x196   : > { %3611 = vrot.lane.b32.xlu0 %v3568_v10, %s7287_s29 }
 0x197   : > { %v7184_v26 = vld [vmem:[#allocation5 + $0x10] sm:$0xff]  }
 0x198   : > { %7093 = vmatprep.mubr.msk.bf16.mxu0 %vm2431_vm3, %v7184_v26 }
 0x19a   : > { %3724 = vrot.lane.b32.xlu0 %v3681_v4, %s7277_s28 }
 0x19b   : > { %v7185_v28 = vld [vmem:[#allocation5 + $0x18] sm:$0xff]  }
 0x19c   : > { %7094 = vmatmul.mubr.msk.bf16.gmra.mxu0 %vm2431_vm3, %v7185_v28  ;;  %v7289_v28 = vmov 1966171168  }
 0x19d   : > { %v2543_v13 = vunpack.c.l.s4 %v7289_v28 }
 0x19f   : > { %v2544_v32 = vunpack.c.0.s8 %v2543_v13 }
 0x1a1   : > { %v8294_v37 = vsub.s32 %v2544_v32, %v8289_v22 }
 0x220   : > { %v7091_v26 = vpop.f32.mrf.mxu0 }
 0x221   : > { %v2487_v30 = vadd.f32 %v7091_v26, %v8285_v16 }
 0x222   : > { %v2478_v19 = vpop.f32.mrf.mxu0 }
 0x223   : > { %v2479_v62 = vadd.f32 %v8285_v16, %v2478_v19  ;;  %v2519_v35 = vmul.f32 0.2, %v2487_v30  ;;  %vm2511_vm3 = vcmp.ge.f32.partialorder %v2487_v30, 0.0 }
 0x224   : > { %v7092_v0 = vpop.f32.mrf.mxu0 }
 0x225   : > { %v2490_v18 = vadd.f32 %v7092_v0, %v8285_v16  ;;  %v2517_v14 = vmul.f32 0.2, %v2479_v62  ;;  %vm2509_vm6 = vcmp.ge.f32.partialorder %v2479_v62, 0.0  ;;  %v2527_v36 = vsel %vm2511_vm3, %v2487_v30, %v2519_v35 }
 0x226   : > { %v2481_v21 = vpop.f32.mrf.mxu0  ;;  %vm3623_vm3 = vcmask 189568  }
 0x227   : > { %vm2512_vm5 = vcmp.ge.f32.partialorder %v2490_v18, 0.0  ;;  %v2520_v20 = vmul.f32 0.2, %v2490_v18  ;;  %v2482_v38 = vadd.f32 %v8285_v16, %v2481_v21  ;;  %v2525_v44 = vsel %vm2509_vm6, %v2479_v62, %v2517_v14 }
 0x229   : > { %v2528_v39 = vsel %vm2512_vm5, %v2490_v18, %v2520_v20  ;;  %vm2510_vm7 = vcmp.ge.f32.partialorder %v2482_v38, 0.0  ;;  %v2518_v27 = vmul.f32 0.2, %v2482_v38  ;;  %vm3736_vm5 = vcmask 255168  }
 0x22a   : > { %v2534_v33 = vpack.c.bf16 %v2528_v39, %v2527_v36  ;;  %v6824_v40 = vpack.c.bf16 %v2528_v39, %v2528_v39 }
 0x22b   : > { %v2526_v45 = vsel %vm2510_vm7, %v2482_v38, %v2518_v27 }
 0x22c   : > { %v2597_v49 = vrot.slane %v2534_v33, %v8294_v37  ;;  %v2604_v54 = vrot.slane %v6824_v40, %v8294_v37  ;;  %v2533_v50 = vpack.c.bf16 %v2526_v45, %v2525_v44  ;;  %v6823_v63 = vpack.c.bf16 %v2526_v45, %v2526_v45 }
 0x22e   : > { %v2605_v2 = vcombine.high %v2597_v49, %v2597_v49  ;;  %v2606_v5 = vcombine.high %v2604_v54, %v2604_v54  ;;  %v2613_v6 = vrot.slane %v2597_v49, %v8294_v37  ;;  %v2620_v7 = vrot.slane %v2604_v54, %v8294_v37 }
 0x22f   : > { %v2548_v10 = vrot.slane %v2533_v50, %v8294_v37  ;;  %v2555_v24 = vrot.slane %v6823_v63, %v8294_v37 }
 0x230   : > { %v2627_v8 = vrot.slane %v2605_v2, %v8294_v37  ;;  %v2634_v59 = vrot.slane %v2606_v5, %v8294_v37  ;;  %v2635_v1 = vcombine.high %v2613_v6, %v2613_v6  ;;  %v2636_v3 = vcombine.high %v2620_v7, %v2620_v7  ;;  %v3046_v2 = vld [vmem:[#allocation2 + $0x2c] sm:$0x7] }
 0x231   : > { %v2799_v29 = vrot.slane %v2613_v6, %v8299_v23  ;;  %v3117_v41 = vrot.slane %v2620_v7, %v8299_v23  ;;  %v2556_v42 = vcombine.high %v2548_v10, %v2548_v10  ;;  %v2557_v11 = vcombine.high %v2555_v24, %v2555_v24 }
 0x232   : > { %v2637_v46 = vcombine.high %v2627_v8, %v2627_v8  ;;  %v2638_v48 = vcombine.high %v2634_v59, %v2634_v59  ;;  %v2813_v51 = vrot.slane %v2627_v8, %v8299_v23  ;;  %v2827_v4 = vrot.slane %v2635_v1, %v8299_v23 }
 0x233   : > { %v2806_v55 = vrot.slane %v2799_v29, %v8299_v23  ;;  %v3124_v15 = vrot.slane %v3117_v41, %v8299_v23  ;;  %v3131_v43 = vrot.slane %v2634_v59, %v8299_v23  ;;  %v3145_v61 = vrot.slane %v2636_v3, %v8299_v23  ;;  %v3356_v59 = vld [vmem:[#allocation2 + $0x8] sm:$0x7] }
 0x234   : > { %v2820_v56 = vrot.slane %v2813_v51, %v8299_v23  ;;  %v2834_v12 = vrot.slane %v2827_v4, %v8299_v23  ;;  %v2841_v47 = vrot.slane %v2637_v46, %v8299_v23  ;;  %v3159_v53 = vrot.slane %v2638_v48, %v8299_v23 }
 0x235   : > { %v2965_v58 = vunpack.c.l.b16 %v2806_v55  ;;  %v3138_v60 = vrot.slane %v3131_v43, %v8299_v23  ;;  %v3152_v26 = vrot.slane %v3145_v61, %v8299_v23  ;;  %v3283_v28 = vunpack.c.l.b16 %v3124_v15 }
 0x236   : > { %v2848_v13 = vrot.slane %v2841_v47, %v8299_v23  ;;  %v2966_v52 = vunpack.c.l.b16 %v2820_v56  ;;  %v2967_v30 = vunpack.c.l.b16 %v2834_v12  ;;  %v3166_v19 = vrot.slane %v3159_v53, %v8299_v23  ;;  %v3492_v12 = vpop.permute.xlu0 %3491 }
 0x237   : > { %v3284_v62 = vunpack.c.l.b16 %v3138_v60  ;;  %v3285_v0 = vunpack.c.l.b16 %v3152_v26  ;;  %v2564_v32 = vrot.slane %v2548_v10, %v8294_v37  ;;  %v2571_v57 = vrot.slane %v2555_v24, %v8294_v37  ;;  %3504 = vst.msk [vmem:[#allocation6] sm:$0x3] %vm3503_vm4, %v3492_v12 }
 0x238   : > { %v2968_v17 = vunpack.c.l.b16 %v2848_v13  ;;  %v2986_v35 = vrot.slane %v2966_v52, 7  ;;  %v2988_v18 = vrot.slane %v2967_v30, 6  ;;  %v3286_v21 = vunpack.c.l.b16 %v3166_v19 }
 0x239   : > { %v3301_v14 = vrot.slane %v3284_v62, 7  ;;  %v3303_v20 = vrot.slane %v3285_v0, 6  ;;  %v2578_v38 = vrot.slane %v2556_v42, %v8294_v37  ;;  %v2585_v25 = vrot.slane %v2557_v11, %v8294_v37 }
 0x23a   : > { %v2987_v36 = vsel %vm2978_vm10, %v2986_v35, %v2965_v58  ;;  %v2990_v39 = vrot.slane %v2968_v17, 5  ;;  %v3022_v27 = vsel %vm9239_vm11, %v2986_v35, %v2965_v58  ;;  %v3305_v33 = vrot.slane %v3286_v21, 5 }
 0x23b   : > { %v2989_v40 = vsel %vm9239_vm11, %v2988_v18, %v2987_v36  ;;  %v3023_v44 = vsel %vm2984_vm14, %v2988_v18, %v3022_v27  ;;  %v3302_v45 = vsel %vm2978_vm10, %v3301_v14, %v3283_v28  ;;  %v3335_v49 = vsel %vm9239_vm11, %v3301_v14, %v3283_v28 }
 0x23c   : > { %v2991_v54 = vsel %vm2984_vm14, %v2990_v39, %v2989_v40  ;;  %v3024_v50 = vsel %vm3020_vm15, %v2990_v39, %v3023_v44  ;;  %v3304_v5 = vsel %vm9239_vm11, %v3303_v20, %v3302_v45  ;;  %v3336_v6 = vsel %vm2984_vm14, %v3303_v20, %v3335_v49  ;;  %v3612_v39 = vpop.permute.xlu0 %3611 }
 0x23d   : > { %v3005_v7 = vpack.c.b16 %v2991_v54, %v2991_v54  ;;  %v3032_v10 = vpack.c.b16 %v3024_v50, %v3024_v50  ;;  %v3306_v24 = vsel %vm2984_vm14, %v3305_v33, %v3304_v5  ;;  %v3337_v8 = vsel %vm3020_vm15, %v3305_v33, %v3336_v6  ;;  %3624 = vst.msk [vmem:[#allocation6] sm:$0x3] %vm3623_vm3, %v3612_v39 }
 0x23e   : > { %v3320_v1 = vpack.c.b16 %v3306_v24, %v3306_v24  ;;  %v3345_v3 = vpack.c.b16 %v3337_v8, %v3337_v8  ;;  %v2586_v29 = vcombine.high %v2564_v32, %v2564_v32  ;;  %v2587_v41 = vcombine.high %v2571_v57, %v2571_v57 }
 0x23f   : > { %3015 = vst.msk [vmem:[#allocation2 + $0x40] sm:$0x3] %vm3013_vm13, %v3005_v7  ;;  %v3047_v42 = vsel %vm8338_vm1, %v3032_v10, %v3046_v2  ;;  %v2588_v11 = vcombine.high %v2578_v38, %v2578_v38  ;;  %v2589_v34 = vcombine.high %v2585_v25, %v2585_v25  ;;  %v2743_v46 = vrot.slane %v2564_v32, %v8299_v23  ;;  %v3043_v10 = vld [vmem:[#allocation2 + $0x28] sm:$0x7] }
 0x240   : > { %3048 = vst [vmem:[#allocation2 + $0x2c] sm:$0x7] %v3047_v42  ;;  %3329 = vst.msk [vmem:[#allocation2 + $0x1c] sm:$0x3] %vm3013_vm13, %v3320_v1  ;;  %v3357_v48 = vsel %vm8338_vm1, %v3345_v3, %v3356_v59  ;;  %v2757_v51 = vrot.slane %v2578_v38, %v8299_v23  ;;  %v2771_v4 = vrot.slane %v2586_v29, %v8299_v23 }
 0x241   : > { %v3061_v55 = vrot.slane %v2571_v57, %v8299_v23  ;;  %3358 = vst [vmem:[#allocation2 + $0x8] sm:$0x7] %v3357_v48  ;;  %v2750_v15 = vrot.slane %v2743_v46, %v8299_v23  ;;  %v2785_v43 = vrot.slane %v2588_v11, %v8299_v23  ;;  %v3075_v61 = vrot.slane %v2585_v25, %v8299_v23  ;;  %v3353_v11 = vld [vmem:[#allocation2 + $0x4] sm:$0x7] }
 0x242   : > { %v3089_v56 = vrot.slane %v2587_v41, %v8299_v23  ;;  %v2764_v47 = vrot.slane %v2757_v51, %v8299_v23  ;;  %v2778_v53 = vrot.slane %v2771_v4, %v8299_v23  ;;  %v3103_v60 = vrot.slane %v2589_v34, %v8299_v23  ;;  %v3725_v51 = vpop.permute.xlu0 %3724 }
 0x243   : > { %v3068_v58 = vrot.slane %v3061_v55, %v8299_v23  ;;  %v2792_v26 = vrot.slane %v2785_v43, %v8299_v23  ;;  %v3082_v28 = vrot.slane %v3075_v61, %v8299_v23  ;;  %v2961_v52 = vunpack.c.l.b16 %v2750_v15  ;;  %3737 = vst.msk [vmem:[#allocation6] sm:$0x3] %vm3736_vm5, %v3725_v51 }
 0x244   : > { %v3096_v13 = vrot.slane %v3089_v56, %v8299_v23  ;;  %v2962_v30 = vunpack.c.l.b16 %v2764_v47  ;;  %v2963_v19 = vunpack.c.l.b16 %v2778_v53  ;;  %v3110_v62 = vrot.slane %v3103_v60, %v8299_v23 }
 0x245   : > { %v2964_v0 = vunpack.c.l.b16 %v2792_v26  ;;  %v3280_v32 = vunpack.c.l.b16 %v3082_v28  ;;  %v3279_v18 = vunpack.c.l.b16 %v3068_v58 }
 0x246   : > { %v3281_v57 = vunpack.c.l.b16 %v3096_v13  ;;  %v2977_v17 = vrot.slane %v2962_v30, 7  ;;  %v2980_v35 = vrot.slane %v2963_v19, 6  ;;  %v3282_v21 = vunpack.c.l.b16 %v3110_v62  ;;  %v6844_v14 = vld.sshfl [vmem:[#allocation2 + $0x40] sm:$0x3 pattern:$0x76325410] }
 0x247   : > { %v3416_v20 = vld [vmem:[#allocation2 + $0x2c] sm:$0x1]  ;;  %v2983_v38 = vrot.slane %v2964_v0, 5  ;;  %v3295_v25 = vrot.slane %v3280_v32, 7  ;;  %3832 = vrot.lane.b32.xlu1 %v6844_v14, %s7291_s14 }
 0x248   : > { %v3297_v36 = vrot.slane %v3281_v57, 6  ;;  %v3379_v27 = vld [vmem:[#allocation2 + $0x8] sm:$0x1]  ;;  %v3417_v33 = vsel %vm8231_vm9, 0, %v3416_v20  ;;  %v2979_v40 = vsel %vm2978_vm10, %v2977_v17, %v2961_v52  ;;  %v3018_v44 = vsel %vm9239_vm11, %v2977_v17, %v2961_v52 }
 0x249   : > { %v3299_v45 = vrot.slane %v3282_v21, 5  ;;  %v3380_v49 = vsel %vm8231_vm9, 0, %v3379_v27  ;;  %3418 = vst [vmem:[#allocation2 + $0x2c] sm:$0x1] %v3417_v33  ;;  %v2982_v54 = vsel %vm9239_vm11, %v2980_v35, %v2979_v40  ;;  %v3019_v50 = vsel %vm2984_vm14, %v2980_v35, %v3018_v44 }
 0x24a   : > { %v3296_v2 = vsel %vm2978_vm10, %v3295_v25, %v3279_v18  ;;  %v6829_v5 = vld.sshfl [vmem:[#allocation2 + $0x1c] sm:$0x3 pattern:$0x76325410]  ;;  %3381 = vst [vmem:[#allocation2 + $0x8] sm:$0x1] %v3380_v49  ;;  %v2985_v6 = vsel %vm2984_vm14, %v2983_v38, %v2982_v54  ;;  %v3021_v7 = vsel %vm3020_vm15, %v2983_v38, %v3019_v50  ;;  %v3332_v8 = vsel %vm9239_vm11, %v3295_v25, %v3279_v18 }
 0x24b   : > { %v3298_v24 = vsel %vm9239_vm11, %v3297_v36, %v3296_v2  ;;  %3495 = vrot.lane.b32.xlu0 %v6829_v5, %s7285_s16  ;;  %v3004_v59 = vpack.c.b16 %v2985_v6, %v2985_v6  ;;  %v3031_v1 = vpack.c.b16 %v3021_v7, %v3021_v7  ;;  %v3333_v29 = vsel %vm2984_vm14, %v3297_v36, %v3332_v8  ;;  %v6837_v58 = vld.sshfl [vmem:[#allocation2 + $0x1c] sm:$0x13 pattern:$0x76325410] }
 0x24c   : > { %v3300_v3 = vsel %vm2984_vm14, %v3299_v45, %v3298_v24  ;;  %4164 = vrot.lane.b32.xlu1 %v6829_v5, %s7292_s15  ;;  %v3334_v42 = vsel %vm3020_vm15, %v3299_v45, %v3333_v29  ;;  %v6852_v28 = vld.sshfl [vmem:[#allocation2 + $0x40] sm:$0x13 pattern:$0x76325410]  ;;  %v3659_v52 = vcombine.high %v6837_v58, %v6837_v58  ;;  %v3697_v62 = vshrl.u32 %v6837_v58, 16 }
 0x24d   : > { %v3319_v41 = vpack.c.b16 %v3300_v3, %v3300_v3  ;;  %3014 = vst.msk [vmem:[#allocation2 + $0x3c] sm:$0x3] %vm3013_vm13, %v3004_v59  ;;  %v3044_v34 = vsel %vm8338_vm1, %v3031_v1, %v3043_v10  ;;  %v3344_v46 = vpack.c.b16 %v3334_v42, %v3334_v42  ;;  %v3700_v57 = vshll.u32 %v6837_v58, 16 }
 0x24e   : > { %3045 = vst [vmem:[#allocation2 + $0x28] sm:$0x7] %v3044_v34  ;;  %v4015_v17 = vshrl.u32 %v6852_v28, 16  ;;  %v4018_v35 = vshll.u32 %v6852_v28, 16  ;;  %v8410_v20 = vshll.u32 %v3659_v52, 16  ;;  %v3983_v38 = vcombine.high %v6852_v28, %v6852_v28 }
 0x24f   : > { %3328 = vst.msk [vmem:[#allocation2 + $0x18] sm:$0x3] %vm3013_vm13, %v3319_v41  ;;  %4496 = vrot.lane.b32.xlu0 %v6844_v14, %s7288_s30  ;;  %v3354_v48 = vsel %vm8338_vm1, %v3344_v46, %v3353_v11  ;;  %v8412_v40 = vrot.slane %v3697_v62, 6  ;;  %v8414_v44 = vrot.slane %v3700_v57, 7 }
 0x250   : > { %3355 = vst [vmem:[#allocation2 + $0x4] sm:$0x7] %v3354_v48  ;;  %v8416_v54 = vrot.slane %v4015_v17, 6  ;;  %v8418_v50 = vrot.slane %v4018_v35, 7  ;;  %v3708_v7 = vrot.slane %v8410_v20, 7  ;;  %v8423_v10 = vshll.u32 %v3983_v38, 16 }
 0x251   : > { %v3449_v4 = vld [vmem:[#allocation2 + $0x8] sm:$0x3]  ;;  %v3703_v41 = vor.u32 %v8414_v44, %v8412_v40 }
 0x252   : > { %3453 = vst.msk [vmem:[#allocation6 + $0x4] sm:$0x3] %vm3013_vm13, %v3449_v4  ;;  %v4021_v42 = vor.u32 %v8418_v50, %v8416_v54 }
 0x254   : > { %v6843_v55 = vld.sshfl [vmem:[#allocation2 + $0x3c] sm:$0x3 pattern:$0x76325410]  ;;  %v4022_v44 = vrot.slane %v4021_v42, 2 }
 0x255   : > { %v3413_v15 = vld [vmem:[#allocation2 + $0x28] sm:$0x1]  ;;  %3830 = vrot.lane.b32.xlu0 %v6843_v55, %s7291_s14 }
 0x256   : > { %v6828_v43 = vld.sshfl [vmem:[#allocation2 + $0x18] sm:$0x3 pattern:$0x76325410]  ;;  %v3414_v61 = vsel %vm8231_vm9, 0, %v3413_v15 }
 0x257   : > { %3493 = vrot.lane.b32.xlu1 %v6828_v43, %s7285_s16  ;;  %v3376_v56 = vld [vmem:[#allocation2 + $0x4] sm:$0x1]  ;;  %3415 = vst [vmem:[#allocation2 + $0x28] sm:$0x1] %v3414_v61 }
 0x258   : > { %v3377_v12 = vsel %vm8231_vm9, 0, %v3376_v56 }
 0x259   : > { %3378 = vst [vmem:[#allocation2 + $0x4] sm:$0x1] %v3377_v12  ;;  %4162 = vrot.lane.b32.xlu0 %v6828_v43, %s7292_s15 }
 0x25c   : > { %v7095_v47 = vpop.f32.mrf.mxu0 }
 0x25d   : > { %v2503_v53 = vadd.f32 %v7095_v47, %v8285_v16 }
 0x25e   : > { %v2494_v60 = vpop.f32.mrf.mxu0 }
 0x25f   : > { %v2495_v26 = vadd.f32 %v8285_v16, %v2494_v60  ;;  %v2523_v30 = vmul.f32 0.2, %v2503_v53  ;;  %vm2515_vm6 = vcmp.ge.f32.partialorder %v2503_v53, 0.0 }
 0x260   : > { %v7096_v13 = vpop.f32.mrf.mxu0  ;;  %v3448_v0 = vld [vmem:[#allocation2 + $0x4] sm:$0x3] }
 0x261   : > { %v2506_v19 = vadd.f32 %v7096_v13, %v8285_v16  ;;  %3452 = vst.msk [vmem:[#allocation6 + $0x2] sm:$0x3] %vm3013_vm13, %v3448_v0  ;;  %v2521_v18 = vmul.f32 0.2, %v2495_v26  ;;  %vm2513_vm0 = vcmp.ge.f32.partialorder %v2495_v26, 0.0  ;;  %v2531_v25 = vsel %vm2515_vm6, %v2503_v53, %v2523_v30 }
 0x262   : > { %v2497_v32 = vpop.f32.mrf.mxu0  ;;  %vm4400_vm6 = vcmask 779968  }
 0x263   : > { %vm2516_vm7 = vcmp.ge.f32.partialorder %v2506_v19, 0.0  ;;  %v2524_v21 = vmul.f32 0.2, %v2506_v19  ;;  %v2498_v14 = vadd.f32 %v8285_v16, %v2497_v32  ;;  %v2529_v45 = vsel %vm2513_vm0, %v2495_v26, %v2521_v18 }
 0x264   : > { %vm4508_vm0 = vcmask 911168  }
 0x265   : > { %v2532_v36 = vsel %vm2516_vm7, %v2506_v19, %v2524_v21  ;;  %vm2514_vm8 = vcmp.ge.f32.partialorder %v2498_v14, 0.0  ;;  %v2522_v39 = vmul.f32 0.2, %v2498_v14  ;;  %vm4454_vm7 = vcmask 845568  }
 0x266   : > { %v2536_v27 = vpack.c.bf16 %v2532_v36, %v2531_v25  ;;  %v6826_v33 = vpack.c.bf16 %v2532_v36, %v2532_v36 }
 0x267   : > { %v2530_v49 = vsel %vm2514_vm8, %v2498_v14, %v2522_v39  ;;  %vm7301_vm8 = vmmov 0  }
 0x268   : > { %v2695_v16 = vrot.slane %v2536_v27, %v8294_v37  ;;  %v2702_v2 = vrot.slane %v6826_v33, %v8294_v37  ;;  %v2535_v5 = vpack.c.bf16 %v2530_v49, %v2529_v45  ;;  %v6825_v6 = vpack.c.bf16 %v2530_v49, %v2530_v49 }
 0x26a   : > { %v2703_v24 = vcombine.high %v2695_v16, %v2695_v16  ;;  %v2704_v8 = vcombine.high %v2702_v2, %v2702_v2  ;;  %v2711_v59 = vrot.slane %v2695_v16, %v8294_v37  ;;  %v2718_v1 = vrot.slane %v2702_v2, %v8294_v37 }
 0x26b   : > { %v2646_v3 = vrot.slane %v2535_v5, %v8294_v37  ;;  %v2653_v29 = vrot.slane %v6825_v6, %v8294_v37 }
 0x26c   : > { %v2725_v11 = vrot.slane %v2703_v24, %v8294_v37  ;;  %v2732_v34 = vrot.slane %v2704_v8, %v8294_v37  ;;  %v2733_v46 = vcombine.high %v2711_v59, %v2711_v59  ;;  %v2734_v48 = vcombine.high %v2718_v1, %v2718_v1 }
 0x26d   : > { %v2911_v51 = vrot.slane %v2711_v59, %v8299_v23  ;;  %v3229_v4 = vrot.slane %v2718_v1, %v8299_v23  ;;  %v2654_v55 = vcombine.high %v2646_v3, %v2646_v3  ;;  %v2655_v15 = vcombine.high %v2653_v29, %v2653_v29 }
 0x26e   : > { %v2735_v43 = vcombine.high %v2725_v11, %v2725_v11  ;;  %v2736_v61 = vcombine.high %v2732_v34, %v2732_v34  ;;  %v2925_v56 = vrot.slane %v2725_v11, %v8299_v23  ;;  %v2939_v12 = vrot.slane %v2733_v46, %v8299_v23 }
 0x26f   : > { %v2918_v47 = vrot.slane %v2911_v51, %v8299_v23  ;;  %v3236_v53 = vrot.slane %v3229_v4, %v8299_v23  ;;  %v3243_v58 = vrot.slane %v2732_v34, %v8299_v23  ;;  %v3257_v60 = vrot.slane %v2734_v48, %v8299_v23  ;;  %v3052_v34 = vld [vmem:[#allocation2 + $0x34] sm:$0x7] }
 0x270   : > { %v2932_v26 = vrot.slane %v2925_v56, %v8299_v23  ;;  %v2946_v28 = vrot.slane %v2939_v12, %v8299_v23  ;;  %v2953_v13 = vrot.slane %v2735_v43, %v8299_v23  ;;  %v3271_v52 = vrot.slane %v2736_v61, %v8299_v23  ;;  %v3362_v43 = vld [vmem:[#allocation2 + $0x10] sm:$0x7] }
 0x271   : > { %v2973_v30 = vunpack.c.l.b16 %v2918_v47  ;;  %v3250_v19 = vrot.slane %v3243_v58, %v8299_v23  ;;  %v3264_v62 = vrot.slane %v3257_v60, %v8299_v23  ;;  %v3291_v0 = vunpack.c.l.b16 %v3236_v53 }
 0x272   : > { %v2960_v32 = vrot.slane %v2953_v13, %v8299_v23  ;;  %v2974_v57 = vunpack.c.l.b16 %v2932_v26  ;;  %v2975_v17 = vunpack.c.l.b16 %v2946_v28  ;;  %v3278_v35 = vrot.slane %v3271_v52, %v8299_v23 }
 0x273   : > { %v3292_v18 = vunpack.c.l.b16 %v3250_v19  ;;  %v3293_v21 = vunpack.c.l.b16 %v3264_v62  ;;  %v2662_v14 = vrot.slane %v2646_v3, %v8294_v37  ;;  %v2669_v38 = vrot.slane %v2653_v29, %v8294_v37 }
 0x274   : > { %v2976_v25 = vunpack.c.l.b16 %v2960_v32  ;;  %v2998_v36 = vrot.slane %v2974_v57, 7  ;;  %v3000_v39 = vrot.slane %v2975_v17, 6  ;;  %v3294_v27 = vunpack.c.l.b16 %v3278_v35 }
 0x275   : > { %v3313_v33 = vrot.slane %v3292_v18, 7  ;;  %v3315_v45 = vrot.slane %v3293_v21, 6  ;;  %v2676_v49 = vrot.slane %v2654_v55, %v8294_v37  ;;  %v2683_v16 = vrot.slane %v2655_v15, %v8294_v37 }
 0x276   : > { %v2999_v2 = vsel %vm2978_vm10, %v2998_v36, %v2973_v30  ;;  %v3002_v5 = vrot.slane %v2976_v25, 5  ;;  %v3028_v6 = vsel %vm9239_vm11, %v2998_v36, %v2973_v30  ;;  %v3317_v24 = vrot.slane %v3294_v27, 5 }
 0x277   : > { %v3001_v8 = vsel %vm9239_vm11, %v3000_v39, %v2999_v2  ;;  %v3029_v59 = vsel %vm2984_vm14, %v3000_v39, %v3028_v6  ;;  %v3314_v1 = vsel %vm2978_vm10, %v3313_v33, %v3291_v0  ;;  %v3341_v3 = vsel %vm9239_vm11, %v3313_v33, %v3291_v0 }
 0x278   : > { %v3003_v29 = vsel %vm2984_vm14, %v3002_v5, %v3001_v8  ;;  %v3030_v11 = vsel %vm3020_vm15, %v3002_v5, %v3029_v59  ;;  %v3316_v46 = vsel %vm9239_vm11, %v3315_v45, %v3314_v1  ;;  %v3342_v48 = vsel %vm2984_vm14, %v3315_v45, %v3341_v3 }
 0x279   : > { %v3007_v51 = vpack.c.b16 %v3003_v29, %v3003_v29  ;;  %v3034_v4 = vpack.c.b16 %v3030_v11, %v3030_v11  ;;  %v3318_v55 = vsel %vm2984_vm14, %v3317_v24, %v3316_v46  ;;  %v3343_v15 = vsel %vm3020_vm15, %v3317_v24, %v3342_v48 }
 0x27a   : > { %v3322_v61 = vpack.c.b16 %v3318_v55, %v3318_v55  ;;  %v3347_v56 = vpack.c.b16 %v3343_v15, %v3343_v15  ;;  %v2684_v12 = vcombine.high %v2662_v14, %v2662_v14  ;;  %v2685_v47 = vcombine.high %v2669_v38, %v2669_v38 }
 0x27b   : > { %3017 = vst.msk [vmem:[#allocation2 + $0x48] sm:$0x3] %vm3013_vm13, %v3007_v51  ;;  %v3053_v53 = vsel %vm8338_vm1, %v3034_v4, %v3052_v34  ;;  %v2686_v58 = vcombine.high %v2676_v49, %v2676_v49  ;;  %v2687_v60 = vcombine.high %v2683_v16, %v2683_v16  ;;  %v2855_v26 = vrot.slane %v2662_v14, %v8299_v23  ;;  %v3049_v4 = vld [vmem:[#allocation2 + $0x30] sm:$0x7] }
 0x27c   : > { %3054 = vst [vmem:[#allocation2 + $0x34] sm:$0x7] %v3053_v53  ;;  %3331 = vst.msk [vmem:[#allocation2 + $0x24] sm:$0x3] %vm3013_vm13, %v3322_v61  ;;  %v3363_v28 = vsel %vm8338_vm1, %v3347_v56, %v3362_v43  ;;  %v2869_v13 = vrot.slane %v2676_v49, %v8299_v23  ;;  %v2883_v52 = vrot.slane %v2684_v12, %v8299_v23  ;;  %v3704_v32 = vrot.slane %v3703_v41, 2 }
 0x27d   : > { %v3173_v30 = vrot.slane %v2669_v38, %v8299_v23  ;;  %3364 = vst [vmem:[#allocation2 + $0x10] sm:$0x7] %v3363_v28  ;;  %v2897_v19 = vrot.slane %v2686_v58, %v8299_v23  ;;  %v3187_v62 = vrot.slane %v2683_v16, %v8299_v23  ;;  %v3201_v0 = vrot.slane %v2685_v47, %v8299_v23  ;;  %v3359_v53 = vld [vmem:[#allocation2 + $0xc] sm:$0x7] }
 0x27e   : > { %v2862_v57 = vrot.slane %v2855_v26, %v8299_v23  ;;  %v2876_v17 = vrot.slane %v2869_v13, %v8299_v23  ;;  %v2890_v35 = vrot.slane %v2883_v52, %v8299_v23  ;;  %v3215_v18 = vrot.slane %v2687_v60, %v8299_v23  ;;  %v6851_v28 = vld.sshfl [vmem:[#allocation2 + $0x3c] sm:$0x13 pattern:$0x76325410] }
 0x27f   : > { %v2904_v21 = vrot.slane %v2897_v19, %v8299_v23  ;;  %v3180_v14 = vrot.slane %v3173_v30, %v8299_v23  ;;  %v3194_v38 = vrot.slane %v3187_v62, %v8299_v23  ;;  %v3208_v25 = vrot.slane %v3201_v0, %v8299_v23  ;;  %v6867_v0 = vld.sshfl [vmem:[#allocation2 + $0x18] sm:$0x13 pattern:$0x76325410] }
 0x280   : > { %v2970_v36 = vunpack.c.l.b16 %v2876_v17  ;;  %v2971_v39 = vunpack.c.l.b16 %v2890_v35  ;;  %v3222_v40 = vrot.slane %v3215_v18, %v8299_v23  ;;  %v3709_v45 = vsel %vm8252_vm2, %v3704_v32, %v3708_v7 }
 0x281   : > { %v2972_v41 = vunpack.c.l.b16 %v2904_v21  ;;  %v3288_v27 = vunpack.c.l.b16 %v3194_v38  ;;  %v3289_v33 = vunpack.c.l.b16 %v3208_v25  ;;  %v2969_v49 = vunpack.c.l.b16 %v2862_v57 }
 0x282   : > { %v2992_v16 = vrot.slane %v2970_v36, 7  ;;  %v2994_v2 = vrot.slane %v2971_v39, 6  ;;  %v3290_v5 = vunpack.c.l.b16 %v3222_v40  ;;  %v6846_v6 = vld.sshfl [vmem:[#allocation2 + $0x48] sm:$0x3 pattern:$0x76325410]  ;;  %v3287_v59 = vunpack.c.l.b16 %v3180_v14 }
 0x283   : > { %v3422_v24 = vld [vmem:[#allocation2 + $0x34] sm:$0x1]  ;;  %v2996_v8 = vrot.slane %v2972_v41, 5  ;;  %v3307_v1 = vrot.slane %v3288_v27, 7  ;;  %v3309_v3 = vrot.slane %v3289_v33, 6  ;;  %3836 = vrot.lane.b32.xlu1 %v6846_v6, %s7291_s14  ;;  %4500 = vrot.lane.b32.xlu0 %v6846_v6, %s7288_s30  ;;  %v4026_v26 = vrot.slane %v8423_v10, 7 }
 0x284   : > { %v3385_v54 = vld [vmem:[#allocation2 + $0x10] sm:$0x1]  ;;  %v3423_v20 = vsel %vm8231_vm9, 0, %v3422_v24  ;;  %v2993_v50 = vsel %vm2978_vm10, %v2992_v16, %v2969_v49  ;;  %v3025_v7 = vsel %vm9239_vm11, %v2992_v16, %v2969_v49  ;;  %v3311_v42 = vrot.slane %v3290_v5, 5 }
 0x285   : > { %v3386_v29 = vsel %vm8231_vm9, 0, %v3385_v54  ;;  %3424 = vst [vmem:[#allocation2 + $0x34] sm:$0x1] %v3423_v20  ;;  %v2995_v11 = vsel %vm9239_vm11, %v2994_v2, %v2993_v50  ;;  %v3026_v34 = vsel %vm2984_vm14, %v2994_v2, %v3025_v7  ;;  %v3308_v46 = vsel %vm2978_vm10, %v3307_v1, %v3287_v59 }
 0x286   : > { %3387 = vst [vmem:[#allocation2 + $0x10] sm:$0x1] %v3386_v29  ;;  %v2997_v48 = vsel %vm2984_vm14, %v2996_v8, %v2995_v11  ;;  %v3027_v51 = vsel %vm3020_vm15, %v2996_v8, %v3026_v34  ;;  %v3310_v55 = vsel %vm9239_vm11, %v3309_v3, %v3308_v46  ;;  %v3338_v15 = vsel %vm9239_vm11, %v3307_v1, %v3287_v59  ;;  %v6862_v43 = vld.sshfl [vmem:[#allocation2 + $0x24] sm:$0x3 pattern:$0x76325410] }
 0x287   : > { %v3006_v61 = vpack.c.b16 %v2997_v48, %v2997_v48  ;;  %v3033_v56 = vpack.c.b16 %v3027_v51, %v3027_v51  ;;  %v3312_v12 = vsel %vm2984_vm14, %v3311_v42, %v3310_v55  ;;  %v3339_v47 = vsel %vm2984_vm14, %v3309_v3, %v3338_v15  ;;  %4168 = vrot.lane.b32.xlu1 %v6862_v43, %s7292_s15  ;;  %v6854_v36 = vld.sshfl [vmem:[#allocation2 + $0x48] sm:$0x13 pattern:$0x76325410] }
 0x288   : > { %v3321_v58 = vpack.c.b16 %v3312_v12, %v3312_v12  ;;  %v3340_v60 = vsel %vm3020_vm15, %v3311_v42, %v3339_v47  ;;  %3728 = vrot.lane.b32.xlu0 %v3709_v45, %s7277_s28  ;;  %v8526_v30 = vsel %vm8252_vm2, %v4022_v44, %v4026_v26  ;;  %v4001_v10 = vshrl.u32 %v6851_v28, 16  ;;  %v6870_v2 = vld.sshfl [vmem:[#allocation2 + $0x24] sm:$0x13 pattern:$0x76325410] }
 0x289   : > { %3016 = vst.msk [vmem:[#allocation2 + $0x44] sm:$0x3] %vm3013_vm13, %v3006_v61  ;;  %v3050_v13 = vsel %vm8338_vm1, %v3033_v56, %v3049_v4  ;;  %v3346_v52 = vpack.c.b16 %v3340_v60, %v3340_v60  ;;  %v4004_v62 = vshll.u32 %v6851_v28, 16  ;;  %v4333_v35 = vshrl.u32 %v6867_v0, 16 }
 0x28a   : > { %3051 = vst [vmem:[#allocation2 + $0x30] sm:$0x7] %v3050_v13  ;;  %3330 = vst.msk [vmem:[#allocation2 + $0x20] sm:$0x3] %vm3013_vm13, %v3321_v58  ;;  %v4003_v32 = vrot.slane %v4001_v10, 6  ;;  %v4336_v18 = vshll.u32 %v6867_v0, 16  ;;  %v3975_v63 = vcombine.high %v6851_v28, %v6851_v28  ;;  %v4307_v33 = vcombine.high %v6867_v0, %v6867_v0 }
 0x28b   : > { %v3360_v19 = vsel %vm8338_vm1, %v3346_v52, %v3359_v53  ;;  %4058 = vrot.lane.b32.xlu1 %v8526_v30, %s7293_s18  ;;  %v4006_v57 = vrot.slane %v4004_v62, 7  ;;  %v4335_v44 = vrot.slane %v4333_v35, 6  ;;  %v4043_v49 = vshrl.u32 %v6854_v36, 16 }
 0x28c   : > { %3361 = vst [vmem:[#allocation2 + $0xc] sm:$0x7] %v3360_v19  ;;  %v4338_v41 = vrot.slane %v4336_v18, 7  ;;  %v4010_v27 = vshll.u32 %v3975_v63, 16  ;;  %v4046_v16 = vshll.u32 %v6854_v36, 16  ;;  %v4342_v8 = vshll.u32 %v4307_v33, 16 }
 0x28d   : > { %v4007_v40 = vor.u32 %v4006_v57, %v4003_v32  ;;  %v6856_v24 = vld.sshfl [vmem:[#allocation2 + $0x8] sm:$0x3 pattern:$0x76325410]  ;;  %v4045_v59 = vrot.slane %v4043_v49, 6  ;;  %v4375_v3 = vshrl.u32 %v6870_v2, 16  ;;  %v3999_v7 = vcombine.high %v6854_v36, %v6854_v36 }
 0x28e   : > { %v4339_v6 = vor.u32 %v4338_v41, %v4335_v44  ;;  %v4012_v31 = vrot.slane %v4010_v27, 7  ;;  %v4048_v1 = vrot.slane %v4046_v16, 7  ;;  %v4378_v54 = vshll.u32 %v6870_v2, 16 }
 0x28f   : > { %4390 = vrot.lane.b32.xlu1 %v3709_v45, %s7294_s19  ;;  %v6871_v45 = vld.sshfl [vmem:[#allocation2 + $0x2c] sm:$0x3 pattern:$0x76325410]  ;;  %v4008_v5 = vrot.slane %v4007_v40, 2  ;;  %v4344_v29 = vrot.slane %v4342_v8, 7  ;;  %v4331_v43 = vcombine.high %v6870_v2, %v6870_v2 }
 0x290   : > { %v6845_v17 = vld.sshfl [vmem:[#allocation2 + $0x44] sm:$0x3 pattern:$0x76325410]  ;;  %v4340_v50 = vrot.slane %v4339_v6, 2  ;;  %v4049_v11 = vor.u32 %v4048_v1, %v4045_v59  ;;  %v4377_v34 = vrot.slane %v4375_v3, 6  ;;  %v8567_v59 = vpop.permute.xlu1 %4448 }
 0x291   : > { %v3419_v21 = vld [vmem:[#allocation2 + $0x30] sm:$0x1]  ;;  %3834 = vrot.lane.b32.xlu0 %v6845_v17, %s7291_s14  ;;  %v6861_v38 = vld.sshfl [vmem:[#allocation2 + $0x20] sm:$0x3 pattern:$0x76325410]  ;;  %v4013_v20 = vsel %vm8252_vm2, %v4008_v5, %v4012_v31 }
 0x292   : > { %v3420_v14 = vsel %vm8231_vm9, 0, %v3419_v21  ;;  %v6833_v42 = vld.sshfl [vmem:[#allocation2 + $0x8] sm:$0x13 pattern:$0x76325410]  ;;  %v4380_v46 = vrot.slane %v4378_v54, 7  ;;  %v4345_v55 = vsel %vm8252_vm2, %v4340_v50, %v4344_v29 }
 0x293   : > { %v3382_v25 = vld [vmem:[#allocation2 + $0xc] sm:$0x1]  ;;  %3421 = vst [vmem:[#allocation2 + $0x30] sm:$0x1] %v3420_v14  ;;  %3497 = vrot.lane.b32.xlu1 %v6861_v38, %s7285_s16  ;;  %v3584_v51 = vshrl.u32 %v6833_v42, 16  ;;  %v3587_v4 = vshll.u32 %v6833_v42, 16  ;;  %v3539_v19 = vcombine.high %v6833_v42, %v6833_v42 }
 0x294   : > { %v3383_v39 = vsel %vm8231_vm9, 0, %v3382_v25  ;;  %v4052_v15 = vshll.u32 %v3999_v7, 16  ;;  %v6853_v61 = vld.sshfl [vmem:[#allocation2 + $0x44] sm:$0x13 pattern:$0x76325410]  ;;  %v4381_v47 = vor.u32 %v4380_v46, %v4377_v34 }
 0x295   : > { %3384 = vst [vmem:[#allocation2 + $0xc] sm:$0x1] %v3383_v39  ;;  %4166 = vrot.lane.b32.xlu0 %v6861_v38, %s7292_s15  ;;  %v6839_v56 = vld.sshfl [vmem:[#allocation2 + $0x28] sm:$0x3 pattern:$0x76325410]  ;;  %v3991_v39 = vcombine.high %v6853_v61, %v6853_v61  ;;  %s712_s15 = scalar_lea.vmem %s9236_s11, %s9287_s10 }
 0x296   : > { %v4050_v12 = vrot.slane %v4049_v11, 2  ;;  %v3586_v53 = vrot.slane %v3584_v51, 6  ;;  %v3589_v58 = vrot.slane %v3587_v4, 7  ;;  %v4054_v26 = vrot.slane %v4052_v15, 7  ;;  %v8579_v15 = vpop.permute.xlu1 %4502 }
 0x297   : > { %3779 = vrot.lane.b32.xlu1 %v6871_v45, %s7295_s23  ;;  %v6869_v60 = vld.sshfl [vmem:[#allocation2 + $0x20] sm:$0x13 pattern:$0x76325410]  ;;  %v4384_v28 = vshll.u32 %v4331_v43, 16  ;;  %v4029_v13 = vshrl.u32 %v6853_v61, 16 }
 0x298   : > { %v4032_v52 = vshll.u32 %v6853_v61, 16  ;;  %v6879_v10 = vld.sshfl [vmem:[#allocation2 + $0x2c] sm:$0x13 pattern:$0x76325410]  ;;  %v8555_v62 = vsel %vm8252_vm2, %v4050_v12, %v4054_v26  ;;  %v4382_v0 = vrot.slane %v4381_v47, 2  ;;  %v3590_v18 = vor.u32 %v3589_v58, %v3586_v53 }
 0x299   : > { %4442 = vrot.lane.b32.xlu0 %v6871_v45, %s7286_s27  ;;  %v4361_v32 = vshrl.u32 %v6869_v60, 16  ;;  %v4364_v57 = vshll.u32 %v6869_v60, 16  ;;  %v4386_v35 = vrot.slane %v4384_v28, 7  ;;  %v4031_v21 = vrot.slane %v4029_v13, 6 }
 0x29a   : > { %v4034_v63 = vrot.slane %v4032_v52, 7  ;;  %v3593_v14 = vshll.u32 %v3539_v19, 16  ;;  %v4554_v38 = vshrl.u32 %v6879_v10, 16  ;;  %v4557_v25 = vshll.u32 %v6879_v10, 16 }
 0x29b   : > { %4111 = vrot.lane.b32.xlu1 %v6856_v24, %s7296_s24  ;;  %v4387_v36 = vsel %vm8252_vm2, %v4382_v0, %v4386_v35  ;;  %v4363_v40 = vrot.slane %v4361_v32, 6  ;;  %v4366_v44 = vrot.slane %v4364_v57, 7  ;;  %v6873_v41 = vld.sshfl [vmem:[#allocation2 + $0x34] sm:$0x3 pattern:$0x76325410]  ;;  %v4323_v45 = vcombine.high %v6869_v60, %v6869_v60 }
 0x29c   : > { %v3450_v48 = vld [vmem:[#allocation2 + $0xc] sm:$0x3]  ;;  %v3591_v27 = vrot.slane %v3590_v18, 2  ;;  %v4035_v33 = vor.u32 %v4034_v63, %v4031_v21  ;;  %v3595_v49 = vrot.slane %v3593_v14, 7  ;;  %v4038_v16 = vshll.u32 %v3991_v39, 16 }
 0x29d   : > { %4056 = vrot.lane.b32.xlu0 %v4013_v20, %s7293_s18  ;;  %3454 = vst.msk [vmem:[#allocation6 + $0x6] sm:$0x3] %vm3013_vm13, %v3450_v48  ;;  %v4367_v2 = vor.u32 %v4366_v44, %v4363_v40  ;;  %v4556_v5 = vrot.slane %v4554_v38, 6  ;;  %v4559_v6 = vrot.slane %v4557_v25, 7  ;;  %v4528_v31 = vcombine.high %v6879_v10, %v6879_v10 }
 0x29e   : > { %v3596_v24 = vsel %vm8252_vm2, %v3591_v27, %v3595_v49  ;;  %v4036_v8 = vrot.slane %v4035_v33, 2  ;;  %v4370_v1 = vshll.u32 %v4323_v45, 16  ;;  %v6847_v3 = vld.sshfl [vmem:[#allocation2 + $0x28] sm:$0x13 pattern:$0x76325410] }
 0x29f   : > { %4498 = vrot.lane.b32.xlu1 %v6845_v17, %s7288_s30  ;;  %v6855_v17 = vld.sshfl [vmem:[#allocation2 + $0x4] sm:$0x3 pattern:$0x76325410]  ;;  %v4040_v20 = vrot.slane %v4038_v16, 7  ;;  %v4368_v7 = vrot.slane %v4367_v2, 2  ;;  %v4560_v42 = vor.u32 %v4559_v6, %v4556_v5  ;;  %v3862_v10 = vcombine.high %v6847_v3, %v6847_v3 }
 0x2a0   : > { %v6832_v54 = vld.sshfl [vmem:[#allocation2 + $0x4] sm:$0x13 pattern:$0x76325410]  ;;  %v4563_v29 = vshll.u32 %v4528_v31, 16  ;;  %v4372_v34 = vrot.slane %v4370_v1, 7 }
 0x2a1   : > { %4388 = vrot.lane.b32.xlu0 %v4345_v55, %s7294_s19  ;;  %v6858_v50 = vld.sshfl [vmem:[#allocation2 + $0x10] sm:$0x3 pattern:$0x76325410]  ;;  %v8573_v11 = vsel %vm8252_vm2, %v4036_v8, %v4040_v20  ;;  %v3888_v46 = vshrl.u32 %v6847_v3, 16  ;;  %v3891_v48 = vshll.u32 %v6847_v3, 16  ;;  %v3531_v0 = vcombine.high %v6832_v54, %v6832_v54 }
 0x2a2   : > { %v3570_v51 = vshrl.u32 %v6832_v54, 16  ;;  %v3573_v4 = vshll.u32 %v6832_v54, 16  ;;  %v4561_v43 = vrot.slane %v4560_v42, 2  ;;  %vm3789_vm9 = vcmask 320768  }
 0x2a3   : > { %3726 = vrot.lane.b32.xlu1 %v4345_v55, %s7277_s28  ;;  %v4373_v55 = vsel %vm8252_vm2, %v4368_v7, %v4372_v34  ;;  %v6850_v61 = vld.sshfl [vmem:[#allocation2 + $0x34] sm:$0x13 pattern:$0x76325410]  ;;  %v3890_v12 = vrot.slane %v3888_v46, 6  ;;  %v3893_v47 = vrot.slane %v3891_v48, 7 }
 0x2a4   : > { %v3572_v53 = vrot.slane %v3570_v51, 6  ;;  %v3575_v58 = vrot.slane %v3573_v4, 7  ;;  %v3930_v60 = vshrl.u32 %v6850_v61, 16  ;;  %v3933_v26 = vshll.u32 %v6850_v61, 16 }
 0x2a5   : > { %3777 = vrot.lane.b32.xlu0 %v6839_v56, %s7295_s23  ;;  %v4565_v56 = vrot.slane %v4563_v29, 7  ;;  %v6866_v13 = vld.sshfl [vmem:[#allocation2 + $0x10] sm:$0x13 pattern:$0x76325410]  ;;  %v3894_v32 = vor.u32 %v3893_v47, %v3890_v12  ;;  %v3886_v14 = vcombine.high %v6850_v61, %v6850_v61  ;;  %v3579_v39 = vshll.u32 %v3531_v0, 16 }
 0x2a6   : > { %v3576_v57 = vor.u32 %v3575_v58, %v3572_v53  ;;  %v3935_v35 = vrot.slane %v3933_v26, 7  ;;  %v4262_v18 = vshrl.u32 %v6866_v13, 16  ;;  %v4265_v21 = vshll.u32 %v6866_v13, 16 }
 0x2a7   : > { %4062 = vrot.lane.b32.xlu1 %v8555_v62, %s7293_s18  ;;  %v4566_v28 = vsel %vm8252_vm2, %v4561_v43, %v4565_v56  ;;  %v6882_v63 = vld.sshfl [vmem:[#allocation2 + $0x38] sm:$0x13 pattern:$0x76325410]  ;;  %v3895_v40 = vrot.slane %v3894_v32, 2  ;;  %v3939_v6 = vshll.u32 %v3886_v14, 16  ;;  %v4218_v31 = vcombine.high %v6866_v13, %v6866_v13 }
 0x2a8   : > { %v6834_v38 = vld.sshfl [vmem:[#allocation2 + $0xc] sm:$0x13 pattern:$0x76325410]  ;;  %v3577_v44 = vrot.slane %v3576_v57, 2  ;;  %v4264_v45 = vrot.slane %v4262_v18, 6  ;;  %v4552_v7 = vcombine.high %v6882_v63, %v6882_v63 }
 0x2a9   : > { %4109 = vrot.lane.b32.xlu0 %v6855_v17, %s7296_s24  ;;  %v3932_v17 = vrot.slane %v3930_v60, 6  ;;  %v6841_v25 = vld.sshfl [vmem:[#allocation2 + $0x30] sm:$0x3 pattern:$0x76325410]  ;;  %v4267_v49 = vrot.slane %v4265_v21, 7 }
 0x2aa   : > { %v6849_v27 = vld.sshfl [vmem:[#allocation2 + $0x30] sm:$0x13 pattern:$0x76325410]  ;;  %v3598_v16 = vshrl.u32 %v6834_v38, 16  ;;  %v3601_v2 = vshll.u32 %v6834_v38, 16 }
 0x2ab   : > { %4394 = vrot.lane.b32.xlu1 %v4387_v36, %s7294_s19  ;;  %v3897_v36 = vshll.u32 %v3862_v10, 16  ;;  %v6857_v5 = vld.sshfl [vmem:[#allocation2 + $0xc] sm:$0x3 pattern:$0x76325410]  ;;  %v3581_v8 = vrot.slane %v3579_v39, 7  ;;  %v4268_v29 = vor.u32 %v4267_v49, %v4264_v45  ;;  %v3878_v60 = vcombine.high %v6849_v27, %v6849_v27 }
 0x2ac   : > { %v3916_v1 = vshrl.u32 %v6849_v27, 16  ;;  %v3919_v3 = vshll.u32 %v6849_v27, 16  ;;  %v4599_v54 = vshll.u32 %v6882_v63, 16  ;;  %v3600_v34 = vrot.slane %v3598_v16, 6  ;;  %v7188_v27 = vld [vmem:[%s9228_s3 + $0x28] sm:$0xff]  }
 0x2ad   : > { %4446 = vrot.lane.b32.xlu0 %v6873_v41, %s7286_s27  ;;  %v3899_v20 = vrot.slane %v3897_v36, 7  ;;  %v3582_v42 = vsel %vm8252_vm2, %v3577_v44, %v3581_v8  ;;  %v3603_v46 = vrot.slane %v3601_v2, 7  ;;  %v3941_v51 = vrot.slane %v3939_v6, 7  ;;  %v7189_v6 = vld [vmem:[%s9228_s3 + $0x20] sm:$0xff]   ;;  %v7190_v8 = vld [vmem:[%s9228_s3 + $0x18] sm:$0xff]  }
 0x2ae   : > { %v4271_v4 = vshll.u32 %v4218_v31, 16  ;;  %v3918_v61 = vrot.slane %v3916_v1, 6  ;;  %v3921_v56 = vrot.slane %v3919_v3, 7  ;;  %v4601_v47 = vrot.slane %v4599_v54, 7  ;;  %v7191_v54 = vld [vmem:[%s9228_s3 + $0x10] sm:$0xff]  }
 0x2af   : > { %3783 = vrot.lane.b32.xlu1 %v6873_v41, %s7295_s23  ;;  %v3936_v41 = vor.u32 %v3935_v35, %v3932_v17  ;;  %v3900_v48 = vsel %vm8252_vm2, %v3895_v40, %v3899_v20  ;;  %v4269_v58 = vrot.slane %v4268_v29, 2  ;;  %v3604_v26 = vor.u32 %v3603_v46, %v3600_v34  ;;  %v6886_v17 = vld.sshfl [vmem:[#allocation2 + $0x4c] sm:$0x13 pattern:$0x76325410] }
 0x2b0   : > { %v7300_v13 = vmov 0.0   ;;  %v4273_v10 = vrot.slane %v4271_v4, 7  ;;  %v3922_v0 = vor.u32 %v3921_v56, %v3918_v61  ;;  %v4605_v57 = vshll.u32 %v4552_v7, 16 }
 0x2b1   : > { %3615 = vrot.lane.b32.xlu0 %v3596_v24, %s7287_s29  ;;  %7097 = vmatprep.subr.bf16.mxu1 %v7300_v13  ;;  %v3925_v18 = vshll.u32 %v3878_v60, 16  ;;  %v3605_v21 = vrot.slane %v3604_v26, 2  ;;  %v4712_v40 = vshll.u32 %v6886_v17, 16  ;;  %v4665_v45 = vcombine.high %v6886_v17, %v6886_v17 }
 0x2b2   : > { %v4274_v35 = vsel %vm8252_vm2, %v4269_v58, %v4273_v10  ;;  %v4607_v39 = vrot.slane %v4605_v57, 7  ;;  %7113 = vmatprep.mubr.msk.bf16.mxu1 %vm7301_vm8, %v7300_v13  ;;  %vm3955_vm13 = vcmask 451968   ;;  %vm4068_vm14 = vcmask 517568  }
 0x2b3   : > { %4115 = vrot.lane.b32.xlu1 %v6858_v50, %s7296_s24  ;;  %v3937_v50 = vrot.slane %v3936_v41, 2  ;;  %v3927_v44 = vrot.slane %v3925_v18, 7  ;;  %vm4121_vm15 = vcmask 583168   ;;  %vm4174_vm1 = vcmask 648768  }
 0x2b4   : > { %vm4621_vm8 = vcmask 976768   ;;  %vm5277_vm11 = vsmask.f32 5396 }
 0x2b5   : > { %4060 = vrot.lane.b32.xlu0 %v8573_v11, %s7293_s18  ;;  %v3942_v53 = vsel %vm8252_vm2, %v3937_v50, %v3941_v51 }
 0x2b7   : > { %3730 = vrot.lane.b32.xlu1 %v4373_v55, %s7277_s28  ;;  %s7298_s28 = smov 112  }
 0x2b9   : > { %4392 = vrot.lane.b32.xlu0 %v4373_v55, %s7294_s19  ;;  %v8586_v19 = vpop.permute.xlu1 %3832  ;;  %v3547_v55 = vcombine.high %v6834_v38, %v6834_v38  ;;  %v4709_v38 = vshrl.u32 %v6886_v17, 16 }
 0x2bb   : > { %3945 = vrot.lane.b32.xlu1 %v4566_v28, %s7297_s26  ;;  %v4711_v2 = vrot.slane %v4709_v38, 6 }
 0x2bd   : > { %v3496_v52 = vpop.permute.xlu0 %3495  ;;  %4609 = vrot.lane.b32.xlu0 %v4566_v28, %s7298_s28  ;;  %v3607_v28 = vshll.u32 %v3547_v55, 16 }
 0x2be   : > { %3506 = vst.msk [vmem:[#allocation6 + $0x4] sm:$0x3] %vm3503_vm4, %v3496_v52  ;;  %v8592_v33 = vpop.permute.xlu1 %4164  ;;  %v7186_v52 = vld [vmem:[%s9228_s3 + $0x38] sm:$0xff]  }
 0x2bf   : > { %4277 = vrot.lane.b32.xlu1 %v3596_v24, %s7299_s17  ;;  %v4596_v24 = vshrl.u32 %v6882_v63, 16  ;;  %7098 = vmatpush3.bf16.msra.mxu1 %v7186_v52  ;;  %v7187_v63 = vld [vmem:[%s9228_s3 + $0x30] sm:$0xff]   ;;  %v3609_v14 = vrot.slane %v3607_v28, 7 }
 0x2c0   : > { %7099 = vmatprep.subr.bf16.mxu1 %v7300_v13 }
 0x2c1   : > { %3781 = vrot.lane.b32.xlu0 %v6841_v25, %s7295_s23  ;;  %v4598_v12 = vrot.slane %v4596_v24, 6  ;;  %v3610_v41 = vsel %vm8252_vm2, %v3605_v21, %v3609_v14  ;;  %v4718_v24 = vshll.u32 %v4665_v45, 16  ;;  %v8660_v50 = vpop.permute.xlu0 %4496 }
 0x2c3   : > { %4444 = vrot.lane.b32.xlu1 %v6841_v25, %s7286_s27  ;;  %v4602_v32 = vor.u32 %v4601_v47, %v4598_v12  ;;  %v3923_v25 = vrot.slane %v3922_v0, 2  ;;  %7100 = vmatpush3.bf16.msra.mxu1 %v7187_v63  ;;  %v4720_v3 = vrot.slane %v4718_v24, 7 }
 0x2c4   : > { %7101 = vmatprep.subr.bf16.mxu1 %v7300_v13 }
 0x2c5   : > { %4113 = vrot.lane.b32.xlu0 %v6857_v5, %s7296_s24  ;;  %v4603_v36 = vrot.slane %v4602_v32, 2  ;;  %v3928_v49 = vsel %vm8252_vm2, %v3923_v25, %v3927_v44  ;;  %v4714_v5 = vrot.slane %v4712_v40, 7 }
 0x2c7   : > { %3613 = vrot.lane.b32.xlu1 %v3582_v42, %s7287_s29  ;;  %v4608_v16 = vsel %vm8252_vm2, %v4603_v36, %v4607_v39  ;;  %7102 = vmatpush3.bf16.msra.mxu1 %v7188_v27  ;;  %v4715_v31 = vor.u32 %v4714_v5, %v4711_v2  ;;  %v3831_v9 = vpop.permute.xlu0 %3830 }
 0x2c8   : > { %7103 = vmatprep.subr.bf16.mxu1 %v7300_v13 }
 0x2c9   : > { %v3494_v43 = vpop.permute.xlu1 %3493  ;;  %3943 = vrot.lane.b32.xlu0 %v3900_v48, %s7297_s26  ;;  %v4716_v1 = vrot.slane %v4715_v31, 2  ;;  %v7303_v31 = vmov 1983009808  }
 0x2ca   : > { %3505 = vst.msk [vmem:[#allocation6 + $0x2] sm:$0x3] %vm3503_vm4, %v3494_v43  ;;  %v4773_v24 = vunpack.c.l.s4 %v7303_v31 }
 0x2cb   : > { %3949 = vrot.lane.b32.xlu1 %v3942_v53, %s7297_s26  ;;  %7104 = vmatpush3.bf16.msra.mxu1 %v7189_v6  ;;  %v4721_v20 = vsel %vm8252_vm2, %v4716_v1, %v4720_v3  ;;  %vm3842_vm2 = vcmask 386368  }
 0x2cc   : > { %7105 = vmatprep.subr.bf16.mxu1 %v7300_v13 }
 0x2cd   : > { %4275 = vrot.lane.b32.xlu0 %v3582_v42, %s7299_s17 }
 0x2cf   : > { %4281 = vrot.lane.b32.xlu1 %v4274_v35, %s7299_s17  ;;  %7106 = vmatpush3.bf16.msra.mxu1 %v7190_v8  ;;  %v4774_v8 = vunpack.c.0.s8 %v4773_v24 }
 0x2d0   : > { %7107 = vmatprep.subr.bf16.mxu1 %v7300_v13 }
 0x2d1   : > { %4613 = vrot.lane.b32.xlu0 %v3942_v53, %s7298_s28 }
 0x2d3   : > { %3617 = vrot.lane.b32.xlu1 %v3610_v41, %s7287_s29  ;;  %7108 = vmatpush3.bf16.msra.mxu1 %v7191_v54 }
 0x2d4   : > { %7109 = vmatprep.subr.bf16.mxu1 %v7300_v13 }
 0x2d5   : > { %3947 = vrot.lane.b32.xlu0 %v3928_v49, %s7297_s26 }
 0x2d7   : > { %4615 = vrot.lane.b32.xlu1 %v4608_v16, %s7298_s28 }
 0x2d9   : > { %4279 = vrot.lane.b32.xlu0 %v3610_v41, %s7299_s17 }
 0x2db   : > { %4724 = vrot.lane.b32.xlu1 %v8573_v11, %s7302_s12  ;;  %v7192_v11 = vld [vmem:[%s9228_s3 + $0x8] sm:$0xff]  }
 0x2dc   : > { %7110 = vmatpush3.bf16.msra.mxu1 %v7192_v11 }
 0x2dd   : > { %4722 = vrot.lane.b32.xlu0 %v8526_v30, %s7302_s12  ;;  %v7193_v30 = vld [vmem:[%s9228_s3] sm:$0xff]   ;;  %7111 = vmatprep.subr.bf16.mxu1 %v7300_v13 }
 0x2df   : > { %4611 = vrot.lane.b32.xlu1 %v3928_v49, %s7298_s28 }
 0x2e0   : > { %7112 = vmatpush3.bf16.msra.mxu1 %v7193_v30 }
 0x2e1   : > { %4726 = vrot.lane.b32.xlu0 %v8555_v62, %s7302_s12  ;;  %v4163_v62 = vpop.permute.xlu0 %4162 }
 0x2e3   : > { %4728 = vrot.lane.b32.xlu1 %v4721_v20, %s7302_s12 }
 0x2f5   : > { %v8662_v7 = vpop.permute.xlu1 %3836  ;;  %v8664_v42 = vpop.permute.xlu0 %4500 }
 0x2f9   : > { %v8666_v29 = vpop.permute.xlu1 %4168 }
 0x2fa   : > { %v3729_v34 = vpop.permute.xlu0 %3728 }
 0x2fd   : > { %v4059_v46 = vpop.permute.xlu1 %4058 }
 0x301   : > { %v8668_v48 = vpop.permute.xlu1 %4390 }
 0x303   : > { %v3835_v51 = vpop.permute.xlu0 %3834 }
 0x305   : > { %v3498_v4 = vpop.permute.xlu1 %3497 }
 0x306   : > { %3507 = vst.msk [vmem:[#allocation6 + $0x6] sm:$0x3] %vm3503_vm4, %v3498_v4  ;;  %vm4287_vm4 = vcmask 714368  }
 0x307   : > { %v8671_v55 = vpop.permute.xlu0 %4166 }
 0x309   : > { %v3780_v43 = vpop.permute.xlu1 %3779 }
 0x30b   : > { %v4443_v61 = vpop.permute.xlu0 %4442 }
 0x30d   : > { %v4112_v56 = vpop.permute.xlu1 %4111 }
 0x30f   : > { %v4057_v12 = vpop.permute.xlu0 %4056 }
 0x311   : > { %v8673_v47 = vpop.permute.xlu1 %4498 }
 0x313   : > { %v4389_v53 = vpop.permute.xlu0 %4388 }
 0x315   : > { %v3727_v58 = vpop.permute.xlu1 %3726 }
 0x317   : > { %v3778_v60 = vpop.permute.xlu0 %3777 }
 0x318   : > { %3790 = vst.msk [vmem:[#allocation6] sm:$0x3] %vm3789_vm9, %v3778_v60 }
 0x319   : > { %v8676_v26 = vpop.permute.xlu1 %4062  ;;  %3843 = vst.msk [vmem:[#allocation6] sm:$0x3] %vm3842_vm2, %v3831_v9 }
 0x31b   : > { %v4110_v28 = vpop.permute.xlu0 %4109 }
 0x31d   : > { %v8679_v13 = vpop.permute.xlu1 %4394 }
 0x31f   : > { %v8681_v52 = vpop.permute.xlu0 %4446 }
 0x321   : > { %v3784_v10 = vpop.permute.xlu1 %3783 }
 0x323   : > { %v3616_v0 = vpop.permute.xlu0 %3615 }
 0x324   : > { %3626 = vst.msk [vmem:[#allocation6 + $0x4] sm:$0x3] %vm3623_vm3, %v3616_v0 }
 0x325   : > { %3739 = vst.msk [vmem:[#allocation6 + $0x4] sm:$0x3] %vm3736_vm5, %v3729_v34  ;;  %v4116_v32 = vpop.permute.xlu1 %4115 }
 0x327   : > { %v4061_v57 = vpop.permute.xlu0 %4060 }
 0x329   : > { %v3731_v17 = vpop.permute.xlu1 %3730 }
 0x32b   : > { %v4393_v35 = vpop.permute.xlu0 %4392 }
 0x32d   : > { %v3946_v18 = vpop.permute.xlu1 %3945 }
 0x32f   : > { %v4610_v21 = vpop.permute.xlu0 %4609 }
 0x331   : > { %v4278_v63 = vpop.permute.xlu1 %4277 }
 0x333   : > { %v3782_v14 = vpop.permute.xlu0 %3781 }
 0x334   : > { %3792 = vst.msk [vmem:[#allocation6 + $0x4] sm:$0x3] %vm3789_vm9, %v3782_v14 }
 0x335   : > { %v4445_v38 = vpop.permute.xlu1 %4444  ;;  %3845 = vst.msk [vmem:[#allocation6 + $0x4] sm:$0x3] %vm3842_vm2, %v3835_v51 }
 0x337   : > { %v4114_v25 = vpop.permute.xlu0 %4113 }
 0x339   : > { %v3614_v36 = vpop.permute.xlu1 %3613 }
 0x33a   : > { %3625 = vst.msk [vmem:[#allocation6 + $0x2] sm:$0x3] %vm3623_vm3, %v3614_v36 }
 0x33b   : > { %v3944_v39 = vpop.permute.xlu0 %3943  ;;  %3738 = vst.msk [vmem:[#allocation6 + $0x2] sm:$0x3] %vm3736_vm5, %v3727_v58 }
 0x33c   : > { %3956 = vst.msk [vmem:[#allocation6] sm:$0x3] %vm3955_vm13, %v3944_v39 }
 0x33d   : > { %3791 = vst.msk [vmem:[#allocation6 + $0x2] sm:$0x3] %vm3789_vm9, %v3780_v43  ;;  %v3950_v40 = vpop.permute.xlu1 %3949  ;;  %v5206_v43 = vld [vmem:[#allocation3 + $0x16] sm:$0x3] }
 0x33e   : > { %4069 = vst.msk [vmem:[#allocation6] sm:$0x3] %vm4068_vm14, %v4057_v12  ;;  %v5186_v12 = vld [vmem:[#allocation3 + $0x8] sm:$0x2] }
 0x33f   : > { %3844 = vst.msk [vmem:[#allocation6 + $0x2] sm:$0x3] %vm3842_vm2, %v8586_v19  ;;  %v4276_v44 = vpop.permute.xlu0 %4275 }
 0x340   : > { %3957 = vst.msk [vmem:[#allocation6 + $0x2] sm:$0x3] %vm3955_vm13, %v3946_v18 }
 0x341   : > { %4122 = vst.msk [vmem:[#allocation6] sm:$0x3] %vm4121_vm15, %v4110_v28  ;;  %v4282_v19 = vpop.permute.xlu1 %4281 }
 0x342   : > { %4070 = vst.msk [vmem:[#allocation6 + $0x2] sm:$0x3] %vm4068_vm14, %v4059_v46  ;;  %v5178_v46 = vld [vmem:[#allocation3 + $0x6] sm:$0x3] }
 0x343   : > { %4175 = vst.msk [vmem:[#allocation6] sm:$0x3] %vm4174_vm1, %v4163_v62  ;;  %v4614_v41 = vpop.permute.xlu0 %4613 }
 0x344   : > { %4123 = vst.msk [vmem:[#allocation6 + $0x2] sm:$0x3] %vm4121_vm15, %v4112_v56 }
 0x345   : > { %4288 = vst.msk [vmem:[#allocation6] sm:$0x3] %vm4287_vm4, %v4276_v44 }
 0x346   : > { %4176 = vst.msk [vmem:[#allocation6 + $0x2] sm:$0x3] %vm4174_vm1, %v8592_v33  ;;  %v3618_v33 = vpop.permute.xlu1 %3617 }
 0x347   : > { %4401 = vst.msk [vmem:[#allocation6] sm:$0x3] %vm4400_vm6, %v4389_v53  ;;  %v3948_v27 = vpop.permute.xlu0 %3947 }
 0x348   : > { %4289 = vst.msk [vmem:[#allocation6 + $0x2] sm:$0x3] %vm4287_vm4, %v4278_v63 }
 0x349   : > { %4455 = vst.msk [vmem:[#allocation6] sm:$0x3] %vm4454_vm7, %v4443_v61 }
 0x34a   : > { %4402 = vst.msk [vmem:[#allocation6 + $0x2] sm:$0x3] %vm4400_vm6, %v8668_v48  ;;  %v4616_v45 = vpop.permute.xlu1 %4615  ;;  %v5193_v48 = vld [vmem:[#allocation3 + $0x10] sm:$0x3] }
 0x34b   : > { %4509 = vst.msk [vmem:[#allocation6] sm:$0x3] %vm4508_vm0, %v8660_v50  ;;  %v4280_v49 = vpop.permute.xlu0 %4279 }
 0x34c   : > { %4456 = vst.msk [vmem:[#allocation6 + $0x2] sm:$0x3] %vm4454_vm7, %v4445_v38 }
 0x34d   : > { %4622 = vst.msk [vmem:[#allocation6] sm:$0x3] %vm4621_vm8, %v4610_v21 }
 0x34e   : > { %4510 = vst.msk [vmem:[#allocation6 + $0x2] sm:$0x3] %vm4508_vm0, %v8673_v47  ;;  %v4725_v16 = vpop.permute.xlu1 %4724 }
 0x34f   : > { %3627 = vst.msk [vmem:[#allocation6 + $0x6] sm:$0x3] %vm3623_vm3, %v3618_v33  ;;  %vm4734_vm3 = vcmask 1042368   ;;  %v4723_v2 = vpop.permute.xlu0 %4722 }
 0x350   : > { %3740 = vst.msk [vmem:[#allocation6 + $0x6] sm:$0x3] %vm3736_vm5, %v3731_v17  ;;  %vm9238_vm5 = vcmask 123904   ;;  %v7209_v17 = vld [vmem:[%s9230_s5] sm:$0xff]  }
 0x351   : > { %3958 = vst.msk [vmem:[#allocation6 + $0x4] sm:$0x3] %vm3955_vm13, %v3948_v27 }
 0x352   : > { %3793 = vst.msk [vmem:[#allocation6 + $0x6] sm:$0x3] %vm3789_vm9, %v3784_v10  ;;  %v4612_v5 = vpop.permute.xlu1 %4611  ;;  %vm8756_vm9 = vmand %vm9238_vm5, %vm3548_vm12 }
 0x353   : > { %4071 = vst.msk [vmem:[#allocation6 + $0x4] sm:$0x3] %vm4068_vm14, %v4061_v57  ;;  %v4727_v6 = vpop.permute.xlu0 %4726  ;;  %v5179_v4 = vsel %vm8756_vm9, 0, %v5178_v46  ;;  %v5207_v61 = vsel %vm8756_vm9, 0, %v5206_v43  ;;  %v5189_v57 = vld [vmem:[#allocation3 + $0xa] sm:$0x2] }
 0x354   : > { %3846 = vst.msk [vmem:[#allocation6 + $0x6] sm:$0x3] %vm3842_vm2, %v8662_v7  ;;  %vm5017_vm2 = vcmask 122880   ;;  %5180 = vst [vmem:[#allocation3 + $0x6] sm:$0x3] %v5179_v4 }
 0x355   : > { %4124 = vst.msk [vmem:[#allocation6 + $0x4] sm:$0x3] %vm4121_vm15, %v4114_v25  ;;  %5208 = vst [vmem:[#allocation3 + $0x16] sm:$0x3] %v5207_v61 }
 0x356   : > { %3959 = vst.msk [vmem:[#allocation6 + $0x6] sm:$0x3] %vm3955_vm13, %v3950_v40  ;;  %vm9254_vm13 = vsmask.f32 256 }
 0x357   : > { %4177 = vst.msk [vmem:[#allocation6 + $0x4] sm:$0x3] %vm4174_vm1, %v8671_v55  ;;  %v5194_v55 = vsel %vm8756_vm9, 0, %v5193_v48 }
 0x358   : > { %4072 = vst.msk [vmem:[#allocation6 + $0x6] sm:$0x3] %vm4068_vm14, %v8676_v26  ;;  %vm8764_vm14 = vmand %vm5017_vm2, %vm9254_vm13 }
 0x359   : > { %4125 = vst.msk [vmem:[#allocation6 + $0x6] sm:$0x3] %vm4121_vm15, %v4116_v32  ;;  %vm5181_vm15 = vcmask 123905   ;;  %5195 = vst [vmem:[#allocation3 + $0x10] sm:$0x3] %v5194_v55 }
 0x35a   : > { %4290 = vst.msk [vmem:[#allocation6 + $0x4] sm:$0x3] %vm4287_vm4, %v4280_v49 }
 0x35b   : > { %4403 = vst.msk [vmem:[#allocation6 + $0x4] sm:$0x3] %vm4400_vm6, %v4393_v35  ;;  %v5183_v58 = vld [vmem:[#allocation3 + $0x6] sm:$0x2] }
 0x35c   : > { %4178 = vst.msk [vmem:[#allocation6 + $0x6] sm:$0x3] %vm4174_vm1, %v8666_v29  ;;  %vm8777_vm1 = vmand %vm5181_vm15, %vm3548_vm12  ;;  %vm5279_vm15 = vsmask.f32 6424 }
 0x35d   : > { %4457 = vst.msk [vmem:[#allocation6 + $0x4] sm:$0x3] %vm4454_vm7, %v8681_v52  ;;  %v5187_v47 = vsel %vm8777_vm1, 0, %v5186_v12  ;;  %v5184_v26 = vsel %vm8777_vm1, 0, %v5183_v58  ;;  %v5190_v35 = vsel %vm8777_vm1, 0, %v5189_v57 }
 0x35e   : > { %4291 = vst.msk [vmem:[#allocation6 + $0x6] sm:$0x3] %vm4287_vm4, %v4282_v19  ;;  %vm5269_vm4 = vsmask.f32 1284  ;;  %5188 = vst [vmem:[#allocation3 + $0x8] sm:$0x2] %v5187_v47 }
 0x35f   : > { %4404 = vst.msk [vmem:[#allocation6 + $0x6] sm:$0x3] %vm4400_vm6, %v8679_v13  ;;  %vm5271_vm6 = vsmask.f32 2312  ;;  %5185 = vst [vmem:[#allocation3 + $0x6] sm:$0x2] %v5184_v26 }
 0x360   : > { %4511 = vst.msk [vmem:[#allocation6 + $0x4] sm:$0x3] %vm4508_vm0, %v8664_v42  ;;  %v5163_v42 = vld [vmem:[#allocation3] sm:$0x3]  ;;  %v5202_v53 = vld [vmem:[#allocation3 + $0x10] sm:$0x1] }
 0x361   : > { %4458 = vst.msk [vmem:[#allocation6 + $0x6] sm:$0x3] %vm4454_vm7, %v8567_v59  ;;  %v4729_v59 = vpop.permute.xlu1 %4728  ;;  %vm9259_vm7 = vmmov %vm9254_vm13  ;;  %v5203_v60 = vsel %vm8764_vm14, 0, %v5202_v53  ;;  %v5215_v13 = vld [vmem:[#allocation3 + $0x16] sm:$0x2] }
 0x362   : > { %4735 = vst.msk [vmem:[#allocation6] sm:$0x3] %vm4734_vm3, %v4723_v2  ;;  %v6897_v28 = vld.sshfl [vmem:[#allocation3 + $0x6] sm:$0x1 pattern:$0x75316420] }
 0x363   : > { %4624 = vst.msk [vmem:[#allocation6 + $0x4] sm:$0x3] %vm4621_vm8, %v4614_v41  ;;  %4623 = vst.msk [vmem:[#allocation6 + $0x2] sm:$0x3] %vm4621_vm8, %v4612_v5  ;;  %5240 = vrot.lane.b32.xlu0 %v6897_v28, %s7287_s29  ;;  %v5216_v52 = vsel %vm8777_vm1, 0, %v5215_v13 }
 0x364   : > { %4512 = vst.msk [vmem:[#allocation6 + $0x6] sm:$0x3] %vm4508_vm0, %v8579_v15  ;;  %v8750_v15 = vsub.s32 %v4774_v8, %v8289_v22  ;;  %v5164_v22 = vsel %vm8756_vm9, 0, %v5163_v42  ;;  %vm5270_vm0 = vmor %vm9259_vm7, %vm5269_vm4 }
 0x365   : > { %4625 = vst.msk [vmem:[#allocation6 + $0x6] sm:$0x3] %vm4621_vm8, %v4616_v45  ;;  %5165 = vst [vmem:[#allocation3] sm:$0x3] %v5164_v22  ;;  %vm5273_vm8 = vsmask.f32 3340 }
 0x366   : > { %4736 = vst.msk [vmem:[#allocation6 + $0x2] sm:$0x3] %vm4734_vm3, %v4725_v16  ;;  %4737 = vst.msk [vmem:[#allocation6 + $0x4] sm:$0x3] %vm4734_vm3, %v4727_v6  ;;  %v5209_v45 = vld [vmem:[#allocation3 + $0x12] sm:$0x2] }
 0x367   : > { %4738 = vst.msk [vmem:[#allocation6 + $0x6] sm:$0x3] %vm4734_vm3, %v4729_v59  ;;  %vm5275_vm3 = vsmask.f32 4368  ;;  %vm5272_vm13 = vmor %vm5270_vm0, %vm5271_vm6  ;;  %vm5281_vm6 = vsmask.f32 7452 }
 0x368   : > { %vm5274_vm5 = vmor %vm5272_vm13, %vm5273_vm8  ;;  %5204 = vst [vmem:[#allocation3 + $0x10] sm:$0x1] %v5203_v60  ;;  %v6932_v14 = vld.sshfl [vmem:[#allocation3 + $0x16] sm:$0x1 pattern:$0x75316420] }
 0x369   : > { %v4739_v3 = vld [vmem:[#allocation6] sm:$0x3]  ;;  %vm5276_vm9 = vmor %vm5274_vm5, %vm5275_vm3  ;;  %5217 = vst [vmem:[#allocation3 + $0x16] sm:$0x2] %v5216_v52  ;;  %v5210_v49 = vsel %vm8777_vm1, 0, %v5209_v45  ;;  %vm9262_vm0 = vcmask 1042434  }
 0x36a   : > { %vm5278_vm12 = vmor %vm5276_vm9, %vm5277_vm11  ;;  %5191 = vst [vmem:[#allocation3 + $0xa] sm:$0x2] %v5190_v35  ;;  %v6903_v39 = vld.sshfl [vmem:[#allocation3 + $0x6] sm:$0x11 pattern:$0x75316420] }
 0x36b   : > { %vm5280_vm4 = vmor %vm5278_vm12, %vm5279_vm15  ;;  %v5321_v40 = vcombine.high %v6903_v39, %v6903_v39  ;;  %v5331_v44 = vshrl.u32 %v6903_v39, 16  ;;  %5211 = vst [vmem:[#allocation3 + $0x12] sm:$0x2] %v5210_v49  ;;  %v5212_v16 = vld [vmem:[#allocation3 + $0x14] sm:$0x2]  ;;  %vm9264_vm3 = vcmask 123904  }
 0x36c   : > { %v5168_v34 = vld [vmem:[#allocation3] sm:$0x1]  ;;  %vm8791_vm11 = vmor %vm5280_vm4, %vm5281_vm6  ;;  %v5213_v2 = vsel %vm8777_vm1, 0, %v5212_v16  ;;  %v6887_v6 = vld [vmem:[%s9229_s4] ss:$0 sm:$0xff]  ;;  %vm5307_vm15 = vcmask 385280  }
 0x36d   : > { %v4740_v1 = vld [vmem:[#allocation6 + $0x2] sm:$0x3]  ;;  %v4741_v20 = vld [vmem:[#allocation6 + $0x4] sm:$0x3]  ;;  %v5169_v51 = vsel %vm8764_vm14, 0, %v5168_v34  ;;  %v5336_v41 = vshll.u32 %v5321_v40, 16  ;;  %vm9263_vm8 = vmmov %vm9262_vm0 }
 0x36e   : > { %v4770_v54 = vcombine.low %v4739_v3, %v4740_v1  ;;  %v4742_v11 = vld [vmem:[#allocation6 + $0x6] sm:$0x3]  ;;  %5170 = vst [vmem:[#allocation3] sm:$0x1] %v5169_v51  ;;  %5214 = vst [vmem:[#allocation3 + $0x14] sm:$0x2] %v5213_v2 }
 0x36f   : > { %v4771_v30 = vcombine.low %v4741_v20, %v4742_v11  ;;  %v6930_v63 = vld.sshfl [vmem:[#allocation3 + $0x10] sm:$0x1 pattern:$0x75316420]  ;;  %v5338_v27 = vsel %vm8791_vm11, %v5331_v44, %v5336_v41  ;;  %vm5042_vm1 = vsmask.f32 1282  ;;  %vm9267_vm9 = vmmov %vm9262_vm0 }
 0x370   : > { %v4778_v50 = vrot.slane %v4770_v54, %v8750_v15  ;;  %5648 = vrot.lane.b32.xlu1 %v6930_v63, %s7296_s24  ;;  %v6934_v38 = vld.sshfl [vmem:[#allocation3 + $0x10] sm:$0x11 pattern:$0x75316420]  ;;  %vm8843_vm13 = vmand %vm9264_vm3, %vm5042_vm1  ;;  %v5044_v2 = vld [vmem:[#allocation3 + $0xc] sm:$0x3] }
 0x371   : > { %v4785_v9 = vrot.slane %v4771_v30, %v8750_v15  ;;  %v5700_v25 = vcombine.high %v6934_v38, %v6934_v38  ;;  %v5711_v36 = vshrl.u32 %v6934_v38, 16  ;;  %vm9268_vm12 = vmmov %vm9262_vm0  ;;  %vm5408_vm4 = vcmask 778880  }
 0x372   : > { %vm5455_vm6 = vcmask 910080  }
 0x373   : > { %v4786_v62 = vcombine.low %v4778_v50, %v4785_v9  ;;  %v5716_v19 = vshll.u32 %v5700_v25, 16 }
 0x374   : > { %5675 = vrot.lane.b32.xlu1 %v6932_v14, %s7299_s17 }
 0x375   : > { %7114 = vmatmul.mubr.bf16.vlgmr.msra.gmra.mxu1 %v4786_v62  ;;  %v6899_v10 = vld.sshfl [vmem:[#allocation3] sm:$0x11 pattern:$0x75316420]  ;;  %v5718_v33 = vsel %vm8791_vm11, %v5711_v36, %v5716_v19 }
 0x376   : > { %v5260_v0 = vcombine.high %v6899_v10, %v6899_v10  ;;  %v5284_v32 = vshrl.u32 %v6899_v10, 16  ;;  %v5218_v5 = vld [vmem:[#allocation3] sm:$0x1] }
 0x377   : > { %5220 = vst.msk [vmem:[#allocation7] sm:$0x1] %vm5017_vm2, %v5218_v5  ;;  %v5047_v5 = vld [vmem:[#allocation3 + $0xe] sm:$0x3] }
 0x378   : > { %v5289_v18 = vshll.u32 %v5260_v0, 16  ;;  %5721 = vrot.lane.b32.xlu1 %v5718_v33, %s7286_s27 }
 0x37a   : > { %v5291_v21 = vsel %vm8791_vm11, %v5284_v32, %v5289_v18 }
 0x37b   : > { %5301 = vrot.lane.b32.xlu0 %v5291_v21, %s7295_s23 }
 0x37f   : > { %5348 = vrot.lane.b32.xlu0 %v5338_v27, %s7297_s26 }
 0x435   : > { %v4870_v31 = vpop.f32.mrf.mxu1 }
 0x436   : > { %v4871_v24 = vadd.f32 %v6887_v6, %v4870_v31 }
 0x437   : > { %v7115_v59 = vpop.f32.mrf.mxu1 }
 0x438   : > { %v4879_v1 = vmul.f32 0.2, %v4871_v24  ;;  %vm4877_vm5 = vcmp.ge.f32.partialorder %v4871_v24, 0.0 }
 0x439   : > { %v4873_v8 = vpop.f32.mrf.mxu1 }
 0x43a   : > { %v4874_v3 = vadd.f32 %v6887_v6, %v4873_v8  ;;  %v4881_v11 = vsel %vm4877_vm5, %v4871_v24, %v4879_v1  ;;  %vm5982_vm5 = vcmask 253952  }
 0x43b   : > { %v7116_v54 = vpop.f32.mrf.mxu1 }
 0x43c   : > { %vm4878_vm7 = vcmp.ge.f32.partialorder %v4874_v3, 0.0  ;;  %v4880_v20 = vmul.f32 0.2, %v4874_v3 }
 0x43e   : > { %v4882_v30 = vsel %vm4878_vm7, %v4874_v3, %v4880_v20  ;;  %vm5988_vm7 = vsmask.f32 7938 }
 0x43f   : > { %v4883_v50 = vpack.c.bf16 %v4882_v30, %v4881_v11  ;;  %v6896_v9 = vpack.c.bf16 %v4882_v30, %v4882_v30  ;;  %vm9006_vm1 = vmand %vm5982_vm5, %vm5988_vm7 }
 0x441   : > { %v4892_v62 = vrot.slane %v4883_v50, %v8294_v37  ;;  %v4899_v7 = vrot.slane %v6896_v9, %v8294_v37 }
 0x443   : > { %v4900_v42 = vcombine.high %v4892_v62, %v4892_v62  ;;  %v4901_v22 = vcombine.high %v4899_v7, %v4899_v7  ;;  %v4908_v34 = vrot.slane %v4892_v62, %v8294_v37  ;;  %v4915_v46 = vrot.slane %v4899_v7, %v8294_v37 }
 0x445   : > { %v4922_v48 = vrot.slane %v4900_v42, %v8294_v37  ;;  %v4929_v51 = vrot.slane %v4901_v22, %v8294_v37  ;;  %v4930_v4 = vcombine.high %v4908_v34, %v4908_v34  ;;  %v4931_v55 = vcombine.high %v4915_v46, %v4915_v46 }
 0x446   : > { %v4940_v43 = vrot.slane %v4908_v34, %v8299_v23  ;;  %v4954_v61 = vrot.slane %v4915_v46, %v8299_v23 }
 0x447   : > { %v4932_v56 = vcombine.high %v4922_v48, %v4922_v48  ;;  %v4933_v12 = vcombine.high %v4929_v51, %v4929_v51  ;;  %v4947_v47 = vrot.slane %v4922_v48, %v8299_v23  ;;  %v4961_v53 = vrot.slane %v4929_v51, %v8299_v23  ;;  %v5156_v51 = vld [vmem:[#allocation3 + $0x2] sm:$0x3] }
 0x448   : > { %v4968_v58 = vrot.slane %v4940_v43, %v8750_v15  ;;  %v4982_v60 = vrot.slane %v4954_v61, %v8750_v15  ;;  %v5056_v26 = vrot.slane %v4930_v4, %v8299_v23  ;;  %v5070_v28 = vrot.slane %v4931_v55, %v8299_v23  ;;  %v5159_v4 = vld [vmem:[#allocation3 + $0x4] sm:$0x3] }
 0x449   : > { %v4975_v13 = vrot.slane %v4947_v47, %v8750_v15  ;;  %v4989_v52 = vrot.slane %v4961_v53, %v8750_v15  ;;  %v5063_v10 = vrot.slane %v4932_v56, %v8299_v23  ;;  %v5077_v0 = vrot.slane %v4933_v12, %v8299_v23 }
 0x44a   : > { %v4990_v21 = vunpack.c.l.b16 %v4968_v58  ;;  %v4992_v63 = vunpack.c.l.b16 %v4982_v60  ;;  %v5084_v14 = vrot.slane %v5056_v26, %v8750_v15  ;;  %v5098_v38 = vrot.slane %v5070_v28, %v8750_v15  ;;  %v5241_v28 = vpop.permute.xlu0 %5240 }
 0x44b   : > { %v4991_v32 = vunpack.c.l.b16 %v4975_v13  ;;  %v4993_v57 = vunpack.c.l.b16 %v4989_v52  ;;  %v5091_v35 = vrot.slane %v5063_v10, %v8750_v15  ;;  %v5105_v18 = vrot.slane %v5077_v0, %v8750_v15 }
 0x44c   : > { %v5106_v6 = vunpack.c.l.b16 %v5084_v14  ;;  %v5108_v31 = vunpack.c.l.b16 %v5098_v38 }
 0x44d   : > { %v4994_v25 = vrot.slane %v4991_v32, 7  ;;  %v4996_v36 = vrot.slane %v4993_v57, 7  ;;  %v5107_v39 = vunpack.c.l.b16 %v5091_v35  ;;  %v5109_v40 = vunpack.c.l.b16 %v5105_v18 }
 0x44f   : > { %v4995_v44 = vsel %vm2978_vm10, %v4994_v25, %v4990_v21  ;;  %v4997_v23 = vsel %vm2978_vm10, %v4996_v36, %v4992_v63  ;;  %v5020_v19 = vsel %vm9262_vm0, %v4994_v25, %v4990_v21  ;;  %v5021_v41 = vsel %vm9263_vm8, %v4996_v36, %v4992_v63  ;;  %v5302_v25 = vpop.permute.xlu0 %5301 }
 0x450   : > { %v4998_v33 = vpack.c.b16 %v4995_v44, %v4995_v44  ;;  %v4999_v27 = vpack.c.b16 %v4997_v23, %v4997_v23  ;;  %v5022_v45 = vpack.c.b16 %v5020_v19, %v5020_v19  ;;  %v5023_v49 = vpack.c.b16 %v5021_v41, %v5021_v41  ;;  %v7195_v44 = vld [vmem:[%s9230_s5 + $0x38] sm:$0xff]  }
 0x451   : > { %v5110_v24 = vrot.slane %v5107_v39, 7  ;;  %v5112_v59 = vrot.slane %v5109_v40, 7  ;;  %v7194_v40 = vld [vmem:[%s9230_s5 + $0x78] sm:$0xff]   ;;  %vm9271_vm0 = vsmask.f32 256 }
 0x452   : > { %v5006_v8 = vrot.slane %v4998_v33, %v8750_v15  ;;  %v5013_v1 = vrot.slane %v4999_v27, %v8750_v15  ;;  %v5030_v3 = vrot.slane %v5022_v45, %v8750_v15  ;;  %v5037_v54 = vrot.slane %v5023_v49, %v8750_v15  ;;  %7017 = vmatprep.subr.bf16.mxu0 %v7194_v40  ;;  %vm9016_vm8 = vmand %vm5982_vm5, %vm9271_vm0 }
 0x453   : > { %v5111_v20 = vsel %vm2978_vm10, %v5110_v24, %v5106_v6  ;;  %v5113_v11 = vsel %vm2978_vm10, %v5112_v59, %v5108_v31  ;;  %v5135_v30 = vsel %vm9267_vm9, %v5110_v24, %v5106_v6  ;;  %v5136_v50 = vsel %vm9268_vm12, %v5112_v59, %v5108_v31  ;;  %7018 = vmatpush3.bf16.msra.mxu0 %v7195_v44  ;;  %v5349_v24 = vpop.permute.xlu0 %5348  ;;  %v7196_v59 = vld [vmem:[%s9230_s5 + $0x70] sm:$0xff]   ;;  %vm9274_vm9 = vmmov %vm9271_vm0 }
 0x454   : > { %5018 = vst.msk [vmem:[#allocation3 + $0x12] sm:$0x1] %vm5017_vm2, %v5006_v8  ;;  %5019 = vst.msk [vmem:[#allocation3 + $0x14] sm:$0x1] %vm5017_vm2, %v5013_v1  ;;  %v5045_v9 = vsel %vm8843_vm13, %v5030_v3, %v5044_v2  ;;  %v5048_v62 = vsel %vm8843_vm13, %v5037_v54, %v5047_v5  ;;  %v5114_v7 = vpack.c.b16 %v5111_v20, %v5111_v20  ;;  %vm5246_vm10 = vcmask 254080   ;;  %v7197_v8 = vld [vmem:[%s9230_s5 + $0x30] sm:$0xff]   ;;  %7019 = vmatprep.subr.bf16.mxu0 %v7196_v59 }
 0x455   : > { %v5115_v42 = vpack.c.b16 %v5113_v11, %v5113_v11  ;;  %5046 = vst [vmem:[#allocation3 + $0xc] sm:$0x3] %v5045_v9  ;;  %5049 = vst [vmem:[#allocation3 + $0xe] sm:$0x3] %v5048_v62  ;;  %v5137_v22 = vpack.c.b16 %v5135_v30, %v5135_v30  ;;  %v5138_v34 = vpack.c.b16 %v5136_v50, %v5136_v50 }
 0x456   : > { %v5122_v46 = vrot.slane %v5114_v7, %v8750_v15  ;;  %5247 = vst.msk [vmem:[#allocation7] sm:$0x1] %vm5246_vm10, %v5241_v28  ;;  %v6938_v62 = vld.sshfl [vmem:[#allocation3 + $0x16] sm:$0x11 pattern:$0x75316420] }
 0x457   : > { %v5129_v48 = vrot.slane %v5115_v42, %v8750_v15  ;;  %v5145_v55 = vrot.slane %v5137_v22, %v8750_v15  ;;  %v5152_v43 = vrot.slane %v5138_v34, %v8750_v15  ;;  %5308 = vst.msk [vmem:[#allocation7] sm:$0x1] %vm5307_vm15, %v5302_v25  ;;  %7020 = vmatpush3.bf16.msra.mxu0 %v7197_v8  ;;  %v7198_v7 = vld [vmem:[%s9230_s5 + $0x68] sm:$0xff]  }
 0x458   : > { %5133 = vst.msk [vmem:[#allocation3 + $0x8] sm:$0x1] %vm5017_vm2, %v5122_v46  ;;  %v7199_v34 = vld [vmem:[%s9230_s5 + $0x28] sm:$0xff]   ;;  %v7200_v46 = vld [vmem:[%s9230_s5 + $0x60] sm:$0xff]   ;;  %7021 = vmatprep.subr.bf16.mxu0 %v7198_v7  ;;  %v7304_v7 = vmov 0  }
 0x459   : > { %5134 = vst.msk [vmem:[#allocation3 + $0xa] sm:$0x1] %vm5017_vm2, %v5129_v48  ;;  %v5157_v61 = vsel %vm8843_vm13, %v5145_v55, %v5156_v51  ;;  %v5160_v56 = vsel %vm8843_vm13, %v5152_v43, %v5159_v4  ;;  %v7201_v43 = vld [vmem:[%s9230_s5 + $0x20] sm:$0xff]   ;;  %vm6059_vm13 = vcmask 516352  }
 0x45a   : > { %5158 = vst [vmem:[#allocation3 + $0x2] sm:$0x3] %v5157_v61  ;;  %5161 = vst [vmem:[#allocation3 + $0x4] sm:$0x3] %v5160_v56 }
 0x45b   : > { %v6910_v12 = vld.sshfl [vmem:[#allocation3 + $0x14] sm:$0x1 pattern:$0x75316420]  ;;  %7022 = vmatpush3.bf16.msra.mxu0 %v7199_v34  ;;  %6019 = vst.msk [vmem:[#allocation4] sm:$0x1] %vm5982_vm5, %v7304_v7  ;;  %vm9053_vm12 = vmand %vm6059_vm13, %vm9274_vm9 }
 0x45c   : > { %v5196_v47 = vld [vmem:[#allocation3 + $0xc] sm:$0x1]  ;;  %v5199_v53 = vld [vmem:[#allocation3 + $0xe] sm:$0x1]  ;;  %5404 = vrot.lane.b32.xlu1 %v6910_v12, %s7299_s17  ;;  %7023 = vmatprep.subr.bf16.mxu0 %v7200_v46  ;;  %6027 = vst.msk [vmem:[#allocation4 + $0x2] sm:$0x1] %vm5982_vm5, %v7304_v7 }
 0x45d   : > { %v5197_v15 = vsel %vm8764_vm14, 0, %v5196_v47  ;;  %v5200_v58 = vsel %vm8764_vm14, 0, %v5199_v53  ;;  %v6909_v60 = vld.sshfl [vmem:[#allocation3 + $0x12] sm:$0x1 pattern:$0x75316420] }
 0x45e   : > { %5198 = vst [vmem:[#allocation3 + $0xc] sm:$0x1] %v5197_v15  ;;  %5201 = vst [vmem:[#allocation3 + $0xe] sm:$0x1] %v5200_v58  ;;  %5402 = vrot.lane.b32.xlu0 %v6909_v60, %s7299_s17  ;;  %v7202_v47 = vld [vmem:[%s9230_s5 + $0x58] sm:$0xff]   ;;  %v7204_v60 = vld [vmem:[%s9230_s5 + $0x50] sm:$0xff]  }
 0x45f   : > { %v6898_v26 = vld.sshfl [vmem:[#allocation3 + $0x8] sm:$0x1 pattern:$0x75316420]  ;;  %7024 = vmatpush3.bf16.msra.mxu0 %v7201_v43  ;;  %6035 = vst.msk [vmem:[#allocation4 + $0x5] sm:$0x1] %vm5982_vm5, %v7304_v7 }
 0x460   : > { %5242 = vrot.lane.b32.xlu1 %v6898_v26, %s7287_s29  ;;  %v6920_v10 = vld.sshfl [vmem:[#allocation3 + $0xa] sm:$0x1 pattern:$0x75316420]  ;;  %7025 = vmatprep.subr.bf16.mxu0 %v7202_v47  ;;  %6043 = vst.msk [vmem:[#allocation4 + $0x7] sm:$0x1] %vm5982_vm5, %v7304_v7 }
 0x461   : > { %v5171_v13 = vld [vmem:[#allocation3 + $0x2] sm:$0x1]  ;;  %v5174_v52 = vld [vmem:[#allocation3 + $0x4] sm:$0x1]  ;;  %v7203_v58 = vld [vmem:[%s9230_s5 + $0x18] sm:$0xff]   ;;  %vm6582_vm5 = vcmask 0  }
 0x462   : > { %v5172_v0 = vsel %vm8764_vm14, 0, %v5171_v13  ;;  %v5175_v32 = vsel %vm8764_vm14, 0, %v5174_v52  ;;  %5673 = vrot.lane.b32.xlu0 %v6910_v12, %s7299_s17  ;;  %v6925_v57 = vld.sshfl [vmem:[#allocation3 + $0x8] sm:$0x11 pattern:$0x75316420]  ;;  %v5746_v12 = vcombine.high %v6938_v62, %v6938_v62 }
 0x463   : > { %5173 = vst [vmem:[#allocation3 + $0x2] sm:$0x1] %v5172_v0  ;;  %5176 = vst [vmem:[#allocation3 + $0x4] sm:$0x1] %v5175_v32  ;;  %v5592_v35 = vcombine.high %v6925_v57, %v6925_v57  ;;  %v5602_v63 = vshrl.u32 %v6925_v57, 16  ;;  %vm5354_vm14 = vcmask 516480   ;;  %7026 = vmatpush3.bf16.msra.mxu0 %v7203_v58 }
 0x464   : > { %v6926_v18 = vld.sshfl [vmem:[#allocation3 + $0xa] sm:$0x11 pattern:$0x75316420]  ;;  %5529 = vrot.lane.b32.xlu1 %v6920_v10, %s7287_s29  ;;  %5355 = vst.msk [vmem:[#allocation7] sm:$0x1] %vm5354_vm14, %v5349_v24  ;;  %7027 = vmatprep.subr.bf16.mxu0 %v7204_v60 }
 0x465   : > { %v5600_v21 = vcombine.high %v6926_v18, %v6926_v18  ;;  %v5607_v14 = vshll.u32 %v5592_v35, 16  ;;  %v6912_v36 = vld.sshfl [vmem:[#allocation3 + $0xe] sm:$0x11 pattern:$0x75316420]  ;;  %v5611_v39 = vshrl.u32 %v6926_v18, 16 }
 0x466   : > { %5527 = vrot.lane.b32.xlu0 %v6898_v26, %s7287_s29  ;;  %v6911_v23 = vld.sshfl [vmem:[#allocation3 + $0xc] sm:$0x11 pattern:$0x75316420]  ;;  %v5430_v41 = vcombine.high %v6912_v36, %v6912_v36  ;;  %v5441_v54 = vshrl.u32 %v6912_v36, 16  ;;  %v5757_v13 = vshrl.u32 %v6938_v62, 16 }
 0x467   : > { %v5609_v38 = vsel %vm8791_vm11, %v5602_v63, %v5607_v14  ;;  %v5616_v29 = vshll.u32 %v5600_v21, 16  ;;  %v6907_v49 = vld.sshfl [vmem:[#allocation3 + $0xc] sm:$0x1 pattern:$0x75316420]  ;;  %v5422_v16 = vcombine.high %v6911_v23, %v6911_v23  ;;  %v5432_v20 = vshrl.u32 %v6911_v23, 16  ;;  %v5649_v14 = vpop.permute.xlu1 %5648 }
 0x468   : > { %5350 = vrot.lane.b32.xlu1 %v5609_v38, %s7297_s26  ;;  %v6929_v5 = vld.sshfl [vmem:[#allocation3 + $0xe] sm:$0x1 pattern:$0x75316420]  ;;  %v5446_v6 = vshll.u32 %v5430_v41, 16  ;;  %v5762_v52 = vshll.u32 %v5746_v12, 16 }
 0x469   : > { %v5618_v19 = vsel %vm8791_vm11, %v5611_v39, %v5616_v29  ;;  %v5437_v3 = vshll.u32 %v5422_v16, 16  ;;  %v6916_v9 = vld.sshfl [vmem:[#allocation3 + $0x14] sm:$0x11 pattern:$0x75316420]  ;;  %v7205_v32 = vld [vmem:[%s9230_s5 + $0x10] sm:$0xff]  }
 0x46a   : > { %5619 = vrot.lane.b32.xlu0 %v5609_v38, %s7297_s26  ;;  %v6900_v33 = vld.sshfl [vmem:[#allocation3 + $0x2] sm:$0x11 pattern:$0x75316420]  ;;  %v5506_v45 = vld [vmem:[#allocation3 + $0x4] sm:$0x1]  ;;  %v5448_v11 = vsel %vm8791_vm11, %v5441_v54, %v5446_v6  ;;  %v5477_v55 = vcombine.high %v6916_v9, %v6916_v9  ;;  %v5764_v18 = vsel %vm8791_vm11, %v5757_v13, %v5762_v52  ;;  %7028 = vmatpush3.bf16.msra.mxu0 %v7205_v32 }
 0x46b   : > { %v5219_v27 = vld [vmem:[#allocation3 + $0x2] sm:$0x1]  ;;  %5508 = vst.msk [vmem:[#allocation7 + $0x3] sm:$0x1] %vm5017_vm2, %v5506_v45  ;;  %v5268_v31 = vcombine.high %v6900_v33, %v6900_v33  ;;  %v5439_v42 = vsel %vm8791_vm11, %v5432_v20, %v5437_v3  ;;  %v5293_v22 = vshrl.u32 %v6900_v33, 16  ;;  %v5488_v28 = vshrl.u32 %v6916_v9, 16  ;;  %v5676_v38 = vpop.permute.xlu1 %5675 }
 0x46c   : > { %5621 = vrot.lane.b32.xlu1 %v5618_v19, %s7297_s26  ;;  %5221 = vst.msk [vmem:[#allocation7 + $0x2] sm:$0x1] %vm5017_vm2, %v5219_v27  ;;  %v5505_v2 = vld [vmem:[#allocation3 + $0x2] sm:$0x1]  ;;  %v5493_v15 = vshll.u32 %v5477_v55, 16  ;;  %v7206_v57 = vld [vmem:[%s9230_s5 + $0x48] sm:$0xff]  }
 0x46d   : > { %5507 = vst.msk [vmem:[#allocation7 + $0x1] sm:$0x1] %vm5017_vm2, %v5505_v2  ;;  %v6922_v1 = vld.sshfl [vmem:[#allocation3 + $0x4] sm:$0x11 pattern:$0x75316420]  ;;  %7029 = vmatprep.subr.bf16.mxu0 %v7206_v57 }
 0x46e   : > { %5375 = vrot.lane.b32.xlu0 %v6907_v49, %s7296_s24  ;;  %v5298_v30 = vshll.u32 %v5268_v31, 16  ;;  %v5554_v50 = vcombine.high %v6922_v1, %v6922_v1  ;;  %v6915_v48 = vld.sshfl [vmem:[#allocation3 + $0x12] sm:$0x11 pattern:$0x75316420]  ;;  %v5565_v61 = vshrl.u32 %v6922_v1, 16  ;;  %v5495_v0 = vsel %vm8791_vm11, %v5488_v28, %v5493_v15 }
 0x46f   : > { %v5469_v56 = vcombine.high %v6915_v48, %v6915_v48  ;;  %v5479_v10 = vshrl.u32 %v6915_v48, 16  ;;  %v7207_v21 = vld [vmem:[%s9230_s5 + $0x8] sm:$0xff]   ;;  %v7208_v63 = vld [vmem:[%s9230_s5 + $0x40] sm:$0xff]   ;;  %v5722_v29 = vpop.permute.xlu1 %5721  ;;  %vm5381_vm2 = vcmask 647680   ;;  %v7217_v7 = vld [vmem:[%s9232_s7 + $0xb0] sm:$0xff]  }
 0x470   : > { %5377 = vrot.lane.b32.xlu1 %v6929_v5, %s7296_s24  ;;  %v5300_v51 = vsel %vm8791_vm11, %v5293_v22, %v5298_v30  ;;  %v5570_v4 = vshll.u32 %v5554_v50, 16  ;;  %7030 = vmatpush3.bf16.msra.mxu0 %v7207_v21  ;;  %v6028_v22 = vld [vmem:[#allocation4 + $0x2] sm:$0x1]  ;;  %v6047_v34 = vld [vmem:[#allocation4 + $0x7] sm:$0x1] }
 0x471   : > { %v5484_v26 = vshll.u32 %v5469_v56, 16  ;;  %7031 = vmatprep.subr.bf16.mxu0 %v7208_v63  ;;  %v6029_v46 = vsel %vm9006_vm1, 0, %v6028_v22  ;;  %v6048_v48 = vsel %vm9006_vm1, 0, %v6047_v34  ;;  %v6020_v55 = vld [vmem:[#allocation4] sm:$0x1] }
 0x472   : > { %5646 = vrot.lane.b32.xlu0 %v6929_v5, %s7296_s24  ;;  %v5572_v53 = vsel %vm8791_vm11, %v5565_v61, %v5570_v4  ;;  %6030 = vst [vmem:[#allocation4 + $0x2] sm:$0x1] %v6029_v46  ;;  %6049 = vst [vmem:[#allocation4 + $0x7] sm:$0x1] %v6048_v48  ;;  %v6021_v43 = vsel %vm9016_vm8, 0, %v6020_v55  ;;  %v7218_v34 = vld [vmem:[%s9232_s7 + $0x68] sm:$0xff]  }
 0x473   : > { %v5486_v35 = vsel %vm8791_vm11, %v5479_v10, %v5484_v26  ;;  %vm5502_vm11 = vcmask 1041280   ;;  %6022 = vst [vmem:[#allocation4] sm:$0x1] %v6021_v43  ;;  %v6039_v61 = vld [vmem:[#allocation4 + $0x5] sm:$0x1]  ;;  %v7223_v4 = vld [vmem:[%s9232_s7 + $0x20] sm:$0xff]  }
 0x474   : > { %5451 = vrot.lane.b32.xlu1 %v5448_v11, %s7286_s27  ;;  %7032 = vmatpush3.bf16.msra.mxu0 %v7209_v17  ;;  %v6040_v56 = vsel %vm9016_vm8, 0, %v6039_v61  ;;  %v6941_v47 = vld [vmem:[%s9231_s6] ss:$0 sm:$0xff]  ;;  %v5984_v52 = vld [vmem:[#allocation4 + $0x6] sm:$0x1] }
 0x475   : > { %6041 = vst [vmem:[#allocation4 + $0x5] sm:$0x1] %v6040_v56  ;;  %v5990_v10 = vld [vmem:[#allocation4 + $0x4] sm:$0x1]  ;;  %v6011_v21 = vld [vmem:[#allocation4 + $0x3] sm:$0x1] }
 0x476   : > { %5449 = vrot.lane.b32.xlu0 %v5439_v42, %s7286_s27  ;;  %v6015_v63 = vld [vmem:[#allocation4 + $0x1] sm:$0x1]  ;;  %v6129_v48 = vld [vmem:[#allocation8 + $0x2] sm:$0x1] }
 0x477   : > { %v7219_v46 = vld [vmem:[%s9232_s7 + $0x28] sm:$0xff]  }
 0x478   : > { %5303 = vrot.lane.b32.xlu1 %v5300_v51, %s7295_s23 }
 0x47a   : > { %5719 = vrot.lane.b32.xlu0 %v5448_v11, %s7286_s27  ;;  %v6064_v42 = vld [vmem:[#allocation4] sm:$0x1] }
 0x47b   : > { %v6066_v61 = vshrl.u32 %v6064_v42, 16 }
 0x47c   : > { %5575 = vrot.lane.b32.xlu1 %v5572_v53, %s7295_s23  ;;  %v6176_v55 = vld [vmem:[#allocation4 + $0x5] sm:$0x1] }
 0x47e   : > { %5573 = vrot.lane.b32.xlu0 %v5300_v51, %s7295_s23  ;;  %v6054_v51 = vld [vmem:[#allocation4 + $0x2] sm:$0x1] }
 0x480   : > { %5498 = vrot.lane.b32.xlu1 %v5495_v0, %s7298_s28 }
 0x482   : > { %5496 = vrot.lane.b32.xlu0 %v5486_v35, %s7298_s28 }
 0x484   : > { %5767 = vrot.lane.b32.xlu1 %v5764_v18, %s7298_s28 }
 0x486   : > { %5765 = vrot.lane.b32.xlu0 %v5495_v0, %s7298_s28 }
 0x48a   : > { %6056 = vrot.lane.b32.xlu0 %v6054_v51, %s7295_s23 }
 0x4ce   : > { %v5405_v25 = vpop.permute.xlu1 %5404 }
 0x4d0   : > { %v5403_v36 = vpop.permute.xlu0 %5402 }
 0x4d2   : > { %v5243_v39 = vpop.permute.xlu1 %5242 }
 0x4d3   : > { %5248 = vst.msk [vmem:[#allocation7 + $0x2] sm:$0x1] %vm5246_vm10, %v5243_v39 }
 0x4d4   : > { %v5674_v40 = vpop.permute.xlu0 %5673 }
 0x4d6   : > { %v5530_v44 = vpop.permute.xlu1 %5529 }
 0x4d7   : > { %5534 = vst.msk [vmem:[#allocation7 + $0x3] sm:$0x1] %vm5246_vm10, %v5530_v44 }
 0x4d8   : > { %v5528_v23 = vpop.permute.xlu0 %5527 }
 0x4d9   : > { %5533 = vst.msk [vmem:[#allocation7 + $0x1] sm:$0x1] %vm5246_vm10, %v5528_v23  ;;  %vm6073_vm10 = vcmask 778752  }
 0x4da   : > { %v5351_v19 = vpop.permute.xlu1 %5350 }
 0x4dc   : > { %v5620_v41 = vpop.permute.xlu0 %5619 }
 0x4de   : > { %v5622_v33 = vpop.permute.xlu1 %5621 }
 0x4e0   : > { %v5376_v27 = vpop.permute.xlu0 %5375 }
 0x4e1   : > { %5382 = vst.msk [vmem:[#allocation7] sm:$0x1] %vm5381_vm2, %v5376_v27  ;;  %v7210_v27 = vld [vmem:[%s9232_s7 + $0x78] sm:$0xff]  }
 0x4e2   : > { %v5378_v45 = vpop.permute.xlu1 %5377  ;;  %5409 = vst.msk [vmem:[#allocation7] sm:$0x1] %vm5408_vm4, %v5403_v36  ;;  %v6164_v36 = vld [vmem:[#allocation4 + $0x5] sm:$0x1]  ;;  %7039 = vmatprep.subr.bf16.mxu1 %v7210_v27  ;;  %v7239_v27 = vld [vmem:[%s9232_s7] sm:$0xff]  }
 0x4e4   : > { %v5647_v49 = vpop.permute.xlu0 %5646 }
 0x4e6   : > { %v5452_v16 = vpop.permute.xlu1 %5451 }
 0x4e8   : > { %v5450_v2 = vpop.permute.xlu0 %5449 }
 0x4e9   : > { %5456 = vst.msk [vmem:[#allocation7] sm:$0x1] %vm5455_vm6, %v5450_v2 }
 0x4ea   : > { %v5304_v5 = vpop.permute.xlu1 %5303 }
 0x4eb   : > { %5309 = vst.msk [vmem:[#allocation7 + $0x2] sm:$0x1] %vm5307_vm15, %v5304_v5 }
 0x4ec   : > { %5356 = vst.msk [vmem:[#allocation7 + $0x2] sm:$0x1] %vm5354_vm14, %v5351_v19  ;;  %v5720_v6 = vpop.permute.xlu0 %5719 }
 0x4ed   : > { %5383 = vst.msk [vmem:[#allocation7 + $0x2] sm:$0x1] %vm5381_vm2, %v5378_v45  ;;  %v7211_v45 = vld [vmem:[%s9232_s7 + $0x38] sm:$0xff]  }
 0x4ee   : > { %5410 = vst.msk [vmem:[#allocation7 + $0x2] sm:$0x1] %vm5408_vm4, %v5405_v25  ;;  %v5576_v31 = vpop.permute.xlu1 %5575  ;;  %v6051_v25 = vld [vmem:[#allocation8] sm:$0x1]  ;;  %7040 = vmatpush3.bf16.msra.mxu1 %v7211_v45  ;;  %v7241_v45 = vld [vmem:[%s9232_s7 + $0x80] sm:$0xff]  }
 0x4ef   : > { %5457 = vst.msk [vmem:[#allocation7 + $0x2] sm:$0x1] %vm5455_vm6, %v5452_v16 }
 0x4f0   : > { %5580 = vst.msk [vmem:[#allocation7 + $0x3] sm:$0x1] %vm5307_vm15, %v5576_v31  ;;  %v5574_v24 = vpop.permute.xlu0 %5573 }
 0x4f1   : > { %5626 = vst.msk [vmem:[#allocation7 + $0x3] sm:$0x1] %vm5354_vm14, %v5622_v33 }
 0x4f2   : > { %5653 = vst.msk [vmem:[#allocation7 + $0x3] sm:$0x1] %vm5381_vm2, %v5649_v14  ;;  %v5499_v59 = vpop.permute.xlu1 %5498 }
 0x4f3   : > { %5579 = vst.msk [vmem:[#allocation7 + $0x1] sm:$0x1] %vm5307_vm15, %v5574_v24  ;;  %vm9277_vm15 = vmmov %vm9271_vm0 }
 0x4f4   : > { %5680 = vst.msk [vmem:[#allocation7 + $0x3] sm:$0x1] %vm5408_vm4, %v5676_v38  ;;  %v5497_v8 = vpop.permute.xlu0 %5496 }
 0x4f5   : > { %5625 = vst.msk [vmem:[#allocation7 + $0x1] sm:$0x1] %vm5354_vm14, %v5620_v41  ;;  %vm9175_vm14 = vmand %vm6073_vm10, %vm9277_vm15 }
 0x4f6   : > { %5652 = vst.msk [vmem:[#allocation7 + $0x1] sm:$0x1] %vm5381_vm2, %v5647_v49  ;;  %v5768_v1 = vpop.permute.xlu1 %5767  ;;  %vm6087_vm2 = vcmask 1041152  }
 0x4f7   : > { %5726 = vst.msk [vmem:[#allocation7 + $0x3] sm:$0x1] %vm5455_vm6, %v5722_v29  ;;  %v6050_v29 = vld [vmem:[#allocation4] sm:$0x1] }
 0x4f8   : > { %5504 = vst.msk [vmem:[#allocation7 + $0x2] sm:$0x1] %vm5502_vm11, %v5499_v59  ;;  %5503 = vst.msk [vmem:[#allocation7] sm:$0x1] %vm5502_vm11, %v5497_v8  ;;  %v5766_v3 = vpop.permute.xlu0 %5765  ;;  %v6052_v39 = vsel %vm9016_vm8, %v6050_v29, %v6051_v25  ;;  %v7212_v59 = vld [vmem:[%s9232_s7 + $0xf8] sm:$0xff]   ;;  %v7231_v29 = vld [vmem:[%s9232_s7 + $0x10] sm:$0xff]  }
 0x4f9   : > { %5679 = vst.msk [vmem:[#allocation7 + $0x1] sm:$0x1] %vm5408_vm4, %v5674_v40  ;;  %v6165_v40 = vld [vmem:[#allocation8 + $0x3] sm:$0x1]  ;;  %6053 = vst [vmem:[#allocation8] sm:$0x1] %v6052_v39  ;;  %7061 = vmatprep.subr.bf16.mxu0 %v7212_v59 }
 0x4fa   : > { %5725 = vst.msk [vmem:[#allocation7 + $0x1] sm:$0x1] %vm5455_vm6, %v5720_v6  ;;  %v6166_v19 = vsel %vm9016_vm8, %v6164_v36, %v6165_v40  ;;  %v7213_v8 = vld [vmem:[%s9232_s7 + $0xb8] sm:$0xff]   ;;  %v7234_v36 = vld [vmem:[%s9232_s7 + $0x48] sm:$0xff]   ;;  %v7233_v39 = vld [vmem:[%s9232_s7 + $0x90] sm:$0xff]  }
 0x4fb   : > { %5772 = vst.msk [vmem:[#allocation7 + $0x3] sm:$0x1] %vm5502_vm11, %v5768_v1  ;;  %5771 = vst.msk [vmem:[#allocation7 + $0x1] sm:$0x1] %vm5502_vm11, %v5766_v3  ;;  %v6093_v1 = vld [vmem:[#allocation8 + $0x1] sm:$0x1] }
 0x4fc   : > { %6167 = vst [vmem:[#allocation8 + $0x3] sm:$0x1] %v6166_v19  ;;  %v6057_v49 = vpop.permute.xlu0 %6056  ;;  %v7236_v40 = vld [vmem:[%s9232_s7 + $0xc8] sm:$0xff]   ;;  %v7238_v19 = vld [vmem:[%s9232_s7 + $0x40] sm:$0xff]   ;;  %vm9280_vm4 = vmmov %vm9271_vm0  ;;  %vm6569_vm11 = vcmask 516096  }
 0x4fd   : > { %vm9188_vm6 = vmand %vm6087_vm2, %vm9280_vm4 }
 0x500   : > { %v6061_v24 = vld [vmem:[#allocation8] sm:$0x1] }
 0x501   : > { %v6062_v3 = vsel %vm9053_vm12, %v6057_v49, %v6061_v24 }
 0x502   : > { %v5774_v54 = vld [vmem:[#allocation7 + $0x2] sm:$0x3]  ;;  %v5773_v20 = vld [vmem:[#allocation7] sm:$0x3]  ;;  %6063 = vst [vmem:[#allocation8] sm:$0x1] %v6062_v3 }
 0x503   : > { %v5816_v11 = vcombine.low %v5773_v20, %v5774_v54  ;;  %v7214_v54 = vld [vmem:[%s9232_s7 + $0x70] sm:$0xff]  }
 0x504   : > { %v7215_v20 = vld [vmem:[%s9232_s7 + $0x30] sm:$0xff]   ;;  %7041 = vmatprep.subr.bf16.mxu1 %v7214_v54 }
 0x505   : > { %v5823_v30 = vrot.slane %v5816_v11, %v8294_v37  ;;  %7042 = vmatpush3.bf16.msra.mxu1 %v7215_v20 }
 0x506   : > { %7043 = vmatprep.subr.bf16.mxu1 %v7218_v34 }
 0x507   : > { %v5824_v50 = vcombine.high %v5823_v30, %v5823_v30  ;;  %v5831_v62 = vrot.slane %v5823_v30, %v8294_v37 }
 0x509   : > { %v5838_v9 = vrot.slane %v5824_v50, %v8294_v37  ;;  %v6168_v50 = vld [vmem:[#allocation4 + $0x7] sm:$0x1]  ;;  %7044 = vmatpush3.bf16.msra.mxu1 %v7219_v46  ;;  %v6075_v20 = vld [vmem:[#allocation8] sm:$0x1] }
 0x50b   : > { %5969 = vmatprep.mubr.bf16.mxu0 %v5838_v9 }
 0x50c   : > { %5970 = vmatmul.mubr.bf16.vlgmr.msra.gmra.mxu0 %v5831_v62  ;;  %v7216_v62 = vld [vmem:[%s9232_s7 + $0xf0] sm:$0xff]  }
 0x50d   : > { %7062 = vmatpush3.bf16.msra.mxu0 %v7213_v8 }
 0x50e   : > { %7063 = vmatprep.subr.bf16.mxu0 %v7216_v62 }
 0x511   : > { %7064 = vmatpush3.bf16.msra.mxu0 %v7217_v7 }
 0x5cc   : > { %v7033_v12 = vpop.f32.mrf.mxu0 }
 0x5ce   : > { %v7034_v53 = vpop.f32.mrf.mxu0 }
 0x5cf   : > { %v7035_v15 = vadd.f32 %v7034_v53, %v7033_v12  ;;  %v7221_v53 = vld [vmem:[%s9232_s7 + $0xa8] sm:$0xff]  }
 0x5d0   : > { %v7036_v58 = vpop.f32.mrf.mxu0 }
 0x5d1   : > { %v5972_v60 = vadd.f32 %v7035_v15, %v6941_v47  ;;  %v7220_v47 = vld [vmem:[%s9232_s7 + $0xe8] sm:$0xff]   ;;  %v7222_v15 = vld [vmem:[%s9232_s7 + $0x60] sm:$0xff]   ;;  %v6178_v58 = vshrl.u32 %v6176_v55, 16 }
 0x5d2   : > { %v7037_v26 = vpop.f32.mrf.mxu0  ;;  %7065 = vmatprep.subr.bf16.mxu0 %v7220_v47  ;;  %7045 = vmatprep.subr.bf16.mxu1 %v7222_v15 }
 0x5d3   : > { %vm5977_vm3 = vcmp.ge.f32.partialorder %v5972_v60, 0.0  ;;  %v5978_v28 = vmul.f32 0.2, %v5972_v60  ;;  %7066 = vmatpush3.bf16.msra.mxu0 %v7221_v53  ;;  %7046 = vmatpush3.bf16.msra.mxu1 %v7223_v4 }
 0x5d5   : > { %v5979_v13 = vsel %vm5977_vm3, %v5972_v60, %v5978_v28  ;;  %v7224_v60 = vld [vmem:[%s9232_s7 + $0xe0] sm:$0xff]  }
 0x5d6   : > { %v5980_v0 = vpack.c.bf16 %v5979_v13, %v5979_v13  ;;  %v7225_v28 = vld [vmem:[%s9232_s7 + $0xa0] sm:$0xff]   ;;  %7067 = vmatprep.subr.bf16.mxu0 %v7224_v60 }
 0x5d7   : > { %7068 = vmatpush3.bf16.msra.mxu0 %v7225_v28 }
 0x5d8   : > { %v5985_v32 = vsel %vm9016_vm8, %v5980_v0, %v5984_v52  ;;  %v5991_v57 = vsel %vm9006_vm1, %v5980_v0, %v5990_v10  ;;  %v6000_v35 = vrot.slane %v5980_v0, %v8294_v37  ;;  %v6078_v52 = vld [vmem:[#allocation4 + $0x2] sm:$0x1]  ;;  %v7226_v0 = vld [vmem:[%s9232_s7 + $0x58] sm:$0xff]  }
 0x5d9   : > { %5986 = vst [vmem:[#allocation4 + $0x6] sm:$0x1] %v5985_v32  ;;  %5992 = vst [vmem:[#allocation4 + $0x4] sm:$0x1] %v5991_v57  ;;  %v7227_v32 = vld [vmem:[%s9232_s7 + $0x18] sm:$0xff]   ;;  %7047 = vmatprep.subr.bf16.mxu1 %v7226_v0 }
 0x5da   : > { %v6001_v18 = vcombine.high %v6000_v35, %v6000_v35  ;;  %v7228_v57 = vld [vmem:[%s9232_s7 + $0xd8] sm:$0xff]   ;;  %v6188_v35 = vld [vmem:[#allocation4 + $0x7] sm:$0x1]  ;;  %7048 = vmatpush3.bf16.msra.mxu1 %v7227_v32  ;;  %v6265_v32 = vld [vmem:[%s9233_s8] sm:$0x1] }
 0x5db   : > { %7069 = vmatprep.subr.bf16.mxu0 %v7228_v57 }
 0x5dc   : > { %v6008_v17 = vrot.slane %v6001_v18, %v8294_v37  ;;  %v7230_v18 = vld [vmem:[%s9232_s7 + $0x50] sm:$0xff]  }
 0x5dd   : > { %7049 = vmatprep.subr.bf16.mxu1 %v7230_v18 }
 0x5de   : > { %v6012_v14 = vsel %vm9016_vm8, %v6008_v17, %v6011_v21  ;;  %v6016_v38 = vsel %vm9006_vm1, %v6008_v17, %v6015_v63  ;;  %v6080_v63 = vshrl.u32 %v6078_v52, 16  ;;  %v7229_v17 = vld [vmem:[%s9232_s7 + $0x98] sm:$0xff]   ;;  %7050 = vmatpush3.bf16.msra.mxu1 %v7231_v29  ;;  %v6567_v29 = vld [vmem:[%s9234_s9] sm:$0x1] }
 0x5df   : > { %6013 = vst [vmem:[#allocation4 + $0x3] sm:$0x1] %v6012_v14  ;;  %6017 = vst [vmem:[#allocation4 + $0x1] sm:$0x1] %v6016_v38  ;;  %v7232_v14 = vld [vmem:[%s9232_s7 + $0xd0] sm:$0xff]   ;;  %v6190_v38 = vshrl.u32 %v6188_v35, 16  ;;  %7070 = vmatpush3.bf16.msra.mxu0 %v7229_v17  ;;  %7051 = vmatprep.subr.bf16.mxu1 %v7234_v36 }
 0x5e0   : > { %v6036_v44 = vld [vmem:[#allocation4 + $0x4] sm:$0x1]  ;;  %v6044_v23 = vld [vmem:[#allocation4 + $0x6] sm:$0x1]  ;;  %7071 = vmatprep.subr.bf16.mxu0 %v7232_v14 }
 0x5e1   : > { %v6037_v41 = vsel %vm9016_vm8, 0, %v6036_v44  ;;  %v6045_v33 = vsel %vm9006_vm1, 0, %v6044_v23  ;;  %v7235_v23 = vld [vmem:[%s9232_s7 + $0x8] sm:$0xff]  }
 0x5e2   : > { %6038 = vst [vmem:[#allocation4 + $0x4] sm:$0x1] %v6037_v41  ;;  %6046 = vst [vmem:[#allocation4 + $0x6] sm:$0x1] %v6045_v33  ;;  %v7237_v41 = vld [vmem:[%s9232_s7 + $0x88] sm:$0xff]   ;;  %v7240_v33 = vld [vmem:[%s9232_s7 + $0xc0] sm:$0xff]   ;;  %7052 = vmatpush3.bf16.msra.mxu1 %v7235_v23 }
 0x5e3   : > { %7072 = vmatpush3.bf16.msra.mxu0 %v7233_v39  ;;  %7053 = vmatprep.subr.bf16.mxu1 %v7238_v19 }
 0x5e4   : > { %7073 = vmatprep.subr.bf16.mxu0 %v7236_v40 }
 0x5e6   : > { %v6023_v16 = vld [vmem:[#allocation4 + $0x1] sm:$0x1]  ;;  %v6031_v2 = vld [vmem:[#allocation4 + $0x3] sm:$0x1]  ;;  %7054 = vmatpush3.bf16.msra.mxu1 %v7239_v27 }
 0x5e7   : > { %v6024_v6 = vsel %vm9016_vm8, 0, %v6023_v16  ;;  %v6032_v31 = vsel %vm9006_vm1, 0, %v6031_v2  ;;  %7074 = vmatpush3.bf16.msra.mxu0 %v7237_v41 }
 0x5e8   : > { %6025 = vst [vmem:[#allocation4 + $0x1] sm:$0x1] %v6024_v6  ;;  %6033 = vst [vmem:[#allocation4 + $0x3] sm:$0x1] %v6032_v31  ;;  %7075 = vmatprep.subr.bf16.mxu0 %v7240_v33  ;;  %v6173_v6 = vld [vmem:[#allocation8 + $0x3] sm:$0x1] }
 0x5e9   : > { %v6096_v11 = vld [vmem:[#allocation4 + $0x6] sm:$0x1]  ;;  %v6092_v30 = vld [vmem:[#allocation4 + $0x4] sm:$0x1] }
 0x5ea   : > { %6098 = vrot.lane.b32.xlu1 %v6096_v11, %s7295_s23  ;;  %v6094_v9 = vsel %vm9016_vm8, %v6092_v30, %v6093_v1  ;;  %v6104_v22 = vld [vmem:[#allocation4 + $0x4] sm:$0x1]  ;;  %v6116_v13 = vld [vmem:[#allocation4 + $0x6] sm:$0x1] }
 0x5eb   : > { %6095 = vst [vmem:[#allocation8 + $0x1] sm:$0x1] %v6094_v9  ;;  %v6106_v43 = vshrl.u32 %v6104_v22, 16  ;;  %v6118_v21 = vshrl.u32 %v6116_v13, 16  ;;  %7076 = vmatpush3.bf16.msra.mxu0 %v7241_v45 }
 0x5ee   : > { %6170 = vrot.lane.b32.xlu1 %v6168_v50, %s7295_s23 }
 0x5ef   : > { %v6132_v51 = vld [vmem:[#allocation4 + $0x3] sm:$0x1]  ;;  %v6128_v56 = vld [vmem:[#allocation4 + $0x1] sm:$0x1] }
 0x5f0   : > { %6134 = vrot.lane.b32.xlu0 %v6132_v51, %s7295_s23  ;;  %v6130_v12 = vsel %vm9016_vm8, %v6128_v56, %v6129_v48  ;;  %v6140_v26 = vld [vmem:[#allocation4 + $0x1] sm:$0x1]  ;;  %v6152_v25 = vld [vmem:[#allocation4 + $0x3] sm:$0x1] }
 0x5f1   : > { %6131 = vst [vmem:[#allocation8 + $0x2] sm:$0x1] %v6130_v12  ;;  %v6142_v10 = vshrl.u32 %v6140_v26, 16  ;;  %v6154_v44 = vshrl.u32 %v6152_v25, 16 }
 0x5f2   : > { %6110 = vrot.lane.b32.xlu1 %v6106_v43, %s7296_s24  ;;  %v6101_v49 = vld [vmem:[#allocation8 + $0x1] sm:$0x1] }
 0x5f4   : > { %6070 = vrot.lane.b32.xlu0 %v6066_v61, %s7296_s24 }
 0x5f6   : > { %6182 = vrot.lane.b32.xlu1 %v6178_v58, %s7296_s24 }
 0x5f8   : > { %6146 = vrot.lane.b32.xlu0 %v6142_v10, %s7296_s24  ;;  %v6137_v59 = vld [vmem:[#allocation8 + $0x2] sm:$0x1] }
 0x5fa   : > { %6122 = vrot.lane.b32.xlu1 %v6118_v21, %s7286_s27 }
 0x5fc   : > { %6084 = vrot.lane.b32.xlu0 %v6080_v63, %s7286_s27 }
 0x5fe   : > { %6194 = vrot.lane.b32.xlu1 %v6190_v38, %s7286_s27 }
 0x600   : > { %6158 = vrot.lane.b32.xlu0 %v6154_v44, %s7286_s27  ;;  %v6574_v44 = vld [vmem:[#allocation9] sm:$0x1] }
 0x65c   : > { %v6099_v16 = vpop.permute.xlu1 %6098 }
 0x65d   : > { %v6102_v2 = vsel %vm9053_vm12, %v6099_v16, %v6101_v49 }
 0x65e   : > { %6103 = vst [vmem:[#allocation8 + $0x1] sm:$0x1] %v6102_v2 }
 0x660   : > { %v6171_v31 = vpop.permute.xlu1 %6170 }
 0x661   : > { %v6174_v24 = vsel %vm9053_vm12, %v6171_v31, %v6173_v6 }
 0x662   : > { %6175 = vst [vmem:[#allocation8 + $0x3] sm:$0x1] %v6174_v24  ;;  %v6135_v8 = vpop.permute.xlu0 %6134 }
 0x663   : > { %v6138_v1 = vsel %vm9053_vm12, %v6135_v8, %v6137_v59 }
 0x664   : > { %6139 = vst [vmem:[#allocation8 + $0x2] sm:$0x1] %v6138_v1  ;;  %v6111_v54 = vpop.permute.xlu1 %6110 }
 0x665   : > { %v6113_v11 = vld [vmem:[#allocation8 + $0x1] sm:$0x1] }
 0x666   : > { %v6114_v30 = vsel %vm9175_vm14, %v6111_v54, %v6113_v11  ;;  %v6071_v50 = vpop.permute.xlu0 %6070 }
 0x667   : > { %6115 = vst [vmem:[#allocation8 + $0x1] sm:$0x1] %v6114_v30  ;;  %v6076_v9 = vsel %vm9175_vm14, %v6071_v50, %v6075_v20 }
 0x668   : > { %6077 = vst [vmem:[#allocation8] sm:$0x1] %v6076_v9  ;;  %v6183_v5 = vpop.permute.xlu1 %6182 }
 0x669   : > { %v6185_v62 = vld [vmem:[#allocation8 + $0x3] sm:$0x1] }
 0x66a   : > { %v6186_v7 = vsel %vm9175_vm14, %v6183_v5, %v6185_v62  ;;  %v6147_v42 = vpop.permute.xlu0 %6146 }
 0x66b   : > { %6187 = vst [vmem:[#allocation8 + $0x3] sm:$0x1] %v6186_v7  ;;  %v6149_v22 = vld [vmem:[#allocation8 + $0x2] sm:$0x1] }
 0x66c   : > { %v6150_v34 = vsel %vm9175_vm14, %v6147_v42, %v6149_v22  ;;  %v6123_v48 = vpop.permute.xlu1 %6122 }
 0x66d   : > { %6151 = vst [vmem:[#allocation8 + $0x2] sm:$0x1] %v6150_v34 }
 0x66e   : > { %v6125_v51 = vld [vmem:[#allocation8 + $0x1] sm:$0x1]  ;;  %v6085_v55 = vpop.permute.xlu0 %6084 }
 0x66f   : > { %v6126_v43 = vsel %vm9188_vm6, %v6123_v48, %v6125_v51  ;;  %v6089_v61 = vld [vmem:[#allocation8] sm:$0x1] }
 0x670   : > { %6127 = vst [vmem:[#allocation8 + $0x1] sm:$0x1] %v6126_v43  ;;  %v6090_v56 = vsel %vm9188_vm6, %v6085_v55, %v6089_v61  ;;  %v6195_v12 = vpop.permute.xlu1 %6194 }
 0x671   : > { %6091 = vst [vmem:[#allocation8] sm:$0x1] %v6090_v56 }
 0x672   : > { %v6197_v47 = vld [vmem:[#allocation8 + $0x3] sm:$0x1]  ;;  %v6159_v58 = vpop.permute.xlu0 %6158 }
 0x673   : > { %v6198_v53 = vsel %vm9188_vm6, %v6195_v12, %v6197_v47 }
 0x674   : > { %v6161_v15 = vld [vmem:[#allocation8 + $0x2] sm:$0x1]  ;;  %6199 = vst [vmem:[#allocation8 + $0x3] sm:$0x1] %v6198_v53 }
 0x675   : > { %v6162_v4 = vsel %vm9188_vm6, %v6159_v58, %v6161_v15 }
 0x676   : > { %6163 = vst [vmem:[#allocation8 + $0x2] sm:$0x1] %v6162_v4 }
 0x67d   : > { %v6966_v60 = vld.sshfl [vmem:[#allocation8] sm:$0x33 pattern:$0x75316420] }
 0x67e   : > { %v6274_v26 = vcombine.high %v6966_v60, %v6966_v60  ;;  %v6281_v28 = vrot.slane %v6966_v60, %v8294_v37 }
 0x680   : > { %v6288_v13 = vrot.slane %v6274_v26, %v8294_v37  ;;  %v6289_v10 = vcombine.high %v6281_v28, %v6281_v28 }
 0x682   : > { %6519 = vmatprep.mubr.bf16.mxu1 %v6288_v13  ;;  %v6290_v52 = vcombine.high %v6288_v13, %v6288_v13 }
 0x683   : > { %6520 = vmatmul.mubr.bf16.vlgmr.msra.gmra.mxu1 %v6281_v28 }
 0x684   : > { %6559 = vmatprep.mubr.bf16.mxu0 %v6290_v52 }
 0x685   : > { %6560 = vmatmul.mubr.bf16.vlgmr.msra.gmra.mxu0 %v6289_v10 }
 0x743   : > { %v7055_v0 = vpop.f32.mrf.mxu1 }
 0x745   : > { %v7056_v57 = vpop.f32.mrf.mxu1  ;;  %v7077_v35 = vpop.f32.mrf.mxu0 }
 0x746   : > { %v7057_v18 = vadd.f32 %v7056_v57, %v7055_v0 }
 0x747   : > { %v7058_v21 = vpop.f32.mrf.mxu1  ;;  %v7078_v63 = vpop.f32.mrf.mxu0 }
 0x748   : > { %v6522_v17 = vadd.f32 %v7057_v18, %v6265_v32  ;;  %v7079_v14 = vadd.f32 %v7078_v63, %v7077_v35 }
 0x749   : > { %v7059_v38 = vpop.f32.mrf.mxu1  ;;  %v7080_v37 = vpop.f32.mrf.mxu0 }
 0x74a   : > { %v6562_v25 = vadd.f32 %v7079_v14, %v6522_v17 }
 0x74b   : > { %v7081_v36 = vpop.f32.mrf.mxu0 }
 0x74c   : > { %v6568_v39 = vmul.f32 %v6567_v29, %v6562_v25 }
 0x74e   : > { %v6570_v40 = vsel %vm6569_vm11, %v6568_v39, 0.0 }
 0x74f   : > { %6571 = vadd.xlane.f32.xlu0 %v6570_v40 }
 0x7d8   : > { %v6572_v23 = vpop.xlane.xlu0 %6571 }
 0x7d9   : > { %v6575_v19 = vadd.f32 %v6574_v44, %v6572_v23 }
 0x7db   : > { %v6576_v41 = vsub.f32 0.0, %v6575_v19 }
 0x7dd   : > { %v6577_v33 = vmul.f32 1.442695, %v6576_v41 }
 0x7df   : > { %7242 = vpow2.f32 %v6577_v33 }
 0x7ec   : > { %v7243_v27 = vpop.eup %7242 }
 0x7ed   : > { %v6579_v45 = vadd.f32 1.0, %v7243_v27 }
 0x7ef   : > { %7244 = vrcp.f32 %v6579_v45 }
 0x7fc   : > { %v7245_v49 = vpop.eup %7244 }
 0x7fd   : > { %6583 = vst.msk [vmem:[%s712_s15] sm:$0x1] %vm6582_vm5, %v7245_v49 }
 0x7fe PF: > { %p20_p9 = scmp.ge.s32.totalorder %s7385_s22, 4   ;;  %s9283_s19 = smov %s7264_s20 }
 0x7ff   : > { %s9284_s20 = smov %s7394_s25  ;;  %s9285_s21 = smov %s7385_s22 }
 0x800   :  { %22 = sbr.rel (!%p20_p9) target bundleno = 5 (0x5), region = 172 }

</bundles_post_ra>
